<compile_context>
chip_gen: v7x
topology: tpu7x:2x2x1
jax: 0.10.0
libtpu: 0.0.40
codegen_flags: <defaults>
</compile_context>

<pallas_src>
import functools

import numpy as np
import jax
import jax.numpy as jnp
from jax.experimental import pallas as pl
from jax.experimental.pallas import tpu as pltpu

# ------------------------- problem sizes (small) -------------------------
B, S, INPUT, H, NH, NLAYERS = 2, 8, 16, 32, 4, 2
DK = H // NH
EPS = 1e-5


def _vspec():
    return pl.BlockSpec(memory_space=pltpu.MemorySpace.VMEM)


def _layernorm(y, g, b):
    mu = jnp.mean(y, axis=-1, keepdims=True)
    var = jnp.mean((y - mu) ** 2, axis=-1, keepdims=True)
    return (y - mu) * jax.lax.rsqrt(var + EPS) * g + b


# ====================== single fused decoder kernel ======================
def fused_decoder_kernel(prec, x_ref, gru_ref, vsn_ref, qkv_ref, ffn1_ref,
                         proj_ref, out_ref, aw_ref):
    f32 = jnp.float32

    def mm(a, b):
        return jnp.dot(a, b, preferred_element_type=f32, precision=prec)

    # ------------------------------- GRU --------------------------------
    # GRU slab rows: [0:IN) Wih^T, [IN:IN+H) Whh^T, IN+H bih, IN+H+1 bhh.
    g = gru_ref[...]                                     # (INPUT+H+2, 3H)
    wih = g[0:INPUT, :]
    whh = g[INPUT:INPUT + H, :]
    bih = g[INPUT + H:INPUT + H + 1, :]
    bhh = g[INPUT + H + 1:INPUT + H + 2, :]

    # Input projection hoisted out of the recurrence: one matmul for all steps.
    x_flat = x_ref[...].reshape(B * S, INPUT)
    gi_all = (mm(x_flat, wih) + bih).reshape(B, S, 3 * H)

    h = jnp.zeros((B, H), f32)
    hs = []
    for t in range(S):                                   # static unroll (S=8)
        gi = gi_all[:, t, :]                             # (B, 3H)
        gh = mm(h, whh) + bhh
        r = jax.nn.sigmoid(gi[:, :H] + gh[:, :H])
        z = jax.nn.sigmoid(gi[:, H:2 * H] + gh[:, H:2 * H])
        n = jnp.tanh(gi[:, 2 * H:] + r * gh[:, 2 * H:])
        h = (1.0 - z) * n + z * h
        hs.append(h)                                     # stays in registers
    y = jnp.stack(hs, axis=1).reshape(B * S, H)          # (B*S, H)

    # ------------- variable selection (single input == Linear) ----------
    vsn = vsn_ref[...]                                   # (H+1, H)
    y = mm(y, vsn[0:H, :]) + vsn[H:H + 1, :]

    # --------------------- attention + FFN layers -----------------------
    scale = 1.0 / float(np.sqrt(DK))
    for li in range(NLAYERS):                            # static unroll
        qkv_sl = qkv_ref[li]                             # (H+1, 3H)
        wqkv, bqkv = qkv_sl[0:H, :], qkv_sl[H:H + 1, :]
        ffn1_sl = ffn1_ref[li]                           # (H+1, 4H)
        f1w, f1b = ffn1_sl[0:H, :], ffn1_sl[H:H + 1, :]
        p = proj_ref[li]                                 # (5H+6, H)
        wo = p[0:H, :]
        f2w = p[H:5 * H, :]
        bo = p[5 * H + 0:5 * H + 1, :]
        ln1g = p[5 * H + 1:5 * H + 2, :]
        ln1b = p[5 * H + 2:5 * H + 3, :]
        f2b = p[5 * H + 3:5 * H + 4, :]
        ln2g = p[5 * H + 4:5 * H + 5, :]
        ln2b = p[5 * H + 5:5 * H + 6, :]

        # fused QKV projection: one (B*S,H)x(H,3H) matmul, 96-lane output.
        qkv = mm(y, wqkv) + bqkv                         # (B*S, 3H)

        head_outs, aw_parts = [], []
        for hd in range(NH):                             # static unroll (NH=4)
            qh = qkv[:, hd * DK:(hd + 1) * DK].reshape(B, S, DK)
            kh = qkv[:, H + hd * DK:H + (hd + 1) * DK].reshape(B, S, DK)
            vh = qkv[:, 2 * H + hd * DK:2 * H + (hd + 1) * DK].reshape(B, S, DK)
            sc = jnp.einsum('bqd,bkd->bqk', qh, kh,
                            preferred_element_type=f32, precision=prec) * scale
            m = jnp.max(sc, axis=-1, keepdims=True)
            e = jnp.exp(sc - m)
            awh = e / jnp.sum(e, axis=-1, keepdims=True)  # (B, S, S)
            aw_parts.append(awh.reshape(B, S * S))
            head_outs.append(jnp.einsum('bqk,bkd->bqd', awh, vh,
                                        preferred_element_type=f32,
                                        precision=prec))
        # lane-dense attention-weight store: one unmasked 256-lane write/layer
        aw_ref[li] = jnp.concatenate(aw_parts, axis=-1)   # (B, NH*S*S)

        # concat heads along lanes, then ONE Wo matmul
        o = jnp.concatenate(head_outs, axis=-1).reshape(B * S, H)
        attn = mm(o, wo) + bo

        y = _layernorm(y + attn, ln1g, ln1b)
        h1 = jnp.maximum(mm(y, f1w) + f1b, 0.0)
        y = _layernorm(y + mm(h1, f2w) + f2b, ln2g, ln2b)

    out_ref[...] = y.reshape(B, S, H)


# ======================= host-side param packing ========================
def prepare_params(params):
    """Pack the 19 tensors into 5 lane-dense slabs (pure layout plumbing)."""
    g, vsn, L = params['gru'], params['vsn'], params['layers']
    gru_slab = jnp.concatenate(
        [g['wih'].T, g['whh'].T, g['bih'], g['bhh']], axis=0)        # (IN+H+2, 3H)
    vsn_slab = jnp.concatenate([vsn['w'].T, vsn['b']], axis=0)       # (H+1, H)
    qkv_slab = jnp.stack([
        jnp.concatenate(
            [jnp.concatenate([p['wq'].T, p['wk'].T, p['wv'].T], axis=1),
             jnp.concatenate([p['bq'], p['bk'], p['bv']], axis=1)], axis=0)
        for p in L])                                                 # (L, H+1, 3H)
    ffn1_slab = jnp.stack([
        jnp.concatenate([p['f1w'].T, p['f1b']], axis=0) for p in L]) # (L, H+1, 4H)
    proj_slab = jnp.stack([
        jnp.concatenate([p['wo'].T, p['f2w'].T, p['bo'], p['ln1g'], p['ln1b'],
                         p['f2b'], p['ln2g'], p['ln2b']], axis=0)
        for p in L])                                                 # (L, 5H+6, H)
    return dict(gru=gru_slab, vsn=vsn_slab, qkv=qkv_slab,
                ffn1=ffn1_slab, proj=proj_slab)


# ============================ full decoder ==============================
def build_decoder(prec):
    kernel = functools.partial(fused_decoder_kernel, prec)

    @jax.jit
    def decoder(x, gru_slab, vsn_slab, qkv_slab, ffn1_slab, proj_slab):
        out, aw_flat = pl.pallas_call(
            kernel,
            out_shape=(jax.ShapeDtypeStruct((B, S, H), jnp.float32),
                       jax.ShapeDtypeStruct((NLAYERS, B, NH * S * S),
                                            jnp.float32)),
            in_specs=[_vspec()] * 6,
            out_specs=(_vspec(), _vspec()),
        )(x, gru_slab, vsn_slab, qkv_slab, ffn1_slab, proj_slab)
        # (L, B, NH*S*S) -> (L, B, NH, S, S): already per-layer (B, NH, S, S).
        return out, aw_flat.reshape(NLAYERS, B, NH, S, S)

    return decoder


# ================== per-dot matmul-precision selection ==================
def _probe_matmul_precision():
    """Use 3-pass bf16 (Precision.HIGH) if Mosaic lowers it accurately,
    else fall back to HIGHEST.  Runs one tiny throw-away probe kernel."""
    def probe_kernel(a_ref, b_ref, o_ref):
        o_ref[...] = jnp.dot(a_ref[...], b_ref[...],
                             precision=jax.lax.Precision.HIGH,
                             preferred_element_type=jnp.float32)

    ka, kb = jax.random.split(jax.random.PRNGKey(123))
    a = jax.random.uniform(ka, (8, 128), jnp.float32, 0.5, 1.5)
    b = jax.random.uniform(kb, (128, 128), jnp.float32, 0.5, 1.5)
    try:
        out = pl.pallas_call(
            probe_kernel,
            out_shape=jax.ShapeDtypeStruct((8, 128), jnp.float32),
            in_specs=[_vspec(), _vspec()],
            out_specs=_vspec(),
        )(a, b)
        out = np.asarray(jax.block_until_ready(out))
        ref = np.asarray(a).astype(np.float64) @ np.asarray(b).astype(np.float64)
        rel_err = float(np.max(np.abs(out - ref) / np.abs(ref)))
        if rel_err < 1e-5:
            return jax.lax.Precision.HIGH
    except Exception:
        pass
    return jax.lax.Precision.HIGHEST


# ===================== pure-JAX reference (checking) ====================
def ref_forward(x, params):
    wih, whh = params['gru']['wih'], params['gru']['whh']
    bih, bhh = params['gru']['bih'][0], params['gru']['bhh'][0]
    h = jnp.zeros((B, H), jnp.float32)
    outs = []
    for t in range(S):
        x_t = x[:, t, :]
        gi = x_t @ wih.T + bih
        gh = h @ whh.T + bhh
        r = jax.nn.sigmoid(gi[:, :H] + gh[:, :H])
        z = jax.nn.sigmoid(gi[:, H:2 * H] + gh[:, H:2 * H])
        n = jnp.tanh(gi[:, 2 * H:] + r * gh[:, 2 * H:])
        h = (1 - z) * n + z * h
        outs.append(h)
    y = jnp.stack(outs, axis=1)                           # (B, S, H)
    y = y @ params['vsn']['w'].T + params['vsn']['b'][0]

    aws = []
    for li in range(NLAYERS):
        p = params['layers'][li]
        q = (y @ p['wq'].T + p['bq'][0]).reshape(B, S, NH, DK).transpose(0, 2, 1, 3)
        k = (y @ p['wk'].T + p['bk'][0]).reshape(B, S, NH, DK).transpose(0, 2, 1, 3)
        v = (y @ p['wv'].T + p['bv'][0]).reshape(B, S, NH, DK).transpose(0, 2, 1, 3)
        sc = jnp.einsum('bhqd,bhkd->bhqk', q, k) / np.sqrt(DK)
        aw = jax.nn.softmax(sc, axis=-1)
        aws.append(aw)
        o = jnp.einsum('bhqk,bhkd->bhqd', aw, v).transpose(0, 2, 1, 3).reshape(B, S, H)
        o = o @ p['wo'].T + p['bo'][0]

        def ln(t, g, b):
            mu = t.mean(-1, keepdims=True)
            var = ((t - mu) ** 2).mean(-1, keepdims=True)
            return (t - mu) / jnp.sqrt(var + EPS) * g + b

        y = ln(y + o, p['ln1g'][0], p['ln1b'][0])
        ff = jnp.maximum(y @ p['f1w'].T + p['f1b'][0], 0.0) @ p['f2w'].T + p['f2b'][0]
        y = ln(y + ff, p['ln2g'][0], p['ln2b'][0])
    return y, aws


# =========================== param init ================================
def init_params(key):
    keys = iter(jax.random.split(key, 128))

    def w(shape, scale=0.1):
        return jax.random.normal(next(keys), shape, jnp.float32) * scale

    params = {
        'gru': {'wih': w((3 * H, INPUT)), 'whh': w((3 * H, H)),
                'bih': w((1, 3 * H)), 'bhh': w((1, 3 * H))},
        'vsn': {'w': w((H, H)), 'b': w((1, H))},
        'layers': [],
    }
    for _ in range(NLAYERS):
        params['layers'].append({
            'wq': w((H, H)), 'bq': w((1, H)),
            'wk': w((H, H)), 'bk': w((1, H)),
            'wv': w((H, H)), 'bv': w((1, H)),
            'wo': w((H, H)), 'bo': w((1, H)),
            'ln1g': jnp.ones((1, H), jnp.float32), 'ln1b': jnp.zeros((1, H), jnp.float32),
            'f1w': w((4 * H, H)), 'f1b': w((1, 4 * H)),
            'f2w': w((H, 4 * H)), 'f2b': w((1, H)),
            'ln2g': jnp.ones((1, H), jnp.float32), 'ln2b': jnp.zeros((1, H), jnp.float32),
        })
    return params


# =============================== main ==================================
if __name__ == "__main__":
    key = jax.random.PRNGKey(0)
    kx, kp = jax.random.split(key)
    x = jax.random.normal(kx, (B, S, INPUT), jnp.float32)
    params = init_params(kp)
    prep = prepare_params(params)

    mm_prec = _probe_matmul_precision()
    decoder = build_decoder(mm_prec)

    out, aw = decoder(x, prep['gru'], prep['vsn'], prep['qkv'],
                      prep['ffn1'], prep['proj'])
    out = jax.block_until_ready(out)
    aw = jax.block_until_ready(aw)
    attn_ws = [aw[li] for li in range(NLAYERS)]

    # sanity check against a pure-JAX reference (exact-precision matmuls)
    with jax.default_matmul_precision("highest"):
        ref_out, ref_ws = ref_forward(x, params)
        ref_out = jax.block_until_ready(ref_out)

    np.testing.assert_allclose(np.asarray(out), np.asarray(ref_out),
                               rtol=2e-3, atol=2e-3)
    for a, r in zip(attn_ws, ref_ws):
        np.testing.assert_allclose(np.asarray(a), np.asarray(r),
                                   rtol=2e-3, atol=2e-3)

    assert out.shape == (B, S, H)
    assert all(a.shape == (B, NH, S, S) for a in attn_ws)
    print("KERNEL_OK")
</pallas_src>

<mosaic_0001>
module attributes {stable_mosaic.version = 11 : i64} {
  func.func @fused_decoder_kernel(%arg0: memref<2x8x16xf32, #tpu.memory_space<vmem>>, %arg1: memref<50x96xf32, #tpu.memory_space<vmem>>, %arg2: memref<33x32xf32, #tpu.memory_space<vmem>>, %arg3: memref<2x33x96xf32, #tpu.memory_space<vmem>>, %arg4: memref<2x33x128xf32, #tpu.memory_space<vmem>>, %arg5: memref<2x166x32xf32, #tpu.memory_space<vmem>>, %arg6: memref<2x8x32xf32, #tpu.memory_space<vmem>>, %arg7: memref<2x2x256xf32, #tpu.memory_space<vmem>>) attributes {dimension_semantics = [], scalar_prefetch = 0 : i64, scratch_operands = 0 : i64, tpu.core_type = #tpu.core_type<tc>} {
    %c0 = arith.constant 0 : index
    %c0_0 = arith.constant 0 : index
    %0 = vector.load %arg1[%c0, %c0_0] : memref<50x96xf32, #tpu.memory_space<vmem>>, vector<50x96xf32>
    %1 = vector.extract_strided_slice %0 {offsets = [0, 0], sizes = [16, 96], strides = [1, 1]} : vector<50x96xf32> to vector<16x96xf32>
    %2 = vector.extract_strided_slice %0 {offsets = [16, 0], sizes = [32, 96], strides = [1, 1]} : vector<50x96xf32> to vector<32x96xf32>
    %3 = vector.extract_strided_slice %0 {offsets = [48, 0], sizes = [1, 96], strides = [1, 1]} : vector<50x96xf32> to vector<1x96xf32>
    %4 = vector.extract_strided_slice %0 {offsets = [49, 0], sizes = [1, 96], strides = [1, 1]} : vector<50x96xf32> to vector<1x96xf32>
    %c0_1 = arith.constant 0 : index
    %c0_2 = arith.constant 0 : index
    %c0_3 = arith.constant 0 : index
    %5 = vector.load %arg0[%c0_1, %c0_2, %c0_3] : memref<2x8x16xf32, #tpu.memory_space<vmem>>, vector<2x8x16xf32>
    %6 = vector.shape_cast %5 : vector<2x8x16xf32> to vector<16x16xf32>
    %cst = arith.constant dense<0.000000e+00> : vector<16x96xf32>
    %7 = tpu.matmul %6, %1, %cst {dimension_numbers = #tpu.dot_dimension_numbers<[1], [0], [0], [1], [0, 0, 1, 1], [], []>, precision = #tpu.contract_precision<fp32>} : vector<16x16xf32>, vector<16x96xf32>, vector<16x96xf32> -> vector<16x96xf32>
    %8 = vector.broadcast %3 : vector<1x96xf32> to vector<16x96xf32>
    %9 = arith.addf %7, %8 : vector<16x96xf32>
    %10 = vector.shape_cast %9 : vector<16x96xf32> to vector<2x8x96xf32>
    %cst_4 = arith.constant 0.000000e+00 : f32
    %11 = vector.broadcast %cst_4 : f32 to vector<2x32xf32>
    %12 = vector.extract_strided_slice %10 {offsets = [0, 0, 0], sizes = [2, 1, 96], strides = [1, 1, 1]} : vector<2x8x96xf32> to vector<2x1x96xf32>
    %13 = vector.shape_cast %12 : vector<2x1x96xf32> to vector<2x96xf32>
    %cst_5 = arith.constant dense<0.000000e+00> : vector<2x96xf32>
    %14 = tpu.matmul %11, %2, %cst_5 {dimension_numbers = #tpu.dot_dimension_numbers<[1], [0], [0], [1], [0, 0, 1, 1], [], []>, precision = #tpu.contract_precision<fp32>} : vector<2x32xf32>, vector<32x96xf32>, vector<2x96xf32> -> vector<2x96xf32>
    %15 = vector.broadcast %4 : vector<1x96xf32> to vector<2x96xf32>
    %16 = arith.addf %14, %15 : vector<2x96xf32>
    %17 = vector.extract_strided_slice %13 {offsets = [0, 0], sizes = [2, 32], strides = [1, 1]} : vector<2x96xf32> to vector<2x32xf32>
    %18 = vector.extract_strided_slice %16 {offsets = [0, 0], sizes = [2, 32], strides = [1, 1]} : vector<2x96xf32> to vector<2x32xf32>
    %19 = arith.addf %17, %18 : vector<2x32xf32>
    %20 = arith.negf %19 : vector<2x32xf32>
    %21 = math.exp %20 : vector<2x32xf32>
    %cst_6 = arith.constant 1.000000e+00 : f32
    %22 = vector.broadcast %cst_6 : f32 to vector<2x32xf32>
    %23 = arith.addf %22, %21 : vector<2x32xf32>
    %24 = arith.divf %22, %23 : vector<2x32xf32>
    %25 = vector.extract_strided_slice %13 {offsets = [0, 32], sizes = [2, 32], strides = [1, 1]} : vector<2x96xf32> to vector<2x32xf32>
    %26 = vector.extract_strided_slice %16 {offsets = [0, 32], sizes = [2, 32], strides = [1, 1]} : vector<2x96xf32> to vector<2x32xf32>
    %27 = arith.addf %25, %26 : vector<2x32xf32>
    %28 = arith.negf %27 : vector<2x32xf32>
    %29 = math.exp %28 : vector<2x32xf32>
    %cst_7 = arith.constant 1.000000e+00 : f32
    %30 = vector.broadcast %cst_7 : f32 to vector<2x32xf32>
    %31 = arith.addf %30, %29 : vector<2x32xf32>
    %32 = arith.divf %30, %31 : vector<2x32xf32>
    %33 = vector.extract_strided_slice %13 {offsets = [0, 64], sizes = [2, 32], strides = [1, 1]} : vector<2x96xf32> to vector<2x32xf32>
    %34 = vector.extract_strided_slice %16 {offsets = [0, 64], sizes = [2, 32], strides = [1, 1]} : vector<2x96xf32> to vector<2x32xf32>
    %35 = arith.mulf %24, %34 : vector<2x32xf32>
    %36 = arith.addf %33, %35 : vector<2x32xf32>
    %37 = math.tanh %36 : vector<2x32xf32>
    %cst_8 = arith.constant 1.000000e+00 : f32
    %38 = vector.broadcast %cst_8 : f32 to vector<2x32xf32>
    %39 = arith.subf %38, %32 : vector<2x32xf32>
    %40 = arith.mulf %39, %37 : vector<2x32xf32>
    %41 = arith.mulf %32, %11 : vector<2x32xf32>
    %42 = arith.addf %40, %41 : vector<2x32xf32>
    %43 = vector.extract_strided_slice %10 {offsets = [0, 1, 0], sizes = [2, 1, 96], strides = [1, 1, 1]} : vector<2x8x96xf32> to vector<2x1x96xf32>
    %44 = vector.shape_cast %43 : vector<2x1x96xf32> to vector<2x96xf32>
    %cst_9 = arith.constant dense<0.000000e+00> : vector<2x96xf32>
    %45 = tpu.matmul %42, %2, %cst_9 {dimension_numbers = #tpu.dot_dimension_numbers<[1], [0], [0], [1], [0, 0, 1, 1], [], []>, precision = #tpu.contract_precision<fp32>} : vector<2x32xf32>, vector<32x96xf32>, vector<2x96xf32> -> vector<2x96xf32>
    %46 = vector.broadcast %4 : vector<1x96xf32> to vector<2x96xf32>
    %47 = arith.addf %45, %46 : vector<2x96xf32>
    %48 = vector.extract_strided_slice %44 {offsets = [0, 0], sizes = [2, 32], strides = [1, 1]} : vector<2x96xf32> to vector<2x32xf32>
    %49 = vector.extract_strided_slice %47 {offsets = [0, 0], sizes = [2, 32], strides = [1, 1]} : vector<2x96xf32> to vector<2x32xf32>
    %50 = arith.addf %48, %49 : vector<2x32xf32>
    %51 = arith.negf %50 : vector<2x32xf32>
    %52 = math.exp %51 : vector<2x32xf32>
    %cst_10 = arith.constant 1.000000e+00 : f32
    %53 = vector.broadcast %cst_10 : f32 to vector<2x32xf32>
    %54 = arith.addf %53, %52 : vector<2x32xf32>
    %55 = arith.divf %53, %54 : vector<2x32xf32>
    %56 = vector.extract_strided_slice %44 {offsets = [0, 32], sizes = [2, 32], strides = [1, 1]} : vector<2x96xf32> to vector<2x32xf32>
    %57 = vector.extract_strided_slice %47 {offsets = [0, 32], sizes = [2, 32], strides = [1, 1]} : vector<2x96xf32> to vector<2x32xf32>
    %58 = arith.addf %56, %57 : vector<2x32xf32>
    %59 = arith.negf %58 : vector<2x32xf32>
    %60 = math.exp %59 : vector<2x32xf32>
    %cst_11 = arith.constant 1.000000e+00 : f32
    %61 = vector.broadcast %cst_11 : f32 to vector<2x32xf32>
    %62 = arith.addf %61, %60 : vector<2x32xf32>
    %63 = arith.divf %61, %62 : vector<2x32xf32>
    %64 = vector.extract_strided_slice %44 {offsets = [0, 64], sizes = [2, 32], strides = [1, 1]} : vector<2x96xf32> to vector<2x32xf32>
    %65 = vector.extract_strided_slice %47 {offsets = [0, 64], sizes = [2, 32], strides = [1, 1]} : vector<2x96xf32> to vector<2x32xf32>
    %66 = arith.mulf %55, %65 : vector<2x32xf32>
    %67 = arith.addf %64, %66 : vector<2x32xf32>
    %68 = math.tanh %67 : vector<2x32xf32>
    %cst_12 = arith.constant 1.000000e+00 : f32
    %69 = vector.broadcast %cst_12 : f32 to vector<2x32xf32>
    %70 = arith.subf %69, %63 : vector<2x32xf32>
    %71 = arith.mulf %70, %68 : vector<2x32xf32>
    %72 = arith.mulf %63, %42 : vector<2x32xf32>
    %73 = arith.addf %71, %72 : vector<2x32xf32>
    %74 = vector.extract_strided_slice %10 {offsets = [0, 2, 0], sizes = [2, 1, 96], strides = [1, 1, 1]} : vector<2x8x96xf32> to vector<2x1x96xf32>
    %75 = vector.shape_cast %74 : vector<2x1x96xf32> to vector<2x96xf32>
    %cst_13 = arith.constant dense<0.000000e+00> : vector<2x96xf32>
    %76 = tpu.matmul %73, %2, %cst_13 {dimension_numbers = #tpu.dot_dimension_numbers<[1], [0], [0], [1], [0, 0, 1, 1], [], []>, precision = #tpu.contract_precision<fp32>} : vector<2x32xf32>, vector<32x96xf32>, vector<2x96xf32> -> vector<2x96xf32>
    %77 = vector.broadcast %4 : vector<1x96xf32> to vector<2x96xf32>
    %78 = arith.addf %76, %77 : vector<2x96xf32>
    %79 = vector.extract_strided_slice %75 {offsets = [0, 0], sizes = [2, 32], strides = [1, 1]} : vector<2x96xf32> to vector<2x32xf32>
    %80 = vector.extract_strided_slice %78 {offsets = [0, 0], sizes = [2, 32], strides = [1, 1]} : vector<2x96xf32> to vector<2x32xf32>
    %81 = arith.addf %79, %80 : vector<2x32xf32>
    %82 = arith.negf %81 : vector<2x32xf32>
    %83 = math.exp %82 : vector<2x32xf32>
    %cst_14 = arith.constant 1.000000e+00 : f32
    %84 = vector.broadcast %cst_14 : f32 to vector<2x32xf32>
    %85 = arith.addf %84, %83 : vector<2x32xf32>
    %86 = arith.divf %84, %85 : vector<2x32xf32>
    %87 = vector.extract_strided_slice %75 {offsets = [0, 32], sizes = [2, 32], strides = [1, 1]} : vector<2x96xf32> to vector<2x32xf32>
    %88 = vector.extract_strided_slice %78 {offsets = [0, 32], sizes = [2, 32], strides = [1, 1]} : vector<2x96xf32> to vector<2x32xf32>
    %89 = arith.addf %87, %88 : vector<2x32xf32>
    %90 = arith.negf %89 : vector<2x32xf32>
    %91 = math.exp %90 : vector<2x32xf32>
    %cst_15 = arith.constant 1.000000e+00 : f32
    %92 = vector.broadcast %cst_15 : f32 to vector<2x32xf32>
    %93 = arith.addf %92, %91 : vector<2x32xf32>
    %94 = arith.divf %92, %93 : vector<2x32xf32>
    %95 = vector.extract_strided_slice %75 {offsets = [0, 64], sizes = [2, 32], strides = [1, 1]} : vector<2x96xf32> to vector<2x32xf32>
    %96 = vector.extract_strided_slice %78 {offsets = [0, 64], sizes = [2, 32], strides = [1, 1]} : vector<2x96xf32> to vector<2x32xf32>
    %97 = arith.mulf %86, %96 : vector<2x32xf32>
    %98 = arith.addf %95, %97 : vector<2x32xf32>
    %99 = math.tanh %98 : vector<2x32xf32>
    %cst_16 = arith.constant 1.000000e+00 : f32
    %100 = vector.broadcast %cst_16 : f32 to vector<2x32xf32>
    %101 = arith.subf %100, %94 : vector<2x32xf32>
    %102 = arith.mulf %101, %99 : vector<2x32xf32>
    %103 = arith.mulf %94, %73 : vector<2x32xf32>
    %104 = arith.addf %102, %103 : vector<2x32xf32>
    %105 = vector.extract_strided_slice %10 {offsets = [0, 3, 0], sizes = [2, 1, 96], strides = [1, 1, 1]} : vector<2x8x96xf32> to vector<2x1x96xf32>
    %106 = vector.shape_cast %105 : vector<2x1x96xf32> to vector<2x96xf32>
    %cst_17 = arith.constant dense<0.000000e+00> : vector<2x96xf32>
    %107 = tpu.matmul %104, %2, %cst_17 {dimension_numbers = #tpu.dot_dimension_numbers<[1], [0], [0], [1], [0, 0, 1, 1], [], []>, precision = #tpu.contract_precision<fp32>} : vector<2x32xf32>, vector<32x96xf32>, vector<2x96xf32> -> vector<2x96xf32>
    %108 = vector.broadcast %4 : vector<1x96xf32> to vector<2x96xf32>
    %109 = arith.addf %107, %108 : vector<2x96xf32>
    %110 = vector.extract_strided_slice %106 {offsets = [0, 0], sizes = [2, 32], strides = [1, 1]} : vector<2x96xf32> to vector<2x32xf32>
    %111 = vector.extract_strided_slice %109 {offsets = [0, 0], sizes = [2, 32], strides = [1, 1]} : vector<2x96xf32> to vector<2x32xf32>
    %112 = arith.addf %110, %111 : vector<2x32xf32>
    %113 = arith.negf %112 : vector<2x32xf32>
    %114 = math.exp %113 : vector<2x32xf32>
    %cst_18 = arith.constant 1.000000e+00 : f32
    %115 = vector.broadcast %cst_18 : f32 to vector<2x32xf32>
    %116 = arith.addf %115, %114 : vector<2x32xf32>
    %117 = arith.divf %115, %116 : vector<2x32xf32>
    %118 = vector.extract_strided_slice %106 {offsets = [0, 32], sizes = [2, 32], strides = [1, 1]} : vector<2x96xf32> to vector<2x32xf32>
    %119 = vector.extract_strided_slice %109 {offsets = [0, 32], sizes = [2, 32], strides = [1, 1]} : vector<2x96xf32> to vector<2x32xf32>
    %120 = arith.addf %118, %119 : vector<2x32xf32>
    %121 = arith.negf %120 : vector<2x32xf32>
    %122 = math.exp %121 : vector<2x32xf32>
    %cst_19 = arith.constant 1.000000e+00 : f32
    %123 = vector.broadcast %cst_19 : f32 to vector<2x32xf32>
    %124 = arith.addf %123, %122 : vector<2x32xf32>
    %125 = arith.divf %123, %124 : vector<2x32xf32>
    %126 = vector.extract_strided_slice %106 {offsets = [0, 64], sizes = [2, 32], strides = [1, 1]} : vector<2x96xf32> to vector<2x32xf32>
    %127 = vector.extract_strided_slice %109 {offsets = [0, 64], sizes = [2, 32], strides = [1, 1]} : vector<2x96xf32> to vector<2x32xf32>
    %128 = arith.mulf %117, %127 : vector<2x32xf32>
    %129 = arith.addf %126, %128 : vector<2x32xf32>
    %130 = math.tanh %129 : vector<2x32xf32>
    %cst_20 = arith.constant 1.000000e+00 : f32
    %131 = vector.broadcast %cst_20 : f32 to vector<2x32xf32>
    %132 = arith.subf %131, %125 : vector<2x32xf32>
    %133 = arith.mulf %132, %130 : vector<2x32xf32>
    %134 = arith.mulf %125, %104 : vector<2x32xf32>
    %135 = arith.addf %133, %134 : vector<2x32xf32>
    %136 = vector.extract_strided_slice %10 {offsets = [0, 4, 0], sizes = [2, 1, 96], strides = [1, 1, 1]} : vector<2x8x96xf32> to vector<2x1x96xf32>
    %137 = vector.shape_cast %136 : vector<2x1x96xf32> to vector<2x96xf32>
    %cst_21 = arith.constant dense<0.000000e+00> : vector<2x96xf32>
    %138 = tpu.matmul %135, %2, %cst_21 {dimension_numbers = #tpu.dot_dimension_numbers<[1], [0], [0], [1], [0, 0, 1, 1], [], []>, precision = #tpu.contract_precision<fp32>} : vector<2x32xf32>, vector<32x96xf32>, vector<2x96xf32> -> vector<2x96xf32>
    %139 = vector.broadcast %4 : vector<1x96xf32> to vector<2x96xf32>
    %140 = arith.addf %138, %139 : vector<2x96xf32>
    %141 = vector.extract_strided_slice %137 {offsets = [0, 0], sizes = [2, 32], strides = [1, 1]} : vector<2x96xf32> to vector<2x32xf32>
    %142 = vector.extract_strided_slice %140 {offsets = [0, 0], sizes = [2, 32], strides = [1, 1]} : vector<2x96xf32> to vector<2x32xf32>
    %143 = arith.addf %141, %142 : vector<2x32xf32>
    %144 = arith.negf %143 : vector<2x32xf32>
    %145 = math.exp %144 : vector<2x32xf32>
    %cst_22 = arith.constant 1.000000e+00 : f32
    %146 = vector.broadcast %cst_22 : f32 to vector<2x32xf32>
    %147 = arith.addf %146, %145 : vector<2x32xf32>
    %148 = arith.divf %146, %147 : vector<2x32xf32>
    %149 = vector.extract_strided_slice %137 {offsets = [0, 32], sizes = [2, 32], strides = [1, 1]} : vector<2x96xf32> to vector<2x32xf32>
    %150 = vector.extract_strided_slice %140 {offsets = [0, 32], sizes = [2, 32], strides = [1, 1]} : vector<2x96xf32> to vector<2x32xf32>
    %151 = arith.addf %149, %150 : vector<2x32xf32>
    %152 = arith.negf %151 : vector<2x32xf32>
    %153 = math.exp %152 : vector<2x32xf32>
    %cst_23 = arith.constant 1.000000e+00 : f32
    %154 = vector.broadcast %cst_23 : f32 to vector<2x32xf32>
    %155 = arith.addf %154, %153 : vector<2x32xf32>
    %156 = arith.divf %154, %155 : vector<2x32xf32>
    %157 = vector.extract_strided_slice %137 {offsets = [0, 64], sizes = [2, 32], strides = [1, 1]} : vector<2x96xf32> to vector<2x32xf32>
    %158 = vector.extract_strided_slice %140 {offsets = [0, 64], sizes = [2, 32], strides = [1, 1]} : vector<2x96xf32> to vector<2x32xf32>
    %159 = arith.mulf %148, %158 : vector<2x32xf32>
    %160 = arith.addf %157, %159 : vector<2x32xf32>
    %161 = math.tanh %160 : vector<2x32xf32>
    %cst_24 = arith.constant 1.000000e+00 : f32
    %162 = vector.broadcast %cst_24 : f32 to vector<2x32xf32>
    %163 = arith.subf %162, %156 : vector<2x32xf32>
    %164 = arith.mulf %163, %161 : vector<2x32xf32>
    %165 = arith.mulf %156, %135 : vector<2x32xf32>
    %166 = arith.addf %164, %165 : vector<2x32xf32>
    %167 = vector.extract_strided_slice %10 {offsets = [0, 5, 0], sizes = [2, 1, 96], strides = [1, 1, 1]} : vector<2x8x96xf32> to vector<2x1x96xf32>
    %168 = vector.shape_cast %167 : vector<2x1x96xf32> to vector<2x96xf32>
    %cst_25 = arith.constant dense<0.000000e+00> : vector<2x96xf32>
    %169 = tpu.matmul %166, %2, %cst_25 {dimension_numbers = #tpu.dot_dimension_numbers<[1], [0], [0], [1], [0, 0, 1, 1], [], []>, precision = #tpu.contract_precision<fp32>} : vector<2x32xf32>, vector<32x96xf32>, vector<2x96xf32> -> vector<2x96xf32>
    %170 = vector.broadcast %4 : vector<1x96xf32> to vector<2x96xf32>
    %171 = arith.addf %169, %170 : vector<2x96xf32>
    %172 = vector.extract_strided_slice %168 {offsets = [0, 0], sizes = [2, 32], strides = [1, 1]} : vector<2x96xf32> to vector<2x32xf32>
    %173 = vector.extract_strided_slice %171 {offsets = [0, 0], sizes = [2, 32], strides = [1, 1]} : vector<2x96xf32> to vector<2x32xf32>
    %174 = arith.addf %172, %173 : vector<2x32xf32>
    %175 = arith.negf %174 : vector<2x32xf32>
    %176 = math.exp %175 : vector<2x32xf32>
    %cst_26 = arith.constant 1.000000e+00 : f32
    %177 = vector.broadcast %cst_26 : f32 to vector<2x32xf32>
    %178 = arith.addf %177, %176 : vector<2x32xf32>
    %179 = arith.divf %177, %178 : vector<2x32xf32>
    %180 = vector.extract_strided_slice %168 {offsets = [0, 32], sizes = [2, 32], strides = [1, 1]} : vector<2x96xf32> to vector<2x32xf32>
    %181 = vector.extract_strided_slice %171 {offsets = [0, 32], sizes = [2, 32], strides = [1, 1]} : vector<2x96xf32> to vector<2x32xf32>
    %182 = arith.addf %180, %181 : vector<2x32xf32>
    %183 = arith.negf %182 : vector<2x32xf32>
    %184 = math.exp %183 : vector<2x32xf32>
    %cst_27 = arith.constant 1.000000e+00 : f32
    %185 = vector.broadcast %cst_27 : f32 to vector<2x32xf32>
    %186 = arith.addf %185, %184 : vector<2x32xf32>
    %187 = arith.divf %185, %186 : vector<2x32xf32>
    %188 = vector.extract_strided_slice %168 {offsets = [0, 64], sizes = [2, 32], strides = [1, 1]} : vector<2x96xf32> to vector<2x32xf32>
    %189 = vector.extract_strided_slice %171 {offsets = [0, 64], sizes = [2, 32], strides = [1, 1]} : vector<2x96xf32> to vector<2x32xf32>
    %190 = arith.mulf %179, %189 : vector<2x32xf32>
    %191 = arith.addf %188, %190 : vector<2x32xf32>
    %192 = math.tanh %191 : vector<2x32xf32>
    %cst_28 = arith.constant 1.000000e+00 : f32
    %193 = vector.broadcast %cst_28 : f32 to vector<2x32xf32>
    %194 = arith.subf %193, %187 : vector<2x32xf32>
    %195 = arith.mulf %194, %192 : vector<2x32xf32>
    %196 = arith.mulf %187, %166 : vector<2x32xf32>
    %197 = arith.addf %195, %196 : vector<2x32xf32>
    %198 = vector.extract_strided_slice %10 {offsets = [0, 6, 0], sizes = [2, 1, 96], strides = [1, 1, 1]} : vector<2x8x96xf32> to vector<2x1x96xf32>
    %199 = vector.shape_cast %198 : vector<2x1x96xf32> to vector<2x96xf32>
    %cst_29 = arith.constant dense<0.000000e+00> : vector<2x96xf32>
    %200 = tpu.matmul %197, %2, %cst_29 {dimension_numbers = #tpu.dot_dimension_numbers<[1], [0], [0], [1], [0, 0, 1, 1], [], []>, precision = #tpu.contract_precision<fp32>} : vector<2x32xf32>, vector<32x96xf32>, vector<2x96xf32> -> vector<2x96xf32>
    %201 = vector.broadcast %4 : vector<1x96xf32> to vector<2x96xf32>
    %202 = arith.addf %200, %201 : vector<2x96xf32>
    %203 = vector.extract_strided_slice %199 {offsets = [0, 0], sizes = [2, 32], strides = [1, 1]} : vector<2x96xf32> to vector<2x32xf32>
    %204 = vector.extract_strided_slice %202 {offsets = [0, 0], sizes = [2, 32], strides = [1, 1]} : vector<2x96xf32> to vector<2x32xf32>
    %205 = arith.addf %203, %204 : vector<2x32xf32>
    %206 = arith.negf %205 : vector<2x32xf32>
    %207 = math.exp %206 : vector<2x32xf32>
    %cst_30 = arith.constant 1.000000e+00 : f32
    %208 = vector.broadcast %cst_30 : f32 to vector<2x32xf32>
    %209 = arith.addf %208, %207 : vector<2x32xf32>
    %210 = arith.divf %208, %209 : vector<2x32xf32>
    %211 = vector.extract_strided_slice %199 {offsets = [0, 32], sizes = [2, 32], strides = [1, 1]} : vector<2x96xf32> to vector<2x32xf32>
    %212 = vector.extract_strided_slice %202 {offsets = [0, 32], sizes = [2, 32], strides = [1, 1]} : vector<2x96xf32> to vector<2x32xf32>
    %213 = arith.addf %211, %212 : vector<2x32xf32>
    %214 = arith.negf %213 : vector<2x32xf32>
    %215 = math.exp %214 : vector<2x32xf32>
    %cst_31 = arith.constant 1.000000e+00 : f32
    %216 = vector.broadcast %cst_31 : f32 to vector<2x32xf32>
    %217 = arith.addf %216, %215 : vector<2x32xf32>
    %218 = arith.divf %216, %217 : vector<2x32xf32>
    %219 = vector.extract_strided_slice %199 {offsets = [0, 64], sizes = [2, 32], strides = [1, 1]} : vector<2x96xf32> to vector<2x32xf32>
    %220 = vector.extract_strided_slice %202 {offsets = [0, 64], sizes = [2, 32], strides = [1, 1]} : vector<2x96xf32> to vector<2x32xf32>
    %221 = arith.mulf %210, %220 : vector<2x32xf32>
    %222 = arith.addf %219, %221 : vector<2x32xf32>
    %223 = math.tanh %222 : vector<2x32xf32>
    %cst_32 = arith.constant 1.000000e+00 : f32
    %224 = vector.broadcast %cst_32 : f32 to vector<2x32xf32>
    %225 = arith.subf %224, %218 : vector<2x32xf32>
    %226 = arith.mulf %225, %223 : vector<2x32xf32>
    %227 = arith.mulf %218, %197 : vector<2x32xf32>
    %228 = arith.addf %226, %227 : vector<2x32xf32>
    %229 = vector.extract_strided_slice %10 {offsets = [0, 7, 0], sizes = [2, 1, 96], strides = [1, 1, 1]} : vector<2x8x96xf32> to vector<2x1x96xf32>
    %230 = vector.shape_cast %229 : vector<2x1x96xf32> to vector<2x96xf32>
    %cst_33 = arith.constant dense<0.000000e+00> : vector<2x96xf32>
    %231 = tpu.matmul %228, %2, %cst_33 {dimension_numbers = #tpu.dot_dimension_numbers<[1], [0], [0], [1], [0, 0, 1, 1], [], []>, precision = #tpu.contract_precision<fp32>} : vector<2x32xf32>, vector<32x96xf32>, vector<2x96xf32> -> vector<2x96xf32>
    %232 = vector.broadcast %4 : vector<1x96xf32> to vector<2x96xf32>
    %233 = arith.addf %231, %232 : vector<2x96xf32>
    %234 = vector.extract_strided_slice %230 {offsets = [0, 0], sizes = [2, 32], strides = [1, 1]} : vector<2x96xf32> to vector<2x32xf32>
    %235 = vector.extract_strided_slice %233 {offsets = [0, 0], sizes = [2, 32], strides = [1, 1]} : vector<2x96xf32> to vector<2x32xf32>
    %236 = arith.addf %234, %235 : vector<2x32xf32>
    %237 = arith.negf %236 : vector<2x32xf32>
    %238 = math.exp %237 : vector<2x32xf32>
    %cst_34 = arith.constant 1.000000e+00 : f32
    %239 = vector.broadcast %cst_34 : f32 to vector<2x32xf32>
    %240 = arith.addf %239, %238 : vector<2x32xf32>
    %241 = arith.divf %239, %240 : vector<2x32xf32>
    %242 = vector.extract_strided_slice %230 {offsets = [0, 32], sizes = [2, 32], strides = [1, 1]} : vector<2x96xf32> to vector<2x32xf32>
    %243 = vector.extract_strided_slice %233 {offsets = [0, 32], sizes = [2, 32], strides = [1, 1]} : vector<2x96xf32> to vector<2x32xf32>
    %244 = arith.addf %242, %243 : vector<2x32xf32>
    %245 = arith.negf %244 : vector<2x32xf32>
    %246 = math.exp %245 : vector<2x32xf32>
    %cst_35 = arith.constant 1.000000e+00 : f32
    %247 = vector.broadcast %cst_35 : f32 to vector<2x32xf32>
    %248 = arith.addf %247, %246 : vector<2x32xf32>
    %249 = arith.divf %247, %248 : vector<2x32xf32>
    %250 = vector.extract_strided_slice %230 {offsets = [0, 64], sizes = [2, 32], strides = [1, 1]} : vector<2x96xf32> to vector<2x32xf32>
    %251 = vector.extract_strided_slice %233 {offsets = [0, 64], sizes = [2, 32], strides = [1, 1]} : vector<2x96xf32> to vector<2x32xf32>
    %252 = arith.mulf %241, %251 : vector<2x32xf32>
    %253 = arith.addf %250, %252 : vector<2x32xf32>
    %254 = math.tanh %253 : vector<2x32xf32>
    %cst_36 = arith.constant 1.000000e+00 : f32
    %255 = vector.broadcast %cst_36 : f32 to vector<2x32xf32>
    %256 = arith.subf %255, %249 : vector<2x32xf32>
    %257 = arith.mulf %256, %254 : vector<2x32xf32>
    %258 = arith.mulf %249, %228 : vector<2x32xf32>
    %259 = arith.addf %257, %258 : vector<2x32xf32>
    %260 = vector.shape_cast %42 : vector<2x32xf32> to vector<2x1x32xf32>
    %261 = vector.shape_cast %73 : vector<2x32xf32> to vector<2x1x32xf32>
    %262 = vector.shape_cast %104 : vector<2x32xf32> to vector<2x1x32xf32>
    %263 = vector.shape_cast %135 : vector<2x32xf32> to vector<2x1x32xf32>
    %264 = vector.shape_cast %166 : vector<2x32xf32> to vector<2x1x32xf32>
    %265 = vector.shape_cast %197 : vector<2x32xf32> to vector<2x1x32xf32>
    %266 = vector.shape_cast %228 : vector<2x32xf32> to vector<2x1x32xf32>
    %267 = vector.shape_cast %259 : vector<2x32xf32> to vector<2x1x32xf32>
    %268 = tpu.concatenate %260, %261, %262, %263, %264, %265, %266, %267 in 1 : vector<2x1x32xf32>, vector<2x1x32xf32>, vector<2x1x32xf32>, vector<2x1x32xf32>, vector<2x1x32xf32>, vector<2x1x32xf32>, vector<2x1x32xf32>, vector<2x1x32xf32> -> vector<2x8x32xf32>
    %269 = vector.shape_cast %268 : vector<2x8x32xf32> to vector<16x32xf32>
    %c0_37 = arith.constant 0 : index
    %c0_38 = arith.constant 0 : index
    %270 = vector.load %arg2[%c0_37, %c0_38] : memref<33x32xf32, #tpu.memory_space<vmem>>, vector<33x32xf32>
    %271 = vector.extract_strided_slice %270 {offsets = [0, 0], sizes = [32, 32], strides = [1, 1]} : vector<33x32xf32> to vector<32x32xf32>
    %cst_39 = arith.constant dense<0.000000e+00> : vector<16x32xf32>
    %272 = tpu.matmul %269, %271, %cst_39 {dimension_numbers = #tpu.dot_dimension_numbers<[1], [0], [0], [1], [0, 0, 1, 1], [], []>, precision = #tpu.contract_precision<fp32>} : vector<16x32xf32>, vector<32x32xf32>, vector<16x32xf32> -> vector<16x32xf32>
    %273 = vector.extract_strided_slice %270 {offsets = [32, 0], sizes = [1, 32], strides = [1, 1]} : vector<33x32xf32> to vector<1x32xf32>
    %274 = vector.broadcast %273 : vector<1x32xf32> to vector<16x32xf32>
    %275 = arith.addf %272, %274 : vector<16x32xf32>
    %c0_40 = arith.constant 0 : index
    %c0_41 = arith.constant 0 : index
    %c0_42 = arith.constant 0 : index
    %276 = vector.load %arg3[%c0_40, %c0_41, %c0_42] : memref<2x33x96xf32, #tpu.memory_space<vmem>>, vector<1x33x96xf32>
    %277 = vector.shape_cast %276 : vector<1x33x96xf32> to vector<33x96xf32>
    %278 = vector.extract_strided_slice %277 {offsets = [0, 0], sizes = [32, 96], strides = [1, 1]} : vector<33x96xf32> to vector<32x96xf32>
    %279 = vector.extract_strided_slice %277 {offsets = [32, 0], sizes = [1, 96], strides = [1, 1]} : vector<33x96xf32> to vector<1x96xf32>
    %c0_43 = arith.constant 0 : index
    %c0_44 = arith.constant 0 : index
    %c0_45 = arith.constant 0 : index
    %280 = vector.load %arg4[%c0_43, %c0_44, %c0_45] : memref<2x33x128xf32, #tpu.memory_space<vmem>>, vector<1x33x128xf32>
    %281 = vector.shape_cast %280 : vector<1x33x128xf32> to vector<33x128xf32>
    %282 = vector.extract_strided_slice %281 {offsets = [0, 0], sizes = [32, 128], strides = [1, 1]} : vector<33x128xf32> to vector<32x128xf32>
    %283 = vector.extract_strided_slice %281 {offsets = [32, 0], sizes = [1, 128], strides = [1, 1]} : vector<33x128xf32> to vector<1x128xf32>
    %c0_46 = arith.constant 0 : index
    %c0_47 = arith.constant 0 : index
    %c0_48 = arith.constant 0 : index
    %284 = vector.load %arg5[%c0_46, %c0_47, %c0_48] : memref<2x166x32xf32, #tpu.memory_space<vmem>>, vector<1x166x32xf32>
    %285 = vector.shape_cast %284 : vector<1x166x32xf32> to vector<166x32xf32>
    %286 = vector.extract_strided_slice %285 {offsets = [0, 0], sizes = [32, 32], strides = [1, 1]} : vector<166x32xf32> to vector<32x32xf32>
    %287 = vector.extract_strided_slice %285 {offsets = [32, 0], sizes = [128, 32], strides = [1, 1]} : vector<166x32xf32> to vector<128x32xf32>
    %288 = vector.extract_strided_slice %285 {offsets = [160, 0], sizes = [1, 32], strides = [1, 1]} : vector<166x32xf32> to vector<1x32xf32>
    %289 = vector.extract_strided_slice %285 {offsets = [161, 0], sizes = [1, 32], strides = [1, 1]} : vector<166x32xf32> to vector<1x32xf32>
    %290 = vector.extract_strided_slice %285 {offsets = [162, 0], sizes = [1, 32], strides = [1, 1]} : vector<166x32xf32> to vector<1x32xf32>
    %291 = vector.extract_strided_slice %285 {offsets = [163, 0], sizes = [1, 32], strides = [1, 1]} : vector<166x32xf32> to vector<1x32xf32>
    %292 = vector.extract_strided_slice %285 {offsets = [164, 0], sizes = [1, 32], strides = [1, 1]} : vector<166x32xf32> to vector<1x32xf32>
    %293 = vector.extract_strided_slice %285 {offsets = [165, 0], sizes = [1, 32], strides = [1, 1]} : vector<166x32xf32> to vector<1x32xf32>
    %cst_49 = arith.constant dense<0.000000e+00> : vector<16x96xf32>
    %294 = tpu.matmul %275, %278, %cst_49 {dimension_numbers = #tpu.dot_dimension_numbers<[1], [0], [0], [1], [0, 0, 1, 1], [], []>, precision = #tpu.contract_precision<fp32>} : vector<16x32xf32>, vector<32x96xf32>, vector<16x96xf32> -> vector<16x96xf32>
    %295 = vector.broadcast %279 : vector<1x96xf32> to vector<16x96xf32>
    %296 = arith.addf %294, %295 : vector<16x96xf32>
    %297 = vector.extract_strided_slice %296 {offsets = [0, 0], sizes = [16, 8], strides = [1, 1]} : vector<16x96xf32> to vector<16x8xf32>
    %298 = vector.shape_cast %297 : vector<16x8xf32> to vector<2x8x8xf32>
    %299 = vector.extract_strided_slice %296 {offsets = [0, 32], sizes = [16, 8], strides = [1, 1]} : vector<16x96xf32> to vector<16x8xf32>
    %300 = vector.shape_cast %299 : vector<16x8xf32> to vector<2x8x8xf32>
    %301 = vector.extract_strided_slice %296 {offsets = [0, 64], sizes = [16, 8], strides = [1, 1]} : vector<16x96xf32> to vector<16x8xf32>
    %302 = vector.shape_cast %301 : vector<16x8xf32> to vector<2x8x8xf32>
    "tpu.trace_start"() <{level = 10 : i32, message = "bqd,bkd->bqk"}> : () -> ()
    %cst_50 = arith.constant dense<0.000000e+00> : vector<2x8x8xf32>
    %303 = tpu.matmul %298, %300, %cst_50 {dimension_numbers = #tpu.dot_dimension_numbers<[2], [2], [1], [1], [0, 0, 0, 1, 1, 1], [0], [0]>, precision = #tpu.contract_precision<fp32>} : vector<2x8x8xf32>, vector<2x8x8xf32>, vector<2x8x8xf32> -> vector<2x8x8xf32>
    "tpu.trace_stop"() : () -> ()
    %cst_51 = arith.constant 0.353553385 : f32
    %304 = vector.broadcast %cst_51 : f32 to vector<2x8x8xf32>
    %305 = arith.mulf %303, %304 : vector<2x8x8xf32>
    %cst_52 = arith.constant dense<0xFF800000> : vector<2x8xf32>
    %306 = vector.multi_reduction <maximumf>, %305, %cst_52 [2] : vector<2x8x8xf32> to vector<2x8xf32>
    %307 = vector.shape_cast %306 : vector<2x8xf32> to vector<2x8x1xf32>
    %308 = vector.broadcast %307 : vector<2x8x1xf32> to vector<2x8x8xf32>
    %309 = arith.subf %305, %308 : vector<2x8x8xf32>
    %310 = math.exp %309 : vector<2x8x8xf32>
    %cst_53 = arith.constant dense<0.000000e+00> : vector<2x8xf32>
    %311 = vector.multi_reduction <add>, %310, %cst_53 [2] : vector<2x8x8xf32> to vector<2x8xf32>
    %312 = vector.shape_cast %311 : vector<2x8xf32> to vector<2x8x1xf32>
    %313 = vector.broadcast %312 : vector<2x8x1xf32> to vector<2x8x8xf32>
    %314 = arith.divf %310, %313 : vector<2x8x8xf32>
    %315 = vector.shape_cast %314 : vector<2x8x8xf32> to vector<2x64xf32>
    "tpu.trace_start"() <{level = 10 : i32, message = "bqk,bkd->bqd"}> : () -> ()
    %cst_54 = arith.constant dense<0.000000e+00> : vector<2x8x8xf32>
    %316 = tpu.matmul %314, %302, %cst_54 {dimension_numbers = #tpu.dot_dimension_numbers<[2], [1], [1], [2], [0, 0, 0, 1, 1, 2], [0], [0]>, precision = #tpu.contract_precision<fp32>} : vector<2x8x8xf32>, vector<2x8x8xf32>, vector<2x8x8xf32> -> vector<2x8x8xf32>
    "tpu.trace_stop"() : () -> ()
    %317 = vector.extract_strided_slice %296 {offsets = [0, 8], sizes = [16, 8], strides = [1, 1]} : vector<16x96xf32> to vector<16x8xf32>
    %318 = vector.shape_cast %317 : vector<16x8xf32> to vector<2x8x8xf32>
    %319 = vector.extract_strided_slice %296 {offsets = [0, 40], sizes = [16, 8], strides = [1, 1]} : vector<16x96xf32> to vector<16x8xf32>
    %320 = vector.shape_cast %319 : vector<16x8xf32> to vector<2x8x8xf32>
    %321 = vector.extract_strided_slice %296 {offsets = [0, 72], sizes = [16, 8], strides = [1, 1]} : vector<16x96xf32> to vector<16x8xf32>
    %322 = vector.shape_cast %321 : vector<16x8xf32> to vector<2x8x8xf32>
    "tpu.trace_start"() <{level = 10 : i32, message = "bqd,bkd->bqk"}> : () -> ()
    %cst_55 = arith.constant dense<0.000000e+00> : vector<2x8x8xf32>
    %323 = tpu.matmul %318, %320, %cst_55 {dimension_numbers = #tpu.dot_dimension_numbers<[2], [2], [1], [1], [0, 0, 0, 1, 1, 1], [0], [0]>, precision = #tpu.contract_precision<fp32>} : vector<2x8x8xf32>, vector<2x8x8xf32>, vector<2x8x8xf32> -> vector<2x8x8xf32>
    "tpu.trace_stop"() : () -> ()
    %cst_56 = arith.constant 0.353553385 : f32
    %324 = vector.broadcast %cst_56 : f32 to vector<2x8x8xf32>
    %325 = arith.mulf %323, %324 : vector<2x8x8xf32>
    %cst_57 = arith.constant dense<0xFF800000> : vector<2x8xf32>
    %326 = vector.multi_reduction <maximumf>, %325, %cst_57 [2] : vector<2x8x8xf32> to vector<2x8xf32>
    %327 = vector.shape_cast %326 : vector<2x8xf32> to vector<2x8x1xf32>
    %328 = vector.broadcast %327 : vector<2x8x1xf32> to vector<2x8x8xf32>
    %329 = arith.subf %325, %328 : vector<2x8x8xf32>
    %330 = math.exp %329 : vector<2x8x8xf32>
    %cst_58 = arith.constant dense<0.000000e+00> : vector<2x8xf32>
    %331 = vector.multi_reduction <add>, %330, %cst_58 [2] : vector<2x8x8xf32> to vector<2x8xf32>
    %332 = vector.shape_cast %331 : vector<2x8xf32> to vector<2x8x1xf32>
    %333 = vector.broadcast %332 : vector<2x8x1xf32> to vector<2x8x8xf32>
    %334 = arith.divf %330, %333 : vector<2x8x8xf32>
    %335 = vector.shape_cast %334 : vector<2x8x8xf32> to vector<2x64xf32>
    "tpu.trace_start"() <{level = 10 : i32, message = "bqk,bkd->bqd"}> : () -> ()
    %cst_59 = arith.constant dense<0.000000e+00> : vector<2x8x8xf32>
    %336 = tpu.matmul %334, %322, %cst_59 {dimension_numbers = #tpu.dot_dimension_numbers<[2], [1], [1], [2], [0, 0, 0, 1, 1, 2], [0], [0]>, precision = #tpu.contract_precision<fp32>} : vector<2x8x8xf32>, vector<2x8x8xf32>, vector<2x8x8xf32> -> vector<2x8x8xf32>
    "tpu.trace_stop"() : () -> ()
    %337 = vector.extract_strided_slice %296 {offsets = [0, 16], sizes = [16, 8], strides = [1, 1]} : vector<16x96xf32> to vector<16x8xf32>
    %338 = vector.shape_cast %337 : vector<16x8xf32> to vector<2x8x8xf32>
    %339 = vector.extract_strided_slice %296 {offsets = [0, 48], sizes = [16, 8], strides = [1, 1]} : vector<16x96xf32> to vector<16x8xf32>
    %340 = vector.shape_cast %339 : vector<16x8xf32> to vector<2x8x8xf32>
    %341 = vector.extract_strided_slice %296 {offsets = [0, 80], sizes = [16, 8], strides = [1, 1]} : vector<16x96xf32> to vector<16x8xf32>
    %342 = vector.shape_cast %341 : vector<16x8xf32> to vector<2x8x8xf32>
    "tpu.trace_start"() <{level = 10 : i32, message = "bqd,bkd->bqk"}> : () -> ()
    %cst_60 = arith.constant dense<0.000000e+00> : vector<2x8x8xf32>
    %343 = tpu.matmul %338, %340, %cst_60 {dimension_numbers = #tpu.dot_dimension_numbers<[2], [2], [1], [1], [0, 0, 0, 1, 1, 1], [0], [0]>, precision = #tpu.contract_precision<fp32>} : vector<2x8x8xf32>, vector<2x8x8xf32>, vector<2x8x8xf32> -> vector<2x8x8xf32>
    "tpu.trace_stop"() : () -> ()
    %cst_61 = arith.constant 0.353553385 : f32
    %344 = vector.broadcast %cst_61 : f32 to vector<2x8x8xf32>
    %345 = arith.mulf %343, %344 : vector<2x8x8xf32>
    %cst_62 = arith.constant dense<0xFF800000> : vector<2x8xf32>
    %346 = vector.multi_reduction <maximumf>, %345, %cst_62 [2] : vector<2x8x8xf32> to vector<2x8xf32>
    %347 = vector.shape_cast %346 : vector<2x8xf32> to vector<2x8x1xf32>
    %348 = vector.broadcast %347 : vector<2x8x1xf32> to vector<2x8x8xf32>
    %349 = arith.subf %345, %348 : vector<2x8x8xf32>
    %350 = math.exp %349 : vector<2x8x8xf32>
    %cst_63 = arith.constant dense<0.000000e+00> : vector<2x8xf32>
    %351 = vector.multi_reduction <add>, %350, %cst_63 [2] : vector<2x8x8xf32> to vector<2x8xf32>
    %352 = vector.shape_cast %351 : vector<2x8xf32> to vector<2x8x1xf32>
    %353 = vector.broadcast %352 : vector<2x8x1xf32> to vector<2x8x8xf32>
    %354 = arith.divf %350, %353 : vector<2x8x8xf32>
    %355 = vector.shape_cast %354 : vector<2x8x8xf32> to vector<2x64xf32>
    "tpu.trace_start"() <{level = 10 : i32, message = "bqk,bkd->bqd"}> : () -> ()
    %cst_64 = arith.constant dense<0.000000e+00> : vector<2x8x8xf32>
    %356 = tpu.matmul %354, %342, %cst_64 {dimension_numbers = #tpu.dot_dimension_numbers<[2], [1], [1], [2], [0, 0, 0, 1, 1, 2], [0], [0]>, precision = #tpu.contract_precision<fp32>} : vector<2x8x8xf32>, vector<2x8x8xf32>, vector<2x8x8xf32> -> vector<2x8x8xf32>
    "tpu.trace_stop"() : () -> ()
    %357 = vector.extract_strided_slice %296 {offsets = [0, 24], sizes = [16, 8], strides = [1, 1]} : vector<16x96xf32> to vector<16x8xf32>
    %358 = vector.shape_cast %357 : vector<16x8xf32> to vector<2x8x8xf32>
    %359 = vector.extract_strided_slice %296 {offsets = [0, 56], sizes = [16, 8], strides = [1, 1]} : vector<16x96xf32> to vector<16x8xf32>
    %360 = vector.shape_cast %359 : vector<16x8xf32> to vector<2x8x8xf32>
    %361 = vector.extract_strided_slice %296 {offsets = [0, 88], sizes = [16, 8], strides = [1, 1]} : vector<16x96xf32> to vector<16x8xf32>
    %362 = vector.shape_cast %361 : vector<16x8xf32> to vector<2x8x8xf32>
    "tpu.trace_start"() <{level = 10 : i32, message = "bqd,bkd->bqk"}> : () -> ()
    %cst_65 = arith.constant dense<0.000000e+00> : vector<2x8x8xf32>
    %363 = tpu.matmul %358, %360, %cst_65 {dimension_numbers = #tpu.dot_dimension_numbers<[2], [2], [1], [1], [0, 0, 0, 1, 1, 1], [0], [0]>, precision = #tpu.contract_precision<fp32>} : vector<2x8x8xf32>, vector<2x8x8xf32>, vector<2x8x8xf32> -> vector<2x8x8xf32>
    "tpu.trace_stop"() : () -> ()
    %cst_66 = arith.constant 0.353553385 : f32
    %364 = vector.broadcast %cst_66 : f32 to vector<2x8x8xf32>
    %365 = arith.mulf %363, %364 : vector<2x8x8xf32>
    %cst_67 = arith.constant dense<0xFF800000> : vector<2x8xf32>
    %366 = vector.multi_reduction <maximumf>, %365, %cst_67 [2] : vector<2x8x8xf32> to vector<2x8xf32>
    %367 = vector.shape_cast %366 : vector<2x8xf32> to vector<2x8x1xf32>
    %368 = vector.broadcast %367 : vector<2x8x1xf32> to vector<2x8x8xf32>
    %369 = arith.subf %365, %368 : vector<2x8x8xf32>
    %370 = math.exp %369 : vector<2x8x8xf32>
    %cst_68 = arith.constant dense<0.000000e+00> : vector<2x8xf32>
    %371 = vector.multi_reduction <add>, %370, %cst_68 [2] : vector<2x8x8xf32> to vector<2x8xf32>
    %372 = vector.shape_cast %371 : vector<2x8xf32> to vector<2x8x1xf32>
    %373 = vector.broadcast %372 : vector<2x8x1xf32> to vector<2x8x8xf32>
    %374 = arith.divf %370, %373 : vector<2x8x8xf32>
    %375 = vector.shape_cast %374 : vector<2x8x8xf32> to vector<2x64xf32>
    "tpu.trace_start"() <{level = 10 : i32, message = "bqk,bkd->bqd"}> : () -> ()
    %cst_69 = arith.constant dense<0.000000e+00> : vector<2x8x8xf32>
    %376 = tpu.matmul %374, %362, %cst_69 {dimension_numbers = #tpu.dot_dimension_numbers<[2], [1], [1], [2], [0, 0, 0, 1, 1, 2], [0], [0]>, precision = #tpu.contract_precision<fp32>} : vector<2x8x8xf32>, vector<2x8x8xf32>, vector<2x8x8xf32> -> vector<2x8x8xf32>
    "tpu.trace_stop"() : () -> ()
    %377 = tpu.concatenate %315, %335, %355, %375 in 1 : vector<2x64xf32>, vector<2x64xf32>, vector<2x64xf32>, vector<2x64xf32> -> vector<2x256xf32>
    %c0_70 = arith.constant 0 : index
    %c0_71 = arith.constant 0 : index
    %c0_72 = arith.constant 0 : index
    %378 = vector.load %arg7[%c0_70, %c0_71, %c0_72] : memref<2x2x256xf32, #tpu.memory_space<vmem>>, vector<1x2x256xf32>
    %379 = vector.shape_cast %378 : vector<1x2x256xf32> to vector<2x256xf32>
    %380 = vector.shape_cast %377 : vector<2x256xf32> to vector<1x2x256xf32>
    tpu.vector_store %arg7[%c0_70, %c0_71, %c0_72], %380 {strides = array<i32>} : memref<2x2x256xf32, #tpu.memory_space<vmem>>, vector<1x2x256xf32>,
    %381 = tpu.concatenate %316, %336, %356, %376 in 2 : vector<2x8x8xf32>, vector<2x8x8xf32>, vector<2x8x8xf32>, vector<2x8x8xf32> -> vector<2x8x32xf32>
    %382 = vector.shape_cast %381 : vector<2x8x32xf32> to vector<16x32xf32>
    %cst_73 = arith.constant dense<0.000000e+00> : vector<16x32xf32>
    %383 = tpu.matmul %382, %286, %cst_73 {dimension_numbers = #tpu.dot_dimension_numbers<[1], [0], [0], [1], [0, 0, 1, 1], [], []>, precision = #tpu.contract_precision<fp32>} : vector<16x32xf32>, vector<32x32xf32>, vector<16x32xf32> -> vector<16x32xf32>
    %384 = vector.broadcast %288 : vector<1x32xf32> to vector<16x32xf32>
    %385 = arith.addf %383, %384 : vector<16x32xf32>
    %386 = arith.addf %275, %385 : vector<16x32xf32>
    %cst_74 = arith.constant dense<0.000000e+00> : vector<16xf32>
    %387 = vector.multi_reduction <add>, %386, %cst_74 [1] : vector<16x32xf32> to vector<16xf32>
    %388 = vector.shape_cast %387 : vector<16xf32> to vector<16x1xf32>
    %cst_75 = arith.constant 3.200000e+01 : f32
    %389 = vector.broadcast %cst_75 : f32 to vector<16x1xf32>
    %390 = arith.divf %388, %389 : vector<16x1xf32>
    %391 = vector.broadcast %390 : vector<16x1xf32> to vector<16x32xf32>
    %392 = arith.subf %386, %391 : vector<16x32xf32>
    %393 = arith.mulf %392, %392 : vector<16x32xf32>
    %cst_76 = arith.constant dense<0.000000e+00> : vector<16xf32>
    %394 = vector.multi_reduction <add>, %393, %cst_76 [1] : vector<16x32xf32> to vector<16xf32>
    %395 = vector.shape_cast %394 : vector<16xf32> to vector<16x1xf32>
    %cst_77 = arith.constant 3.200000e+01 : f32
    %396 = vector.broadcast %cst_77 : f32 to vector<16x1xf32>
    %397 = arith.divf %395, %396 : vector<16x1xf32>
    %398 = vector.broadcast %390 : vector<16x1xf32> to vector<16x32xf32>
    %399 = arith.subf %386, %398 : vector<16x32xf32>
    %cst_78 = arith.constant 9.99999974E-6 : f32
    %400 = vector.broadcast %cst_78 : f32 to vector<16x1xf32>
    %401 = arith.addf %397, %400 : vector<16x1xf32>
    %402 = math.rsqrt %401 : vector<16x1xf32>
    %403 = vector.broadcast %402 : vector<16x1xf32> to vector<16x32xf32>
    %404 = arith.mulf %399, %403 : vector<16x32xf32>
    %405 = vector.broadcast %289 : vector<1x32xf32> to vector<16x32xf32>
    %406 = arith.mulf %404, %405 : vector<16x32xf32>
    %407 = vector.broadcast %290 : vector<1x32xf32> to vector<16x32xf32>
    %408 = arith.addf %406, %407 : vector<16x32xf32>
    %cst_79 = arith.constant dense<0.000000e+00> : vector<16x128xf32>
    %409 = tpu.matmul %408, %282, %cst_79 {dimension_numbers = #tpu.dot_dimension_numbers<[1], [0], [0], [1], [0, 0, 1, 1], [], []>, precision = #tpu.contract_precision<fp32>} : vector<16x32xf32>, vector<32x128xf32>, vector<16x128xf32> -> vector<16x128xf32>
    %410 = vector.broadcast %283 : vector<1x128xf32> to vector<16x128xf32>
    %411 = arith.addf %409, %410 : vector<16x128xf32>
    %cst_80 = arith.constant 0.000000e+00 : f32
    %412 = vector.broadcast %cst_80 : f32 to vector<16x128xf32>
    %413 = arith.maximumf %411, %412 : vector<16x128xf32>
    %cst_81 = arith.constant dense<0.000000e+00> : vector<16x32xf32>
    %414 = tpu.matmul %413, %287, %cst_81 {dimension_numbers = #tpu.dot_dimension_numbers<[1], [0], [0], [1], [0, 0, 1, 1], [], []>, precision = #tpu.contract_precision<fp32>} : vector<16x128xf32>, vector<128x32xf32>, vector<16x32xf32> -> vector<16x32xf32>
    %415 = arith.addf %408, %414 : vector<16x32xf32>
    %416 = vector.broadcast %291 : vector<1x32xf32> to vector<16x32xf32>
    %417 = arith.addf %415, %416 : vector<16x32xf32>
    %cst_82 = arith.constant dense<0.000000e+00> : vector<16xf32>
    %418 = vector.multi_reduction <add>, %417, %cst_82 [1] : vector<16x32xf32> to vector<16xf32>
    %419 = vector.shape_cast %418 : vector<16xf32> to vector<16x1xf32>
    %cst_83 = arith.constant 3.200000e+01 : f32
    %420 = vector.broadcast %cst_83 : f32 to vector<16x1xf32>
    %421 = arith.divf %419, %420 : vector<16x1xf32>
    %422 = vector.broadcast %421 : vector<16x1xf32> to vector<16x32xf32>
    %423 = arith.subf %417, %422 : vector<16x32xf32>
    %424 = arith.mulf %423, %423 : vector<16x32xf32>
    %cst_84 = arith.constant dense<0.000000e+00> : vector<16xf32>
    %425 = vector.multi_reduction <add>, %424, %cst_84 [1] : vector<16x32xf32> to vector<16xf32>
    %426 = vector.shape_cast %425 : vector<16xf32> to vector<16x1xf32>
    %cst_85 = arith.constant 3.200000e+01 : f32
    %427 = vector.broadcast %cst_85 : f32 to vector<16x1xf32>
    %428 = arith.divf %426, %427 : vector<16x1xf32>
    %429 = vector.broadcast %421 : vector<16x1xf32> to vector<16x32xf32>
    %430 = arith.subf %417, %429 : vector<16x32xf32>
    %cst_86 = arith.constant 9.99999974E-6 : f32
    %431 = vector.broadcast %cst_86 : f32 to vector<16x1xf32>
    %432 = arith.addf %428, %431 : vector<16x1xf32>
    %433 = math.rsqrt %432 : vector<16x1xf32>
    %434 = vector.broadcast %433 : vector<16x1xf32> to vector<16x32xf32>
    %435 = arith.mulf %430, %434 : vector<16x32xf32>
    %436 = vector.broadcast %292 : vector<1x32xf32> to vector<16x32xf32>
    %437 = arith.mulf %435, %436 : vector<16x32xf32>
    %438 = vector.broadcast %293 : vector<1x32xf32> to vector<16x32xf32>
    %439 = arith.addf %437, %438 : vector<16x32xf32>
    %c1 = arith.constant 1 : index
    %c0_87 = arith.constant 0 : index
    %c0_88 = arith.constant 0 : index
    %440 = vector.load %arg3[%c1, %c0_87, %c0_88] : memref<2x33x96xf32, #tpu.memory_space<vmem>>, vector<1x33x96xf32>
    %441 = vector.shape_cast %440 : vector<1x33x96xf32> to vector<33x96xf32>
    %442 = vector.extract_strided_slice %441 {offsets = [0, 0], sizes = [32, 96], strides = [1, 1]} : vector<33x96xf32> to vector<32x96xf32>
    %443 = vector.extract_strided_slice %441 {offsets = [32, 0], sizes = [1, 96], strides = [1, 1]} : vector<33x96xf32> to vector<1x96xf32>
    %c1_89 = arith.constant 1 : index
    %c0_90 = arith.constant 0 : index
    %c0_91 = arith.constant 0 : index
    %444 = vector.load %arg4[%c1_89, %c0_90, %c0_91] : memref<2x33x128xf32, #tpu.memory_space<vmem>>, vector<1x33x128xf32>
    %445 = vector.shape_cast %444 : vector<1x33x128xf32> to vector<33x128xf32>
    %446 = vector.extract_strided_slice %445 {offsets = [0, 0], sizes = [32, 128], strides = [1, 1]} : vector<33x128xf32> to vector<32x128xf32>
    %447 = vector.extract_strided_slice %445 {offsets = [32, 0], sizes = [1, 128], strides = [1, 1]} : vector<33x128xf32> to vector<1x128xf32>
    %c1_92 = arith.constant 1 : index
    %c0_93 = arith.constant 0 : index
    %c0_94 = arith.constant 0 : index
    %448 = vector.load %arg5[%c1_92, %c0_93, %c0_94] : memref<2x166x32xf32, #tpu.memory_space<vmem>>, vector<1x166x32xf32>
    %449 = vector.shape_cast %448 : vector<1x166x32xf32> to vector<166x32xf32>
    %450 = vector.extract_strided_slice %449 {offsets = [0, 0], sizes = [32, 32], strides = [1, 1]} : vector<166x32xf32> to vector<32x32xf32>
    %451 = vector.extract_strided_slice %449 {offsets = [32, 0], sizes = [128, 32], strides = [1, 1]} : vector<166x32xf32> to vector<128x32xf32>
    %452 = vector.extract_strided_slice %449 {offsets = [160, 0], sizes = [1, 32], strides = [1, 1]} : vector<166x32xf32> to vector<1x32xf32>
    %453 = vector.extract_strided_slice %449 {offsets = [161, 0], sizes = [1, 32], strides = [1, 1]} : vector<166x32xf32> to vector<1x32xf32>
    %454 = vector.extract_strided_slice %449 {offsets = [162, 0], sizes = [1, 32], strides = [1, 1]} : vector<166x32xf32> to vector<1x32xf32>
    %455 = vector.extract_strided_slice %449 {offsets = [163, 0], sizes = [1, 32], strides = [1, 1]} : vector<166x32xf32> to vector<1x32xf32>
    %456 = vector.extract_strided_slice %449 {offsets = [164, 0], sizes = [1, 32], strides = [1, 1]} : vector<166x32xf32> to vector<1x32xf32>
    %457 = vector.extract_strided_slice %449 {offsets = [165, 0], sizes = [1, 32], strides = [1, 1]} : vector<166x32xf32> to vector<1x32xf32>
    %cst_95 = arith.constant dense<0.000000e+00> : vector<16x96xf32>
    %458 = tpu.matmul %439, %442, %cst_95 {dimension_numbers = #tpu.dot_dimension_numbers<[1], [0], [0], [1], [0, 0, 1, 1], [], []>, precision = #tpu.contract_precision<fp32>} : vector<16x32xf32>, vector<32x96xf32>, vector<16x96xf32> -> vector<16x96xf32>
    %459 = vector.broadcast %443 : vector<1x96xf32> to vector<16x96xf32>
    %460 = arith.addf %458, %459 : vector<16x96xf32>
    %461 = vector.extract_strided_slice %460 {offsets = [0, 0], sizes = [16, 8], strides = [1, 1]} : vector<16x96xf32> to vector<16x8xf32>
    %462 = vector.shape_cast %461 : vector<16x8xf32> to vector<2x8x8xf32>
    %463 = vector.extract_strided_slice %460 {offsets = [0, 32], sizes = [16, 8], strides = [1, 1]} : vector<16x96xf32> to vector<16x8xf32>
    %464 = vector.shape_cast %463 : vector<16x8xf32> to vector<2x8x8xf32>
    %465 = vector.extract_strided_slice %460 {offsets = [0, 64], sizes = [16, 8], strides = [1, 1]} : vector<16x96xf32> to vector<16x8xf32>
    %466 = vector.shape_cast %465 : vector<16x8xf32> to vector<2x8x8xf32>
    "tpu.trace_start"() <{level = 10 : i32, message = "bqd,bkd->bqk"}> : () -> ()
    %cst_96 = arith.constant dense<0.000000e+00> : vector<2x8x8xf32>
    %467 = tpu.matmul %462, %464, %cst_96 {dimension_numbers = #tpu.dot_dimension_numbers<[2], [2], [1], [1], [0, 0, 0, 1, 1, 1], [0], [0]>, precision = #tpu.contract_precision<fp32>} : vector<2x8x8xf32>, vector<2x8x8xf32>, vector<2x8x8xf32> -> vector<2x8x8xf32>
    "tpu.trace_stop"() : () -> ()
    %cst_97 = arith.constant 0.353553385 : f32
    %468 = vector.broadcast %cst_97 : f32 to vector<2x8x8xf32>
    %469 = arith.mulf %467, %468 : vector<2x8x8xf32>
    %cst_98 = arith.constant dense<0xFF800000> : vector<2x8xf32>
    %470 = vector.multi_reduction <maximumf>, %469, %cst_98 [2] : vector<2x8x8xf32> to vector<2x8xf32>
    %471 = vector.shape_cast %470 : vector<2x8xf32> to vector<2x8x1xf32>
    %472 = vector.broadcast %471 : vector<2x8x1xf32> to vector<2x8x8xf32>
    %473 = arith.subf %469, %472 : vector<2x8x8xf32>
    %474 = math.exp %473 : vector<2x8x8xf32>
    %cst_99 = arith.constant dense<0.000000e+00> : vector<2x8xf32>
    %475 = vector.multi_reduction <add>, %474, %cst_99 [2] : vector<2x8x8xf32> to vector<2x8xf32>
    %476 = vector.shape_cast %475 : vector<2x8xf32> to vector<2x8x1xf32>
    %477 = vector.broadcast %476 : vector<2x8x1xf32> to vector<2x8x8xf32>
    %478 = arith.divf %474, %477 : vector<2x8x8xf32>
    %479 = vector.shape_cast %478 : vector<2x8x8xf32> to vector<2x64xf32>
    "tpu.trace_start"() <{level = 10 : i32, message = "bqk,bkd->bqd"}> : () -> ()
    %cst_100 = arith.constant dense<0.000000e+00> : vector<2x8x8xf32>
    %480 = tpu.matmul %478, %466, %cst_100 {dimension_numbers = #tpu.dot_dimension_numbers<[2], [1], [1], [2], [0, 0, 0, 1, 1, 2], [0], [0]>, precision = #tpu.contract_precision<fp32>} : vector<2x8x8xf32>, vector<2x8x8xf32>, vector<2x8x8xf32> -> vector<2x8x8xf32>
    "tpu.trace_stop"() : () -> ()
    %481 = vector.extract_strided_slice %460 {offsets = [0, 8], sizes = [16, 8], strides = [1, 1]} : vector<16x96xf32> to vector<16x8xf32>
    %482 = vector.shape_cast %481 : vector<16x8xf32> to vector<2x8x8xf32>
    %483 = vector.extract_strided_slice %460 {offsets = [0, 40], sizes = [16, 8], strides = [1, 1]} : vector<16x96xf32> to vector<16x8xf32>
    %484 = vector.shape_cast %483 : vector<16x8xf32> to vector<2x8x8xf32>
    %485 = vector.extract_strided_slice %460 {offsets = [0, 72], sizes = [16, 8], strides = [1, 1]} : vector<16x96xf32> to vector<16x8xf32>
    %486 = vector.shape_cast %485 : vector<16x8xf32> to vector<2x8x8xf32>
    "tpu.trace_start"() <{level = 10 : i32, message = "bqd,bkd->bqk"}> : () -> ()
    %cst_101 = arith.constant dense<0.000000e+00> : vector<2x8x8xf32>
    %487 = tpu.matmul %482, %484, %cst_101 {dimension_numbers = #tpu.dot_dimension_numbers<[2], [2], [1], [1], [0, 0, 0, 1, 1, 1], [0], [0]>, precision = #tpu.contract_precision<fp32>} : vector<2x8x8xf32>, vector<2x8x8xf32>, vector<2x8x8xf32> -> vector<2x8x8xf32>
    "tpu.trace_stop"() : () -> ()
    %cst_102 = arith.constant 0.353553385 : f32
    %488 = vector.broadcast %cst_102 : f32 to vector<2x8x8xf32>
    %489 = arith.mulf %487, %488 : vector<2x8x8xf32>
    %cst_103 = arith.constant dense<0xFF800000> : vector<2x8xf32>
    %490 = vector.multi_reduction <maximumf>, %489, %cst_103 [2] : vector<2x8x8xf32> to vector<2x8xf32>
    %491 = vector.shape_cast %490 : vector<2x8xf32> to vector<2x8x1xf32>
    %492 = vector.broadcast %491 : vector<2x8x1xf32> to vector<2x8x8xf32>
    %493 = arith.subf %489, %492 : vector<2x8x8xf32>
    %494 = math.exp %493 : vector<2x8x8xf32>
    %cst_104 = arith.constant dense<0.000000e+00> : vector<2x8xf32>
    %495 = vector.multi_reduction <add>, %494, %cst_104 [2] : vector<2x8x8xf32> to vector<2x8xf32>
    %496 = vector.shape_cast %495 : vector<2x8xf32> to vector<2x8x1xf32>
    %497 = vector.broadcast %496 : vector<2x8x1xf32> to vector<2x8x8xf32>
    %498 = arith.divf %494, %497 : vector<2x8x8xf32>
    %499 = vector.shape_cast %498 : vector<2x8x8xf32> to vector<2x64xf32>
    "tpu.trace_start"() <{level = 10 : i32, message = "bqk,bkd->bqd"}> : () -> ()
    %cst_105 = arith.constant dense<0.000000e+00> : vector<2x8x8xf32>
    %500 = tpu.matmul %498, %486, %cst_105 {dimension_numbers = #tpu.dot_dimension_numbers<[2], [1], [1], [2], [0, 0, 0, 1, 1, 2], [0], [0]>, precision = #tpu.contract_precision<fp32>} : vector<2x8x8xf32>, vector<2x8x8xf32>, vector<2x8x8xf32> -> vector<2x8x8xf32>
    "tpu.trace_stop"() : () -> ()
    %501 = vector.extract_strided_slice %460 {offsets = [0, 16], sizes = [16, 8], strides = [1, 1]} : vector<16x96xf32> to vector<16x8xf32>
    %502 = vector.shape_cast %501 : vector<16x8xf32> to vector<2x8x8xf32>
    %503 = vector.extract_strided_slice %460 {offsets = [0, 48], sizes = [16, 8], strides = [1, 1]} : vector<16x96xf32> to vector<16x8xf32>
    %504 = vector.shape_cast %503 : vector<16x8xf32> to vector<2x8x8xf32>
    %505 = vector.extract_strided_slice %460 {offsets = [0, 80], sizes = [16, 8], strides = [1, 1]} : vector<16x96xf32> to vector<16x8xf32>
    %506 = vector.shape_cast %505 : vector<16x8xf32> to vector<2x8x8xf32>
    "tpu.trace_start"() <{level = 10 : i32, message = "bqd,bkd->bqk"}> : () -> ()
    %cst_106 = arith.constant dense<0.000000e+00> : vector<2x8x8xf32>
    %507 = tpu.matmul %502, %504, %cst_106 {dimension_numbers = #tpu.dot_dimension_numbers<[2], [2], [1], [1], [0, 0, 0, 1, 1, 1], [0], [0]>, precision = #tpu.contract_precision<fp32>} : vector<2x8x8xf32>, vector<2x8x8xf32>, vector<2x8x8xf32> -> vector<2x8x8xf32>
    "tpu.trace_stop"() : () -> ()
    %cst_107 = arith.constant 0.353553385 : f32
    %508 = vector.broadcast %cst_107 : f32 to vector<2x8x8xf32>
    %509 = arith.mulf %507, %508 : vector<2x8x8xf32>
    %cst_108 = arith.constant dense<0xFF800000> : vector<2x8xf32>
    %510 = vector.multi_reduction <maximumf>, %509, %cst_108 [2] : vector<2x8x8xf32> to vector<2x8xf32>
    %511 = vector.shape_cast %510 : vector<2x8xf32> to vector<2x8x1xf32>
    %512 = vector.broadcast %511 : vector<2x8x1xf32> to vector<2x8x8xf32>
    %513 = arith.subf %509, %512 : vector<2x8x8xf32>
    %514 = math.exp %513 : vector<2x8x8xf32>
    %cst_109 = arith.constant dense<0.000000e+00> : vector<2x8xf32>
    %515 = vector.multi_reduction <add>, %514, %cst_109 [2] : vector<2x8x8xf32> to vector<2x8xf32>
    %516 = vector.shape_cast %515 : vector<2x8xf32> to vector<2x8x1xf32>
    %517 = vector.broadcast %516 : vector<2x8x1xf32> to vector<2x8x8xf32>
    %518 = arith.divf %514, %517 : vector<2x8x8xf32>
    %519 = vector.shape_cast %518 : vector<2x8x8xf32> to vector<2x64xf32>
    "tpu.trace_start"() <{level = 10 : i32, message = "bqk,bkd->bqd"}> : () -> ()
    %cst_110 = arith.constant dense<0.000000e+00> : vector<2x8x8xf32>
    %520 = tpu.matmul %518, %506, %cst_110 {dimension_numbers = #tpu.dot_dimension_numbers<[2], [1], [1], [2], [0, 0, 0, 1, 1, 2], [0], [0]>, precision = #tpu.contract_precision<fp32>} : vector<2x8x8xf32>, vector<2x8x8xf32>, vector<2x8x8xf32> -> vector<2x8x8xf32>
    "tpu.trace_stop"() : () -> ()
    %521 = vector.extract_strided_slice %460 {offsets = [0, 24], sizes = [16, 8], strides = [1, 1]} : vector<16x96xf32> to vector<16x8xf32>
    %522 = vector.shape_cast %521 : vector<16x8xf32> to vector<2x8x8xf32>
    %523 = vector.extract_strided_slice %460 {offsets = [0, 56], sizes = [16, 8], strides = [1, 1]} : vector<16x96xf32> to vector<16x8xf32>
    %524 = vector.shape_cast %523 : vector<16x8xf32> to vector<2x8x8xf32>
    %525 = vector.extract_strided_slice %460 {offsets = [0, 88], sizes = [16, 8], strides = [1, 1]} : vector<16x96xf32> to vector<16x8xf32>
    %526 = vector.shape_cast %525 : vector<16x8xf32> to vector<2x8x8xf32>
    "tpu.trace_start"() <{level = 10 : i32, message = "bqd,bkd->bqk"}> : () -> ()
    %cst_111 = arith.constant dense<0.000000e+00> : vector<2x8x8xf32>
    %527 = tpu.matmul %522, %524, %cst_111 {dimension_numbers = #tpu.dot_dimension_numbers<[2], [2], [1], [1], [0, 0, 0, 1, 1, 1], [0], [0]>, precision = #tpu.contract_precision<fp32>} : vector<2x8x8xf32>, vector<2x8x8xf32>, vector<2x8x8xf32> -> vector<2x8x8xf32>
    "tpu.trace_stop"() : () -> ()
    %cst_112 = arith.constant 0.353553385 : f32
    %528 = vector.broadcast %cst_112 : f32 to vector<2x8x8xf32>
    %529 = arith.mulf %527, %528 : vector<2x8x8xf32>
    %cst_113 = arith.constant dense<0xFF800000> : vector<2x8xf32>
    %530 = vector.multi_reduction <maximumf>, %529, %cst_113 [2] : vector<2x8x8xf32> to vector<2x8xf32>
    %531 = vector.shape_cast %530 : vector<2x8xf32> to vector<2x8x1xf32>
    %532 = vector.broadcast %531 : vector<2x8x1xf32> to vector<2x8x8xf32>
    %533 = arith.subf %529, %532 : vector<2x8x8xf32>
    %534 = math.exp %533 : vector<2x8x8xf32>
    %cst_114 = arith.constant dense<0.000000e+00> : vector<2x8xf32>
    %535 = vector.multi_reduction <add>, %534, %cst_114 [2] : vector<2x8x8xf32> to vector<2x8xf32>
    %536 = vector.shape_cast %535 : vector<2x8xf32> to vector<2x8x1xf32>
    %537 = vector.broadcast %536 : vector<2x8x1xf32> to vector<2x8x8xf32>
    %538 = arith.divf %534, %537 : vector<2x8x8xf32>
    %539 = vector.shape_cast %538 : vector<2x8x8xf32> to vector<2x64xf32>
    "tpu.trace_start"() <{level = 10 : i32, message = "bqk,bkd->bqd"}> : () -> ()
    %cst_115 = arith.constant dense<0.000000e+00> : vector<2x8x8xf32>
    %540 = tpu.matmul %538, %526, %cst_115 {dimension_numbers = #tpu.dot_dimension_numbers<[2], [1], [1], [2], [0, 0, 0, 1, 1, 2], [0], [0]>, precision = #tpu.contract_precision<fp32>} : vector<2x8x8xf32>, vector<2x8x8xf32>, vector<2x8x8xf32> -> vector<2x8x8xf32>
    "tpu.trace_stop"() : () -> ()
    %541 = tpu.concatenate %479, %499, %519, %539 in 1 : vector<2x64xf32>, vector<2x64xf32>, vector<2x64xf32>, vector<2x64xf32> -> vector<2x256xf32>
    %c1_116 = arith.constant 1 : index
    %c0_117 = arith.constant 0 : index
    %c0_118 = arith.constant 0 : index
    %542 = vector.load %arg7[%c1_116, %c0_117, %c0_118] : memref<2x2x256xf32, #tpu.memory_space<vmem>>, vector<1x2x256xf32>
    %543 = vector.shape_cast %542 : vector<1x2x256xf32> to vector<2x256xf32>
    %544 = vector.shape_cast %541 : vector<2x256xf32> to vector<1x2x256xf32>
    tpu.vector_store %arg7[%c1_116, %c0_117, %c0_118], %544 {strides = array<i32>} : memref<2x2x256xf32, #tpu.memory_space<vmem>>, vector<1x2x256xf32>,
    %545 = tpu.concatenate %480, %500, %520, %540 in 2 : vector<2x8x8xf32>, vector<2x8x8xf32>, vector<2x8x8xf32>, vector<2x8x8xf32> -> vector<2x8x32xf32>
    %546 = vector.shape_cast %545 : vector<2x8x32xf32> to vector<16x32xf32>
    %cst_119 = arith.constant dense<0.000000e+00> : vector<16x32xf32>
    %547 = tpu.matmul %546, %450, %cst_119 {dimension_numbers = #tpu.dot_dimension_numbers<[1], [0], [0], [1], [0, 0, 1, 1], [], []>, precision = #tpu.contract_precision<fp32>} : vector<16x32xf32>, vector<32x32xf32>, vector<16x32xf32> -> vector<16x32xf32>
    %548 = vector.broadcast %452 : vector<1x32xf32> to vector<16x32xf32>
    %549 = arith.addf %547, %548 : vector<16x32xf32>
    %550 = arith.addf %439, %549 : vector<16x32xf32>
    %cst_120 = arith.constant dense<0.000000e+00> : vector<16xf32>
    %551 = vector.multi_reduction <add>, %550, %cst_120 [1] : vector<16x32xf32> to vector<16xf32>
    %552 = vector.shape_cast %551 : vector<16xf32> to vector<16x1xf32>
    %cst_121 = arith.constant 3.200000e+01 : f32
    %553 = vector.broadcast %cst_121 : f32 to vector<16x1xf32>
    %554 = arith.divf %552, %553 : vector<16x1xf32>
    %555 = vector.broadcast %554 : vector<16x1xf32> to vector<16x32xf32>
    %556 = arith.subf %550, %555 : vector<16x32xf32>
    %557 = arith.mulf %556, %556 : vector<16x32xf32>
    %cst_122 = arith.constant dense<0.000000e+00> : vector<16xf32>
    %558 = vector.multi_reduction <add>, %557, %cst_122 [1] : vector<16x32xf32> to vector<16xf32>
    %559 = vector.shape_cast %558 : vector<16xf32> to vector<16x1xf32>
    %cst_123 = arith.constant 3.200000e+01 : f32
    %560 = vector.broadcast %cst_123 : f32 to vector<16x1xf32>
    %561 = arith.divf %559, %560 : vector<16x1xf32>
    %562 = vector.broadcast %554 : vector<16x1xf32> to vector<16x32xf32>
    %563 = arith.subf %550, %562 : vector<16x32xf32>
    %cst_124 = arith.constant 9.99999974E-6 : f32
    %564 = vector.broadcast %cst_124 : f32 to vector<16x1xf32>
    %565 = arith.addf %561, %564 : vector<16x1xf32>
    %566 = math.rsqrt %565 : vector<16x1xf32>
    %567 = vector.broadcast %566 : vector<16x1xf32> to vector<16x32xf32>
    %568 = arith.mulf %563, %567 : vector<16x32xf32>
    %569 = vector.broadcast %453 : vector<1x32xf32> to vector<16x32xf32>
    %570 = arith.mulf %568, %569 : vector<16x32xf32>
    %571 = vector.broadcast %454 : vector<1x32xf32> to vector<16x32xf32>
    %572 = arith.addf %570, %571 : vector<16x32xf32>
    %cst_125 = arith.constant dense<0.000000e+00> : vector<16x128xf32>
    %573 = tpu.matmul %572, %446, %cst_125 {dimension_numbers = #tpu.dot_dimension_numbers<[1], [0], [0], [1], [0, 0, 1, 1], [], []>, precision = #tpu.contract_precision<fp32>} : vector<16x32xf32>, vector<32x128xf32>, vector<16x128xf32> -> vector<16x128xf32>
    %574 = vector.broadcast %447 : vector<1x128xf32> to vector<16x128xf32>
    %575 = arith.addf %573, %574 : vector<16x128xf32>
    %cst_126 = arith.constant 0.000000e+00 : f32
    %576 = vector.broadcast %cst_126 : f32 to vector<16x128xf32>
    %577 = arith.maximumf %575, %576 : vector<16x128xf32>
    %cst_127 = arith.constant dense<0.000000e+00> : vector<16x32xf32>
    %578 = tpu.matmul %577, %451, %cst_127 {dimension_numbers = #tpu.dot_dimension_numbers<[1], [0], [0], [1], [0, 0, 1, 1], [], []>, precision = #tpu.contract_precision<fp32>} : vector<16x128xf32>, vector<128x32xf32>, vector<16x32xf32> -> vector<16x32xf32>
    %579 = arith.addf %572, %578 : vector<16x32xf32>
    %580 = vector.broadcast %455 : vector<1x32xf32> to vector<16x32xf32>
    %581 = arith.addf %579, %580 : vector<16x32xf32>
    %cst_128 = arith.constant dense<0.000000e+00> : vector<16xf32>
    %582 = vector.multi_reduction <add>, %581, %cst_128 [1] : vector<16x32xf32> to vector<16xf32>
    %583 = vector.shape_cast %582 : vector<16xf32> to vector<16x1xf32>
    %cst_129 = arith.constant 3.200000e+01 : f32
    %584 = vector.broadcast %cst_129 : f32 to vector<16x1xf32>
    %585 = arith.divf %583, %584 : vector<16x1xf32>
    %586 = vector.broadcast %585 : vector<16x1xf32> to vector<16x32xf32>
    %587 = arith.subf %581, %586 : vector<16x32xf32>
    %588 = arith.mulf %587, %587 : vector<16x32xf32>
    %cst_130 = arith.constant dense<0.000000e+00> : vector<16xf32>
    %589 = vector.multi_reduction <add>, %588, %cst_130 [1] : vector<16x32xf32> to vector<16xf32>
    %590 = vector.shape_cast %589 : vector<16xf32> to vector<16x1xf32>
    %cst_131 = arith.constant 3.200000e+01 : f32
    %591 = vector.broadcast %cst_131 : f32 to vector<16x1xf32>
    %592 = arith.divf %590, %591 : vector<16x1xf32>
    %593 = vector.broadcast %585 : vector<16x1xf32> to vector<16x32xf32>
    %594 = arith.subf %581, %593 : vector<16x32xf32>
    %cst_132 = arith.constant 9.99999974E-6 : f32
    %595 = vector.broadcast %cst_132 : f32 to vector<16x1xf32>
    %596 = arith.addf %592, %595 : vector<16x1xf32>
    %597 = math.rsqrt %596 : vector<16x1xf32>
    %598 = vector.broadcast %597 : vector<16x1xf32> to vector<16x32xf32>
    %599 = arith.mulf %594, %598 : vector<16x32xf32>
    %600 = vector.broadcast %456 : vector<1x32xf32> to vector<16x32xf32>
    %601 = arith.mulf %599, %600 : vector<16x32xf32>
    %602 = vector.broadcast %457 : vector<1x32xf32> to vector<16x32xf32>
    %603 = arith.addf %601, %602 : vector<16x32xf32>
    %604 = vector.shape_cast %603 : vector<16x32xf32> to vector<2x8x32xf32>
    %c0_133 = arith.constant 0 : index
    %c0_134 = arith.constant 0 : index
    %c0_135 = arith.constant 0 : index
    %605 = vector.load %arg6[%c0_133, %c0_134, %c0_135] : memref<2x8x32xf32, #tpu.memory_space<vmem>>, vector<2x8x32xf32>
    tpu.vector_store %arg6[%c0_133, %c0_134, %c0_135], %604 {strides = array<i32>} : memref<2x8x32xf32, #tpu.memory_space<vmem>>, vector<2x8x32xf32>,
    return
  }
}

</mosaic_0001>

<bundles_post_ra>
// kernel: decoder.1
= control target key start
LH: loop header
LB: loop body
LE: loop exit
PB: predicated region body
PF: predicated region fallthrough
CT: control target
= control target key end

     0   :  { %vm39_vm0 = vcmask 130048   ;;  %v31354_v7 = vmov 0.0|0.0   ;;  %s34754_s0 = inlined_call_operand.vmem [shape: f32[2,8,16], index: 0, kind: input, shape index: {}]   ;;  %s34755_s1 = inlined_call_operand.vmem [shape: f32[50,96], index: 1, kind: input, shape index: {}]   ;;  %s34756_s2 = inlined_call_operand.vmem [shape: f32[33,32], index: 2, kind: input, shape index: {}]   ;;  %s34757_s3 = inlined_call_operand.vmem [shape: f32[2,33,96], index: 3, kind: input, shape index: {}]   ;;  %s34758_s4 = inlined_call_operand.vmem [shape: f32[2,33,128], index: 4, kind: input, shape index: {}]   ;;  %s34759_s5 = inlined_call_operand.vmem [shape: f32[2,166,32], index: 5, kind: input, shape index: {}]   ;;  %s34760_s6 = inlined_call_operand.hbm [shape: f32[2,8,32], index: 6, kind: output, shape index: {0}]   ;;  %s34761_s7 = inlined_call_operand.vmem [shape: f32[2,2,256], index: 7, kind: output, shape index: {1}]  }
   0x1   :  { %v26_v0 = vld [vmem:[%s34755_s1] sm:$0xff]  ;;  %v27_v1 = vld [vmem:[%s34755_s1 + $0x8] sm:$0xff]  ;;  %29613 = vmatprep.subr.bf16.mxu1 %v31354_v7  ;;  %v28_v8 = vld [vmem:[%s34755_s1 + $0x10] sm:$0xff] }
   0x2   :  { %v33_v2 = vld [vmem:[%s34754_s0] sm:$0xff]  ;;  %v47_v3 = vand.u32 4294901760, %v26_v0  ;;  %v50_v4 = vand.u32 4294901760, %v27_v1  ;;  %v34_v6 = vld [vmem:[%s34754_s0 + $0x8] sm:$0xff]  ;;  %v29_v9 = vld [vmem:[%s34755_s1 + $0x18] sm:$0xff]  ;;  %v557_v12 = vand.u32 4294901760, %v28_v8 }
   0x3   :  { %v41_v5 = vsel %vm39_vm0, %v33_v2, 0  ;;  %v44_v11 = vsel %vm39_vm0, %v34_v6, 0  ;;  %v560_v13 = vand.u32 4294901760, %v29_v9  ;;  %v30_v14 = vld [vmem:[%s34755_s1 + $0x20] sm:$0xff]  ;;  %v31_v19 = vld [vmem:[%s34755_s1 + $0x28] sm:$0xff] }
   0x4   :  { %v31436_v10 = vand.u32 4294901760, %v41_v5  ;;  %v31442_v15 = vpack.c.bf16 %v50_v4, %v47_v3  ;;  %v31444_v16 = vand.u32 4294901760, %v44_v11  ;;  %v31446_v17 = vsub.f32 %v26_v0, %v47_v3 }
   0x5   :  { %v31448_v18 = vsub.f32 %v27_v1, %v50_v4 }
   0x6   :  { %13 = vsyncpa [#allocation3], 0  ;;  %v31454_v20 = vsub.f32 %v41_v5, %v31436_v10  ;;  %v31456_v21 = vsub.f32 %v28_v8, %v557_v12  ;;  %v31458_v22 = vsub.f32 %v29_v9, %v560_v13  ;;  %29578 = vmatprep.subr.bf16.mxu0 %v31442_v15  ;;  %v31462_v23 = vsub.f32 %v44_v11, %v31444_v16  ;;  %v32_v5 = vld [vmem:[%s34755_s1 + $0x30] sm:$0x3]  ;;  %s31357_s1 = smov 64   ;;  %s31358_s18 = smov 96  }
   0x7   :  { %v136_v24 = vand.u32 4294901760, %v31446_v17  ;;  %v143_v25 = vand.u32 4294901760, %v31448_v18  ;;  %v563_v26 = vand.u32 4294901760, %v30_v14  ;;  %29580 = vmatpush3.bf16.msra.mxu0 %v31442_v15  ;;  %v566_v29 = vand.u32 4294901760, %v31_v19  ;;  %s31359_s0 = smov 120   ;;  %s31360_s15 = smov 88  }
   0x8   :  { %v115_v27 = vand.u32 4294901760, %v31454_v20  ;;  %v31470_v28 = vpack.c.bf16 %v31458_v22, %v31456_v21  ;;  %v125_v30 = vand.u32 4294901760, %v31462_v23  ;;  %vm31355_vm1 = vmmov 0   ;;  %s31362_s16 = smov 56   ;;  %s31363_s17 = smov 112  }
   0x9   :  { %v137_v31 = vsub.f32 %v31446_v17, %v136_v24  ;;  %v144_v32 = vsub.f32 %v31448_v18, %v143_v25  ;;  %v31475_v33 = vsub.f32 %v30_v14, %v563_v26  ;;  %v34762_v34 = vmov 0.0   ;;  %s31364_s19 = smov 80   ;;  %s31365_s20 = smov 48  }
   0xa   :  { %27237 = vmatprep.mubr.msk.f32.mxu1 %vm31355_vm1, %v34762_v34  ;;  %v116_v35 = vsub.f32 %v31454_v20, %v115_v27  ;;  %29615 = vmatpush3.bf16.msra.mxu1 %v31470_v28  ;;  %v31481_v36 = vsub.f32 %v31_v19, %v566_v29  ;;  %v126_v37 = vsub.f32 %v31462_v23, %v125_v30  ;;  %v638_v47 = vand.u32 4294901760, %v31456_v21  ;;  %s31366_s21 = smov 104   ;;  %s31367_s22 = smov 72  }
   0xb   :  { %v138_v38 = vand.u32 4294901760, %v137_v31  ;;  %v145_v39 = vand.u32 4294901760, %v144_v32  ;;  %29616 = vmatprep.subr.bf16.mxu1 %v31354_v7  ;;  %v31489_v44 = vpack.c.bf16 %v560_v13, %v557_v12  ;;  %v29585_v45 = vpack.c.bf16 %v31448_v18, %v31446_v17  ;;  %s31368_s23 = smov 40   ;;  %s31369_s24 = smov 8  }
   0xc   :  { %v117_v40 = vand.u32 4294901760, %v116_v35  ;;  %v31487_v41 = vpack.c.bf16 %v31481_v36, %v31475_v33  ;;  %v127_v42 = vand.u32 4294901760, %v126_v37  ;;  %v31497_v46 = vpack.c.bf16 %v566_v29, %v563_v26  ;;  %s31370_s25 = smov 16   ;;  %s31371_s11 = smov 24  }
   0xd   :  { %v29581_v43 = vpack.c.bf16 %v145_v39, %v138_v38  ;;  %v645_v48 = vand.u32 4294901760, %v31458_v22  ;;  %v652_v50 = vand.u32 4294901760, %v31475_v33  ;;  %v659_v51 = vand.u32 4294901760, %v31481_v36  ;;  %s31373_s12 = smov 32  }
   0xe   :  { %27169 = vmatprep.mubr.f32.mxu0 %v117_v40  ;;  %29618 = vmatpush3.bf16.msra.mxu1 %v31487_v41  ;;  %v29593_v53 = vpack.c.bf16 %v143_v25, %v136_v24  ;;  %v639_v54 = vsub.f32 %v31456_v21, %v638_v47  ;;  %v35_v0 = vlaneseq  ;;  %vm1098_vm2 = vcmask 1041409  }
   0xf   :  { %27170 = vmatmul.mubr.f32.vlgmr.msra.gmra.mrb[0].mxu0 %v127_v42  ;;  %29582 = vmatprep.subr.bf16.mxu0 %v29581_v43  ;;  %v31506_v49 = vpack.c.bf16 %v645_v48, %v638_v47  ;;  %v31516_v52 = vpack.c.bf16 %v659_v51, %v652_v50  ;;  %v646_v55 = vsub.f32 %v31458_v22, %v645_v48  ;;  %vm552_vm3 = vcmask 261120  }
  0x10   :  { %29584 = vmatpush3.bf16.msra.mxu0 %v29581_v43  ;;  %27176 = vmatprep.mubr.f32.mxu0 %v31436_v10  ;;  %v640_v56 = vand.u32 4294901760, %v639_v54  ;;  %v653_v58 = vsub.f32 %v31475_v33, %v652_v50  ;;  %v660_v59 = vsub.f32 %v31481_v36, %v659_v51  ;;  %v31574_v3 = vshrl.u32 %v35_v0, 7 }
  0x11   :  { %27238 = vmatmul.mubr.f32.vlgmr.msra.gmra.mrb[0].mxu1 %v34762_v34  ;;  %29619 = vmatprep.subr.bf16.mxu1 %v31354_v7  ;;  %v647_v57 = vand.u32 4294901760, %v646_v55  ;;  %vm4963_vm4 = vcmask 1040384   ;;  %vm4966_vm5 = vcmask 1041408   ;;  %vm4969_vm6 = vcmask 1042432  }
  0x12   :  { %29621 = vmatpush3.bf16.msra.mxu1 %v31489_v44  ;;  %29586 = vmatprep.subr.bf16.mxu0 %v29585_v45  ;;  %v654_v61 = vand.u32 4294901760, %v653_v58  ;;  %v661_v62 = vand.u32 4294901760, %v660_v59  ;;  %v31577_v4 = vsub.s32 0, %v31574_v3  ;;  %v31588_v12 = vsub.s32 1, %v31574_v3 }
  0x13   :  { %29622 = vmatprep.subr.bf16.mxu1 %v31354_v7  ;;  %27248 = vmatprep.mubr.msk.f32.mxu1 %vm31355_vm1, %v34762_v34  ;;  %v31555_v60 = vpack.c.bf16 %v647_v57, %v640_v56  ;;  %vm4972_vm7 = vcmask 1043456   ;;  %vm4975_vm8 = vcmask 1044480   ;;  %vm4978_vm9 = vcmask 1045504  }
  0x14   :  { %v31560_v63 = vpack.c.bf16 %v661_v62, %v654_v61  ;;  %v38_v6 = vrot.slane %v32_v5, %v31577_v4  ;;  %34807 = vst [vmem:[#allocation5_spill] sm:$0xff] %v31588_v12  ;;  %v31591_v13 = vrot.slane %v32_v5, %v31588_v12  ;;  %vm4981_vm10 = vcmask 1046528  }
  0x15   :  { %vm6103_vm11 = vcmask 64512   ;;  %vm7127_vm12 = vcmask 195584   ;;  %vm7130_vm13 = vcmask 326656   ;;  %vm7132_vm14 = vcmask 392192  }
  0x16   :  { %29624 = vmatpush3.bf16.msra.mxu1 %v31497_v46  ;;  %vm7134_vm15 = vcmask 457728  }
  0x17   :  { %27177 = vmatmul.mubr.f32.vlgmr.msra.gmra.mrb[0].mxu0 %v31444_v16  ;;  %29625 = vmatprep.subr.bf16.mxu1 %v31354_v7 }
  0x18   :  { %29588 = vmatpush3.bf16.msra.mxu0 %v29585_v45  ;;  %27183 = vmatprep.mubr.f32.mxu0 %v31454_v20 }
  0x19   :  { %27249 = vmatmul.mubr.f32.vlgmr.msra.gmra.mrb[0].mxu1 %v34762_v34  ;;  %29590 = vmatprep.subr.bf16.mxu0 %v31442_v15 }
  0x1a   :  { %29627 = vmatpush3.bf16.msra.mxu1 %v31506_v49  ;;  %27259 = vmatprep.mubr.msk.f32.mxu1 %vm31355_vm1, %v34762_v34 }
  0x1b   :  { %29628 = vmatprep.subr.bf16.mxu1 %v31354_v7 }
  0x1e   :  { %29630 = vmatpush3.bf16.msra.mxu1 %v31516_v52 }
  0x1f   :  { %27184 = vmatmul.mubr.f32.vlgmr.msra.gmra.mrb[0].mxu0 %v31462_v23  ;;  %29631 = vmatprep.subr.bf16.mxu1 %v31354_v7 }
  0x20   :  { %29592 = vmatpush3.bf16.msra.mxu0 %v31442_v15  ;;  %27190 = vmatprep.mubr.f32.mxu0 %v115_v27 }
  0x21   :  { %27260 = vmatmul.mubr.f32.vlgmr.msra.gmra.mrb[0].mxu1 %v34762_v34  ;;  %29594 = vmatprep.subr.bf16.mxu0 %v29593_v53 }
  0x22   :  { %29633 = vmatpush3.bf16.msra.mxu1 %v31489_v44  ;;  %27270 = vmatprep.mubr.msk.f32.mxu1 %vm31355_vm1, %v34762_v34 }
  0x23   :  { %29634 = vmatprep.subr.bf16.mxu1 %v31354_v7 }
  0x26   :  { %29636 = vmatpush3.bf16.msra.mxu1 %v31497_v46 }
  0x27   :  { %27191 = vmatmul.mubr.f32.vlgmr.msra.gmra.mrb[0].mxu0 %v125_v30  ;;  %29673 = vmatprep.subr.bf16.mxu1 %v31354_v7 }
  0x28   :  { %29596 = vmatpush3.bf16.msra.mxu0 %v29593_v53  ;;  %27197 = vmatprep.mubr.f32.mxu0 %v31436_v10 }
  0x29   :  { %27271 = vmatmul.mubr.f32.vlgmr.msra.gmra.mrb[0].mxu1 %v34762_v34  ;;  %29598 = vmatprep.subr.bf16.mxu0 %v31442_v15 }
  0x2a   :  { %29675 = vmatpush3.bf16.msra.mxu1 %v31489_v44  ;;  %27347 = vmatprep.mubr.msk.f32.mxu1 %vm31355_vm1, %v34762_v34 }
  0x2b   :  { %29676 = vmatprep.subr.bf16.mxu1 %v31354_v7 }
  0x2e   :  { %29678 = vmatpush3.bf16.msra.mxu1 %v31497_v46 }
  0x2f   :  { %27198 = vmatmul.mubr.f32.vlgmr.msra.gmra.mrb[0].mxu0 %v31444_v16  ;;  %29679 = vmatprep.subr.bf16.mxu1 %v31354_v7 }
  0x30   :  { %29600 = vmatpush3.bf16.msra.mxu0 %v31442_v15  ;;  %27204 = vmatprep.mubr.f32.mxu0 %v31436_v10 }
  0x31   :  { %29601 = vmatprep.subr.bf16.mxu0 %v31354_v7 }
  0x37   :  { %27205 = vmatmul.mubr.f32.vlgmr.msra.gmra.mrb[0].mxu0 %v31444_v16 }
  0x38   :  { %29603 = vmatpush3.bf16.msra.mxu0 %v31489_v44  ;;  %27215 = vmatprep.mubr.msk.f32.mxu0 %vm31355_vm1, %v34762_v34 }
  0x39   :  { %29604 = vmatprep.subr.bf16.mxu0 %v31354_v7 }
  0x3c   :  { %29606 = vmatpush3.bf16.msra.mxu0 %v31497_v46 }
  0x3d   :  { %29607 = vmatprep.subr.bf16.mxu0 %v31354_v7 }
  0x3f   :  { %27216 = vmatmul.mubr.f32.vlgmr.msra.gmra.mrb[2].mxu0 %v34762_v34 }
  0x40   :  { %29609 = vmatpush3.bf16.msra.mxu0 %v31555_v60  ;;  %27226 = vmatprep.mubr.msk.f32.mxu0 %vm31355_vm1, %v34762_v34 }
  0x41   :  { %29610 = vmatprep.subr.bf16.mxu0 %v31354_v7 }
  0x44   :  { %29612 = vmatpush3.bf16.msra.mxu0 %v31560_v63 }
  0x45   :  { %29637 = vmatprep.subr.bf16.mxu0 %v31354_v7 }
  0x47   :  { %27227 = vmatmul.mubr.f32.vlgmr.msra.gmra.mrb[2].mxu0 %v34762_v34 }
  0x48   :  { %29639 = vmatpush3.bf16.msra.mxu0 %v31489_v44  ;;  %27281 = vmatprep.mubr.msk.f32.mxu0 %vm31355_vm1, %v34762_v34 }
  0x49   :  { %29640 = vmatprep.subr.bf16.mxu0 %v31354_v7 }
  0x4c   :  { %29642 = vmatpush3.bf16.msra.mxu0 %v31497_v46 }
  0x4d   :  { %29643 = vmatprep.subr.bf16.mxu0 %v31354_v7 }
  0xfc   :  { %v1037_v1 = vpop.f32.mrb[0].mxu1 }
  0xfd   :  { %v27272_v2 = vpop.f32.mrb[1].mxu1 }
 0x10a   :  { %v27206_v8 = vpop.f32.mrb[0].mxu0 }
 0x10b   :  { %v31583_v9 = vadd.f32 %v27206_v8, %v38_v6  ;;  %v538_v10 = vpop.f32.mrb[1].mxu0 }
 0x10c   :  { %v31585_v11 = vadd.f32 %v538_v10, %v38_v6 }
 0x11a   :  { %v722_v14 = vpop.f32.mrb[2].mxu0 }
 0x11b   :  { %v30611_v15 = vadd.f32 %v722_v14, %v31591_v13  ;;  %v27228_v16 = vpop.f32.mrb[3].mxu0 }
 0x11d   :  { %v30612_v17 = vadd.f32 %v30611_v15, %v1037_v1 }
 0x11f   :  { %v1042_v18 = vrot.slane %v30612_v17, 1  ;;  %v1045_v20 = vadd.f32 %v30612_v17, %v31585_v11 }
 0x121   :  { %1061 = vrot.lane.b32.xlu0 %v1042_v18, %s31357_s1  ;;  %v1046_v19 = vadd.f32 %v31583_v9, %v1042_v18  ;;  %v25994_v22 = vmul.f32 -1.442695, %v1045_v20 }
 0x123   :  { %v25995_v21 = vmul.f32 -1.442695, %v1046_v19 }
 0x125   :  { %1059 = vrot.lane.b32.xlu0 %v30612_v17, %s31357_s1  ;;  %31153 = vpow2.f32 %v25995_v21 }
 0x126   :  { %31155 = vpow2.f32 %v25994_v22 }
 0x12f   :  { %v31154_v23 = vpop.eup %31153 }
 0x130   :  { %v1054_v24 = vadd.f32 1.0, %v31154_v23  ;;  %v31156_v25 = vpop.eup %31155 }
 0x131   :  { %v1053_v26 = vadd.f32 1.0, %v31156_v25 }
 0x132   :  { %31157 = vrcp.f32 %v1054_v24 }
 0x133   :  { %31159 = vrcp.f32 %v1053_v26 }
 0x13c   :  { %v31158_v27 = vpop.eup %31157 }
 0x13d   :  { %v31160_v31 = vpop.eup %31159  ;;  %v1080_v42 = vsub.f32 1.0, %v31158_v27  ;;  %v1092_v45 = vmul.f32 0.0, %v31158_v27 }
 0x13e   :  { %v1079_v50 = vsub.f32 1.0, %v31160_v31  ;;  %v1091_v53 = vmul.f32 0.0, %v31160_v31 }
 0x193   :  { %v1062_v29 = vpop.permute.xlu0 %1061 }
 0x194   :  { %v1066_v30 = vmul.f32 %v31158_v27, %v1062_v29 }
 0x196   :  { %1071 = vrot.lane.b32.xlu1 %v1066_v30, %s31357_s1 }
 0x197   :  { %v1060_v32 = vpop.permute.xlu0 %1059 }
 0x198   :  { %v1065_v33 = vmul.f32 %v31160_v31, %v1060_v32 }
 0x19a   :  { %1069 = vrot.lane.b32.xlu1 %v1065_v33, %s31357_s1 }
 0x208   :  { %v1072_v35 = vpop.permute.xlu1 %1071 }
 0x209   :  { %v1076_v36 = vadd.f32 %v31583_v9, %v1072_v35 }
 0x20b   :  { %31161 = vtanh.f32 %v1076_v36 }
 0x20c   :  { %v1070_v37 = vpop.permute.xlu1 %1069 }
 0x20d   :  { %v1075_v38 = vadd.f32 %v31585_v11, %v1070_v37 }
 0x20f   :  { %31163 = vtanh.f32 %v1075_v38 }
 0x215   :  { %v31162_v39 = vpop.eup %31161 }
 0x216   :  { %1085 = vrot.lane.b32.xlu0 %v31162_v39, %s31358_s18 }
 0x219   :  { %v31164_v40 = vpop.eup %31163 }
 0x21a   :  { %1083 = vrot.lane.b32.xlu1 %v31164_v40, %s31358_s18 }
 0x288   :  { %v1086_v43 = vpop.permute.xlu0 %1085 }
 0x289   :  { %v1090_v47 = vmul.f32 %v1086_v43, %v1080_v42 }
 0x28b   :  { %v31604_v48 = vadd.f32 %v1092_v45, %v1090_v47 }
 0x28c   :  { %v1084_v51 = vpop.permute.xlu1 %1083 }
 0x28d   :  { %v1089_v54 = vmul.f32 %v1084_v51, %v1079_v50  ;;  %v1097_v55 = vrot.slane %v31604_v48, 7 }
 0x28f   :  { %v31607_v56 = vadd.f32 %v1091_v53, %v1089_v54 }
 0x291   :  { %v1099_v57 = vsel %vm1098_vm2, %v1097_v55, %v31607_v56  ;;  %v1639_v39 = vrot.slane %v31607_v56, 7 }
 0x292   :  { %1100 = vrot.lane.b32.xlu0 %v1099_v57, %s31358_s18 }
 0x304   :  { %v1101_v58 = vpop.permute.xlu0 %1100 }
 0x305   :  { %v1102_v59 = vsel %vm552_vm3, %v1101_v58, 0 }
 0x306   :  { %v1173_v61 = vand.u32 4294901760, %v1102_v59 }
 0x308   :  { %v1174_v62 = vsub.f32 %v1102_v59, %v1173_v61 }
 0x30a   :  { %v1175_v0 = vand.u32 4294901760, %v1174_v62 }
 0x30c   :  { %v1176_v1 = vsub.f32 %v1174_v62, %v1175_v0 }
 0x30e   :  { %v1177_v2 = vand.u32 4294901760, %v1176_v1 }
 0x310   :  { %27282 = vmatmul.mubr.f32.vlgmr.msra.gmra.mrb[4].mxu0 %v1177_v2 }
 0x311   :  { %29645 = vmatpush3.bf16.msra.mxu0 %v31555_v60  ;;  %27292 = vmatprep.mubr.msk.f32.mxu0 %vm31355_vm1, %v34762_v34 }
 0x312   :  { %29646 = vmatprep.subr.bf16.mxu0 %v31354_v7 }
 0x315   :  { %29648 = vmatpush3.bf16.msra.mxu0 %v31560_v63 }
 0x316   :  { %29649 = vmatprep.subr.bf16.mxu0 %v31354_v7 }
 0x318   :  { %27293 = vmatmul.mubr.f32.vlgmr.msra.gmra.mrb[4].mxu0 %v1173_v61 }
 0x319   :  { %29651 = vmatpush3.bf16.msra.mxu0 %v31470_v28  ;;  %27303 = vmatprep.mubr.msk.f32.mxu0 %vm31355_vm1, %v34762_v34 }
 0x31a   :  { %29652 = vmatprep.subr.bf16.mxu0 %v31354_v7 }
 0x31d   :  { %29654 = vmatpush3.bf16.msra.mxu0 %v31487_v41 }
 0x31e   :  { %29655 = vmatprep.subr.bf16.mxu0 %v31354_v7 }
 0x320   :  { %27304 = vmatmul.mubr.f32.vlgmr.msra.gmra.mrb[4].mxu0 %v1174_v62 }
 0x321   :  { %29657 = vmatpush3.bf16.msra.mxu0 %v31489_v44  ;;  %27314 = vmatprep.mubr.msk.f32.mxu0 %vm31355_vm1, %v34762_v34 }
 0x322   :  { %29658 = vmatprep.subr.bf16.mxu0 %v31354_v7 }
 0x325   :  { %29660 = vmatpush3.bf16.msra.mxu0 %v31497_v46 }
 0x326   :  { %29661 = vmatprep.subr.bf16.mxu0 %v31354_v7 }
 0x328   :  { %27315 = vmatmul.mubr.f32.vlgmr.msra.gmra.mrb[4].mxu0 %v1175_v0 }
 0x329   :  { %29663 = vmatpush3.bf16.msra.mxu0 %v31506_v49  ;;  %27325 = vmatprep.mubr.msk.f32.mxu0 %vm31355_vm1, %v34762_v34 }
 0x32a   :  { %29664 = vmatprep.subr.bf16.mxu0 %v31354_v7 }
 0x32d   :  { %29666 = vmatpush3.bf16.msra.mxu0 %v31516_v52 }
 0x32e   :  { %29667 = vmatprep.subr.bf16.mxu0 %v31354_v7 }
 0x330   :  { %27326 = vmatmul.mubr.f32.vlgmr.msra.gmra.mrb[4].mxu0 %v1173_v61 }
 0x331   :  { %29669 = vmatpush3.bf16.msra.mxu0 %v31489_v44  ;;  %27336 = vmatprep.mubr.msk.f32.mxu0 %vm31355_vm1, %v34762_v34 }
 0x332   :  { %29670 = vmatprep.subr.bf16.mxu0 %v31354_v7 }
 0x335   :  { %29672 = vmatpush3.bf16.msra.mxu0 %v31497_v46 }
 0x336   :  { %29709 = vmatprep.subr.bf16.mxu0 %v31354_v7 }
 0x338   :  { %27337 = vmatmul.mubr.f32.vlgmr.msra.gmra.mrb[4].mxu0 %v1173_v61 }
 0x339   :  { %29711 = vmatpush3.bf16.msra.mxu0 %v31489_v44  ;;  %27413 = vmatprep.mubr.msk.f32.mxu0 %vm31355_vm1, %v34762_v34 }
 0x33a   :  { %29712 = vmatprep.subr.bf16.mxu0 %v31354_v7 }
 0x33d   :  { %29714 = vmatpush3.bf16.msra.mxu0 %v31497_v46 }
 0x33e   :  { %29715 = vmatprep.subr.bf16.mxu0 %v31354_v7 }
 0x40b   :  { %v1585_v5 = vpop.f32.mrb[4].mxu0 }
 0x40c   :  { %v30613_v6 = vadd.f32 %v1585_v5, %v31591_v13  ;;  %v27338_v8 = vpop.f32.mrb[5].mxu0 }
 0x40e   :  { %1609 = vrot.lane.b32.xlu0 %v30613_v6, %s31357_s1  ;;  %v1590_v10 = vrot.slane %v30613_v6, 7  ;;  %v1594_v14 = vadd.f32 %v30613_v6, %v31583_v9 }
 0x410   :  { %1607 = vrot.lane.b32.xlu1 %v1590_v10, %s31357_s1  ;;  %v1593_v15 = vadd.f32 %v31585_v11, %v1590_v10  ;;  %v25997_v16 = vmul.f32 -1.442695, %v1594_v14 }
 0x412   :  { %v25996_v17 = vmul.f32 -1.442695, %v1593_v15  ;;  %31165 = vpow2.f32 %v25997_v16 }
 0x414   :  { %31167 = vpow2.f32 %v25996_v17 }
 0x41c   :  { %v31166_v18 = vpop.eup %31165 }
 0x41d   :  { %v1602_v20 = vadd.f32 1.0, %v31166_v18 }
 0x41e   :  { %v31168_v19 = vpop.eup %31167 }
 0x41f   :  { %v1601_v21 = vadd.f32 1.0, %v31168_v19  ;;  %31169 = vrcp.f32 %v1602_v20 }
 0x421   :  { %31171 = vrcp.f32 %v1601_v21 }
 0x429   :  { %v31170_v22 = vpop.eup %31169 }
 0x42a   :  { %v1628_v37 = vsub.f32 1.0, %v31170_v22  ;;  %v1643_v47 = vmul.f32 %v31170_v22, %v1097_v55 }
 0x42b   :  { %v31172_v25 = vpop.eup %31171 }
 0x42c   :  { %v1627_v38 = vsub.f32 1.0, %v31172_v25  ;;  %v1642_v43 = vmul.f32 %v31172_v25, %v1639_v39 }
 0x480   :  { %v1610_v23 = vpop.permute.xlu0 %1609 }
 0x481   :  { %v1614_v24 = vmul.f32 %v31170_v22, %v1610_v23 }
 0x482   :  { %v1608_v26 = vpop.permute.xlu1 %1607 }
 0x483   :  { %v1613_v27 = vmul.f32 %v31172_v25, %v1608_v26  ;;  %1619 = vrot.lane.b32.xlu0 %v1614_v24, %s31357_s1 }
 0x485   :  { %1617 = vrot.lane.b32.xlu1 %v1613_v27, %s31357_s1 }
 0x4f5   :  { %v1620_v29 = vpop.permute.xlu0 %1619 }
 0x4f6   :  { %v1624_v30 = vadd.f32 %v31583_v9, %v1620_v29 }
 0x4f7   :  { %v1618_v31 = vpop.permute.xlu1 %1617 }
 0x4f8   :  { %31173 = vtanh.f32 %v1624_v30  ;;  %v1623_v32 = vadd.f32 %v31585_v11, %v1618_v31 }
 0x4fa   :  { %31175 = vtanh.f32 %v1623_v32 }
 0x502   :  { %v31174_v33 = vpop.eup %31173 }
 0x503   :  { %1633 = vrot.lane.b32.xlu0 %v31174_v33, %s31358_s18 }
 0x504   :  { %v31176_v35 = vpop.eup %31175 }
 0x505   :  { %1631 = vrot.lane.b32.xlu1 %v31176_v35, %s31358_s18 }
 0x575   :  { %v1634_v36 = vpop.permute.xlu0 %1633 }
 0x576   :  { %v1638_v42 = vmul.f32 %v1634_v36, %v1628_v37 }
 0x577   :  { %v1632_v40 = vpop.permute.xlu1 %1631 }
 0x578   :  { %v1637_v45 = vmul.f32 %v1632_v40, %v1627_v38  ;;  %v31667_v51 = vadd.f32 %v1643_v47, %v1638_v42 }
 0x57a   :  { %v31665_v50 = vadd.f32 %v1642_v43, %v1637_v45  ;;  %v2191_v36 = vrot.slane %v31667_v51, 7 }
 0x57c   :  { %v1648_v53 = vrot.slane %v31665_v50, 1  ;;  %v2190_v39 = vrot.slane %v31665_v50, 7 }
 0x57e   :  { %v1649_v54 = vsel %vm1098_vm2, %v31667_v51, %v1648_v53 }
 0x57f   :  { %1650 = vrot.lane.b32.xlu1 %v1649_v54, %s31358_s18  ;;  %v4965_v54 = vsel %vm4963_vm4, %v31604_v48, %v31667_v51 }
 0x5f1   :  { %v1651_v57 = vpop.permute.xlu1 %1650 }
 0x5f2   :  { %v1652_v58 = vsel %vm552_vm3, %v1651_v57, 0 }
 0x5f3   :  { %v1723_v59 = vand.u32 4294901760, %v1652_v58 }
 0x5f5   :  { %v1724_v61 = vsub.f32 %v1652_v58, %v1723_v59  ;;  %v4964_v58 = vsel %vm4963_vm4, %v31607_v56, %v31665_v50 }
 0x5f7   :  { %v1725_v62 = vand.u32 4294901760, %v1724_v61 }
 0x5f9   :  { %v1726_v0 = vsub.f32 %v1724_v61, %v1725_v62 }
 0x5fb   :  { %v1727_v1 = vand.u32 4294901760, %v1726_v0 }
 0x5fd   :  { %27348 = vmatmul.mubr.f32.vlgmr.msra.gmra.mrb[2].mxu1 %v1727_v1 }
 0x5fe   :  { %29681 = vmatpush3.bf16.msra.mxu1 %v31555_v60  ;;  %27358 = vmatprep.mubr.msk.f32.mxu1 %vm31355_vm1, %v34762_v34 }
 0x5ff   :  { %29682 = vmatprep.subr.bf16.mxu1 %v31354_v7 }
 0x602   :  { %29684 = vmatpush3.bf16.msra.mxu1 %v31560_v63 }
 0x603   :  { %29685 = vmatprep.subr.bf16.mxu1 %v31354_v7 }
 0x605   :  { %27359 = vmatmul.mubr.f32.vlgmr.msra.gmra.mrb[2].mxu1 %v1723_v59 }
 0x606   :  { %29687 = vmatpush3.bf16.msra.mxu1 %v31470_v28  ;;  %27369 = vmatprep.mubr.msk.f32.mxu1 %vm31355_vm1, %v34762_v34 }
 0x607   :  { %29688 = vmatprep.subr.bf16.mxu1 %v31354_v7 }
 0x60a   :  { %29690 = vmatpush3.bf16.msra.mxu1 %v31487_v41 }
 0x60b   :  { %29691 = vmatprep.subr.bf16.mxu1 %v31354_v7 }
 0x60d   :  { %27370 = vmatmul.mubr.f32.vlgmr.msra.gmra.mrb[2].mxu1 %v1724_v61 }
 0x60e   :  { %29693 = vmatpush3.bf16.msra.mxu1 %v31489_v44  ;;  %27380 = vmatprep.mubr.msk.f32.mxu1 %vm31355_vm1, %v34762_v34 }
 0x60f   :  { %29694 = vmatprep.subr.bf16.mxu1 %v31354_v7 }
 0x612   :  { %29696 = vmatpush3.bf16.msra.mxu1 %v31497_v46 }
 0x613   :  { %29697 = vmatprep.subr.bf16.mxu1 %v31354_v7 }
 0x615   :  { %27381 = vmatmul.mubr.f32.vlgmr.msra.gmra.mrb[2].mxu1 %v1725_v62 }
 0x616   :  { %29699 = vmatpush3.bf16.msra.mxu1 %v31506_v49  ;;  %27391 = vmatprep.mubr.msk.f32.mxu1 %vm31355_vm1, %v34762_v34 }
 0x617   :  { %29700 = vmatprep.subr.bf16.mxu1 %v31354_v7 }
 0x61a   :  { %29702 = vmatpush3.bf16.msra.mxu1 %v31516_v52 }
 0x61b   :  { %29703 = vmatprep.subr.bf16.mxu1 %v31354_v7 }
 0x61d   :  { %27392 = vmatmul.mubr.f32.vlgmr.msra.gmra.mrb[2].mxu1 %v1723_v59 }
 0x61e   :  { %29705 = vmatpush3.bf16.msra.mxu1 %v31489_v44  ;;  %27402 = vmatprep.mubr.msk.f32.mxu1 %vm31355_vm1, %v34762_v34 }
 0x61f   :  { %29706 = vmatprep.subr.bf16.mxu1 %v31354_v7 }
 0x622   :  { %29708 = vmatpush3.bf16.msra.mxu1 %v31497_v46 }
 0x623   :  { %29745 = vmatprep.subr.bf16.mxu1 %v31354_v7 }
 0x625   :  { %27403 = vmatmul.mubr.f32.vlgmr.msra.gmra.mrb[2].mxu1 %v1723_v59 }
 0x626   :  { %29747 = vmatpush3.bf16.msra.mxu1 %v31489_v44  ;;  %27479 = vmatprep.mubr.msk.f32.mxu1 %vm31355_vm1, %v34762_v34 }
 0x627   :  { %29748 = vmatprep.subr.bf16.mxu1 %v31354_v7 }
 0x62a   :  { %29750 = vmatpush3.bf16.msra.mxu1 %v31497_v46 }
 0x62b   :  { %29751 = vmatprep.subr.bf16.mxu1 %v31354_v7 }
 0x6f8   :  { %v2135_v55 = vpop.f32.mrb[2].mxu1 }
 0x6f9   :  { %v30614_v2 = vadd.f32 %v2135_v55, %v31591_v13  ;;  %v27404_v5 = vpop.f32.mrb[3].mxu1 }
 0x6fb   :  { %v2140_v6 = vrot.slane %v30614_v2, 6  ;;  %v2141_v8 = vrot.slane %v30614_v2, 7 }
 0x6fd   :  { %2160 = vrot.lane.b32.xlu1 %v2141_v8, %s31357_s1  ;;  %2158 = vrot.lane.b32.xlu0 %v2140_v6, %s31357_s1  ;;  %v2144_v10 = vadd.f32 %v31585_v11, %v2140_v6  ;;  %v2145_v14 = vadd.f32 %v31583_v9, %v2141_v8 }
 0x6ff   :  { %v25998_v15 = vmul.f32 -1.442695, %v2144_v10  ;;  %v25999_v16 = vmul.f32 -1.442695, %v2145_v14 }
 0x701   :  { %31177 = vpow2.f32 %v25998_v15 }
 0x702   :  { %31179 = vpow2.f32 %v25999_v16 }
 0x70b   :  { %v31178_v17 = vpop.eup %31177 }
 0x70c   :  { %v31180_v18 = vpop.eup %31179  ;;  %v2152_v19 = vadd.f32 1.0, %v31178_v17 }
 0x70d   :  { %v2153_v20 = vadd.f32 1.0, %v31180_v18 }
 0x70e   :  { %31181 = vrcp.f32 %v2152_v19 }
 0x70f   :  { %31183 = vrcp.f32 %v2153_v20 }
 0x718   :  { %v31182_v21 = vpop.eup %31181 }
 0x719   :  { %v31184_v22 = vpop.eup %31183  ;;  %v2178_v38 = vsub.f32 1.0, %v31182_v21  ;;  %v2194_v45 = vmul.f32 %v31182_v21, %v2190_v39 }
 0x71a   :  { %v2179_v35 = vsub.f32 1.0, %v31184_v22  ;;  %v2195_v40 = vmul.f32 %v31184_v22, %v2191_v36 }
 0x76f   :  { %v2161_v23 = vpop.permute.xlu1 %2160  ;;  %v2159_v24 = vpop.permute.xlu0 %2158 }
 0x770   :  { %v2165_v25 = vmul.f32 %v31184_v22, %v2161_v23  ;;  %v2164_v26 = vmul.f32 %v31182_v21, %v2159_v24 }
 0x772   :  { %2170 = vrot.lane.b32.xlu1 %v2165_v25, %s31357_s1  ;;  %2168 = vrot.lane.b32.xlu0 %v2164_v26, %s31357_s1 }
 0x7e4   :  { %v2171_v27 = vpop.permute.xlu1 %2170  ;;  %v2169_v29 = vpop.permute.xlu0 %2168 }
 0x7e5   :  { %v2175_v30 = vadd.f32 %v31583_v9, %v2171_v27  ;;  %v2174_v31 = vadd.f32 %v31585_v11, %v2169_v29 }
 0x7e7   :  { %31185 = vtanh.f32 %v2175_v30 }
 0x7e8   :  { %31187 = vtanh.f32 %v2174_v31 }
 0x7f1   :  { %v31186_v32 = vpop.eup %31185 }
 0x7f2   :  { %v31188_v33 = vpop.eup %31187  ;;  %2184 = vrot.lane.b32.xlu1 %v31186_v32, %s31358_s18 }
 0x7f3   :  { %2182 = vrot.lane.b32.xlu0 %v31188_v33, %s31358_s18 }
 0x864   :  { %v2185_v37 = vpop.permute.xlu1 %2184 }
 0x865   :  { %v2189_v42 = vmul.f32 %v2185_v37, %v2179_v35  ;;  %v2183_v43 = vpop.permute.xlu0 %2182 }
 0x866   :  { %v2188_v47 = vmul.f32 %v2183_v43, %v2178_v38 }
 0x867   :  { %v31723_v53 = vadd.f32 %v2195_v40, %v2189_v42 }
 0x868   :  { %v31727_v57 = vadd.f32 %v2194_v45, %v2188_v47 }
 0x869   :  { %v31732_v59 = vsel %vm4966_vm5, %v4965_v54, %v31723_v53  ;;  %v2201_v61 = vrot.slane %v31723_v53, 1  ;;  %v2744_v39 = vrot.slane %v31723_v53, 7 }
 0x86a   :  { %v31736_v62 = vsel %vm4966_vm5, %v4964_v58, %v31727_v57  ;;  %v2200_v0 = vrot.slane %v31727_v57, 2  ;;  %v2743_v43 = vrot.slane %v31727_v57, 7 }
 0x86c   :  { %v2202_v1 = vsel %vm1098_vm2, %v2201_v61, %v2200_v0 }
 0x86d   :  { %2203 = vrot.lane.b32.xlu0 %v2202_v1, %s31358_s18 }
 0x8df   :  { %v2204_v48 = vpop.permute.xlu0 %2203 }
 0x8e0   :  { %v2205_v51 = vsel %vm552_vm3, %v2204_v48, 0 }
 0x8e1   :  { %v2276_v55 = vand.u32 4294901760, %v2205_v51 }
 0x8e3   :  { %v2277_v2 = vsub.f32 %v2205_v51, %v2276_v55 }
 0x8e5   :  { %v2278_v56 = vand.u32 4294901760, %v2277_v2 }
 0x8e7   :  { %v2279_v50 = vsub.f32 %v2277_v2, %v2278_v56 }
 0x8e9   :  { %v2280_v5 = vand.u32 4294901760, %v2279_v50 }
 0x8eb   :  { %27414 = vmatmul.mubr.f32.vlgmr.msra.gmra.mrb[6].mxu0 %v2280_v5 }
 0x8ec   :  { %29717 = vmatpush3.bf16.msra.mxu0 %v31555_v60  ;;  %27424 = vmatprep.mubr.msk.f32.mxu0 %vm31355_vm1, %v34762_v34 }
 0x8ed   :  { %29718 = vmatprep.subr.bf16.mxu0 %v31354_v7 }
 0x8f0   :  { %29720 = vmatpush3.bf16.msra.mxu0 %v31560_v63 }
 0x8f1   :  { %29721 = vmatprep.subr.bf16.mxu0 %v31354_v7 }
 0x8f3   :  { %27425 = vmatmul.mubr.f32.vlgmr.msra.gmra.mrb[6].mxu0 %v2276_v55 }
 0x8f4   :  { %29723 = vmatpush3.bf16.msra.mxu0 %v31470_v28  ;;  %27435 = vmatprep.mubr.msk.f32.mxu0 %vm31355_vm1, %v34762_v34 }
 0x8f5   :  { %29724 = vmatprep.subr.bf16.mxu0 %v31354_v7 }
 0x8f8   :  { %29726 = vmatpush3.bf16.msra.mxu0 %v31487_v41 }
 0x8f9   :  { %29727 = vmatprep.subr.bf16.mxu0 %v31354_v7 }
 0x8fb   :  { %27436 = vmatmul.mubr.f32.vlgmr.msra.gmra.mrb[6].mxu0 %v2277_v2 }
 0x8fc   :  { %29729 = vmatpush3.bf16.msra.mxu0 %v31489_v44  ;;  %27446 = vmatprep.mubr.msk.f32.mxu0 %vm31355_vm1, %v34762_v34 }
 0x8fd   :  { %29730 = vmatprep.subr.bf16.mxu0 %v31354_v7 }
 0x900   :  { %29732 = vmatpush3.bf16.msra.mxu0 %v31497_v46 }
 0x901   :  { %29733 = vmatprep.subr.bf16.mxu0 %v31354_v7 }
 0x903   :  { %27447 = vmatmul.mubr.f32.vlgmr.msra.gmra.mrb[6].mxu0 %v2278_v56 }
 0x904   :  { %29735 = vmatpush3.bf16.msra.mxu0 %v31506_v49  ;;  %27457 = vmatprep.mubr.msk.f32.mxu0 %vm31355_vm1, %v34762_v34 }
 0x905   :  { %29736 = vmatprep.subr.bf16.mxu0 %v31354_v7 }
 0x908   :  { %29738 = vmatpush3.bf16.msra.mxu0 %v31516_v52 }
 0x909   :  { %29739 = vmatprep.subr.bf16.mxu0 %v31354_v7 }
 0x90b   :  { %27458 = vmatmul.mubr.f32.vlgmr.msra.gmra.mrb[6].mxu0 %v2276_v55 }
 0x90c   :  { %29741 = vmatpush3.bf16.msra.mxu0 %v31489_v44  ;;  %27468 = vmatprep.mubr.msk.f32.mxu0 %vm31355_vm1, %v34762_v34 }
 0x90d   :  { %29742 = vmatprep.subr.bf16.mxu0 %v31354_v7 }
 0x910   :  { %29744 = vmatpush3.bf16.msra.mxu0 %v31497_v46 }
 0x911   :  { %29781 = vmatprep.subr.bf16.mxu0 %v31354_v7 }
 0x913   :  { %27469 = vmatmul.mubr.f32.vlgmr.msra.gmra.mrb[6].mxu0 %v2276_v55 }
 0x914   :  { %29783 = vmatpush3.bf16.msra.mxu0 %v31489_v44  ;;  %27545 = vmatprep.mubr.msk.f32.mxu0 %vm31355_vm1, %v34762_v34 }
 0x915   :  { %29784 = vmatprep.subr.bf16.mxu0 %v31354_v7 }
 0x918   :  { %29786 = vmatpush3.bf16.msra.mxu0 %v31497_v46 }
 0x919   :  { %29787 = vmatprep.subr.bf16.mxu0 %v31354_v7 }
 0x9e6   :  { %v2688_v6 = vpop.f32.mrb[6].mxu0 }
 0x9e7   :  { %v30615_v8 = vadd.f32 %v2688_v6, %v31591_v13  ;;  %v27470_v10 = vpop.f32.mrb[7].mxu0 }
 0x9e9   :  { %v2693_v14 = vrot.slane %v30615_v8, 5  ;;  %v2694_v15 = vrot.slane %v30615_v8, 6 }
 0x9eb   :  { %2713 = vrot.lane.b32.xlu0 %v2694_v15, %s31357_s1  ;;  %2711 = vrot.lane.b32.xlu1 %v2693_v14, %s31357_s1  ;;  %v2697_v16 = vadd.f32 %v31585_v11, %v2693_v14  ;;  %v2698_v17 = vadd.f32 %v31583_v9, %v2694_v15 }
 0x9ed   :  { %v26000_v18 = vmul.f32 -1.442695, %v2697_v16  ;;  %v26001_v19 = vmul.f32 -1.442695, %v2698_v17 }
 0x9ef   :  { %31189 = vpow2.f32 %v26000_v18 }
 0x9f0   :  { %31191 = vpow2.f32 %v26001_v19 }
 0x9f9   :  { %v31190_v20 = vpop.eup %31189 }
 0x9fa   :  { %v31192_v21 = vpop.eup %31191  ;;  %v2705_v22 = vadd.f32 1.0, %v31190_v20 }
 0x9fb   :  { %v2706_v23 = vadd.f32 1.0, %v31192_v21 }
 0x9fc   :  { %31193 = vrcp.f32 %v2705_v22 }
 0x9fd   :  { %31195 = vrcp.f32 %v2706_v23 }
 0xa06   :  { %v31194_v24 = vpop.eup %31193 }
 0xa07   :  { %v31196_v25 = vpop.eup %31195  ;;  %v2731_v42 = vsub.f32 1.0, %v31194_v24  ;;  %v2747_v58 = vmul.f32 %v31194_v24, %v2743_v43 }
 0xa08   :  { %v2732_v38 = vsub.f32 1.0, %v31196_v25  ;;  %v2748_v45 = vmul.f32 %v31196_v25, %v2744_v39 }
 0xa5d   :  { %v2714_v26 = vpop.permute.xlu0 %2713  ;;  %v2712_v27 = vpop.permute.xlu1 %2711 }
 0xa5e   :  { %v2718_v29 = vmul.f32 %v31196_v25, %v2714_v26  ;;  %v2717_v30 = vmul.f32 %v31194_v24, %v2712_v27 }
 0xa60   :  { %2723 = vrot.lane.b32.xlu0 %v2718_v29, %s31357_s1  ;;  %2721 = vrot.lane.b32.xlu1 %v2717_v30, %s31357_s1 }
 0xad2   :  { %v2724_v31 = vpop.permute.xlu0 %2723  ;;  %v2722_v32 = vpop.permute.xlu1 %2721 }
 0xad3   :  { %v2728_v33 = vadd.f32 %v31583_v9, %v2724_v31  ;;  %v2727_v35 = vadd.f32 %v31585_v11, %v2722_v32 }
 0xad5   :  { %31197 = vtanh.f32 %v2728_v33 }
 0xad6   :  { %31199 = vtanh.f32 %v2727_v35 }
 0xadf   :  { %v31198_v36 = vpop.eup %31197 }
 0xae0   :  { %v31200_v37 = vpop.eup %31199  ;;  %2737 = vrot.lane.b32.xlu0 %v31198_v36, %s31358_s18 }
 0xae1   :  { %2735 = vrot.lane.b32.xlu1 %v31200_v37, %s31358_s18 }
 0xb52   :  { %v2738_v40 = vpop.permute.xlu0 %2737 }
 0xb53   :  { %v2742_v47 = vmul.f32 %v2738_v40, %v2732_v38  ;;  %v2736_v54 = vpop.permute.xlu1 %2735 }
 0xb54   :  { %v2741_v61 = vmul.f32 %v2736_v54, %v2731_v42 }
 0xb55   :  { %v31791_v0 = vadd.f32 %v2748_v45, %v2742_v47 }
 0xb56   :  { %v31793_v1 = vadd.f32 %v2747_v58, %v2741_v61 }
 0xb57   :  { %v31797_v48 = vsel %vm4969_vm6, %v31732_v59, %v31791_v0  ;;  %v2754_v53 = vrot.slane %v31791_v0, 2  ;;  %v3297_v40 = vrot.slane %v31791_v0, 7 }
 0xb58   :  { %v31802_v51 = vsel %vm4969_vm6, %v31736_v62, %v31793_v1  ;;  %v2753_v57 = vrot.slane %v31793_v1, 3  ;;  %v3296_v45 = vrot.slane %v31793_v1, 7 }
 0xb5a   :  { %v2755_v55 = vsel %vm1098_vm2, %v2754_v53, %v2753_v57 }
 0xb5b   :  { %2756 = vrot.lane.b32.xlu1 %v2755_v55, %s31358_s18 }
 0xbcd   :  { %v2757_v2 = vpop.permute.xlu1 %2756 }
 0xbce   :  { %v2758_v56 = vsel %vm552_vm3, %v2757_v2, 0 }
 0xbcf   :  { %v2829_v50 = vand.u32 4294901760, %v2758_v56 }
 0xbd1   :  { %v2830_v5 = vsub.f32 %v2758_v56, %v2829_v50 }
 0xbd3   :  { %v2831_v6 = vand.u32 4294901760, %v2830_v5 }
 0xbd5   :  { %v2832_v59 = vsub.f32 %v2830_v5, %v2831_v6 }
 0xbd7   :  { %v2833_v8 = vand.u32 4294901760, %v2832_v59 }
 0xbd9   :  { %27480 = vmatmul.mubr.f32.vlgmr.msra.gmra.mrb[4].mxu1 %v2833_v8 }
 0xbda   :  { %29753 = vmatpush3.bf16.msra.mxu1 %v31555_v60  ;;  %27490 = vmatprep.mubr.msk.f32.mxu1 %vm31355_vm1, %v34762_v34 }
 0xbdb   :  { %29754 = vmatprep.subr.bf16.mxu1 %v31354_v7 }
 0xbde   :  { %29756 = vmatpush3.bf16.msra.mxu1 %v31560_v63 }
 0xbdf   :  { %29757 = vmatprep.subr.bf16.mxu1 %v31354_v7 }
 0xbe1   :  { %27491 = vmatmul.mubr.f32.vlgmr.msra.gmra.mrb[4].mxu1 %v2829_v50 }
 0xbe2   :  { %29759 = vmatpush3.bf16.msra.mxu1 %v31470_v28  ;;  %27501 = vmatprep.mubr.msk.f32.mxu1 %vm31355_vm1, %v34762_v34 }
 0xbe3   :  { %29760 = vmatprep.subr.bf16.mxu1 %v31354_v7 }
 0xbe6   :  { %29762 = vmatpush3.bf16.msra.mxu1 %v31487_v41 }
 0xbe7   :  { %29763 = vmatprep.subr.bf16.mxu1 %v31354_v7 }
 0xbe9   :  { %27502 = vmatmul.mubr.f32.vlgmr.msra.gmra.mrb[4].mxu1 %v2830_v5 }
 0xbea   :  { %29765 = vmatpush3.bf16.msra.mxu1 %v31489_v44  ;;  %27512 = vmatprep.mubr.msk.f32.mxu1 %vm31355_vm1, %v34762_v34 }
 0xbeb   :  { %29766 = vmatprep.subr.bf16.mxu1 %v31354_v7 }
 0xbee   :  { %29768 = vmatpush3.bf16.msra.mxu1 %v31497_v46 }
 0xbef   :  { %29769 = vmatprep.subr.bf16.mxu1 %v31354_v7 }
 0xbf1   :  { %27513 = vmatmul.mubr.f32.vlgmr.msra.gmra.mrb[4].mxu1 %v2831_v6 }
 0xbf2   :  { %29771 = vmatpush3.bf16.msra.mxu1 %v31506_v49  ;;  %27523 = vmatprep.mubr.msk.f32.mxu1 %vm31355_vm1, %v34762_v34 }
 0xbf3   :  { %29772 = vmatprep.subr.bf16.mxu1 %v31354_v7 }
 0xbf6   :  { %29774 = vmatpush3.bf16.msra.mxu1 %v31516_v52 }
 0xbf7   :  { %29775 = vmatprep.subr.bf16.mxu1 %v31354_v7 }
 0xbf9   :  { %27524 = vmatmul.mubr.f32.vlgmr.msra.gmra.mrb[4].mxu1 %v2829_v50 }
 0xbfa   :  { %29777 = vmatpush3.bf16.msra.mxu1 %v31489_v44  ;;  %27534 = vmatprep.mubr.msk.f32.mxu1 %vm31355_vm1, %v34762_v34 }
 0xbfb   :  { %29778 = vmatprep.subr.bf16.mxu1 %v31354_v7 }
 0xbfe   :  { %29780 = vmatpush3.bf16.msra.mxu1 %v31497_v46 }
 0xbff   :  { %29817 = vmatprep.subr.bf16.mxu1 %v31354_v7 }
 0xc01   :  { %27535 = vmatmul.mubr.f32.vlgmr.msra.gmra.mrb[4].mxu1 %v2829_v50 }
 0xc02   :  { %29819 = vmatpush3.bf16.msra.mxu1 %v31489_v44  ;;  %27611 = vmatprep.mubr.msk.f32.mxu1 %vm31355_vm1, %v34762_v34 }
 0xc03   :  { %29820 = vmatprep.subr.bf16.mxu1 %v31354_v7 }
 0xc06   :  { %29822 = vmatpush3.bf16.msra.mxu1 %v31497_v46 }
 0xc07   :  { %29823 = vmatprep.subr.bf16.mxu1 %v31354_v7 }
 0xcd4   :  { %v3241_v62 = vpop.f32.mrb[4].mxu1 }
 0xcd5   :  { %v30616_v10 = vadd.f32 %v3241_v62, %v31591_v13  ;;  %v27536_v14 = vpop.f32.mrb[5].mxu1 }
 0xcd7   :  { %v3246_v15 = vrot.slane %v30616_v10, 4  ;;  %v3247_v16 = vrot.slane %v30616_v10, 5 }
 0xcd9   :  { %3266 = vrot.lane.b32.xlu1 %v3247_v16, %s31357_s1  ;;  %3264 = vrot.lane.b32.xlu0 %v3246_v15, %s31357_s1  ;;  %v3250_v17 = vadd.f32 %v31585_v11, %v3246_v15  ;;  %v3251_v18 = vadd.f32 %v31583_v9, %v3247_v16 }
 0xcdb   :  { %v26002_v19 = vmul.f32 -1.442695, %v3250_v17  ;;  %v26003_v20 = vmul.f32 -1.442695, %v3251_v18 }
 0xcdd   :  { %31201 = vpow2.f32 %v26002_v19 }
 0xcde   :  { %31203 = vpow2.f32 %v26003_v20 }
 0xce7   :  { %v31202_v21 = vpop.eup %31201 }
 0xce8   :  { %v31204_v22 = vpop.eup %31203  ;;  %v3258_v23 = vadd.f32 1.0, %v31202_v21 }
 0xce9   :  { %v3259_v24 = vadd.f32 1.0, %v31204_v22 }
 0xcea   :  { %31205 = vrcp.f32 %v3258_v23 }
 0xceb   :  { %31207 = vrcp.f32 %v3259_v24 }
 0xcf4   :  { %v31206_v25 = vpop.eup %31205 }
 0xcf5   :  { %v31208_v26 = vpop.eup %31207  ;;  %v3284_v43 = vsub.f32 1.0, %v31206_v25  ;;  %v3300_v61 = vmul.f32 %v31206_v25, %v3296_v45 }
 0xcf6   :  { %v3285_v39 = vsub.f32 1.0, %v31208_v26  ;;  %v3301_v47 = vmul.f32 %v31208_v26, %v3297_v40 }
 0xd4b   :  { %v3267_v27 = vpop.permute.xlu1 %3266  ;;  %v3265_v29 = vpop.permute.xlu0 %3264 }
 0xd4c   :  { %v3271_v30 = vmul.f32 %v31208_v26, %v3267_v27  ;;  %v3270_v31 = vmul.f32 %v31206_v25, %v3265_v29 }
 0xd4e   :  { %3276 = vrot.lane.b32.xlu1 %v3271_v30, %s31357_s1  ;;  %3274 = vrot.lane.b32.xlu0 %v3270_v31, %s31357_s1 }
 0xdc0   :  { %v3277_v32 = vpop.permute.xlu1 %3276  ;;  %v3275_v33 = vpop.permute.xlu0 %3274 }
 0xdc1   :  { %v3281_v35 = vadd.f32 %v31583_v9, %v3277_v32  ;;  %v3280_v36 = vadd.f32 %v31585_v11, %v3275_v33 }
 0xdc3   :  { %31209 = vtanh.f32 %v3281_v35 }
 0xdc4   :  { %31211 = vtanh.f32 %v3280_v36 }
 0xdcd   :  { %v31210_v37 = vpop.eup %31209 }
 0xdce   :  { %v31212_v38 = vpop.eup %31211  ;;  %3290 = vrot.lane.b32.xlu1 %v31210_v37, %s31358_s18 }
 0xdcf   :  { %3288 = vrot.lane.b32.xlu0 %v31212_v38, %s31358_s18 }
 0xe40   :  { %v3291_v42 = vpop.permute.xlu1 %3290 }
 0xe41   :  { %v3295_v54 = vmul.f32 %v3291_v42, %v3285_v39  ;;  %v3289_v58 = vpop.permute.xlu0 %3288 }
 0xe42   :  { %v3294_v53 = vmul.f32 %v3289_v58, %v3284_v43 }
 0xe43   :  { %v31857_v57 = vadd.f32 %v3301_v47, %v3295_v54 }
 0xe44   :  { %v31859_v55 = vadd.f32 %v3300_v61, %v3294_v53 }
 0xe45   :  { %v31863_v2 = vsel %vm4972_vm7, %v31797_v48, %v31857_v57  ;;  %v3307_v0 = vrot.slane %v31857_v57, 3  ;;  %v3850_v42 = vrot.slane %v31857_v57, 7 }
 0xe46   :  { %v31868_v56 = vsel %vm4972_vm7, %v31802_v51, %v31859_v55  ;;  %v3306_v1 = vrot.slane %v31859_v55, 4  ;;  %v3849_v47 = vrot.slane %v31859_v55, 7 }
 0xe48   :  { %v3308_v50 = vsel %vm1098_vm2, %v3307_v0, %v3306_v1 }
 0xe49   :  { %3309 = vrot.lane.b32.xlu0 %v3308_v50, %s31358_s18 }
 0xebb   :  { %v3310_v5 = vpop.permute.xlu0 %3309 }
 0xebc   :  { %v3311_v6 = vsel %vm552_vm3, %v3310_v5, 0 }
 0xebd   :  { %v3382_v59 = vand.u32 4294901760, %v3311_v6 }
 0xebf   :  { %v3383_v8 = vsub.f32 %v3311_v6, %v3382_v59 }
 0xec1   :  { %v3384_v62 = vand.u32 4294901760, %v3383_v8 }
 0xec3   :  { %v3385_v48 = vsub.f32 %v3383_v8, %v3384_v62 }
 0xec5   :  { %v3386_v10 = vand.u32 4294901760, %v3385_v48 }
 0xec7   :  { %27546 = vmatmul.mubr.f32.vlgmr.msra.gmra.mrb[8].mxu0 %v3386_v10 }
 0xec8   :  { %29789 = vmatpush3.bf16.msra.mxu0 %v31555_v60  ;;  %27556 = vmatprep.mubr.msk.f32.mxu0 %vm31355_vm1, %v34762_v34 }
 0xec9   :  { %29790 = vmatprep.subr.bf16.mxu0 %v31354_v7 }
 0xecc   :  { %29792 = vmatpush3.bf16.msra.mxu0 %v31560_v63 }
 0xecd   :  { %29793 = vmatprep.subr.bf16.mxu0 %v31354_v7 }
 0xecf   :  { %27557 = vmatmul.mubr.f32.vlgmr.msra.gmra.mrb[8].mxu0 %v3382_v59 }
 0xed0   :  { %29795 = vmatpush3.bf16.msra.mxu0 %v31470_v28  ;;  %27567 = vmatprep.mubr.msk.f32.mxu0 %vm31355_vm1, %v34762_v34 }
 0xed1   :  { %29796 = vmatprep.subr.bf16.mxu0 %v31354_v7 }
 0xed4   :  { %29798 = vmatpush3.bf16.msra.mxu0 %v31487_v41 }
 0xed5   :  { %29799 = vmatprep.subr.bf16.mxu0 %v31354_v7 }
 0xed7   :  { %27568 = vmatmul.mubr.f32.vlgmr.msra.gmra.mrb[8].mxu0 %v3383_v8 }
 0xed8   :  { %29801 = vmatpush3.bf16.msra.mxu0 %v31489_v44  ;;  %27578 = vmatprep.mubr.msk.f32.mxu0 %vm31355_vm1, %v34762_v34 }
 0xed9   :  { %29802 = vmatprep.subr.bf16.mxu0 %v31354_v7 }
 0xedc   :  { %29804 = vmatpush3.bf16.msra.mxu0 %v31497_v46 }
 0xedd   :  { %29805 = vmatprep.subr.bf16.mxu0 %v31354_v7 }
 0xedf   :  { %27579 = vmatmul.mubr.f32.vlgmr.msra.gmra.mrb[8].mxu0 %v3384_v62 }
 0xee0   :  { %29807 = vmatpush3.bf16.msra.mxu0 %v31506_v49  ;;  %27589 = vmatprep.mubr.msk.f32.mxu0 %vm31355_vm1, %v34762_v34 }
 0xee1   :  { %29808 = vmatprep.subr.bf16.mxu0 %v31354_v7 }
 0xee4   :  { %29810 = vmatpush3.bf16.msra.mxu0 %v31516_v52 }
 0xee5   :  { %29811 = vmatprep.subr.bf16.mxu0 %v31354_v7 }
 0xee7   :  { %27590 = vmatmul.mubr.f32.vlgmr.msra.gmra.mrb[8].mxu0 %v3382_v59 }
 0xee8   :  { %29813 = vmatpush3.bf16.msra.mxu0 %v31489_v44  ;;  %27600 = vmatprep.mubr.msk.f32.mxu0 %vm31355_vm1, %v34762_v34 }
 0xee9   :  { %29814 = vmatprep.subr.bf16.mxu0 %v31354_v7 }
 0xeec   :  { %29816 = vmatpush3.bf16.msra.mxu0 %v31497_v46 }
 0xeed   :  { %29853 = vmatprep.subr.bf16.mxu0 %v31354_v7 }
 0xeef   :  { %27601 = vmatmul.mubr.f32.vlgmr.msra.gmra.mrb[8].mxu0 %v3382_v59 }
 0xef0   :  { %29855 = vmatpush3.bf16.msra.mxu0 %v31489_v44  ;;  %27677 = vmatprep.mubr.msk.f32.mxu0 %vm31355_vm1, %v34762_v34 }
 0xef1   :  { %29856 = vmatprep.subr.bf16.mxu0 %v31354_v7 }
 0xef4   :  { %29858 = vmatpush3.bf16.msra.mxu0 %v31497_v46 }
 0xef5   :  { %29859 = vmatprep.subr.bf16.mxu0 %v31354_v7 }
 0xfc2   :  { %v3794_v51 = vpop.f32.mrb[8].mxu0 }
 0xfc3   :  { %v30617_v14 = vadd.f32 %v3794_v51, %v31591_v13  ;;  %v27602_v15 = vpop.f32.mrb[9].mxu0 }
 0xfc5   :  { %v3799_v16 = vrot.slane %v30617_v14, 3  ;;  %v3800_v17 = vrot.slane %v30617_v14, 4 }
 0xfc7   :  { %3819 = vrot.lane.b32.xlu0 %v3800_v17, %s31357_s1  ;;  %3817 = vrot.lane.b32.xlu1 %v3799_v16, %s31357_s1  ;;  %v3803_v18 = vadd.f32 %v31585_v11, %v3799_v16  ;;  %v3804_v19 = vadd.f32 %v31583_v9, %v3800_v17 }
 0xfc9   :  { %v26004_v20 = vmul.f32 -1.442695, %v3803_v18  ;;  %v26005_v21 = vmul.f32 -1.442695, %v3804_v19 }
 0xfcb   :  { %31213 = vpow2.f32 %v26004_v20 }
 0xfcc   :  { %31215 = vpow2.f32 %v26005_v21 }
 0xfd5   :  { %v31214_v22 = vpop.eup %31213 }
 0xfd6   :  { %v31216_v23 = vpop.eup %31215  ;;  %v3811_v24 = vadd.f32 1.0, %v31214_v22 }
 0xfd7   :  { %v3812_v25 = vadd.f32 1.0, %v31216_v23 }
 0xfd8   :  { %31217 = vrcp.f32 %v3811_v24 }
 0xfd9   :  { %31219 = vrcp.f32 %v3812_v25 }
 0xfe2   :  { %v31218_v26 = vpop.eup %31217 }
 0xfe3   :  { %v31220_v27 = vpop.eup %31219  ;;  %v3837_v45 = vsub.f32 1.0, %v31218_v26  ;;  %v3853_v53 = vmul.f32 %v31218_v26, %v3849_v47 }
 0xfe4   :  { %v3838_v40 = vsub.f32 1.0, %v31220_v27  ;;  %v3854_v54 = vmul.f32 %v31220_v27, %v3850_v42 }
0x1039   :  { %v3820_v29 = vpop.permute.xlu0 %3819  ;;  %v3818_v30 = vpop.permute.xlu1 %3817 }
0x103a   :  { %v3824_v31 = vmul.f32 %v31220_v27, %v3820_v29  ;;  %v3823_v32 = vmul.f32 %v31218_v26, %v3818_v30 }
0x103c   :  { %3829 = vrot.lane.b32.xlu0 %v3824_v31, %s31357_s1  ;;  %3827 = vrot.lane.b32.xlu1 %v3823_v32, %s31357_s1 }
0x10ae   :  { %v3830_v33 = vpop.permute.xlu0 %3829  ;;  %v3828_v35 = vpop.permute.xlu1 %3827 }
0x10af   :  { %v3834_v36 = vadd.f32 %v31583_v9, %v3830_v33  ;;  %v3833_v37 = vadd.f32 %v31585_v11, %v3828_v35 }
0x10b1   :  { %31221 = vtanh.f32 %v3834_v36 }
0x10b2   :  { %31223 = vtanh.f32 %v3833_v37 }
0x10bb   :  { %v31222_v38 = vpop.eup %31221 }
0x10bc   :  { %v31224_v39 = vpop.eup %31223  ;;  %3843 = vrot.lane.b32.xlu0 %v31222_v38, %s31358_s18 }
0x10bd   :  { %3841 = vrot.lane.b32.xlu1 %v31224_v39, %s31358_s18 }
0x112e   :  { %v3844_v43 = vpop.permute.xlu0 %3843 }
0x112f   :  { %v3848_v58 = vmul.f32 %v3844_v43, %v3838_v40  ;;  %v3842_v61 = vpop.permute.xlu1 %3841 }
0x1130   :  { %v3847_v0 = vmul.f32 %v3842_v61, %v3837_v45 }
0x1131   :  { %v31923_v1 = vadd.f32 %v3854_v54, %v3848_v58 }
0x1132   :  { %v31925_v50 = vadd.f32 %v3853_v53, %v3847_v0 }
0x1133   :  { %v3860_v5 = vrot.slane %v31923_v1, 4  ;;  %v31930_v6 = vsel %vm4975_vm8, %v31863_v2, %v31923_v1  ;;  %v4403_v43 = vrot.slane %v31923_v1, 7 }
0x1134   :  { %v3859_v57 = vrot.slane %v31925_v50, 5  ;;  %v31935_v55 = vsel %vm4975_vm8, %v31868_v56, %v31925_v50  ;;  %v4402_v54 = vrot.slane %v31925_v50, 7 }
0x1136   :  { %v3861_v59 = vsel %vm1098_vm2, %v3860_v5, %v3859_v57 }
0x1137   :  { %3862 = vrot.lane.b32.xlu1 %v3861_v59, %s31358_s18 }
0x11a9   :  { %v3863_v8 = vpop.permute.xlu1 %3862 }
0x11aa   :  { %v3864_v62 = vsel %vm552_vm3, %v3863_v8, 0 }
0x11ab   :  { %v3935_v48 = vand.u32 4294901760, %v3864_v62 }
0x11ad   :  { %v3936_v10 = vsub.f32 %v3864_v62, %v3935_v48 }
0x11af   :  { %v3937_v51 = vand.u32 4294901760, %v3936_v10 }
0x11b1   :  { %v3938_v14 = vsub.f32 %v3936_v10, %v3937_v51 }
0x11b3   :  { %v3939_v15 = vand.u32 4294901760, %v3938_v14 }
0x11b5   :  { %27612 = vmatmul.mubr.f32.vlgmr.msra.gmra.mrb[6].mxu1 %v3939_v15 }
0x11b6   :  { %29825 = vmatpush3.bf16.msra.mxu1 %v31555_v60  ;;  %27622 = vmatprep.mubr.msk.f32.mxu1 %vm31355_vm1, %v34762_v34 }
0x11b7   :  { %29826 = vmatprep.subr.bf16.mxu1 %v31354_v7 }
0x11ba   :  { %29828 = vmatpush3.bf16.msra.mxu1 %v31560_v63 }
0x11bb   :  { %29829 = vmatprep.subr.bf16.mxu1 %v31354_v7 }
0x11bd   :  { %27623 = vmatmul.mubr.f32.vlgmr.msra.gmra.mrb[6].mxu1 %v3935_v48 }
0x11be   :  { %29831 = vmatpush3.bf16.msra.mxu1 %v31470_v28  ;;  %27633 = vmatprep.mubr.msk.f32.mxu1 %vm31355_vm1, %v34762_v34 }
0x11bf   :  { %29832 = vmatprep.subr.bf16.mxu1 %v31354_v7 }
0x11c2   :  { %29834 = vmatpush3.bf16.msra.mxu1 %v31487_v41 }
0x11c3   :  { %29835 = vmatprep.subr.bf16.mxu1 %v31354_v7 }
0x11c5   :  { %27634 = vmatmul.mubr.f32.vlgmr.msra.gmra.mrb[6].mxu1 %v3936_v10 }
0x11c6   :  { %29837 = vmatpush3.bf16.msra.mxu1 %v31489_v44  ;;  %27644 = vmatprep.mubr.msk.f32.mxu1 %vm31355_vm1, %v34762_v34 }
0x11c7   :  { %29838 = vmatprep.subr.bf16.mxu1 %v31354_v7 }
0x11ca   :  { %29840 = vmatpush3.bf16.msra.mxu1 %v31497_v46 }
0x11cb   :  { %29841 = vmatprep.subr.bf16.mxu1 %v31354_v7 }
0x11cd   :  { %27645 = vmatmul.mubr.f32.vlgmr.msra.gmra.mrb[6].mxu1 %v3937_v51 }
0x11ce   :  { %29843 = vmatpush3.bf16.msra.mxu1 %v31506_v49  ;;  %27655 = vmatprep.mubr.msk.f32.mxu1 %vm31355_vm1, %v34762_v34 }
0x11cf   :  { %29844 = vmatprep.subr.bf16.mxu1 %v31354_v7 }
0x11d2   :  { %29846 = vmatpush3.bf16.msra.mxu1 %v31516_v52 }
0x11d3   :  { %29847 = vmatprep.subr.bf16.mxu1 %v31354_v7 }
0x11d5   :  { %27656 = vmatmul.mubr.f32.vlgmr.msra.gmra.mrb[6].mxu1 %v3935_v48 }
0x11d6   :  { %29849 = vmatpush3.bf16.msra.mxu1 %v31489_v44  ;;  %27666 = vmatprep.mubr.msk.f32.mxu1 %vm31355_vm1, %v34762_v34 }
0x11d7   :  { %29850 = vmatprep.subr.bf16.mxu1 %v31354_v7 }
0x11da   :  { %29852 = vmatpush3.bf16.msra.mxu1 %v31497_v46 }
0x11dd   :  { %27667 = vmatmul.mubr.f32.vlgmr.msra.gmra.mrb[6].mxu1 %v3935_v48 }
0x12b0   :  { %v4347_v2 = vpop.f32.mrb[6].mxu1 }
0x12b1   :  { %v30618_v56 = vadd.f32 %v4347_v2, %v31591_v13  ;;  %v27668_v16 = vpop.f32.mrb[7].mxu1 }
0x12b3   :  { %v4352_v17 = vrot.slane %v30618_v56, 2  ;;  %v4353_v18 = vrot.slane %v30618_v56, 3 }
0x12b5   :  { %4372 = vrot.lane.b32.xlu1 %v4353_v18, %s31357_s1  ;;  %4370 = vrot.lane.b32.xlu0 %v4352_v17, %s31357_s1  ;;  %v4356_v19 = vadd.f32 %v31585_v11, %v4352_v17  ;;  %v4357_v20 = vadd.f32 %v31583_v9, %v4353_v18 }
0x12b7   :  { %v26006_v21 = vmul.f32 -1.442695, %v4356_v19  ;;  %v26007_v22 = vmul.f32 -1.442695, %v4357_v20 }
0x12b9   :  { %31225 = vpow2.f32 %v26006_v21 }
0x12ba   :  { %31227 = vpow2.f32 %v26007_v22 }
0x12c3   :  { %v31226_v23 = vpop.eup %31225 }
0x12c4   :  { %v31228_v24 = vpop.eup %31227  ;;  %v4364_v25 = vadd.f32 1.0, %v31226_v23 }
0x12c5   :  { %v4365_v26 = vadd.f32 1.0, %v31228_v24 }
0x12c6   :  { %31229 = vrcp.f32 %v4364_v25 }
0x12c7   :  { %31231 = vrcp.f32 %v4365_v26 }
0x12d0   :  { %v31230_v27 = vpop.eup %31229 }
0x12d1   :  { %v31232_v29 = vpop.eup %31231  ;;  %v4390_v47 = vsub.f32 1.0, %v31230_v27  ;;  %v4406_v0 = vmul.f32 %v31230_v27, %v4402_v54 }
0x12d2   :  { %v4391_v42 = vsub.f32 1.0, %v31232_v29  ;;  %v4407_v58 = vmul.f32 %v31232_v29, %v4403_v43 }
0x1327   :  { %v4373_v30 = vpop.permute.xlu1 %4372  ;;  %v4371_v31 = vpop.permute.xlu0 %4370 }
0x1328   :  { %v4377_v32 = vmul.f32 %v31232_v29, %v4373_v30  ;;  %v4376_v33 = vmul.f32 %v31230_v27, %v4371_v31  ;;  %v4984_v31 = vld [vmem:[%s34756_s2] sm:$0xff] }
0x132a   :  { %4382 = vrot.lane.b32.xlu1 %v4377_v32, %s31357_s1  ;;  %4380 = vrot.lane.b32.xlu0 %v4376_v33, %s31357_s1  ;;  %v4985_v32 = vld [vmem:[%s34756_s2 + $0x8] sm:$0xff]  ;;  %v5004_v33 = vand.u32 4294901760, %v4984_v31 }
0x139c   :  { %v4383_v35 = vpop.permute.xlu1 %4382  ;;  %v4381_v36 = vpop.permute.xlu0 %4380 }
0x139d   :  { %v4387_v37 = vadd.f32 %v31583_v9, %v4383_v35  ;;  %v4386_v38 = vadd.f32 %v31585_v11, %v4381_v36 }
0x139f   :  { %31233 = vtanh.f32 %v4387_v37 }
0x13a0   :  { %31235 = vtanh.f32 %v4386_v38  ;;  %v4986_v38 = vld [vmem:[%s34756_s2 + $0x10] sm:$0xff] }
0x13a9   :  { %v31234_v39 = vpop.eup %31233 }
0x13aa   :  { %v31236_v40 = vpop.eup %31235  ;;  %4396 = vrot.lane.b32.xlu1 %v31234_v39, %s31358_s18  ;;  %v4987_v39 = vld [vmem:[%s34756_s2 + $0x18] sm:$0xff] }
0x13ab   :  { %4394 = vrot.lane.b32.xlu0 %v31236_v40, %s31358_s18  ;;  %v5010_v40 = vand.u32 4294901760, %v4986_v38 }
0x141c   :  { %v4397_v45 = vpop.permute.xlu1 %4396 }
0x141d   :  { %v4401_v61 = vmul.f32 %v4397_v45, %v4391_v42  ;;  %v4395_v53 = vpop.permute.xlu0 %4394  ;;  %v5013_v42 = vand.u32 4294901760, %v4987_v39 }
0x141e   :  { %v4400_v5 = vmul.f32 %v4395_v53, %v4390_v47 }
0x141f   :  { %v31982_v57 = vadd.f32 %v4407_v58, %v4401_v61 }
0x1420   :  { %v31984_v59 = vadd.f32 %v4406_v0, %v4400_v5  ;;  %v32057_v0 = vpack.c.bf16 %v5013_v42, %v5010_v40 }
0x1421   :  { %v4413_v8 = vrot.slane %v31982_v57, 5  ;;  %v31989_v62 = vsel %vm4978_vm9, %v31930_v6, %v31982_v57  ;;  %v4956_v54 = vrot.slane %v31982_v57, 7 }
0x1422   :  { %v4412_v1 = vrot.slane %v31984_v59, 6  ;;  %v31994_v50 = vsel %vm4978_vm9, %v31935_v55, %v31984_v59  ;;  %v4955_v37 = vrot.slane %v31984_v59, 7 }
0x1424   :  { %v4414_v48 = vsel %vm1098_vm2, %v4413_v8, %v4412_v1  ;;  %v5108_v8 = vsub.f32 %v4986_v38, %v5010_v40  ;;  %v5534_v38 = vld [vmem:[%s34757_s3 + $0x18] sm:$0xff] }
0x1425   :  { %4415 = vrot.lane.b32.xlu0 %v4414_v48, %s31358_s18  ;;  %v5582_v40 = vand.u32 4294901760, %v5534_v38 }
0x1497   :  { %v4416_v10 = vpop.permute.xlu0 %4415 }
0x1498   :  { %v4417_v51 = vsel %vm552_vm3, %v4416_v10, 0 }
0x1499   :  { %v4488_v14 = vand.u32 4294901760, %v4417_v51 }
0x149b   :  { %v4489_v15 = vsub.f32 %v4417_v51, %v4488_v14  ;;  %v5115_v51 = vsub.f32 %v4987_v39, %v5013_v42 }
0x149d   :  { %v4490_v2 = vand.u32 4294901760, %v4489_v15 }
0x149f   :  { %v4491_v56 = vsub.f32 %v4489_v15, %v4490_v2 }
0x14a1   :  { %v4492_v16 = vand.u32 4294901760, %v4491_v56 }
0x14a3   :  { %27678 = vmatmul.mubr.f32.vlgmr.msra.gmra.mrb[10].mxu0 %v4492_v16  ;;  %v5116_v16 = vand.u32 4294901760, %v5115_v51 }
0x14a4   :  { %29861 = vmatpush3.bf16.msra.mxu0 %v31555_v60  ;;  %27688 = vmatprep.mubr.msk.f32.mxu0 %vm31355_vm1, %v34762_v34 }
0x14a5   :  { %29862 = vmatprep.subr.bf16.mxu0 %v31354_v7 }
0x14a8   :  { %29864 = vmatpush3.bf16.msra.mxu0 %v31560_v63 }
0x14a9   :  { %29865 = vmatprep.subr.bf16.mxu0 %v31354_v7 }
0x14ab   :  { %27689 = vmatmul.mubr.f32.vlgmr.msra.gmra.mrb[10].mxu0 %v4488_v14 }
0x14ac   :  { %29867 = vmatpush3.bf16.msra.mxu0 %v31470_v28  ;;  %27699 = vmatprep.mubr.msk.f32.mxu0 %vm31355_vm1, %v34762_v34 }
0x14ad   :  { %29868 = vmatprep.subr.bf16.mxu0 %v31354_v7 }
0x14b0   :  { %29870 = vmatpush3.bf16.msra.mxu0 %v31487_v41 }
0x14b1   :  { %29871 = vmatprep.subr.bf16.mxu0 %v31354_v7 }
0x14b3   :  { %27700 = vmatmul.mubr.f32.vlgmr.msra.gmra.mrb[10].mxu0 %v4489_v15 }
0x14b4   :  { %29873 = vmatpush3.bf16.msra.mxu0 %v31489_v44  ;;  %27710 = vmatprep.mubr.msk.f32.mxu0 %vm31355_vm1, %v34762_v34 }
0x14b5   :  { %29874 = vmatprep.subr.bf16.mxu0 %v31354_v7 }
0x14b8   :  { %29876 = vmatpush3.bf16.msra.mxu0 %v31497_v46 }
0x14b9   :  { %29877 = vmatprep.subr.bf16.mxu0 %v31354_v7 }
0x14bb   :  { %27711 = vmatmul.mubr.f32.vlgmr.msra.gmra.mrb[10].mxu0 %v4490_v2  ;;  %v5109_v2 = vand.u32 4294901760, %v5108_v8 }
0x14bc   :  { %29879 = vmatpush3.bf16.msra.mxu0 %v31506_v49  ;;  %27721 = vmatprep.mubr.msk.f32.mxu0 %vm31355_vm1, %v34762_v34 }
0x14bd   :  { %29880 = vmatprep.subr.bf16.mxu0 %v31354_v7 }
0x14c0   :  { %29882 = vmatpush3.bf16.msra.mxu0 %v31516_v52 }
0x14c1   :  { %29883 = vmatprep.subr.bf16.mxu0 %v31354_v7 }
0x14c3   :  { %27722 = vmatmul.mubr.f32.vlgmr.msra.gmra.mrb[10].mxu0 %v4488_v14 }
0x14c4   :  { %29885 = vmatpush3.bf16.msra.mxu0 %v31489_v44  ;;  %27732 = vmatprep.mubr.msk.f32.mxu0 %vm31355_vm1, %v34762_v34 }
0x14c5   :  { %29886 = vmatprep.subr.bf16.mxu0 %v31354_v7 }
0x14c8   :  { %29888 = vmatpush3.bf16.msra.mxu0 %v31497_v46 }
0x14cb   :  { %27733 = vmatmul.mubr.f32.vlgmr.msra.gmra.mrb[10].mxu0 %v4488_v14 }
0x159e   :  { %v4900_v28 = vpop.f32.mrb[10].mxu0 }
0x159f   :  { %v30619_v41 = vadd.f32 %v4900_v28, %v31591_v13  ;;  %v27734_v49 = vpop.f32.mrb[11].mxu0 }
0x15a0   :  { %v5110_v49 = vsub.f32 %v5108_v8, %v5109_v2 }
0x15a1   :  { %v4905_v60 = vrot.slane %v30619_v41, 1  ;;  %v4906_v63 = vrot.slane %v30619_v41, 2 }
0x15a3   :  { %4925 = vrot.lane.b32.xlu0 %v4906_v63, %s31357_s1  ;;  %4923 = vrot.lane.b32.xlu1 %v4905_v60, %s31357_s1  ;;  %v4909_v44 = vadd.f32 %v31585_v11, %v4905_v60  ;;  %v4910_v52 = vadd.f32 %v31583_v9, %v4906_v63  ;;  %v5117_v63 = vsub.f32 %v5115_v51, %v5116_v16 }
0x15a5   :  { %v26008_v6 = vmul.f32 -1.442695, %v4909_v44  ;;  %v26009_v55 = vmul.f32 -1.442695, %v4910_v52  ;;  %v5111_v52 = vand.u32 4294901760, %v5110_v49 }
0x15a7   :  { %31237 = vpow2.f32 %v26008_v6  ;;  %v5118_v6 = vand.u32 4294901760, %v5117_v63 }
0x15a8   :  { %31239 = vpow2.f32 %v26009_v55 }
0x15a9   :  { %v29901_v55 = vpack.c.bf16 %v5118_v6, %v5111_v52 }
0x15b1   :  { %v31238_v7 = vpop.eup %31237 }
0x15b2   :  { %v31240_v46 = vpop.eup %31239  ;;  %v4917_v17 = vadd.f32 1.0, %v31238_v7 }
0x15b3   :  { %v4918_v18 = vadd.f32 1.0, %v31240_v46  ;;  %v29909_v46 = vpack.c.bf16 %v5115_v51, %v5108_v8 }
0x15b4   :  { %31241 = vrcp.f32 %v4917_v17 }
0x15b5   :  { %31243 = vrcp.f32 %v4918_v18  ;;  %v29925_v18 = vpack.c.bf16 %v5116_v16, %v5109_v2  ;;  %v26010_v16 = vld [vmem:[%s34756_s2 + $0x20] ss:$0 sm:$0xff] }
0x15be   :  { %v31242_v13 = vpop.eup %31241 }
0x15bf   :  { %v31244_v19 = vpop.eup %31243  ;;  %v4943_v58 = vsub.f32 1.0, %v31242_v13  ;;  %v4959_v61 = vmul.f32 %v31242_v13, %v4955_v37  ;;  %v5533_v37 = vld [vmem:[%s34757_s3 + $0x10] sm:$0xff] }
0x15c0   :  { %v4944_v47 = vsub.f32 1.0, %v31244_v19  ;;  %v4960_v1 = vmul.f32 %v31244_v19, %v4956_v54  ;;  %v5579_v39 = vand.u32 4294901760, %v5533_v37 }
0x1615   :  { %v4926_v20 = vpop.permute.xlu0 %4925  ;;  %v4924_v21 = vpop.permute.xlu1 %4923 }
0x1616   :  { %v4930_v22 = vmul.f32 %v31244_v19, %v4926_v20  ;;  %v4929_v23 = vmul.f32 %v31242_v13, %v4924_v21 }
0x1618   :  { %4935 = vrot.lane.b32.xlu0 %v4930_v22, %s31357_s1  ;;  %4933 = vrot.lane.b32.xlu1 %v4929_v23, %s31357_s1 }
0x168a   :  { %v4936_v24 = vpop.permute.xlu0 %4935  ;;  %v4934_v25 = vpop.permute.xlu1 %4933 }
0x168b   :  { %v4940_v26 = vadd.f32 %v31583_v9, %v4936_v24  ;;  %v4939_v27 = vadd.f32 %v31585_v11, %v4934_v25  ;;  %v5007_v9 = vand.u32 4294901760, %v4985_v32  ;;  %v5094_v11 = vsub.f32 %v4984_v31, %v5004_v33  ;;  %v5531_v31 = vld [vmem:[%s34757_s3] sm:$0xff] }
0x168d   :  { %31245 = vtanh.f32 %v4940_v26  ;;  %v32045_v35 = vpack.c.bf16 %v5007_v9, %v5004_v33  ;;  %v5101_v36 = vsub.f32 %v4985_v32, %v5007_v9  ;;  %v5095_v43 = vand.u32 4294901760, %v5094_v11  ;;  %v5532_v32 = vld [vmem:[%s34757_s3 + $0x8] sm:$0xff] }
0x168e   :  { %31247 = vtanh.f32 %v4939_v27  ;;  %v5573_v33 = vand.u32 4294901760, %v5531_v31  ;;  %v5576_v9 = vand.u32 4294901760, %v5532_v32 }
0x168f   :  { %29890 = vmatprep.subr.bf16.mxu1 %v32045_v35  ;;  %v5102_v45 = vand.u32 4294901760, %v5101_v36  ;;  %v5096_v5 = vsub.f32 %v5094_v11, %v5095_v43  ;;  %v29905_v7 = vpack.c.bf16 %v5101_v36, %v5094_v11 }
0x1690   :  { %29892 = vmatpush3.bf16.msra.mxu1 %v32045_v35  ;;  %v5663_v11 = vsub.f32 %v5531_v31, %v5573_v33 }
0x1691   :  { %v5103_v59 = vsub.f32 %v5101_v36, %v5102_v45  ;;  %29894 = vmatprep.subr.bf16.mxu1 %v32057_v0  ;;  %v5097_v15 = vand.u32 4294901760, %v5096_v5  ;;  %v29921_v17 = vpack.c.bf16 %v5102_v45, %v5095_v43  ;;  %v5670_v36 = vsub.f32 %v5532_v32, %v5576_v9 }
0x1692   :  { %v5664_v42 = vand.u32 4294901760, %v5663_v11  ;;  %v32096_v45 = vpack.c.bf16 %v5582_v40, %v5579_v39 }
0x1693   :  { %v5104_v57 = vand.u32 4294901760, %v5103_v59  ;;  %v5671_v43 = vand.u32 4294901760, %v5670_v36 }
0x1694   :  { %29896 = vmatpush3.bf16.msra.mxu1 %v32057_v0 }
0x1695   :  { %v29897_v41 = vpack.c.bf16 %v5104_v57, %v5097_v15  ;;  %v5672_v54 = vsub.f32 %v5670_v36, %v5671_v43  ;;  %v29953_v15 = vpack.c.bf16 %v5670_v36, %v5663_v11  ;;  %v29969_v2 = vpack.c.bf16 %v5671_v43, %v5664_v42 }
0x1697   :  { %v31246_v29 = vpop.eup %31245  ;;  %29898 = vmatprep.subr.bf16.mxu1 %v29897_v41 }
0x1698   :  { %v31248_v30 = vpop.eup %31247  ;;  %4949 = vrot.lane.b32.xlu0 %v31246_v29, %s31358_s18 }
0x1699   :  { %4947 = vrot.lane.b32.xlu1 %v31248_v30, %s31358_s18 }
0x170a   :  { %v4950_v53 = vpop.permute.xlu0 %4949 }
0x170b   :  { %v4954_v48 = vmul.f32 %v4950_v53, %v4944_v47  ;;  %v4948_v10 = vpop.permute.xlu1 %4947  ;;  %v5665_v47 = vsub.f32 %v5663_v11, %v5664_v42 }
0x170c   :  { %v4953_v14 = vmul.f32 %v4948_v10, %v4943_v58  ;;  %v5677_v58 = vsub.f32 %v5533_v37, %v5579_v39 }
0x170d   :  { %v4962_v56 = vadd.f32 %v4960_v1, %v4954_v48  ;;  %v5666_v53 = vand.u32 4294901760, %v5665_v47 }
0x170e   :  { %v4961_v28 = vadd.f32 %v4959_v61, %v4953_v14  ;;  %v5684_v61 = vsub.f32 %v5534_v38, %v5582_v40  ;;  %v5678_v5 = vand.u32 4294901760, %v5677_v58 }
0x170f   :  { %v4983_v60 = vsel %vm4981_vm10, %v31989_v62, %v4962_v56 }
0x1710   :  { %4997 = vrot.lane.b32.xlu0 %v4983_v60, %s31358_s18  ;;  %v4982_v44 = vsel %vm4981_vm10, %v31994_v50, %v4961_v28  ;;  %v5685_v59 = vand.u32 4294901760, %v5684_v61  ;;  %v5679_v1 = vsub.f32 %v5677_v58, %v5678_v5  ;;  %v29957_v57 = vpack.c.bf16 %v5684_v61, %v5677_v58 }
0x1711   :  { %4995 = vrot.lane.b32.xlu1 %v4982_v44, %s31358_s18 }
0x1712   :  { %v5686_v48 = vsub.f32 %v5684_v61, %v5685_v59  ;;  %v5680_v10 = vand.u32 4294901760, %v5679_v1  ;;  %v29973_v56 = vpack.c.bf16 %v5685_v59, %v5678_v5 }
0x1714   :  { %v5687_v51 = vand.u32 4294901760, %v5686_v48 }
0x1716   :  { %v29949_v14 = vpack.c.bf16 %v5687_v51, %v5680_v10 }
0x1782   :  { %v4998_v13 = vpop.permute.xlu0 %4997 }
0x1783   :  { %v5001_v19 = vsel %vm552_vm3, %v4998_v13, 0  ;;  %v4996_v62 = vpop.permute.xlu1 %4995 }
0x1784   :  { %v5082_v20 = vand.u32 4294901760, %v5001_v19  ;;  %v4999_v21 = vsel %vm552_vm3, %v4996_v62, 0 }
0x1785   :  { %v5072_v22 = vand.u32 4294901760, %v4999_v21 }
0x1786   :  { %v5083_v23 = vsub.f32 %v5001_v19, %v5082_v20 }
0x1787   :  { %v5073_v50 = vsub.f32 %v4999_v21, %v5072_v22 }
0x1788   :  { %v5084_v24 = vand.u32 4294901760, %v5083_v23 }
0x1789   :  { %v5074_v25 = vand.u32 4294901760, %v5073_v50 }
0x178a   :  { %v5085_v26 = vsub.f32 %v5083_v23, %v5084_v24 }
0x178b   :  { %v5075_v27 = vsub.f32 %v5073_v50, %v5074_v25 }
0x178c   :  { %v5086_v29 = vand.u32 4294901760, %v5085_v26 }
0x178d   :  { %v5076_v30 = vand.u32 4294901760, %v5075_v27 }
0x178f   :  { %27743 = vmatprep.mubr.f32.mxu1 %v5076_v30 }
0x1790   :  { %27744 = vmatmul.mubr.f32.vlgmr.msra.gmra.mrb[8].mxu1 %v5086_v29 }
0x1791   :  { %29900 = vmatpush3.bf16.msra.mxu1 %v29897_v41  ;;  %27754 = vmatprep.mubr.f32.mxu1 %v5072_v22 }
0x1792   :  { %29902 = vmatprep.subr.bf16.mxu1 %v29901_v55 }
0x1795   :  { %29904 = vmatpush3.bf16.msra.mxu1 %v29901_v55 }
0x1796   :  { %29906 = vmatprep.subr.bf16.mxu1 %v29905_v7 }
0x1798   :  { %27755 = vmatmul.mubr.f32.vlgmr.msra.gmra.mrb[8].mxu1 %v5082_v20 }
0x1799   :  { %29908 = vmatpush3.bf16.msra.mxu1 %v29905_v7  ;;  %27765 = vmatprep.mubr.f32.mxu1 %v5073_v50 }
0x179a   :  { %29910 = vmatprep.subr.bf16.mxu1 %v29909_v46 }
0x179d   :  { %29912 = vmatpush3.bf16.msra.mxu1 %v29909_v46 }
0x179e   :  { %29914 = vmatprep.subr.bf16.mxu1 %v32045_v35 }
0x17a0   :  { %27766 = vmatmul.mubr.f32.vlgmr.msra.gmra.mrb[8].mxu1 %v5083_v23 }
0x17a1   :  { %29916 = vmatpush3.bf16.msra.mxu1 %v32045_v35  ;;  %27776 = vmatprep.mubr.f32.mxu1 %v5074_v25 }
0x17a2   :  { %29918 = vmatprep.subr.bf16.mxu1 %v32057_v0 }
0x17a5   :  { %29920 = vmatpush3.bf16.msra.mxu1 %v32057_v0 }
0x17a6   :  { %29922 = vmatprep.subr.bf16.mxu1 %v29921_v17 }
0x17a8   :  { %27777 = vmatmul.mubr.f32.vlgmr.msra.gmra.mrb[8].mxu1 %v5084_v24 }
0x17a9   :  { %29924 = vmatpush3.bf16.msra.mxu1 %v29921_v17  ;;  %27787 = vmatprep.mubr.f32.mxu1 %v5072_v22 }
0x17aa   :  { %29926 = vmatprep.subr.bf16.mxu1 %v29925_v18 }
0x17ad   :  { %29928 = vmatpush3.bf16.msra.mxu1 %v29925_v18 }
0x17ae   :  { %29930 = vmatprep.subr.bf16.mxu1 %v32045_v35 }
0x17b0   :  { %27788 = vmatmul.mubr.f32.vlgmr.msra.gmra.mrb[8].mxu1 %v5082_v20 }
0x17b1   :  { %29932 = vmatpush3.bf16.msra.mxu1 %v32045_v35  ;;  %27798 = vmatprep.mubr.f32.mxu1 %v5072_v22  ;;  %v32086_v35 = vpack.c.bf16 %v5576_v9, %v5573_v33 }
0x17b2   :  { %29934 = vmatprep.subr.bf16.mxu1 %v32057_v0 }
0x17b3   :  { %29938 = vmatprep.subr.bf16.mxu0 %v32086_v35 }
0x17b4   :  { %29940 = vmatpush3.bf16.msra.mxu0 %v32086_v35 }
0x17b5   :  { %29936 = vmatpush3.bf16.msra.mxu1 %v32057_v0  ;;  %29942 = vmatprep.subr.bf16.mxu0 %v32096_v45  ;;  %v5673_v0 = vand.u32 4294901760, %v5672_v54 }
0x17b6   :  { %27872 = vmatprep.subr.mxu1 %v34762_v34 }
0x17b7   :  { %v29945_v8 = vpack.c.bf16 %v5673_v0, %v5666_v53 }
0x17b8   :  { %27799 = vmatmul.mubr.f32.vlgmr.msra.gmra.mrb[8].mxu1 %v5082_v20  ;;  %29944 = vmatpush3.bf16.msra.mxu0 %v32096_v45  ;;  %v26011_v20 = vld [vmem:[%s34757_s3 + $0x20] ss:$0 sm:$0xff] }
0x17b9   :  { %27874 = vmatprep.mubr.msk.f32.mxu1 %vm31355_vm1, %v34762_v34  ;;  %29946 = vmatprep.subr.bf16.mxu0 %v29945_v8 }
0x188b   :  { %v27800_v28 = vpop.f32.mrb[8].mxu1 }
0x188c   :  { %v32103_v41 = vadd.f32 %v27800_v28, %v26010_v16  ;;  %v5521_v49 = vpop.f32.mrb[9].mxu1 }
0x188d   :  { %v32105_v60 = vadd.f32 %v26010_v16, %v5521_v49 }
0x188e   :  { %v5570_v63 = vsel %vm552_vm3, %v32103_v41, 0 }
0x188f   :  { %v5651_v44 = vand.u32 4294901760, %v5570_v63  ;;  %v5567_v52 = vsel %vm552_vm3, %v32105_v60, 0 }
0x1890   :  { %v5641_v6 = vand.u32 4294901760, %v5567_v52 }
0x1891   :  { %v5652_v55 = vsub.f32 %v5570_v63, %v5651_v44 }
0x1892   :  { %v5642_v7 = vsub.f32 %v5567_v52, %v5641_v6 }
0x1893   :  { %v5653_v46 = vand.u32 4294901760, %v5652_v55 }
0x1894   :  { %v5643_v17 = vand.u32 4294901760, %v5642_v7 }
0x1895   :  { %v5654_v18 = vsub.f32 %v5652_v55, %v5653_v46 }
0x1896   :  { %v5644_v13 = vsub.f32 %v5642_v7, %v5643_v17 }
0x1897   :  { %v5655_v62 = vand.u32 4294901760, %v5654_v18 }
0x1898   :  { %v5645_v19 = vand.u32 4294901760, %v5644_v13  ;;  %v31361_v13 = vmov 1983009808  }
0x189a   :  { %27809 = vmatprep.mubr.f32.mxu0 %v5645_v19  ;;  %v7033_v19 = vunpack.c.l.s4 %v31361_v13 }
0x189b   :  { %27810 = vmatmul.mubr.f32.vlgmr.msra.gmra.mrb[12].mxu0 %v5655_v62 }
0x189c   :  { %29948 = vmatpush3.bf16.msra.mxu0 %v29945_v8  ;;  %27820 = vmatprep.mubr.f32.mxu0 %v5641_v6 }
0x189d   :  { %29950 = vmatprep.subr.bf16.mxu0 %v29949_v14 }
0x18a0   :  { %29952 = vmatpush3.bf16.msra.mxu0 %v29949_v14 }
0x18a1   :  { %29954 = vmatprep.subr.bf16.mxu0 %v29953_v15 }
0x18a3   :  { %27821 = vmatmul.mubr.f32.vlgmr.msra.gmra.mrb[12].mxu0 %v5651_v44 }
0x18a4   :  { %29956 = vmatpush3.bf16.msra.mxu0 %v29953_v15  ;;  %27831 = vmatprep.mubr.f32.mxu0 %v5642_v7 }
0x18a5   :  { %29958 = vmatprep.subr.bf16.mxu0 %v29957_v57 }
0x18a8   :  { %29960 = vmatpush3.bf16.msra.mxu0 %v29957_v57 }
0x18a9   :  { %29962 = vmatprep.subr.bf16.mxu0 %v32086_v35 }
0x18ab   :  { %27832 = vmatmul.mubr.f32.vlgmr.msra.gmra.mrb[12].mxu0 %v5652_v55 }
0x18ac   :  { %29964 = vmatpush3.bf16.msra.mxu0 %v32086_v35  ;;  %27842 = vmatprep.mubr.f32.mxu0 %v5643_v17 }
0x18ad   :  { %29966 = vmatprep.subr.bf16.mxu0 %v32096_v45 }
0x18b0   :  { %29968 = vmatpush3.bf16.msra.mxu0 %v32096_v45 }
0x18b1   :  { %29970 = vmatprep.subr.bf16.mxu0 %v29969_v2 }
0x18b3   :  { %27843 = vmatmul.mubr.f32.vlgmr.msra.gmra.mrb[12].mxu0 %v5653_v46 }
0x18b4   :  { %29972 = vmatpush3.bf16.msra.mxu0 %v29969_v2  ;;  %27853 = vmatprep.mubr.f32.mxu0 %v5641_v6 }
0x18b5   :  { %29974 = vmatprep.subr.bf16.mxu0 %v29973_v56 }
0x18b8   :  { %29976 = vmatpush3.bf16.msra.mxu0 %v29973_v56 }
0x18b9   :  { %29978 = vmatprep.subr.bf16.mxu0 %v32086_v35 }
0x18bb   :  { %27854 = vmatmul.mubr.f32.vlgmr.msra.gmra.mrb[12].mxu0 %v5651_v44 }
0x18bc   :  { %29980 = vmatpush3.bf16.msra.mxu0 %v32086_v35  ;;  %27864 = vmatprep.mubr.f32.mxu0 %v5641_v6 }
0x18bd   :  { %29982 = vmatprep.subr.bf16.mxu0 %v32096_v45 }
0x18c0   :  { %29984 = vmatpush3.bf16.msra.mxu0 %v32096_v45 }
0x18c1   :  { %27867 = vmatprep.subr.mxu0 %v34762_v34 }
0x18c3   :  { %27865 = vmatmul.mubr.f32.vlgmr.msra.gmra.mrb[12].mxu0 %v5651_v44 }
0x18c4   :  { %27869 = vmatprep.mubr.msk.f32.mxu0 %vm31355_vm1, %v34762_v34 }
0x1996   :  { %v27866_v21 = vpop.f32.mrb[12].mxu0 }
0x1997   :  { %v32125_v22 = vadd.f32 %v27866_v21, %v26011_v20  ;;  %v6090_v23 = vpop.f32.mrb[13].mxu0 }
0x1998   :  { %v32127_v50 = vadd.f32 %v26011_v20, %v6090_v23  ;;  %v7034_v23 = vunpack.c.0.s8 %v7033_v19 }
0x1999   :  { %6555 = vrot.lane.b32.xlu0 %v32125_v22, %s31358_s18  ;;  %v6557_v26 = vsel %vm6103_vm11, %v32125_v22, 0 }
0x199a   :  { %6101 = vrot.lane.b32.xlu1 %v32127_v50, %s31358_s18  ;;  %v6104_v24 = vsel %vm6103_vm11, %v32127_v50, 0  ;;  %v32140_v29 = vand.u32 4294901760, %v6557_v26 }
0x199b   :  { %v32135_v25 = vand.u32 4294901760, %v6104_v24 }
0x199c   :  { %v6628_v31 = vsub.f32 %v6557_v26, %v32140_v29 }
0x199d   :  { %v6175_v27 = vsub.f32 %v6104_v24, %v32135_v25 }
0x199e   :  { %v6629_v37 = vand.u32 4294901760, %v6628_v31 }
0x199f   :  { %v6176_v30 = vand.u32 4294901760, %v6175_v27 }
0x19a0   :  { %v6630_v45 = vsub.f32 %v6628_v31, %v6629_v37 }
0x19a1   :  { %v6177_v36 = vsub.f32 %v6175_v27, %v6176_v30 }
0x19a2   :  { %v6631_v61 = vand.u32 4294901760, %v6630_v45 }
0x19a3   :  { %v6178_v43 = vand.u32 4294901760, %v6177_v36 }
0x1a0b   :  { %v6556_v32 = vpop.permute.xlu0 %6555 }
0x1a0c   :  { %v6559_v33 = vsel %vm6103_vm11, %v6556_v32, 0  ;;  %v6102_v9 = vpop.permute.xlu1 %6101 }
0x1a0d   :  { %v6562_v35 = vand.u32 4294901760, %v6559_v33  ;;  %v6106_v11 = vsel %vm6103_vm11, %v6102_v9, 0 }
0x1a0e   :  { %v6109_v38 = vand.u32 4294901760, %v6106_v11 }
0x1a0f   :  { %v6639_v39 = vsub.f32 %v6559_v33, %v6562_v35 }
0x1a10   :  { %v6186_v40 = vsub.f32 %v6106_v11, %v6109_v38  ;;  %27868 = vmatpush3.xpose.msra.mxu0 %v6109_v38 }
0x1a11   :  { %v6640_v42 = vand.u32 4294901760, %v6639_v39  ;;  %27897 = vmatprep.subr.mxu0 %v34762_v34 }
0x1a12   :  { %v6187_v47 = vand.u32 4294901760, %v6186_v40 }
0x1a13   :  { %v6641_v54 = vsub.f32 %v6639_v39, %v6640_v42  ;;  %27870 = vmatmul.mubr.f32.vlgmr.msra.gmra.mrb[14].mxu0 %v6178_v43 }
0x1a14   :  { %v6188_v58 = vsub.f32 %v6186_v40, %v6187_v47  ;;  %27898 = vmatpush3.xpose.msra.mxu0 %v6562_v35  ;;  %27899 = vmatprep.mubr.msk.f32.mxu0 %vm31355_vm1, %v34762_v34 }
0x1a15   :  { %27902 = vmatprep.subr.mxu0 %v34762_v34  ;;  %v6642_v53 = vand.u32 4294901760, %v6641_v54 }
0x1a16   :  { %v6189_v0 = vand.u32 4294901760, %v6188_v58 }
0x1a17   :  { %27900 = vmatmul.mubr.f32.vlgmr.msra.gmra.mrb[16].mxu0 %v6631_v61 }
0x1a18   :  { %27873 = vmatpush3.xpose.msra.mxu1 %v6189_v0  ;;  %27903 = vmatpush3.xpose.msra.mxu0 %v6642_v53 }
0x1a19   :  { %27877 = vmatprep.subr.mxu1 %v34762_v34  ;;  %27904 = vmatprep.mubr.msk.f32.mxu0 %vm31355_vm1, %v34762_v34 }
0x1a1a   :  { %27907 = vmatprep.subr.mxu0 %v34762_v34 }
0x1a1b   :  { %27875 = vmatmul.mubr.f32.vlgmr.msra.gmra.mrb[10].mxu1 %v32135_v25 }
0x1a1c   :  { %27878 = vmatpush3.xpose.msra.mxu1 %v6186_v40  ;;  %27879 = vmatprep.mubr.msk.f32.mxu1 %vm31355_vm1, %v34762_v34 }
0x1a1d   :  { %27882 = vmatprep.subr.mxu1 %v34762_v34 }
0x1a1f   :  { %27905 = vmatmul.mubr.f32.vlgmr.msra.gmra.mrb[16].mxu0 %v32140_v29 }
0x1a20   :  { %27908 = vmatpush3.xpose.msra.mxu0 %v6639_v39  ;;  %27909 = vmatprep.mubr.msk.f32.mxu0 %vm31355_vm1, %v34762_v34 }
0x1a21   :  { %27912 = vmatprep.subr.mxu0 %v34762_v34 }
0x1a23   :  { %27880 = vmatmul.mubr.f32.vlgmr.msra.gmra.mrb[10].mxu1 %v6175_v27  ;;  %v32212_v27 = vsub.s32 %v7034_v23, %v31574_v3 }
0x1a24   :  { %27883 = vmatpush3.xpose.msra.mxu1 %v6109_v38  ;;  %27884 = vmatprep.mubr.msk.f32.mxu1 %vm31355_vm1, %v34762_v34 }
0x1a25   :  { %27887 = vmatprep.subr.mxu1 %v34762_v34 }
0x1a27   :  { %27910 = vmatmul.mubr.f32.vlgmr.msra.gmra.mrb[16].mxu0 %v6628_v31 }
0x1a28   :  { %27913 = vmatpush3.xpose.msra.mxu0 %v6562_v35  ;;  %27914 = vmatprep.mubr.msk.f32.mxu0 %vm31355_vm1, %v34762_v34 }
0x1a29   :  { %27917 = vmatprep.subr.mxu0 %v34762_v34 }
0x1a2b   :  { %27885 = vmatmul.mubr.f32.vlgmr.msra.gmra.mrb[10].mxu1 %v6176_v30 }
0x1a2c   :  { %27888 = vmatpush3.xpose.msra.mxu1 %v6187_v47  ;;  %27889 = vmatprep.mubr.msk.f32.mxu1 %vm31355_vm1, %v34762_v34 }
0x1a2d   :  { %27892 = vmatprep.subr.mxu1 %v34762_v34 }
0x1a2f   :  { %27915 = vmatmul.mubr.f32.vlgmr.msra.gmra.mrb[16].mxu0 %v6629_v37 }
0x1a30   :  { %27918 = vmatpush3.xpose.msra.mxu0 %v6640_v42  ;;  %27919 = vmatprep.mubr.msk.f32.mxu0 %vm31355_vm1, %v34762_v34 }
0x1a31   :  { %27922 = vmatprep.subr.mxu0 %v34762_v34 }
0x1a33   :  { %27890 = vmatmul.mubr.f32.vlgmr.msra.gmra.mrb[10].mxu1 %v32135_v25 }
0x1a34   :  { %27893 = vmatpush3.xpose.msra.mxu1 %v6109_v38  ;;  %27894 = vmatprep.mubr.msk.f32.mxu1 %vm31355_vm1, %v34762_v34 }
0x1a35   :  { %27927 = vmatprep.subr.mxu1 %v34762_v34 }
0x1a37   :  { %27920 = vmatmul.mubr.f32.vlgmr.msra.gmra.mrb[16].mxu0 %v32140_v29 }
0x1a38   :  { %27923 = vmatpush3.xpose.msra.mxu0 %v6562_v35  ;;  %27924 = vmatprep.mubr.msk.f32.mxu0 %vm31355_vm1, %v34762_v34 }
0x1a39   :  { %27957 = vmatprep.subr.mxu0 %v34762_v34 }
0x1a3b   :  { %27895 = vmatmul.mubr.f32.vlgmr.msra.gmra.mrb[10].mxu1 %v32135_v25 }
0x1a3c   :  { %27929 = vmatprep.mubr.msk.f32.mxu1 %vm31355_vm1, %v34762_v34 }
0x1a3f   :  { %27925 = vmatmul.mubr.f32.vlgmr.msra.gmra.mrb[16].mxu0 %v32140_v29 }
0x1a40   :  { %27959 = vmatprep.mubr.msk.f32.mxu0 %vm31355_vm1, %v34762_v34 }
0x1ae6   :  { %v6180_v5 = vpop.f32.mrb[14].mxu0 }
0x1ae7   :  { %v27871_v59 = vpop.f32.mrb[15].mxu0 }
0x1b0e   :  { %v6550_v8 = vpop.f32.mrb[10].mxu1 }
0x1b0f   :  { %v30624_v1 = vadd.f32 %v6550_v8, %v6180_v5  ;;  %v27896_v48 = vpop.f32.mrb[11].mxu1 }
0x1b11   :  { %v7007_v10 = vmul.f32 0.35355338, %v30624_v1 }
0x1b12   :  { %v7003_v51 = vpop.f32.mrb[16].mxu0 }
0x1b13   :  { %v7008_v14 = vmul.f32 0.35355338, %v7003_v51  ;;  %v27926_v15 = vpop.f32.mrb[17].mxu0  ;;  %v7009_v57 = vsel %vm6103_vm11, %v7007_v10, -inf }
0x1b14   :  { %7010 = vmax.xlane.f32.xlu1 %v7009_v57 }
0x1b15   :  { %v7012_v2 = vsel %vm6103_vm11, %v7008_v14, -inf }
0x1b16   :  { %7013 = vmax.xlane.f32.xlu0 %v7012_v2 }
0x1ba1   :  { %v7011_v56 = vpop.xlane.xlu1 %7010 }
0x1ba2   :  { %v7015_v16 = vsub.f32 %v7007_v10, %v7011_v56 }
0x1ba3   :  { %v7014_v28 = vpop.xlane.xlu0 %7013 }
0x1ba4   :  { %v7017_v49 = vmul.f32 1.442695, %v7015_v16  ;;  %v7016_v63 = vsub.f32 %v7008_v14, %v7014_v28 }
0x1ba6   :  { %31249 = vpow2.f32 %v7017_v49  ;;  %v7019_v44 = vmul.f32 1.442695, %v7016_v63 }
0x1ba8   :  { %31251 = vpow2.f32 %v7019_v44 }
0x1bb0   :  { %v31250_v52 = vpop.eup %31249 }
0x1bb1   :  { %v7021_v6 = vsel %vm6103_vm11, %v31250_v52, 0.0 }
0x1bb2   :  { %v31252_v55 = vpop.eup %31251  ;;  %7022 = vadd.xlane.f32.xlu0 %v7021_v6 }
0x1bb3   :  { %v7024_v7 = vsel %vm6103_vm11, %v31252_v55, 0.0 }
0x1bb4   :  { %7025 = vadd.xlane.f32.xlu1 %v7024_v7 }
0x1bc5   :  { %7588 = vrot.lane.b32.xlu1 %v32125_v22, %s31357_s1 }
0x1bc8   :  { %7136 = vrot.lane.b32.xlu0 %v32127_v50, %s31357_s1 }
0x1bc9   :  { %8040 = vrot.lane.b32.xlu1 %v32127_v50, %s31359_s0 }
0x1bcc   :  { %8494 = vrot.lane.b32.xlu0 %v32125_v22, %s31359_s0 }
0x1bcd   :  { %8042 = vrot.lane.b32.xlu1 %v32127_v50, %s31360_s15 }
0x1bd0   :  { %8496 = vrot.lane.b32.xlu0 %v32125_v22, %s31360_s15 }
0x1c3f   :  { %v7023_v46 = vpop.xlane.xlu0 %7022 }
0x1c40   :  { %31253 = vrcp.f32 %v7023_v46 }
0x1c41   :  { %v7026_v17 = vpop.xlane.xlu1 %7025 }
0x1c42   :  { %31255 = vrcp.f32 %v7026_v17 }
0x1c43   :  { %v7137_v18 = vpop.permute.xlu0 %7136 }
0x1c44   :  { %v32203_v62 = vand.u32 4294901760, %v7137_v18 }
0x1c45   :  { %v7589_v20 = vpop.permute.xlu1 %7588 }
0x1c46   :  { %v32205_v21 = vand.u32 4294901760, %v7589_v20  ;;  %27928 = vmatpush3.msra.mxu1 %v32203_v62  ;;  %v32215_v30 = vsub.f32 %v7137_v18, %v32203_v62 }
0x1c47   :  { %27932 = vmatprep.subr.mxu1 %v34762_v34  ;;  %v8495_v2 = vpop.permute.xlu0 %8494 }
0x1c48   :  { %27958 = vmatpush3.msra.mxu0 %v32205_v21  ;;  %v32218_v31 = vsub.f32 %v7589_v20, %v32205_v21  ;;  %v7221_v36 = vand.u32 4294901760, %v32215_v30  ;;  %v8498_v49 = vsel %vm6103_vm11, %v8495_v2, 0 }
0x1c49   :  { %27962 = vmatprep.subr.mxu0 %v34762_v34  ;;  %v8041_v57 = vpop.permute.xlu1 %8040  ;;  %v32286_v6 = vand.u32 4294901760, %v8498_v49 }
0x1c4a   :  { %v31254_v24 = vpop.eup %31253  ;;  %v7673_v38 = vand.u32 4294901760, %v32218_v31  ;;  %v7222_v54 = vsub.f32 %v32215_v30, %v7221_v36  ;;  %v8044_v28 = vsel %vm6103_vm11, %v8041_v57, 0 }
0x1c4b   :  { %v7028_v25 = vmul.f32 %v31254_v24, %v31250_v52  ;;  %v8497_v16 = vpop.permute.xlu0 %8496  ;;  %v32282_v52 = vand.u32 4294901760, %v8044_v28  ;;  %v8569_v17 = vsub.f32 %v8498_v49, %v32286_v6 }
0x1c4c   :  { %v31256_v26 = vpop.eup %31255  ;;  %v7674_v0 = vsub.f32 %v32218_v31, %v7673_v38  ;;  %v7223_v48 = vand.u32 4294901760, %v7222_v54  ;;  %v8500_v44 = vsel %vm6103_vm11, %v8497_v16, 0 }
0x1c4d   :  { %v7030_v29 = vmul.f32 %v31256_v26, %v31252_v55  ;;  %v7140_v32 = vsel %vm6103_vm11, %v7028_v25, 0  ;;  %v32225_v35 = vrot.slane %v7028_v25, %v32212_v27  ;;  %v7031_v45 = vcombine.high %v7028_v25, %v34762_v34  ;;  %v8043_v56 = vpop.permute.xlu1 %8042 }
0x1c4e   :  { %v32221_v33 = vand.u32 4294901760, %v7140_v32  ;;  %v7675_v15 = vand.u32 4294901760, %v7674_v0  ;;  %v8046_v63 = vsel %vm6103_vm11, %v8043_v56, 0  ;;  %v32293_v7 = vand.u32 4294901760, %v8500_v44 }
0x1c4f   :  { %v7592_v9 = vsel %vm6103_vm11, %v7030_v29, 0  ;;  %v32228_v11 = vrot.slane %v7030_v29, %v32212_v27  ;;  %v7046_v61 = vcombine.high %v7030_v29, %v34762_v34  ;;  %v32245_v59 = vrot.slane %v7031_v45, %v32212_v27 }
0x1c50   :  { %v32231_v37 = vand.u32 4294901760, %v7592_v9  ;;  %v7209_v39 = vsub.f32 %v7140_v32, %v32221_v33  ;;  %v32288_v55 = vand.u32 4294901760, %v8046_v63  ;;  %v8115_v46 = vsub.f32 %v8044_v28, %v32282_v52 }
0x1c51   :  { %34808 = vst [vmem:[#allocation6_spill] sm:$0xff] %v32245_v59  ;;  %v32248_v8 = vrot.slane %v7046_v61, %v32212_v27  ;;  %v8580_v13 = vsub.f32 %v8500_v44, %v32293_v7  ;;  %v8570_v20 = vand.u32 4294901760, %v8569_v17 }
0x1c52   :  { %v7661_v43 = vsub.f32 %v7592_v9, %v32231_v37  ;;  %v7210_v47 = vand.u32 4294901760, %v7209_v39  ;;  %v8126_v18 = vsub.f32 %v8046_v63, %v32288_v55  ;;  %v8116_v19 = vand.u32 4294901760, %v8115_v46 }
0x1c53   :  { %34809 = vst [vmem:[#allocation7_spill] sm:$0xff] %v32248_v8  ;;  %v8581_v24 = vand.u32 4294901760, %v8580_v13 }
0x1c54   :  { %v7662_v58 = vand.u32 4294901760, %v7661_v43  ;;  %v7211_v53 = vsub.f32 %v7209_v39, %v7210_v47  ;;  %v8127_v23 = vand.u32 4294901760, %v8126_v18  ;;  %v8117_v25 = vsub.f32 %v8115_v46, %v8116_v19 }
0x1c55   :  { %v8582_v29 = vsub.f32 %v8580_v13, %v8581_v24 }
0x1c56   :  { %v7663_v5 = vsub.f32 %v7661_v43, %v7662_v58  ;;  %v7212_v1 = vand.u32 4294901760, %v7211_v53  ;;  %v8128_v26 = vsub.f32 %v8126_v18, %v8127_v23 }
0x1c57   :  { %v8583_v32 = vand.u32 4294901760, %v8582_v29 }
0x1c58   :  { %v7664_v10 = vand.u32 4294901760, %v7663_v5  ;;  %27930 = vmatmul.mubr.f32.vlgmr.msra.gmra.mrb[12].mxu1 %v7212_v1 }
0x1c59   :  { %27933 = vmatpush3.msra.mxu1 %v7223_v48  ;;  %27934 = vmatprep.mubr.msk.f32.mxu1 %vm31355_vm1, %v34762_v34 }
0x1c5a   :  { %27960 = vmatmul.mubr.f32.vlgmr.msra.gmra.mrb[18].mxu0 %v7664_v10  ;;  %27937 = vmatprep.subr.mxu1 %v34762_v34 }
0x1c5b   :  { %27963 = vmatpush3.msra.mxu0 %v7675_v15  ;;  %27964 = vmatprep.mubr.msk.f32.mxu0 %vm31355_vm1, %v34762_v34 }
0x1c5c   :  { %27967 = vmatprep.subr.mxu0 %v34762_v34 }
0x1c60   :  { %27935 = vmatmul.mubr.f32.vlgmr.msra.gmra.mrb[12].mxu1 %v32221_v33 }
0x1c61   :  { %27938 = vmatpush3.msra.mxu1 %v32215_v30  ;;  %27939 = vmatprep.mubr.msk.f32.mxu1 %vm31355_vm1, %v34762_v34  ;;  %v8129_v30 = vand.u32 4294901760, %v8128_v26 }
0x1c62   :  { %27965 = vmatmul.mubr.f32.vlgmr.msra.gmra.mrb[18].mxu0 %v32231_v37  ;;  %27942 = vmatprep.subr.mxu1 %v34762_v34 }
0x1c63   :  { %27968 = vmatpush3.msra.mxu0 %v32218_v31  ;;  %27969 = vmatprep.mubr.msk.f32.mxu0 %vm31355_vm1, %v34762_v34 }
0x1c64   :  { %27972 = vmatprep.subr.mxu0 %v34762_v34 }
0x1c68   :  { %27940 = vmatmul.mubr.f32.vlgmr.msra.gmra.mrb[12].mxu1 %v7209_v39 }
0x1c69   :  { %27943 = vmatpush3.msra.mxu1 %v32203_v62  ;;  %27944 = vmatprep.mubr.msk.f32.mxu1 %vm31355_vm1, %v34762_v34 }
0x1c6a   :  { %27970 = vmatmul.mubr.f32.vlgmr.msra.gmra.mrb[18].mxu0 %v7661_v43  ;;  %27947 = vmatprep.subr.mxu1 %v34762_v34 }
0x1c6b   :  { %27973 = vmatpush3.msra.mxu0 %v32205_v21  ;;  %27974 = vmatprep.mubr.msk.f32.mxu0 %vm31355_vm1, %v34762_v34 }
0x1c6c   :  { %27977 = vmatprep.subr.mxu0 %v34762_v34 }
0x1c70   :  { %27945 = vmatmul.mubr.f32.vlgmr.msra.gmra.mrb[12].mxu1 %v7210_v47 }
0x1c71   :  { %27948 = vmatpush3.msra.mxu1 %v7221_v36  ;;  %27949 = vmatprep.mubr.msk.f32.mxu1 %vm31355_vm1, %v34762_v34 }
0x1c72   :  { %27975 = vmatmul.mubr.f32.vlgmr.msra.gmra.mrb[18].mxu0 %v7662_v58  ;;  %27952 = vmatprep.subr.mxu1 %v34762_v34 }
0x1c73   :  { %27978 = vmatpush3.msra.mxu0 %v7673_v38  ;;  %27979 = vmatprep.mubr.msk.f32.mxu0 %vm31355_vm1, %v34762_v34 }
0x1c74   :  { %27982 = vmatprep.subr.mxu0 %v34762_v34 }
0x1c78   :  { %27950 = vmatmul.mubr.f32.vlgmr.msra.gmra.mrb[12].mxu1 %v32221_v33 }
0x1c79   :  { %27953 = vmatpush3.msra.mxu1 %v32203_v62  ;;  %27954 = vmatprep.mubr.msk.f32.mxu1 %vm31355_vm1, %v34762_v34  ;;  %v8571_v62 = vsub.f32 %v8569_v17, %v8570_v20 }
0x1c7a   :  { %27980 = vmatmul.mubr.f32.vlgmr.msra.gmra.mrb[18].mxu0 %v32231_v37  ;;  %27987 = vmatprep.subr.mxu1 %v34762_v34 }
0x1c7b   :  { %27983 = vmatpush3.msra.mxu0 %v32205_v21  ;;  %27984 = vmatprep.mubr.msk.f32.mxu0 %vm31355_vm1, %v34762_v34  ;;  %v8118_v21 = vand.u32 4294901760, %v8117_v25  ;;  %v8572_v31 = vand.u32 4294901760, %v8571_v62 }
0x1c7c   :  { %28017 = vmatprep.subr.mxu0 %v34762_v34 }
0x1c80   :  { %27955 = vmatmul.mubr.f32.vlgmr.msra.gmra.mrb[12].mxu1 %v32221_v33 }
0x1c81   :  { %27988 = vmatpush3.xpose.msra.mxu1 %v32288_v55  ;;  %27989 = vmatprep.mubr.msk.f32.mxu1 %vm31355_vm1, %v34762_v34 }
0x1c82   :  { %27985 = vmatmul.mubr.f32.vlgmr.msra.gmra.mrb[18].mxu0 %v32231_v37  ;;  %27992 = vmatprep.subr.mxu1 %v34762_v34 }
0x1c83   :  { %28018 = vmatpush3.xpose.msra.mxu0 %v32293_v7  ;;  %28019 = vmatprep.mubr.msk.f32.mxu0 %vm31355_vm1, %v34762_v34 }
0x1c84   :  { %27990 = vmatmul.mubr.f32.vlgmr.msra.gmra.mrb[14].mxu1 %v8118_v21  ;;  %28022 = vmatprep.subr.mxu0 %v34762_v34 }
0x1c85   :  { %27993 = vmatpush3.xpose.msra.mxu1 %v8129_v30  ;;  %27994 = vmatprep.mubr.msk.f32.mxu1 %vm31355_vm1, %v34762_v34 }
0x1c86   :  { %28020 = vmatmul.mubr.f32.vlgmr.msra.gmra.mrb[20].mxu0 %v8572_v31  ;;  %27997 = vmatprep.subr.mxu1 %v34762_v34 }
0x1c87   :  { %28023 = vmatpush3.xpose.msra.mxu0 %v8583_v32  ;;  %28024 = vmatprep.mubr.msk.f32.mxu0 %vm31355_vm1, %v34762_v34 }
0x1c88   :  { %28027 = vmatprep.subr.mxu0 %v34762_v34 }
0x1c8c   :  { %27995 = vmatmul.mubr.f32.vlgmr.msra.gmra.mrb[14].mxu1 %v32282_v52 }
0x1c8d   :  { %27998 = vmatpush3.xpose.msra.mxu1 %v8126_v18  ;;  %27999 = vmatprep.mubr.msk.f32.mxu1 %vm31355_vm1, %v34762_v34 }
0x1c8e   :  { %28025 = vmatmul.mubr.f32.vlgmr.msra.gmra.mrb[20].mxu0 %v32286_v6  ;;  %28002 = vmatprep.subr.mxu1 %v34762_v34 }
0x1c8f   :  { %28028 = vmatpush3.xpose.msra.mxu0 %v8580_v13  ;;  %28029 = vmatprep.mubr.msk.f32.mxu0 %vm31355_vm1, %v34762_v34 }
0x1c90   :  { %28032 = vmatprep.subr.mxu0 %v34762_v34 }
0x1c94   :  { %28000 = vmatmul.mubr.f32.vlgmr.msra.gmra.mrb[14].mxu1 %v8115_v46 }
0x1c95   :  { %28003 = vmatpush3.xpose.msra.mxu1 %v32288_v55  ;;  %28004 = vmatprep.mubr.msk.f32.mxu1 %vm31355_vm1, %v34762_v34 }
0x1c96   :  { %28030 = vmatmul.mubr.f32.vlgmr.msra.gmra.mrb[20].mxu0 %v8569_v17  ;;  %28007 = vmatprep.subr.mxu1 %v34762_v34 }
0x1c97   :  { %28033 = vmatpush3.xpose.msra.mxu0 %v32293_v7  ;;  %28034 = vmatprep.mubr.msk.f32.mxu0 %vm31355_vm1, %v34762_v34 }
0x1c98   :  { %28037 = vmatprep.subr.mxu0 %v34762_v34 }
0x1c9c   :  { %28005 = vmatmul.mubr.f32.vlgmr.msra.gmra.mrb[14].mxu1 %v8116_v19 }
0x1c9d   :  { %28008 = vmatpush3.xpose.msra.mxu1 %v8127_v23  ;;  %28009 = vmatprep.mubr.msk.f32.mxu1 %vm31355_vm1, %v34762_v34 }
0x1c9e   :  { %28035 = vmatmul.mubr.f32.vlgmr.msra.gmra.mrb[20].mxu0 %v8570_v20  ;;  %28012 = vmatprep.subr.mxu1 %v34762_v34 }
0x1c9f   :  { %28038 = vmatpush3.xpose.msra.mxu0 %v8581_v24  ;;  %28039 = vmatprep.mubr.msk.f32.mxu0 %vm31355_vm1, %v34762_v34 }
0x1ca0   :  { %28042 = vmatprep.subr.mxu0 %v34762_v34 }
0x1ca4   :  { %28010 = vmatmul.mubr.f32.vlgmr.msra.gmra.mrb[14].mxu1 %v32282_v52 }
0x1ca5   :  { %28013 = vmatpush3.xpose.msra.mxu1 %v32288_v55  ;;  %28014 = vmatprep.mubr.msk.f32.mxu1 %vm31355_vm1, %v34762_v34 }
0x1ca6   :  { %28040 = vmatmul.mubr.f32.vlgmr.msra.gmra.mrb[20].mxu0 %v32286_v6  ;;  %28047 = vmatprep.subr.mxu1 %v34762_v34 }
0x1ca7   :  { %28043 = vmatpush3.xpose.msra.mxu0 %v32293_v7  ;;  %28044 = vmatprep.mubr.msk.f32.mxu0 %vm31355_vm1, %v34762_v34 }
0x1ca8   :  { %28077 = vmatprep.subr.mxu0 %v34762_v34 }
0x1cac   :  { %28015 = vmatmul.mubr.f32.vlgmr.msra.gmra.mrb[14].mxu1 %v32282_v52 }
0x1cad   :  { %28049 = vmatprep.mubr.msk.f32.mxu1 %vm31355_vm1, %v34762_v34 }
0x1cae   :  { %28045 = vmatmul.mubr.f32.vlgmr.msra.gmra.mrb[20].mxu0 %v32286_v6 }
0x1caf   :  { %28079 = vmatprep.mubr.msk.f32.mxu0 %vm31355_vm1, %v34762_v34 }
0x1d53   :  { %v32364_v33 = vpop.f32.mrb[12].mxu1 }
0x1d54   :  { %v27956_v9 = vpop.f32.mrb[13].mxu1 }
0x1d55   :  { %v32366_v36 = vpop.f32.mrb[18].mxu0 }
0x1d56   :  { %v27986_v37 = vpop.f32.mrb[19].mxu0 }
0x1d7f   :  { %v8490_v38 = vpop.f32.mrb[14].mxu1 }
0x1d80   :  { %v8948_v39 = vmul.f32 0.35355338, %v8490_v38  ;;  %v28016_v43 = vpop.f32.mrb[15].mxu1 }
0x1d81   :  { %v8944_v45 = vpop.f32.mrb[20].mxu0 }
0x1d82   :  { %v8949_v47 = vmul.f32 0.35355338, %v8944_v45  ;;  %v28046_v54 = vpop.f32.mrb[21].mxu0  ;;  %v8950_v58 = vsel %vm6103_vm11, %v8948_v39, -inf }
0x1d83   :  { %8951 = vmax.xlane.f32.xlu1 %v8950_v58 }
0x1d84   :  { %v8953_v61 = vsel %vm6103_vm11, %v8949_v47, -inf }
0x1d85   :  { %8954 = vmax.xlane.f32.xlu0 %v8953_v61 }
0x1e10   :  { %v8952_v53 = vpop.xlane.xlu1 %8951 }
0x1e11   :  { %v8956_v0 = vsub.f32 %v8948_v39, %v8952_v53 }
0x1e12   :  { %v8955_v5 = vpop.xlane.xlu0 %8954 }
0x1e13   :  { %v8957_v1 = vsub.f32 %v8949_v47, %v8955_v5  ;;  %v8958_v48 = vmul.f32 1.442695, %v8956_v0 }
0x1e15   :  { %v8960_v10 = vmul.f32 1.442695, %v8957_v1  ;;  %31257 = vpow2.f32 %v8958_v48 }
0x1e17   :  { %31259 = vpow2.f32 %v8960_v10 }
0x1e1f   :  { %v31258_v15 = vpop.eup %31257 }
0x1e20   :  { %v8962_v2 = vsel %vm6103_vm11, %v31258_v15, 0.0 }
0x1e21   :  { %v31260_v57 = vpop.eup %31259  ;;  %8963 = vadd.xlane.f32.xlu0 %v8962_v2 }
0x1e22   :  { %v8965_v56 = vsel %vm6103_vm11, %v31260_v57, 0.0 }
0x1e23   :  { %8966 = vadd.xlane.f32.xlu1 %v8965_v56 }
0x1e34   :  { %9525 = vrot.lane.b32.xlu1 %v32125_v22, %s31362_s16 }
0x1e37   :  { %9073 = vrot.lane.b32.xlu0 %v32127_v50, %s31362_s16 }
0x1e38   :  { %9977 = vrot.lane.b32.xlu1 %v32127_v50, %s31363_s17 }
0x1e3b   :  { %10431 = vrot.lane.b32.xlu0 %v32125_v22, %s31363_s17 }
0x1e3c   :  { %9979 = vrot.lane.b32.xlu1 %v32127_v50, %s31364_s19 }
0x1e3f   :  { %10433 = vrot.lane.b32.xlu0 %v32125_v22, %s31364_s19 }
0x1eae   :  { %v8964_v16 = vpop.xlane.xlu0 %8963 }
0x1eaf   :  { %31261 = vrcp.f32 %v8964_v16 }
0x1eb0   :  { %v8967_v28 = vpop.xlane.xlu1 %8966 }
0x1eb1   :  { %31263 = vrcp.f32 %v8967_v28 }
0x1eb2   :  { %v9074_v49 = vpop.permute.xlu0 %9073 }
0x1eb3   :  { %v32384_v63 = vand.u32 4294901760, %v9074_v49 }
0x1eb4   :  { %v9526_v44 = vpop.permute.xlu1 %9525 }
0x1eb5   :  { %v32386_v52 = vand.u32 4294901760, %v9526_v44  ;;  %28048 = vmatpush3.msra.mxu1 %v32384_v63  ;;  %v32393_v46 = vsub.f32 %v9074_v49, %v32384_v63 }
0x1eb6   :  { %28052 = vmatprep.subr.mxu1 %v34762_v34 }
0x1eb7   :  { %28078 = vmatpush3.msra.mxu0 %v32386_v52  ;;  %v32396_v18 = vsub.f32 %v9526_v44, %v32386_v52  ;;  %v9158_v23 = vand.u32 4294901760, %v32393_v46 }
0x1eb8   :  { %28082 = vmatprep.subr.mxu0 %v34762_v34  ;;  %v9978_v10 = vpop.permute.xlu1 %9977 }
0x1eb9   :  { %v31262_v6 = vpop.eup %31261  ;;  %v9610_v25 = vand.u32 4294901760, %v32396_v18  ;;  %v9159_v32 = vsub.f32 %v32393_v46, %v9158_v23  ;;  %v9981_v56 = vsel %vm6103_vm11, %v9978_v10, 0 }
0x1eba   :  { %v8969_v7 = vmul.f32 %v31262_v6, %v31258_v15  ;;  %v10432_v15 = vpop.permute.xlu0 %10431  ;;  %v32460_v44 = vand.u32 4294901760, %v9981_v56 }
0x1ebb   :  { %v31264_v55 = vpop.eup %31263  ;;  %v9611_v43 = vsub.f32 %v32396_v18, %v9610_v25  ;;  %v9160_v53 = vand.u32 4294901760, %v9159_v32  ;;  %v10435_v16 = vsel %vm6103_vm11, %v10432_v15, 0 }
0x1ebc   :  { %v8971_v17 = vmul.f32 %v31264_v55, %v31260_v57  ;;  %v9077_v13 = vsel %vm6103_vm11, %v8969_v7, 0  ;;  %v32409_v29 = vrot.slane %v8969_v7, %v32212_v27  ;;  %v8972_v31 = vcombine.high %v8969_v7, %v34762_v34  ;;  %v9980_v57 = vpop.permute.xlu1 %9979 }
0x1ebd   :  { %v32399_v19 = vand.u32 4294901760, %v9077_v13  ;;  %v9612_v5 = vand.u32 4294901760, %v9611_v43  ;;  %v9983_v28 = vsel %vm6103_vm11, %v9980_v57, 0  ;;  %v32464_v6 = vand.u32 4294901760, %v10435_v16 }
0x1ebe   :  { %v9529_v20 = vsel %vm6103_vm11, %v8971_v17, 0  ;;  %v32412_v21 = vrot.slane %v8971_v17, %v32212_v27  ;;  %v8987_v45 = vcombine.high %v8971_v17, %v34762_v34  ;;  %v32423_v58 = vrot.slane %v8972_v31, %v32212_v27  ;;  %v10434_v2 = vpop.permute.xlu0 %10433 }
0x1ebf   :  { %v32403_v24 = vand.u32 4294901760, %v9529_v20  ;;  %v9146_v62 = vsub.f32 %v9077_v13, %v32399_v19  ;;  %v10437_v49 = vsel %vm6103_vm11, %v10434_v2, 0  ;;  %v32466_v55 = vand.u32 4294901760, %v9983_v28 }
0x1ec0   :  { %v32426_v61 = vrot.slane %v8987_v45, %v32212_v27  ;;  %v32471_v7 = vand.u32 4294901760, %v10437_v49  ;;  %v10506_v17 = vsub.f32 %v10435_v16, %v32464_v6 }
0x1ec1   :  { %v9598_v26 = vsub.f32 %v9529_v20, %v32403_v24  ;;  %v9147_v30 = vand.u32 4294901760, %v9146_v62 }
0x1ec2   :  { %v10517_v13 = vsub.f32 %v10437_v49, %v32471_v7 }
0x1ec3   :  { %v9599_v9 = vand.u32 4294901760, %v9598_v26  ;;  %v9148_v39 = vsub.f32 %v9146_v62, %v9147_v30 }
0x1ec5   :  { %v9600_v47 = vsub.f32 %v9598_v26, %v9599_v9  ;;  %v9149_v54 = vand.u32 4294901760, %v9148_v39 }
0x1ec7   :  { %v9601_v0 = vand.u32 4294901760, %v9600_v47  ;;  %28050 = vmatmul.mubr.f32.vlgmr.msra.gmra.mrb[16].mxu1 %v9149_v54 }
0x1ec8   :  { %28053 = vmatpush3.msra.mxu1 %v9160_v53  ;;  %28054 = vmatprep.mubr.msk.f32.mxu1 %vm31355_vm1, %v34762_v34 }
0x1ec9   :  { %28080 = vmatmul.mubr.f32.vlgmr.msra.gmra.mrb[22].mxu0 %v9601_v0  ;;  %28057 = vmatprep.subr.mxu1 %v34762_v34 }
0x1eca   :  { %28083 = vmatpush3.msra.mxu0 %v9612_v5  ;;  %28084 = vmatprep.mubr.msk.f32.mxu0 %vm31355_vm1, %v34762_v34 }
0x1ecb   :  { %28087 = vmatprep.subr.mxu0 %v34762_v34 }
0x1ecf   :  { %28055 = vmatmul.mubr.f32.vlgmr.msra.gmra.mrb[16].mxu1 %v32399_v19 }
0x1ed0   :  { %28058 = vmatpush3.msra.mxu1 %v32393_v46  ;;  %28059 = vmatprep.mubr.msk.f32.mxu1 %vm31355_vm1, %v34762_v34  ;;  %v10052_v46 = vsub.f32 %v9981_v56, %v32460_v44 }
0x1ed1   :  { %28085 = vmatmul.mubr.f32.vlgmr.msra.gmra.mrb[22].mxu0 %v32403_v24  ;;  %28062 = vmatprep.subr.mxu1 %v34762_v34 }
0x1ed2   :  { %28088 = vmatpush3.msra.mxu0 %v32396_v18  ;;  %28089 = vmatprep.mubr.msk.f32.mxu0 %vm31355_vm1, %v34762_v34  ;;  %v10063_v18 = vsub.f32 %v9983_v28, %v32466_v55  ;;  %v10053_v20 = vand.u32 4294901760, %v10052_v46 }
0x1ed3   :  { %28092 = vmatprep.subr.mxu0 %v34762_v34 }
0x1ed7   :  { %28060 = vmatmul.mubr.f32.vlgmr.msra.gmra.mrb[16].mxu1 %v9146_v62  ;;  %v10518_v62 = vand.u32 4294901760, %v10517_v13 }
0x1ed8   :  { %28063 = vmatpush3.msra.mxu1 %v32384_v63  ;;  %28064 = vmatprep.mubr.msk.f32.mxu1 %vm31355_vm1, %v34762_v34 }
0x1ed9   :  { %28090 = vmatmul.mubr.f32.vlgmr.msra.gmra.mrb[22].mxu0 %v9598_v26  ;;  %28067 = vmatprep.subr.mxu1 %v34762_v34  ;;  %v10054_v26 = vsub.f32 %v10052_v46, %v10053_v20  ;;  %v10519_v31 = vsub.f32 %v10517_v13, %v10518_v62 }
0x1eda   :  { %28093 = vmatpush3.msra.mxu0 %v32386_v52  ;;  %28094 = vmatprep.mubr.msk.f32.mxu0 %vm31355_vm1, %v34762_v34 }
0x1edb   :  { %28097 = vmatprep.subr.mxu0 %v34762_v34 }
0x1edf   :  { %28065 = vmatmul.mubr.f32.vlgmr.msra.gmra.mrb[16].mxu1 %v9147_v30 }
0x1ee0   :  { %28068 = vmatpush3.msra.mxu1 %v9158_v23  ;;  %28069 = vmatprep.mubr.msk.f32.mxu1 %vm31355_vm1, %v34762_v34  ;;  %v10507_v23 = vand.u32 4294901760, %v10506_v17 }
0x1ee1   :  { %28095 = vmatmul.mubr.f32.vlgmr.msra.gmra.mrb[22].mxu0 %v9599_v9  ;;  %28072 = vmatprep.subr.mxu1 %v34762_v34 }
0x1ee2   :  { %28098 = vmatpush3.msra.mxu0 %v9610_v25  ;;  %28099 = vmatprep.mubr.msk.f32.mxu0 %vm31355_vm1, %v34762_v34  ;;  %v10064_v25 = vand.u32 4294901760, %v10063_v18 }
0x1ee3   :  { %28102 = vmatprep.subr.mxu0 %v34762_v34 }
0x1ee4   :  { %v10065_v30 = vsub.f32 %v10063_v18, %v10064_v25 }
0x1ee6   :  { %v10066_v32 = vand.u32 4294901760, %v10065_v30 }
0x1ee7   :  { %28070 = vmatmul.mubr.f32.vlgmr.msra.gmra.mrb[16].mxu1 %v32399_v19 }
0x1ee8   :  { %28073 = vmatpush3.msra.mxu1 %v32384_v63  ;;  %28074 = vmatprep.mubr.msk.f32.mxu1 %vm31355_vm1, %v34762_v34  ;;  %v10508_v63 = vsub.f32 %v10506_v17, %v10507_v23 }
0x1ee9   :  { %28100 = vmatmul.mubr.f32.vlgmr.msra.gmra.mrb[22].mxu0 %v32403_v24  ;;  %28107 = vmatprep.subr.mxu1 %v34762_v34 }
0x1eea   :  { %28103 = vmatpush3.msra.mxu0 %v32386_v52  ;;  %28104 = vmatprep.mubr.msk.f32.mxu0 %vm31355_vm1, %v34762_v34  ;;  %v10055_v52 = vand.u32 4294901760, %v10054_v26  ;;  %v10509_v9 = vand.u32 4294901760, %v10508_v63 }
0x1eeb   :  { %28137 = vmatprep.subr.mxu0 %v34762_v34 }
0x1eef   :  { %28075 = vmatmul.mubr.f32.vlgmr.msra.gmra.mrb[16].mxu1 %v32399_v19  ;;  %v10520_v19 = vand.u32 4294901760, %v10519_v31 }
0x1ef0   :  { %28108 = vmatpush3.xpose.msra.mxu1 %v32466_v55  ;;  %28109 = vmatprep.mubr.msk.f32.mxu1 %vm31355_vm1, %v34762_v34 }
0x1ef1   :  { %28105 = vmatmul.mubr.f32.vlgmr.msra.gmra.mrb[22].mxu0 %v32403_v24  ;;  %28112 = vmatprep.subr.mxu1 %v34762_v34 }
0x1ef2   :  { %28138 = vmatpush3.xpose.msra.mxu0 %v32471_v7  ;;  %28139 = vmatprep.mubr.msk.f32.mxu0 %vm31355_vm1, %v34762_v34 }
0x1ef3   :  { %28110 = vmatmul.mubr.f32.vlgmr.msra.gmra.mrb[18].mxu1 %v10055_v52  ;;  %28142 = vmatprep.subr.mxu0 %v34762_v34 }
0x1ef4   :  { %28113 = vmatpush3.xpose.msra.mxu1 %v10066_v32  ;;  %28114 = vmatprep.mubr.msk.f32.mxu1 %vm31355_vm1, %v34762_v34 }
0x1ef5   :  { %28140 = vmatmul.mubr.f32.vlgmr.msra.gmra.mrb[24].mxu0 %v10509_v9  ;;  %28117 = vmatprep.subr.mxu1 %v34762_v34 }
0x1ef6   :  { %28143 = vmatpush3.xpose.msra.mxu0 %v10520_v19  ;;  %28144 = vmatprep.mubr.msk.f32.mxu0 %vm31355_vm1, %v34762_v34 }
0x1ef7   :  { %28147 = vmatprep.subr.mxu0 %v34762_v34 }
0x1efb   :  { %28115 = vmatmul.mubr.f32.vlgmr.msra.gmra.mrb[18].mxu1 %v32460_v44 }
0x1efc   :  { %28118 = vmatpush3.xpose.msra.mxu1 %v10063_v18  ;;  %28119 = vmatprep.mubr.msk.f32.mxu1 %vm31355_vm1, %v34762_v34 }
0x1efd   :  { %28145 = vmatmul.mubr.f32.vlgmr.msra.gmra.mrb[24].mxu0 %v32464_v6  ;;  %28122 = vmatprep.subr.mxu1 %v34762_v34 }
0x1efe   :  { %28148 = vmatpush3.xpose.msra.mxu0 %v10517_v13  ;;  %28149 = vmatprep.mubr.msk.f32.mxu0 %vm31355_vm1, %v34762_v34 }
0x1eff   :  { %28152 = vmatprep.subr.mxu0 %v34762_v34 }
0x1f03   :  { %28120 = vmatmul.mubr.f32.vlgmr.msra.gmra.mrb[18].mxu1 %v10052_v46 }
0x1f04   :  { %28123 = vmatpush3.xpose.msra.mxu1 %v32466_v55  ;;  %28124 = vmatprep.mubr.msk.f32.mxu1 %vm31355_vm1, %v34762_v34 }
0x1f05   :  { %28150 = vmatmul.mubr.f32.vlgmr.msra.gmra.mrb[24].mxu0 %v10506_v17  ;;  %28127 = vmatprep.subr.mxu1 %v34762_v34 }
0x1f06   :  { %28153 = vmatpush3.xpose.msra.mxu0 %v32471_v7  ;;  %28154 = vmatprep.mubr.msk.f32.mxu0 %vm31355_vm1, %v34762_v34 }
0x1f07   :  { %28157 = vmatprep.subr.mxu0 %v34762_v34 }
0x1f0b   :  { %28125 = vmatmul.mubr.f32.vlgmr.msra.gmra.mrb[18].mxu1 %v10053_v20 }
0x1f0c   :  { %28128 = vmatpush3.xpose.msra.mxu1 %v10064_v25  ;;  %28129 = vmatprep.mubr.msk.f32.mxu1 %vm31355_vm1, %v34762_v34 }
0x1f0d   :  { %28155 = vmatmul.mubr.f32.vlgmr.msra.gmra.mrb[24].mxu0 %v10507_v23  ;;  %28132 = vmatprep.subr.mxu1 %v34762_v34 }
0x1f0e   :  { %28158 = vmatpush3.xpose.msra.mxu0 %v10518_v62  ;;  %28159 = vmatprep.mubr.msk.f32.mxu0 %vm31355_vm1, %v34762_v34 }
0x1f0f   :  { %28162 = vmatprep.subr.mxu0 %v34762_v34 }
0x1f13   :  { %28130 = vmatmul.mubr.f32.vlgmr.msra.gmra.mrb[18].mxu1 %v32460_v44 }
0x1f14   :  { %28133 = vmatpush3.xpose.msra.mxu1 %v32466_v55  ;;  %28134 = vmatprep.mubr.msk.f32.mxu1 %vm31355_vm1, %v34762_v34 }
0x1f15   :  { %28160 = vmatmul.mubr.f32.vlgmr.msra.gmra.mrb[24].mxu0 %v32464_v6  ;;  %28167 = vmatprep.subr.mxu1 %v34762_v34 }
0x1f16   :  { %28163 = vmatpush3.xpose.msra.mxu0 %v32471_v7  ;;  %28164 = vmatprep.mubr.msk.f32.mxu0 %vm31355_vm1, %v34762_v34 }
0x1f17   :  { %28197 = vmatprep.subr.mxu0 %v34762_v34 }
0x1f1b   :  { %28135 = vmatmul.mubr.f32.vlgmr.msra.gmra.mrb[18].mxu1 %v32460_v44 }
0x1f1c   :  { %28169 = vmatprep.mubr.msk.f32.mxu1 %vm31355_vm1, %v34762_v34 }
0x1f1d   :  { %28165 = vmatmul.mubr.f32.vlgmr.msra.gmra.mrb[24].mxu0 %v32464_v6 }
0x1f1e   :  { %28199 = vmatprep.mubr.msk.f32.mxu0 %vm31355_vm1, %v34762_v34 }
0x1fc2   :  { %v32542_v24 = vpop.f32.mrb[16].mxu1 }
0x1fc3   :  { %v28076_v39 = vpop.f32.mrb[17].mxu1 }
0x1fc4   :  { %v32544_v43 = vpop.f32.mrb[22].mxu0 }
0x1fc5   :  { %v28106_v45 = vpop.f32.mrb[23].mxu0 }
0x1fee   :  { %v10427_v47 = vpop.f32.mrb[18].mxu1 }
0x1fef   :  { %v10885_v54 = vmul.f32 0.35355338, %v10427_v47  ;;  %v28136_v53 = vpop.f32.mrb[19].mxu1 }
0x1ff0   :  { %v10881_v0 = vpop.f32.mrb[24].mxu0 }
0x1ff1   :  { %v10886_v5 = vmul.f32 0.35355338, %v10881_v0  ;;  %v28166_v10 = vpop.f32.mrb[25].mxu0  ;;  %v10887_v15 = vsel %vm6103_vm11, %v10885_v54, -inf }
0x1ff2   :  { %10888 = vmax.xlane.f32.xlu1 %v10887_v15 }
0x1ff3   :  { %v10890_v57 = vsel %vm6103_vm11, %v10886_v5, -inf }
0x1ff4   :  { %10891 = vmax.xlane.f32.xlu0 %v10890_v57 }
0x207f   :  { %v10889_v2 = vpop.xlane.xlu1 %10888 }
0x2080   :  { %v10893_v56 = vsub.f32 %v10885_v54, %v10889_v2 }
0x2081   :  { %v10892_v16 = vpop.xlane.xlu0 %10891 }
0x2082   :  { %v10894_v28 = vsub.f32 %v10886_v5, %v10892_v16  ;;  %v10895_v49 = vmul.f32 1.442695, %v10893_v56  ;;  %v5556_v56 = vld [vmem:[%s34759_s5 + $0x78] sm:$0xff] }
0x2084   :  { %v10897_v44 = vmul.f32 1.442695, %v10894_v28  ;;  %31265 = vpow2.f32 %v10895_v49 }
0x2086   :  { %31267 = vpow2.f32 %v10897_v44 }
0x208e   :  { %v31266_v6 = vpop.eup %31265 }
0x208f   :  { %v10899_v7 = vsel %vm6103_vm11, %v31266_v6, 0.0 }
0x2090   :  { %v31268_v55 = vpop.eup %31267  ;;  %10900 = vadd.xlane.f32.xlu0 %v10899_v7 }
0x2091   :  { %v10902_v46 = vsel %vm6103_vm11, %v31268_v55, 0.0 }
0x2092   :  { %10903 = vadd.xlane.f32.xlu1 %v10902_v46 }
0x20a3   :  { %11462 = vrot.lane.b32.xlu1 %v32125_v22, %s31365_s20 }
0x20a6   :  { %11010 = vrot.lane.b32.xlu0 %v32127_v50, %s31365_s20 }
0x20a7   :  { %11914 = vrot.lane.b32.xlu1 %v32127_v50, %s31366_s21 }
0x20aa   :  { %12368 = vrot.lane.b32.xlu0 %v32125_v22, %s31366_s21 }
0x20ab   :  { %11916 = vrot.lane.b32.xlu1 %v32127_v50, %s31367_s22 }
0x20ae   :  { %12370 = vrot.lane.b32.xlu0 %v32125_v22, %s31367_s22 }
0x211d   :  { %v10901_v17 = vpop.xlane.xlu0 %10900 }
0x211e   :  { %31269 = vrcp.f32 %v10901_v17 }
0x211f   :  { %v10904_v18 = vpop.xlane.xlu1 %10903 }
0x2120   :  { %31271 = vrcp.f32 %v10904_v18 }
0x2121   :  { %v11011_v13 = vpop.permute.xlu0 %11010 }
0x2122   :  { %v32562_v20 = vand.u32 4294901760, %v11011_v13 }
0x2123   :  { %v11463_v23 = vpop.permute.xlu1 %11462 }
0x2124   :  { %v32564_v25 = vand.u32 4294901760, %v11463_v23  ;;  %28168 = vmatpush3.msra.mxu1 %v32562_v20  ;;  %v32571_v30 = vsub.f32 %v11011_v13, %v32562_v20 }
0x2125   :  { %28172 = vmatprep.subr.mxu1 %v34762_v34 }
0x2126   :  { %28198 = vmatpush3.msra.mxu0 %v32564_v25  ;;  %v32574_v52 = vsub.f32 %v11463_v23, %v32564_v25  ;;  %v11095_v39 = vand.u32 4294901760, %v32571_v30 }
0x2127   :  { %28202 = vmatprep.subr.mxu0 %v34762_v34 }
0x2128   :  { %v31270_v62 = vpop.eup %31269  ;;  %v11547_v47 = vand.u32 4294901760, %v32574_v52  ;;  %v11096_v57 = vsub.f32 %v32571_v30, %v11095_v39 }
0x2129   :  { %v10906_v63 = vmul.f32 %v31270_v62, %v31266_v6 }
0x212a   :  { %v31272_v26 = vpop.eup %31271  ;;  %v11548_v49 = vsub.f32 %v32574_v52, %v11547_v47  ;;  %v11097_v17 = vand.u32 4294901760, %v11096_v57 }
0x212b   :  { %v10908_v31 = vmul.f32 %v31272_v26, %v31268_v55  ;;  %v11014_v32 = vsel %vm6103_vm11, %v10906_v63, 0  ;;  %v32587_v0 = vrot.slane %v10906_v63, %v32212_v27  ;;  %v10909_v15 = vcombine.high %v10906_v63, %v34762_v34  ;;  %v11915_v26 = vpop.permute.xlu1 %11914  ;;  %v12369_v63 = vpop.permute.xlu0 %12368 }
0x212c   :  { %v32577_v9 = vand.u32 4294901760, %v11014_v32  ;;  %v11549_v13 = vand.u32 4294901760, %v11548_v49 }
0x212d   :  { %v11466_v19 = vsel %vm6103_vm11, %v10908_v31, 0  ;;  %v32590_v5 = vrot.slane %v10908_v31, %v32212_v27  ;;  %v10924_v44 = vcombine.high %v10908_v31, %v34762_v34  ;;  %v32601_v7 = vrot.slane %v10909_v15, %v32212_v27 }
0x212e   :  { %v32581_v45 = vand.u32 4294901760, %v11466_v19  ;;  %v11083_v54 = vsub.f32 %v11014_v32, %v32577_v9  ;;  %v12372_v32 = vsel %vm6103_vm11, %v12369_v63, 0 }
0x212f   :  { %34810 = vst [vmem:[#allocation8_spill] sm:$0xff] %v32601_v7  ;;  %v32604_v46 = vrot.slane %v10924_v44, %v32212_v27  ;;  %v12371_v31 = vpop.permute.xlu0 %12370  ;;  %v32642_v15 = vand.u32 4294901760, %v12372_v32 }
0x2130   :  { %v11535_v53 = vsub.f32 %v11466_v19, %v32581_v45  ;;  %v11084_v10 = vand.u32 4294901760, %v11083_v54 }
0x2131   :  { %34811 = vst [vmem:[#allocation9_spill] sm:$0xff] %v32604_v46 }
0x2132   :  { %v11536_v2 = vand.u32 4294901760, %v11535_v53  ;;  %v11085_v28 = vsub.f32 %v11083_v54, %v11084_v10 }
0x2134   :  { %v11537_v6 = vsub.f32 %v11535_v53, %v11536_v2  ;;  %v11086_v55 = vand.u32 4294901760, %v11085_v28 }
0x2136   :  { %v11538_v18 = vand.u32 4294901760, %v11537_v6  ;;  %28170 = vmatmul.mubr.f32.vlgmr.msra.gmra.mrb[20].mxu1 %v11086_v55 }
0x2137   :  { %28173 = vmatpush3.msra.mxu1 %v11097_v17  ;;  %28174 = vmatprep.mubr.msk.f32.mxu1 %vm31355_vm1, %v34762_v34 }
0x2138   :  { %28200 = vmatmul.mubr.f32.vlgmr.msra.gmra.mrb[26].mxu0 %v11538_v18  ;;  %28177 = vmatprep.subr.mxu1 %v34762_v34 }
0x2139   :  { %28203 = vmatpush3.msra.mxu0 %v11549_v13  ;;  %28204 = vmatprep.mubr.msk.f32.mxu0 %vm31355_vm1, %v34762_v34 }
0x213a   :  { %28207 = vmatprep.subr.mxu0 %v34762_v34 }
0x213e   :  { %28175 = vmatmul.mubr.f32.vlgmr.msra.gmra.mrb[20].mxu1 %v32577_v9 }
0x213f   :  { %28178 = vmatpush3.msra.mxu1 %v32571_v30  ;;  %28179 = vmatprep.mubr.msk.f32.mxu1 %vm31355_vm1, %v34762_v34  ;;  %v11917_v30 = vpop.permute.xlu1 %11916 }
0x2140   :  { %28205 = vmatmul.mubr.f32.vlgmr.msra.gmra.mrb[26].mxu0 %v32581_v45  ;;  %28182 = vmatprep.subr.mxu1 %v34762_v34  ;;  %v11920_v19 = vsel %vm6103_vm11, %v11917_v30, 0 }
0x2141   :  { %28208 = vmatpush3.msra.mxu0 %v32574_v52  ;;  %28209 = vmatprep.mubr.msk.f32.mxu0 %vm31355_vm1, %v34762_v34  ;;  %v11918_v52 = vsel %vm6103_vm11, %v11915_v26, 0  ;;  %v32644_v57 = vand.u32 4294901760, %v11920_v19 }
0x2142   :  { %28212 = vmatprep.subr.mxu0 %v34762_v34 }
0x2146   :  { %28180 = vmatmul.mubr.f32.vlgmr.msra.gmra.mrb[20].mxu1 %v11083_v54  ;;  %v12374_v54 = vsel %vm6103_vm11, %v12371_v31, 0 }
0x2147   :  { %28183 = vmatpush3.msra.mxu1 %v32562_v20  ;;  %28184 = vmatprep.mubr.msk.f32.mxu1 %vm31355_vm1, %v34762_v34 }
0x2148   :  { %28210 = vmatmul.mubr.f32.vlgmr.msra.gmra.mrb[26].mxu0 %v11535_v53  ;;  %28187 = vmatprep.subr.mxu1 %v34762_v34  ;;  %v32638_v53 = vand.u32 4294901760, %v11918_v52 }
0x2149   :  { %28213 = vmatpush3.msra.mxu0 %v32564_v25  ;;  %28214 = vmatprep.mubr.msk.f32.mxu0 %vm31355_vm1, %v34762_v34 }
0x214a   :  { %28217 = vmatprep.subr.mxu0 %v34762_v34 }
0x214e   :  { %28185 = vmatmul.mubr.f32.vlgmr.msra.gmra.mrb[20].mxu1 %v11084_v10  ;;  %v32649_v10 = vand.u32 4294901760, %v12374_v54 }
0x214f   :  { %28188 = vmatpush3.msra.mxu1 %v11095_v39  ;;  %28189 = vmatprep.mubr.msk.f32.mxu1 %vm31355_vm1, %v34762_v34  ;;  %v11989_v39 = vsub.f32 %v11918_v52, %v32638_v53 }
0x2150   :  { %28215 = vmatmul.mubr.f32.vlgmr.msra.gmra.mrb[26].mxu0 %v11536_v2  ;;  %28192 = vmatprep.subr.mxu1 %v34762_v34  ;;  %v12000_v2 = vsub.f32 %v11920_v19, %v32644_v57  ;;  %v12454_v28 = vsub.f32 %v12374_v54, %v32649_v10 }
0x2151   :  { %28218 = vmatpush3.msra.mxu0 %v11547_v47  ;;  %28219 = vmatprep.mubr.msk.f32.mxu0 %vm31355_vm1, %v34762_v34  ;;  %v12443_v47 = vsub.f32 %v12372_v32, %v32642_v15  ;;  %v11990_v49 = vand.u32 4294901760, %v11989_v39 }
0x2152   :  { %28222 = vmatprep.subr.mxu0 %v34762_v34  ;;  %v12001_v6 = vand.u32 4294901760, %v12000_v2  ;;  %v12455_v55 = vand.u32 4294901760, %v12454_v28 }
0x2153   :  { %v12444_v44 = vand.u32 4294901760, %v12443_v47  ;;  %v11991_v17 = vsub.f32 %v11989_v39, %v11990_v49 }
0x2154   :  { %v12002_v18 = vsub.f32 %v12000_v2, %v12001_v6  ;;  %v12456_v13 = vsub.f32 %v12454_v28, %v12455_v55 }
0x2156   :  { %28190 = vmatmul.mubr.f32.vlgmr.msra.gmra.mrb[20].mxu1 %v32577_v9  ;;  %v12003_v26 = vand.u32 4294901760, %v12002_v18 }
0x2157   :  { %28193 = vmatpush3.msra.mxu1 %v32562_v20  ;;  %28194 = vmatprep.mubr.msk.f32.mxu1 %vm31355_vm1, %v34762_v34  ;;  %v12445_v20 = vsub.f32 %v12443_v47, %v12444_v44 }
0x2158   :  { %28220 = vmatmul.mubr.f32.vlgmr.msra.gmra.mrb[26].mxu0 %v32581_v45  ;;  %28227 = vmatprep.subr.mxu1 %v34762_v34 }
0x2159   :  { %28223 = vmatpush3.msra.mxu0 %v32564_v25  ;;  %28224 = vmatprep.mubr.msk.f32.mxu0 %vm31355_vm1, %v34762_v34  ;;  %v11992_v25 = vand.u32 4294901760, %v11991_v17  ;;  %v12446_v63 = vand.u32 4294901760, %v12445_v20 }
0x215a   :  { %28257 = vmatprep.subr.mxu0 %v34762_v34 }
0x215e   :  { %28195 = vmatmul.mubr.f32.vlgmr.msra.gmra.mrb[20].mxu1 %v32577_v9  ;;  %v12457_v9 = vand.u32 4294901760, %v12456_v13 }
0x215f   :  { %28228 = vmatpush3.xpose.msra.mxu1 %v32644_v57  ;;  %28229 = vmatprep.mubr.msk.f32.mxu1 %vm31355_vm1, %v34762_v34 }
0x2160   :  { %28225 = vmatmul.mubr.f32.vlgmr.msra.gmra.mrb[26].mxu0 %v32581_v45  ;;  %28232 = vmatprep.subr.mxu1 %v34762_v34 }
0x2161   :  { %28258 = vmatpush3.xpose.msra.mxu0 %v32649_v10  ;;  %28259 = vmatprep.mubr.msk.f32.mxu0 %vm31355_vm1, %v34762_v34 }
0x2162   :  { %28230 = vmatmul.mubr.f32.vlgmr.msra.gmra.mrb[22].mxu1 %v11992_v25  ;;  %28262 = vmatprep.subr.mxu0 %v34762_v34 }
0x2163   :  { %28233 = vmatpush3.xpose.msra.mxu1 %v12003_v26  ;;  %28234 = vmatprep.mubr.msk.f32.mxu1 %vm31355_vm1, %v34762_v34 }
0x2164   :  { %28260 = vmatmul.mubr.f32.vlgmr.msra.gmra.mrb[28].mxu0 %v12446_v63  ;;  %28237 = vmatprep.subr.mxu1 %v34762_v34 }
0x2165   :  { %28263 = vmatpush3.xpose.msra.mxu0 %v12457_v9  ;;  %28264 = vmatprep.mubr.msk.f32.mxu0 %vm31355_vm1, %v34762_v34 }
0x2166   :  { %28267 = vmatprep.subr.mxu0 %v34762_v34 }
0x216a   :  { %28235 = vmatmul.mubr.f32.vlgmr.msra.gmra.mrb[22].mxu1 %v32638_v53 }
0x216b   :  { %28238 = vmatpush3.xpose.msra.mxu1 %v12000_v2  ;;  %28239 = vmatprep.mubr.msk.f32.mxu1 %vm31355_vm1, %v34762_v34 }
0x216c   :  { %28265 = vmatmul.mubr.f32.vlgmr.msra.gmra.mrb[28].mxu0 %v32642_v15  ;;  %28242 = vmatprep.subr.mxu1 %v34762_v34 }
0x216d   :  { %28268 = vmatpush3.xpose.msra.mxu0 %v12454_v28  ;;  %28269 = vmatprep.mubr.msk.f32.mxu0 %vm31355_vm1, %v34762_v34 }
0x216e   :  { %28272 = vmatprep.subr.mxu0 %v34762_v34 }
0x2172   :  { %28240 = vmatmul.mubr.f32.vlgmr.msra.gmra.mrb[22].mxu1 %v11989_v39 }
0x2173   :  { %28243 = vmatpush3.xpose.msra.mxu1 %v32644_v57  ;;  %28244 = vmatprep.mubr.msk.f32.mxu1 %vm31355_vm1, %v34762_v34 }
0x2174   :  { %28270 = vmatmul.mubr.f32.vlgmr.msra.gmra.mrb[28].mxu0 %v12443_v47  ;;  %28247 = vmatprep.subr.mxu1 %v34762_v34 }
0x2175   :  { %28273 = vmatpush3.xpose.msra.mxu0 %v32649_v10  ;;  %28274 = vmatprep.mubr.msk.f32.mxu0 %vm31355_vm1, %v34762_v34 }
0x2176   :  { %28277 = vmatprep.subr.mxu0 %v34762_v34 }
0x217a   :  { %28245 = vmatmul.mubr.f32.vlgmr.msra.gmra.mrb[22].mxu1 %v11990_v49 }
0x217b   :  { %28248 = vmatpush3.xpose.msra.mxu1 %v12001_v6  ;;  %28249 = vmatprep.mubr.msk.f32.mxu1 %vm31355_vm1, %v34762_v34 }
0x217c   :  { %28275 = vmatmul.mubr.f32.vlgmr.msra.gmra.mrb[28].mxu0 %v12444_v44  ;;  %28252 = vmatprep.subr.mxu1 %v34762_v34 }
0x217d   :  { %28278 = vmatpush3.xpose.msra.mxu0 %v12455_v55  ;;  %28279 = vmatprep.mubr.msk.f32.mxu0 %vm31355_vm1, %v34762_v34 }
0x217e   :  { %28282 = vmatprep.subr.mxu0 %v34762_v34 }
0x2182   :  { %28250 = vmatmul.mubr.f32.vlgmr.msra.gmra.mrb[22].mxu1 %v32638_v53 }
0x2183   :  { %28253 = vmatpush3.xpose.msra.mxu1 %v32644_v57  ;;  %28254 = vmatprep.mubr.msk.f32.mxu1 %vm31355_vm1, %v34762_v34 }
0x2184   :  { %28280 = vmatmul.mubr.f32.vlgmr.msra.gmra.mrb[28].mxu0 %v32642_v15  ;;  %28287 = vmatprep.subr.mxu1 %v34762_v34 }
0x2185   :  { %28283 = vmatpush3.xpose.msra.mxu0 %v32649_v10  ;;  %28284 = vmatprep.mubr.msk.f32.mxu0 %vm31355_vm1, %v34762_v34 }
0x2186   :  { %28317 = vmatprep.subr.mxu0 %v34762_v34 }
0x218a   :  { %28255 = vmatmul.mubr.f32.vlgmr.msra.gmra.mrb[22].mxu1 %v32638_v53 }
0x218b   :  { %28289 = vmatprep.mubr.msk.f32.mxu1 %vm31355_vm1, %v34762_v34 }
0x218c   :  { %28285 = vmatmul.mubr.f32.vlgmr.msra.gmra.mrb[28].mxu0 %v32642_v15 }
0x218d   :  { %28319 = vmatprep.mubr.msk.f32.mxu0 %vm31355_vm1, %v34762_v34 }
0x2231   :  { %v11458_v45 = vpop.f32.mrb[20].mxu1 }
0x2232   :  { %v28196_v30 = vpop.f32.mrb[21].mxu1 }
0x2233   :  { %v11910_v31 = vpop.f32.mrb[26].mxu0 }
0x2234   :  { %v28226_v52 = vpop.f32.mrb[27].mxu0 }
0x225d   :  { %v12364_v32 = vpop.f32.mrb[22].mxu1 }
0x225e   :  { %v12822_v19 = vmul.f32 0.35355338, %v12364_v32  ;;  %v28256_v54 = vpop.f32.mrb[23].mxu1 }
0x225f   :  { %v12818_v57 = vpop.f32.mrb[28].mxu0 }
0x2260   :  { %v12823_v10 = vmul.f32 0.35355338, %v12818_v57  ;;  %v28286_v39 = vpop.f32.mrb[29].mxu0  ;;  %v12824_v53 = vsel %vm6103_vm11, %v12822_v19, -inf }
0x2261   :  { %12825 = vmax.xlane.f32.xlu1 %v12824_v53 }
0x2262   :  { %v12827_v15 = vsel %vm6103_vm11, %v12823_v10, -inf }
0x2263   :  { %12828 = vmax.xlane.f32.xlu0 %v12827_v15 }
0x22ee   :  { %v12826_v47 = vpop.xlane.xlu1 %12825 }
0x22ef   :  { %v12830_v2 = vsub.f32 %v12822_v19, %v12826_v47 }
0x22f0   :  { %v12829_v28 = vpop.xlane.xlu0 %12828 }
0x22f1   :  { %v12831_v49 = vsub.f32 %v12823_v10, %v12829_v28  ;;  %v12832_v44 = vmul.f32 1.442695, %v12830_v2 }
0x22f3   :  { %v12834_v6 = vmul.f32 1.442695, %v12831_v49  ;;  %31273 = vpow2.f32 %v12832_v44 }
0x22f5   :  { %31275 = vpow2.f32 %v12834_v6 }
0x22fd   :  { %v31274_v55 = vpop.eup %31273 }
0x22fe   :  { %v12836_v20 = vsel %vm6103_vm11, %v31274_v55, 0.0 }
0x22ff   :  { %v31276_v17 = vpop.eup %31275  ;;  %12837 = vadd.xlane.f32.xlu0 %v12836_v20 }
0x2300   :  { %v12839_v18 = vsel %vm6103_vm11, %v31276_v17, 0.0 }
0x2301   :  { %12840 = vadd.xlane.f32.xlu1 %v12839_v18 }
0x2312   :  { %13399 = vrot.lane.b32.xlu1 %v32125_v22, %s31368_s23 }
0x2315   :  { %12947 = vrot.lane.b32.xlu0 %v32127_v50, %s31368_s23 }
0x2316   :  { %13876 = vrot.lane.b32.xlu1 %v32542_v24, %s31369_s24 }
0x2319   :  { %13878 = vrot.lane.b32.xlu0 %v32544_v43, %s31369_s24 }
0x231a   :  { %13884 = vrot.lane.b32.xlu1 %v11458_v45, %s31370_s25 }
0x231d   :  { %13886 = vrot.lane.b32.xlu0 %v11910_v31, %s31370_s25 }
0x238c   :  { %v12838_v13 = vpop.xlane.xlu0 %12837 }
0x238d   :  { %31277 = vrcp.f32 %v12838_v13 }
0x238e   :  { %v12841_v25 = vpop.xlane.xlu1 %12840 }
0x238f   :  { %31279 = vrcp.f32 %v12841_v25 }
0x2390   :  { %v12948_v22 = vpop.permute.xlu0 %12947 }
0x2391   :  { %v32734_v26 = vand.u32 4294901760, %v12948_v22 }
0x2392   :  { %v13400_v50 = vpop.permute.xlu1 %13399 }
0x2393   :  { %v32736_v63 = vand.u32 4294901760, %v13400_v50  ;;  %28288 = vmatpush3.msra.mxu1 %v32734_v26  ;;  %v13031_v45 = vsub.f32 %v12948_v22, %v32734_v26 }
0x2394   :  { %28292 = vmatprep.subr.mxu1 %v34762_v34  ;;  %v13879_v16 = vpop.permute.xlu0 %13878 }
0x2395   :  { %28318 = vmatpush3.msra.mxu0 %v32736_v63  ;;  %v13483_v31 = vsub.f32 %v13400_v50, %v32736_v63  ;;  %v13032_v39 = vand.u32 4294901760, %v13031_v45 }
0x2396   :  { %28322 = vmatprep.subr.mxu0 %v34762_v34  ;;  %v13877_v51 = vpop.permute.xlu1 %13876 }
0x2397   :  { %v31278_v24 = vpop.eup %31277  ;;  %v13484_v47 = vand.u32 4294901760, %v13483_v31  ;;  %v13033_v20 = vsub.f32 %v13031_v45, %v13032_v39 }
0x2398   :  { %v12843_v9 = vmul.f32 %v31278_v24, %v31274_v55 }
0x2399   :  { %v31280_v43 = vpop.eup %31279  ;;  %v13485_v50 = vsub.f32 %v13483_v31, %v13484_v47 }
0x239a   :  { %v12845_v30 = vmul.f32 %v31280_v43, %v31276_v17  ;;  %v12951_v52 = vsel %vm6103_vm11, %v12843_v9, 0  ;;  %v32746_v32 = vrot.slane %v12843_v9, %v32212_v27  ;;  %v12846_v10 = vcombine.high %v12843_v9, %v34762_v34  ;;  %v13885_v42 = vpop.permute.xlu1 %13884 }
0x239b   :  { %v32748_v19 = vand.u32 4294901760, %v12951_v52  ;;  %v13034_v9 = vand.u32 4294901760, %v13033_v20 }
0x239c   :  { %v13403_v54 = vsel %vm6103_vm11, %v12845_v30, 0  ;;  %v32752_v57 = vrot.slane %v12845_v30, %v32212_v27  ;;  %v12861_v15 = vcombine.high %v12845_v30, %v34762_v34  ;;  %v32762_v6 = vrot.slane %v12846_v10, %v32212_v27 }
0x239d   :  { %v13471_v53 = vand.u32 4294901760, %v13403_v54  ;;  %v13020_v2 = vsub.f32 %v12951_v52, %v32748_v19  ;;  %v13486_v52 = vand.u32 4294901760, %v13485_v50 }
0x239e   :  { %v32765_v55 = vrot.slane %v12861_v15, %v32212_v27  ;;  %v5543_v15 = vld [vmem:[%s34759_s5 + $0x10] sm:$0xff] }
0x239f   :  { %v13472_v44 = vsub.f32 %v13403_v54, %v13471_v53  ;;  %v13021_v17 = vand.u32 4294901760, %v13020_v2 }
0x23a1   :  { %v13473_v18 = vand.u32 4294901760, %v13472_v44  ;;  %v13022_v22 = vsub.f32 %v13020_v2, %v13021_v17 }
0x23a3   :  { %v13474_v24 = vsub.f32 %v13472_v44, %v13473_v18  ;;  %v13023_v43 = vand.u32 4294901760, %v13022_v22 }
0x23a5   :  { %v13475_v30 = vand.u32 4294901760, %v13474_v24  ;;  %28290 = vmatmul.mubr.f32.vlgmr.msra.gmra.mrb[24].mxu1 %v13023_v43 }
0x23a6   :  { %28293 = vmatpush3.msra.mxu1 %v13034_v9  ;;  %28294 = vmatprep.mubr.msk.f32.mxu1 %vm31355_vm1, %v34762_v34 }
0x23a7   :  { %28320 = vmatmul.mubr.f32.vlgmr.msra.gmra.mrb[30].mxu0 %v13475_v30  ;;  %28297 = vmatprep.subr.mxu1 %v34762_v34 }
0x23a8   :  { %28323 = vmatpush3.msra.mxu0 %v13486_v52  ;;  %28324 = vmatprep.mubr.msk.f32.mxu0 %vm31355_vm1, %v34762_v34 }
0x23a9   :  { %28327 = vmatprep.subr.mxu0 %v34762_v34 }
0x23ad   :  { %28295 = vmatmul.mubr.f32.vlgmr.msra.gmra.mrb[24].mxu1 %v32748_v19 }
0x23ae   :  { %28298 = vmatpush3.msra.mxu1 %v13031_v45  ;;  %28299 = vmatprep.mubr.msk.f32.mxu1 %vm31355_vm1, %v34762_v34  ;;  %v5541_v45 = vld [vmem:[%s34759_s5] sm:$0xff] }
0x23af   :  { %28325 = vmatmul.mubr.f32.vlgmr.msra.gmra.mrb[30].mxu0 %v13471_v53  ;;  %28302 = vmatprep.subr.mxu1 %v34762_v34 }
0x23b0   :  { %28328 = vmatpush3.msra.mxu0 %v13483_v31  ;;  %28329 = vmatprep.mubr.msk.f32.mxu0 %vm31355_vm1, %v34762_v34  ;;  %v13915_v31 = vand.u32 4294901760, %v5541_v45 }
0x23b1   :  { %28332 = vmatprep.subr.mxu0 %v34762_v34 }
0x23b2   :  { %v14005_v10 = vsub.f32 %v5541_v45, %v13915_v31 }
0x23b5   :  { %28300 = vmatmul.mubr.f32.vlgmr.msra.gmra.mrb[24].mxu1 %v13020_v2  ;;  %v14006_v2 = vand.u32 4294901760, %v14005_v10 }
0x23b6   :  { %28303 = vmatpush3.msra.mxu1 %v32734_v26  ;;  %28304 = vmatprep.mubr.msk.f32.mxu1 %vm31355_vm1, %v34762_v34 }
0x23b7   :  { %28330 = vmatmul.mubr.f32.vlgmr.msra.gmra.mrb[30].mxu0 %v13472_v44  ;;  %28307 = vmatprep.subr.mxu1 %v34762_v34  ;;  %v14007_v20 = vsub.f32 %v14005_v10, %v14006_v2 }
0x23b8   :  { %28333 = vmatpush3.msra.mxu0 %v32736_v63  ;;  %28334 = vmatprep.mubr.msk.f32.mxu0 %vm31355_vm1, %v34762_v34 }
0x23b9   :  { %28337 = vmatprep.subr.mxu0 %v34762_v34  ;;  %v14008_v24 = vand.u32 4294901760, %v14007_v20 }
0x23bd   :  { %28305 = vmatmul.mubr.f32.vlgmr.msra.gmra.mrb[24].mxu1 %v13021_v17 }
0x23be   :  { %28308 = vmatpush3.msra.mxu1 %v13032_v39  ;;  %28309 = vmatprep.mubr.msk.f32.mxu1 %vm31355_vm1, %v34762_v34 }
0x23bf   :  { %28335 = vmatmul.mubr.f32.vlgmr.msra.gmra.mrb[30].mxu0 %v13473_v18  ;;  %28312 = vmatprep.subr.mxu1 %v34762_v34 }
0x23c0   :  { %28338 = vmatpush3.msra.mxu0 %v13484_v47  ;;  %28339 = vmatprep.mubr.msk.f32.mxu0 %vm31355_vm1, %v34762_v34 }
0x23c1   :  { %28342 = vmatprep.subr.mxu0 %v34762_v34 }
0x23c5   :  { %28310 = vmatmul.mubr.f32.vlgmr.msra.gmra.mrb[24].mxu1 %v32748_v19 }
0x23c6   :  { %28313 = vmatpush3.msra.mxu1 %v32734_v26  ;;  %28314 = vmatprep.mubr.msk.f32.mxu1 %vm31355_vm1, %v34762_v34  ;;  %v5542_v26 = vld [vmem:[%s34759_s5 + $0x8] sm:$0xff] }
0x23c7   :  { %28340 = vmatmul.mubr.f32.vlgmr.msra.gmra.mrb[30].mxu0 %v13471_v53  ;;  %v13918_v54 = vand.u32 4294901760, %v5542_v26 }
0x23c8   :  { %28343 = vmatpush3.msra.mxu0 %v32736_v63  ;;  %28344 = vmatprep.mubr.msk.f32.mxu0 %vm31355_vm1, %v34762_v34 }
0x23c9   :  { %v32812_v63 = vpack.c.bf16 %v13918_v54, %v13915_v31  ;;  %v14012_v39 = vsub.f32 %v5542_v26, %v13918_v54 }
0x23cb   :  { %29986 = vmatprep.subr.bf16.mxu1 %v32812_v63  ;;  %v14013_v44 = vand.u32 4294901760, %v14012_v39 }
0x23cd   :  { %28315 = vmatmul.mubr.f32.vlgmr.msra.gmra.mrb[24].mxu1 %v32748_v19  ;;  %v5544_v19 = vld [vmem:[%s34759_s5 + $0x18] sm:$0xff]  ;;  %v14014_v18 = vsub.f32 %v14012_v39, %v14013_v44  ;;  %v30017_v14 = vpack.c.bf16 %v14013_v44, %v14006_v2 }
0x23ce   :  { %v13924_v47 = vand.u32 4294901760, %v5544_v19  ;;  %29988 = vmatpush3.bf16.msra.mxu1 %v32812_v63 }
0x23cf   :  { %28345 = vmatmul.mubr.f32.vlgmr.msra.gmra.mrb[30].mxu0 %v13471_v53  ;;  %v13921_v53 = vand.u32 4294901760, %v5543_v15  ;;  %v14015_v43 = vand.u32 4294901760, %v14014_v18  ;;  %v30001_v18 = vpack.c.bf16 %v14012_v39, %v14005_v10 }
0x23d0   :  { %v14026_v50 = vsub.f32 %v5544_v19, %v13924_v47 }
0x23d1   :  { %v32822_v17 = vpack.c.bf16 %v13924_v47, %v13921_v53  ;;  %v14019_v22 = vsub.f32 %v5543_v15, %v13921_v53  ;;  %v29993_v31 = vpack.c.bf16 %v14015_v43, %v14008_v24  ;;  %v13898_v24 = vsel %vm6103_vm11, %v32364_v33, %v13877_v51 }
0x23d2   :  { %v14027_v52 = vand.u32 4294901760, %v14026_v50  ;;  %v13899_v43 = vsel %vm6103_vm11, %v32366_v36, %v13879_v16 }
0x23d3   :  { %29990 = vmatprep.subr.bf16.mxu1 %v32822_v17  ;;  %v14020_v9 = vand.u32 4294901760, %v14019_v22  ;;  %v30005_v62 = vpack.c.bf16 %v14026_v50, %v14019_v22 }
0x23d4   :  { %29992 = vmatpush3.bf16.msra.mxu1 %v32822_v17  ;;  %v14028_v19 = vsub.f32 %v14026_v50, %v14027_v52 }
0x23d5   :  { %v14021_v54 = vsub.f32 %v14019_v22, %v14020_v9  ;;  %29994 = vmatprep.subr.bf16.mxu1 %v29993_v31  ;;  %v30021_v23 = vpack.c.bf16 %v14027_v52, %v14020_v9 }
0x23d6   :  { %v14029_v47 = vand.u32 4294901760, %v14028_v19 }
0x23d7   :  { %v14022_v53 = vand.u32 4294901760, %v14021_v54 }
0x23d9   :  { %v29997_v20 = vpack.c.bf16 %v14029_v47, %v14022_v53 }
0x24a0   :  { %v13395_v30 = vpop.f32.mrb[24].mxu1 }
0x24a1   :  { %13892 = vrot.lane.b32.xlu1 %v13395_v30, %s31371_s11  ;;  %v28316_v45 = vpop.f32.mrb[25].mxu1  ;;  %v13887_v30 = vpop.permute.xlu0 %13886 }
0x24a2   :  { %v13847_v26 = vpop.f32.mrb[30].mxu0  ;;  %v13900_v45 = vsel %vm39_vm0, %v13898_v24, %v13885_v42  ;;  %v13901_v54 = vsel %vm39_vm0, %v13899_v43, %v13887_v30 }
0x24a3   :  { %13894 = vrot.lane.b32.xlu0 %v13847_v26, %s31371_s11  ;;  %v28346_v15 = vpop.f32.mrb[31].mxu0 }
0x2513   :  { %v13893_v26 = vpop.permute.xlu1 %13892 }
0x2514   :  { %v13902_v10 = vsel %vm7127_vm12, %v13900_v45, %v13893_v26 }
0x2515   :  { %v13895_v39 = vpop.permute.xlu0 %13894  ;;  %v13909_v2 = vsel %vm552_vm3, %v13902_v10, 0 }
0x2516   :  { %v13903_v44 = vsel %vm7127_vm12, %v13901_v54, %v13895_v39  ;;  %v13983_v22 = vand.u32 4294901760, %v13909_v2 }
0x2517   :  { %v13912_v50 = vsel %vm552_vm3, %v13903_v44, 0  ;;  %v5537_v44 = vld [vmem:[%s34758_s4 + $0x8] sm:$0xff] }
0x2518   :  { %v13993_v9 = vand.u32 4294901760, %v13912_v50  ;;  %v13984_v51 = vsub.f32 %v13909_v2, %v13983_v22  ;;  %v5536_v2 = vld [vmem:[%s34758_s4] sm:$0xff] }
0x251a   :  { %v13994_v33 = vsub.f32 %v13912_v50, %v13993_v9  ;;  %v13985_v52 = vand.u32 4294901760, %v13984_v51  ;;  %v14494_v50 = vand.u32 4294901760, %v5536_v2 }
0x251c   :  { %v13995_v36 = vand.u32 4294901760, %v13994_v33  ;;  %v13986_v16 = vsub.f32 %v13984_v51, %v13985_v52 }
0x251e   :  { %v13996_v42 = vsub.f32 %v13994_v33, %v13995_v36  ;;  %v13987_v15 = vand.u32 4294901760, %v13986_v16 }
0x2520   :  { %v13997_v19 = vand.u32 4294901760, %v13996_v42  ;;  %28355 = vmatprep.mubr.f32.mxu1 %v13987_v15  ;;  %v14584_v42 = vsub.f32 %v5536_v2, %v14494_v50 }
0x2522   :  { %28356 = vmatmul.mubr.f32.vlgmr.msra.gmra.mrb[26].mxu1 %v13997_v19  ;;  %v14585_v19 = vand.u32 4294901760, %v14584_v42 }
0x2523   :  { %29996 = vmatpush3.bf16.msra.mxu1 %v29993_v31  ;;  %28366 = vmatprep.mubr.f32.mxu1 %v13983_v22 }
0x2524   :  { %29998 = vmatprep.subr.bf16.mxu1 %v29997_v20 }
0x2527   :  { %30000 = vmatpush3.bf16.msra.mxu1 %v29997_v20 }
0x2528   :  { %30002 = vmatprep.subr.bf16.mxu1 %v30001_v18 }
0x252a   :  { %28367 = vmatmul.mubr.f32.vlgmr.msra.gmra.mrb[26].mxu1 %v13993_v9 }
0x252b   :  { %30004 = vmatpush3.bf16.msra.mxu1 %v30001_v18  ;;  %28377 = vmatprep.mubr.f32.mxu1 %v13984_v51  ;;  %v5539_v51 = vld [vmem:[%s34758_s4 + $0x18] sm:$0xff] }
0x252c   :  { %30006 = vmatprep.subr.bf16.mxu1 %v30005_v62 }
0x252f   :  { %30008 = vmatpush3.bf16.msra.mxu1 %v30005_v62  ;;  %v32849_v62 = vld [vmem:[%s34759_s5 + $0xa0] sm:$0x3f] }
0x2530   :  { %30010 = vmatprep.subr.bf16.mxu1 %v32812_v63 }
0x2532   :  { %28378 = vmatmul.mubr.f32.vlgmr.msra.gmra.mrb[26].mxu1 %v13994_v33 }
0x2533   :  { %30012 = vmatpush3.bf16.msra.mxu1 %v32812_v63  ;;  %28388 = vmatprep.mubr.f32.mxu1 %v13985_v52  ;;  %v14503_v52 = vand.u32 4294901760, %v5539_v51 }
0x2534   :  { %30014 = vmatprep.subr.bf16.mxu1 %v32822_v17 }
0x2537   :  { %30016 = vmatpush3.bf16.msra.mxu1 %v32822_v17 }
0x2538   :  { %30018 = vmatprep.subr.bf16.mxu1 %v30017_v14 }
0x253a   :  { %28389 = vmatmul.mubr.f32.vlgmr.msra.gmra.mrb[26].mxu1 %v13995_v36 }
0x253b   :  { %30020 = vmatpush3.bf16.msra.mxu1 %v30017_v14  ;;  %28399 = vmatprep.mubr.f32.mxu1 %v13983_v22  ;;  %v13907_v14 = vrot.slane %v32849_v62, %v31577_v4 }
0x253c   :  { %30022 = vmatprep.subr.bf16.mxu1 %v30021_v23 }
0x253f   :  { %30024 = vmatpush3.bf16.msra.mxu1 %v30021_v23 }
0x2540   :  { %30026 = vmatprep.subr.bf16.mxu1 %v32812_v63 }
0x2542   :  { %28400 = vmatmul.mubr.f32.vlgmr.msra.gmra.mrb[26].mxu1 %v13993_v9 }
0x2543   :  { %30028 = vmatpush3.bf16.msra.mxu1 %v32812_v63  ;;  %28410 = vmatprep.mubr.f32.mxu1 %v13983_v22  ;;  %v5538_v22 = vld [vmem:[%s34758_s4 + $0x10] sm:$0xff] }
0x2544   :  { %30030 = vmatprep.subr.bf16.mxu1 %v32822_v17  ;;  %v14500_v33 = vand.u32 4294901760, %v5538_v22 }
0x2546   :  { %v32881_v16 = vpack.c.bf16 %v14503_v52, %v14500_v33 }
0x2547   :  { %30032 = vmatpush3.bf16.msra.mxu1 %v32822_v17 }
0x254a   :  { %28411 = vmatmul.mubr.f32.vlgmr.msra.gmra.mrb[26].mxu1 %v13993_v9  ;;  %v14497_v9 = vand.u32 4294901760, %v5537_v44 }
0x254c   :  { %v32879_v36 = vpack.c.bf16 %v14497_v9, %v14494_v50  ;;  %v14591_v15 = vsub.f32 %v5537_v44, %v14497_v9  ;;  %v5546_v50 = vld [vmem:[%s34759_s5 + $0x28] sm:$0xff]  ;;  %v5547_v9 = vld [vmem:[%s34759_s5 + $0x30] sm:$0xff] }
0x254e   :  { %30034 = vmatprep.subr.bf16.mxu0 %v32879_v36 }
0x254f   :  { %30036 = vmatpush3.bf16.msra.mxu0 %v32879_v36 }
0x2550   :  { %30038 = vmatprep.subr.bf16.mxu0 %v32881_v16 }
0x2553   :  { %30040 = vmatpush3.bf16.msra.mxu0 %v32881_v16 }
0x261d   :  { %v28412_v23 = vpop.f32.mrb[26].mxu1 }
0x261e   :  { %v30625_v31 = vadd.f32 %v28412_v23, %v13907_v14  ;;  %v14432_v53 = vpop.f32.mrb[27].mxu1  ;;  %v14586_v23 = vsub.f32 %v14584_v42, %v14585_v19 }
0x261f   :  { %v30626_v47 = vadd.f32 %v14432_v53, %v13907_v14  ;;  %v14592_v14 = vand.u32 4294901760, %v14591_v15  ;;  %v14598_v53 = vsub.f32 %v5538_v22, %v14500_v33  ;;  %v5545_v22 = vld [vmem:[%s34759_s5 + $0x20] sm:$0xff]  ;;  %v15027_v33 = vand.u32 4294901760, %v5546_v50 }
0x2620   :  { %v14443_v63 = vadd.f32 %v30625_v31, %v32103_v41 }
0x2621   :  { %v14442_v20 = vadd.f32 %v30626_v47, %v32105_v60  ;;  %v14593_v31 = vsub.f32 %v14591_v15, %v14592_v14  ;;  %v14605_v47 = vsub.f32 %v5539_v51, %v14503_v52  ;;  %v32896_v2 = vpack.c.bf16 %v14592_v14, %v14585_v19  ;;  %v5548_v52 = vld [vmem:[%s34759_s5 + $0x38] sm:$0xff]  ;;  %v5550_v19 = vld [vmem:[%s34759_s5 + $0x48] sm:$0xff] }
0x2622   :  { %v14447_v18 = vsel %vm552_vm3, %v14443_v63, 0.0  ;;  %v15024_v51 = vand.u32 4294901760, %v5545_v22  ;;  %v15033_v14 = vand.u32 4294901760, %v5548_v52 }
0x2623   :  { %14448 = vadd.xlane.f32.xlu0 %v14447_v18  ;;  %v14444_v17 = vsel %vm552_vm3, %v14442_v20, 0.0  ;;  %v14599_v18 = vand.u32 4294901760, %v14598_v53 }
0x2624   :  { %14445 = vadd.xlane.f32.xlu1 %v14444_v17  ;;  %v14606_v17 = vand.u32 4294901760, %v14605_v47 }
0x2626   :  { %v32898_v44 = vpack.c.bf16 %v14606_v17, %v14599_v18 }
0x26b0   :  { %v14449_v30 = vpop.xlane.xlu0 %14448 }
0x26b1   :  { %v14452_v24 = vmul.f32 0.03125, %v14449_v30  ;;  %v14446_v43 = vpop.xlane.xlu1 %14445 }
0x26b2   :  { %v14451_v45 = vmul.f32 0.03125, %v14446_v43  ;;  %v14607_v43 = vsub.f32 %v14605_v47, %v14606_v17  ;;  %v32928_v17 = vsub.f32 %v5548_v52, %v15033_v14 }
0x26b3   :  { %v32857_v26 = vsub.f32 %v14443_v63, %v14452_v24  ;;  %v14587_v63 = vand.u32 4294901760, %v14586_v23  ;;  %v14600_v24 = vsub.f32 %v14598_v53, %v14599_v18 }
0x26b4   :  { %v32859_v54 = vsub.f32 %v14442_v20, %v14451_v45  ;;  %v14594_v20 = vand.u32 4294901760, %v14593_v31  ;;  %v15039_v31 = vand.u32 4294901760, %v5550_v19 }
0x26b5   :  { %v14456_v10 = vmul.f32 %v32857_v26, %v32857_v26  ;;  %v14601_v45 = vand.u32 4294901760, %v14600_v24 }
0x26b6   :  { %v14455_v41 = vmul.f32 %v32859_v54, %v32859_v54  ;;  %v32887_v30 = vpack.c.bf16 %v14594_v20, %v14587_v63  ;;  %v32922_v63 = vsub.f32 %v5546_v50, %v15027_v33  ;;  %v5552_v50 = vld [vmem:[%s34759_s5 + $0x58] sm:$0xff] }
0x26b7   :  { %v14460_v60 = vsel %vm552_vm3, %v14456_v10, 0.0  ;;  %v14608_v10 = vand.u32 4294901760, %v14607_v43 }
0x26b8   :  { %14461 = vadd.xlane.f32.xlu1 %v14460_v60  ;;  %v14457_v39 = vsel %vm552_vm3, %v14455_v41, 0.0  ;;  %30042 = vmatprep.subr.bf16.mxu0 %v32887_v30  ;;  %v32892_v60 = vpack.c.bf16 %v14591_v15, %v14584_v42  ;;  %v15030_v42 = vand.u32 4294901760, %v5547_v9  ;;  %v5549_v15 = vld [vmem:[%s34759_s5 + $0x40] sm:$0xff] }
0x26b9   :  { %14458 = vadd.xlane.f32.xlu0 %v14457_v39  ;;  %v32890_v41 = vpack.c.bf16 %v14608_v10, %v14601_v45  ;;  %v32894_v39 = vpack.c.bf16 %v14605_v47, %v14598_v53  ;;  %v15036_v23 = vand.u32 4294901760, %v5549_v15  ;;  %v32918_v53 = vpack.c.bf16 %v15027_v33, %v15024_v51 }
0x26ba   :  { %v32920_v47 = vsub.f32 %v5545_v22, %v15024_v51  ;;  %v32924_v20 = vsub.f32 %v5547_v9, %v15030_v42  ;;  %v32926_v18 = vpack.c.bf16 %v15033_v14, %v15030_v42  ;;  %v32936_v10 = vsub.f32 %v5550_v19, %v15039_v31  ;;  %v5551_v22 = vld [vmem:[%s34759_s5 + $0x50] sm:$0xff]  ;;  %v5553_v14 = vld [vmem:[%s34759_s5 + $0x60] sm:$0xff] }
0x26bb   :  { %v32930_v24 = vpack.c.bf16 %v15039_v31, %v15036_v23  ;;  %v32934_v45 = vsub.f32 %v5549_v15, %v15036_v23  ;;  %v15042_v51 = vand.u32 4294901760, %v5551_v22  ;;  %v15045_v33 = vand.u32 4294901760, %v5552_v50  ;;  %v5554_v23 = vld [vmem:[%s34759_s5 + $0x68] sm:$0xff] }
0x26bc   :  { %v30145_v43 = vpack.c.bf16 %v32922_v63, %v32920_v47  ;;  %v30149_v9 = vpack.c.bf16 %v32928_v17, %v32924_v20  ;;  %v15048_v31 = vand.u32 4294901760, %v5553_v14 }
0x26bd   :  { %v32946_v52 = vpack.c.bf16 %v15045_v33, %v15042_v51  ;;  %v30153_v42 = vpack.c.bf16 %v32936_v10, %v32934_v45  ;;  %v32950_v15 = vsub.f32 %v5551_v22, %v15042_v51  ;;  %v32952_v19 = vsub.f32 %v5552_v50, %v15045_v33  ;;  %v5555_v33 = vld [vmem:[%s34759_s5 + $0x70] sm:$0xff] }
0x26be   :  { %30146 = vmatprep.subr.bf16.mxu1 %v30145_v43  ;;  %v32964_v51 = vsub.f32 %v5553_v14, %v15048_v31  ;;  %v15054_v25 = vand.u32 4294901760, %v5555_v33 }
0x26bf   :  { %30148 = vmatpush3.bf16.msra.mxu1 %v30145_v43  ;;  %v15051_v43 = vand.u32 4294901760, %v5554_v23  ;;  %v30157_v22 = vpack.c.bf16 %v32952_v19, %v32950_v15  ;;  %v34812_v7 = vand.u32 4294901760, %v32952_v19 }
0x26c0   :  { %30150 = vmatprep.subr.bf16.mxu1 %v30149_v9 }
0x26c1   :  { %v32960_v40 = vpack.c.bf16 %v15051_v43, %v15048_v31  ;;  %v32966_v50 = vsub.f32 %v5554_v23, %v15051_v43  ;;  %v32978_v31 = vsub.f32 %v5555_v33, %v15054_v25 }
0x26c3   :  { %30152 = vmatpush3.bf16.msra.mxu1 %v30149_v9  ;;  %v15057_v9 = vand.u32 4294901760, %v5556_v56  ;;  %v30161_v14 = vpack.c.bf16 %v32966_v50, %v32964_v51  ;;  %v15190_v59 = vand.u32 4294901760, %v32966_v50 }
0x26c4   :  { %30154 = vmatprep.subr.bf16.mxu1 %v30153_v42 }
0x26c5   :  { %v32974_v48 = vpack.c.bf16 %v15057_v9, %v15054_v25  ;;  %v32980_v23 = vsub.f32 %v5556_v56, %v15057_v9  ;;  %v34765_v25 = vsub.s32 2, %v31574_v3  ;;  %v14474_v56 = vrot.slane %v32849_v62, %v31588_v12 }
0x26c7   :  { %30156 = vmatpush3.bf16.msra.mxu1 %v30153_v42  ;;  %v30165_v43 = vpack.c.bf16 %v32980_v23, %v32978_v31 }
0x26c8   :  { %30158 = vmatprep.subr.bf16.mxu1 %v30157_v22 }
0x26cb   :  { %30160 = vmatpush3.bf16.msra.mxu1 %v30157_v22 }
0x26cc   :  { %30162 = vmatprep.subr.bf16.mxu1 %v30161_v14 }
0x26cf   :  { %30164 = vmatpush3.bf16.msra.mxu1 %v30161_v14  ;;  %v14480_v14 = vrot.slane %v32849_v62, %v34765_v25 }
0x26d0   :  { %30166 = vmatprep.subr.bf16.mxu1 %v30165_v43 }
0x26d3   :  { %30168 = vmatpush3.bf16.msra.mxu1 %v30165_v43 }
0x2745   :  { %v14462_v13 = vpop.xlane.xlu1 %14461 }
0x2746   :  { %v14464_v42 = vmul.f32 0.03125, %v14462_v13  ;;  %v14459_v1 = vpop.xlane.xlu0 %14458 }
0x2747   :  { %v14463_v49 = vmul.f32 0.03125, %v14459_v1 }
0x2748   :  { %v14466_v38 = vadd.f32 1e-05, %v14464_v42 }
0x2749   :  { %v14465_v37 = vadd.f32 1e-05, %v14463_v49 }
0x274a   :  { %31281 = vrsqrt.f32 %v14466_v38 }
0x274b   :  { %31283 = vrsqrt.f32 %v14465_v37 }
0x2754   :  { %v31282_v22 = vpop.eup %31281 }
0x2755   :  { %v31284_v33 = vpop.eup %31283  ;;  %v14470_v9 = vmul.f32 %v31282_v22, %v32857_v26 }
0x2756   :  { %v14469_v13 = vmul.f32 %v31284_v33, %v32859_v54 }
0x2757   :  { %v14476_v1 = vmul.f32 %v14474_v56, %v14470_v9 }
0x2758   :  { %v14475_v43 = vmul.f32 %v14474_v56, %v14469_v13  ;;  %v15127_v13 = vand.u32 4294901760, %v32920_v47 }
0x2759   :  { %v32992_v49 = vadd.f32 %v14480_v14, %v14476_v1  ;;  %v15134_v1 = vand.u32 4294901760, %v32922_v63 }
0x275a   :  { %v32994_v37 = vadd.f32 %v14480_v14, %v14475_v43 }
0x275b   :  { %v14491_v38 = vsel %vm552_vm3, %v32992_v49, 0 }
0x275c   :  { %v14488_v42 = vsel %vm552_vm3, %v32994_v37, 0  ;;  %v14572_v28 = vand.u32 4294901760, %v14491_v38 }
0x275d   :  { %v14562_v26 = vand.u32 4294901760, %v14488_v42 }
0x275e   :  { %v14573_v22 = vsub.f32 %v14491_v38, %v14572_v28  ;;  %v15128_v38 = vsub.f32 %v32920_v47, %v15127_v13 }
0x275f   :  { %v14563_v34 = vsub.f32 %v14488_v42, %v14562_v26  ;;  %v15135_v42 = vsub.f32 %v32922_v63, %v15134_v1 }
0x2760   :  { %v14574_v12 = vand.u32 4294901760, %v14573_v22 }
0x2761   :  { %v14564_v25 = vand.u32 4294901760, %v14563_v34 }
0x2762   :  { %v14575_v46 = vsub.f32 %v14573_v22, %v14574_v12 }
0x2763   :  { %v14565_v54 = vsub.f32 %v14563_v34, %v14564_v25 }
0x2764   :  { %v14576_v56 = vand.u32 4294901760, %v14575_v46 }
0x2765   :  { %v14566_v33 = vand.u32 4294901760, %v14565_v54 }
0x2767   :  { %28421 = vmatprep.mubr.f32.mxu0 %v14566_v33 }
0x2768   :  { %28422 = vmatmul.mubr.f32.vlgmr.msra.gmra.mrb[32].mxu0 %v14576_v56 }
0x2769   :  { %30044 = vmatpush3.bf16.msra.mxu0 %v32887_v30  ;;  %28432 = vmatprep.mubr.f32.mxu0 %v14562_v26  ;;  %v5559_v30 = vld [vmem:[%s34759_s5 + $0x90] sm:$0xff] }
0x276a   :  { %30046 = vmatprep.subr.bf16.mxu0 %v32890_v41 }
0x276d   :  { %30048 = vmatpush3.bf16.msra.mxu0 %v32890_v41  ;;  %v5560_v41 = vld [vmem:[%s34759_s5 + $0x98] sm:$0xff] }
0x276e   :  { %30050 = vmatprep.subr.bf16.mxu0 %v32892_v60 }
0x2770   :  { %28433 = vmatmul.mubr.f32.vlgmr.msra.gmra.mrb[32].mxu0 %v14572_v28 }
0x2771   :  { %30052 = vmatpush3.bf16.msra.mxu0 %v32892_v60  ;;  %28443 = vmatprep.mubr.f32.mxu0 %v14563_v34  ;;  %v5557_v34 = vld [vmem:[%s34759_s5 + $0x80] sm:$0xff] }
0x2772   :  { %30054 = vmatprep.subr.bf16.mxu0 %v32894_v39  ;;  %v15060_v46 = vand.u32 4294901760, %v5557_v34 }
0x2775   :  { %30056 = vmatpush3.bf16.msra.mxu0 %v32894_v39  ;;  %v15066_v39 = vand.u32 4294901760, %v5559_v30 }
0x2776   :  { %30058 = vmatprep.subr.bf16.mxu0 %v32879_v36 }
0x2778   :  { %28444 = vmatmul.mubr.f32.vlgmr.msra.gmra.mrb[32].mxu0 %v14573_v22  ;;  %v15136_v22 = vand.u32 4294901760, %v15135_v42 }
0x2779   :  { %30060 = vmatpush3.bf16.msra.mxu0 %v32879_v36  ;;  %28454 = vmatprep.mubr.f32.mxu0 %v14564_v25 }
0x277a   :  { %30062 = vmatprep.subr.bf16.mxu0 %v32881_v16 }
0x277d   :  { %30064 = vmatpush3.bf16.msra.mxu0 %v32881_v16 }
0x277e   :  { %30066 = vmatprep.subr.bf16.mxu0 %v32896_v2 }
0x2780   :  { %28455 = vmatmul.mubr.f32.vlgmr.msra.gmra.mrb[32].mxu0 %v14574_v12  ;;  %v5558_v12 = vld [vmem:[%s34759_s5 + $0x88] sm:$0xff] }
0x2781   :  { %30068 = vmatpush3.bf16.msra.mxu0 %v32896_v2  ;;  %28465 = vmatprep.mubr.f32.mxu0 %v14562_v26  ;;  %v15069_v2 = vand.u32 4294901760, %v5560_v41 }
0x2782   :  { %30070 = vmatprep.subr.bf16.mxu0 %v32898_v44 }
0x2783   :  { %v15231_v25 = vsub.f32 %v5560_v41, %v15069_v2  ;;  %v33049_v43 = vpack.c.bf16 %v15069_v2, %v15066_v39 }
0x2785   :  { %30072 = vmatpush3.bf16.msra.mxu0 %v32898_v44  ;;  %v15224_v44 = vsub.f32 %v5559_v30, %v15066_v39  ;;  %v15232_v47 = vand.u32 4294901760, %v15231_v25  ;;  %v33061_v39 = vpack.c.bf16 %v15134_v1, %v15127_v13  ;;  %v34769_v13 = vand.u32 4294901760, %v32928_v17 }
0x2786   :  { %30074 = vmatprep.subr.bf16.mxu0 %v32879_v36 }
0x2787   :  { %v30173_v9 = vpack.c.bf16 %v15231_v25, %v15224_v44  ;;  %v15225_v30 = vand.u32 4294901760, %v15224_v44 }
0x2788   :  { %28466 = vmatmul.mubr.f32.vlgmr.msra.gmra.mrb[32].mxu0 %v14572_v28 }
0x2789   :  { %30076 = vmatpush3.bf16.msra.mxu0 %v32879_v36  ;;  %28476 = vmatprep.mubr.f32.mxu0 %v14562_v26  ;;  %v15210_v36 = vsub.f32 %v5557_v34, %v15060_v46  ;;  %v15129_v26 = vand.u32 4294901760, %v15128_v38  ;;  %v15226_v63 = vsub.f32 %v15224_v44, %v15225_v30 }
0x278a   :  { %30078 = vmatprep.subr.bf16.mxu0 %v32881_v16 }
0x278b   :  { %v33056_v54 = vpack.c.bf16 %v15136_v22, %v15129_v26  ;;  %v15211_v33 = vand.u32 4294901760, %v15210_v36  ;;  %v15227_v2 = vand.u32 4294901760, %v15226_v63  ;;  %v33067_v26 = vpack.c.bf16 %v15232_v47, %v15225_v30 }
0x278c   :  { %v15149_v63 = vsub.f32 %v32928_v17, %v34769_v13 }
0x278d   :  { %30080 = vmatpush3.bf16.msra.mxu0 %v32881_v16  ;;  %v15212_v34 = vsub.f32 %v15210_v36, %v15211_v33 }
0x278e   :  { %30082 = vmatprep.subr.bf16.mxu0 %v32918_v53 }
0x2790   :  { %28477 = vmatmul.mubr.f32.vlgmr.msra.gmra.mrb[32].mxu0 %v14572_v28  ;;  %v15063_v28 = vand.u32 4294901760, %v5558_v12 }
0x2791   :  { %30084 = vmatpush3.bf16.msra.mxu0 %v32918_v53 }
0x2792   :  { %30086 = vmatprep.subr.bf16.mxu0 %v32926_v18  ;;  %v15217_v16 = vsub.f32 %v5558_v12, %v15063_v28  ;;  %v33043_v14 = vpack.c.bf16 %v15063_v28, %v15060_v46  ;;  %v15213_v46 = vand.u32 4294901760, %v15212_v34 }
0x2794   :  { %v30169_v60 = vpack.c.bf16 %v15217_v16, %v15210_v36  ;;  %v15218_v56 = vand.u32 4294901760, %v15217_v16  ;;  %v26013_v36 = vld [vmem:[%s34758_s4 + $0x20] ss:$0 sm:$0xff] }
0x2795   :  { %30088 = vmatpush3.bf16.msra.mxu0 %v32926_v18 }
0x2796   :  { %30090 = vmatprep.subr.bf16.mxu0 %v32930_v24  ;;  %30170 = vmatprep.subr.bf16.mxu1 %v30169_v60  ;;  %v15219_v12 = vsub.f32 %v15217_v16, %v15218_v56  ;;  %v33065_v42 = vpack.c.bf16 %v15218_v56, %v15211_v33  ;;  %v34768_v33 = vand.u32 4294901760, %v32934_v45 }
0x2797   :  { %30172 = vmatpush3.bf16.msra.mxu1 %v30169_v60  ;;  %v15233_v60 = vsub.f32 %v15231_v25, %v15232_v47  ;;  %v34771_v25 = vand.u32 4294901760, %v32924_v20 }
0x2798   :  { %30174 = vmatprep.subr.bf16.mxu1 %v30173_v9  ;;  %v15220_v28 = vand.u32 4294901760, %v15219_v12 }
0x2799   :  { %30092 = vmatpush3.bf16.msra.mxu0 %v32930_v24  ;;  %v15142_v47 = vsub.f32 %v32924_v20, %v34771_v25 }
0x279a   :  { %30094 = vmatprep.subr.bf16.mxu0 %v32946_v52  ;;  %v33059_v41 = vpack.c.bf16 %v15220_v28, %v15213_v46  ;;  %v34770_v28 = vand.u32 4294901760, %v32936_v10 }
0x279b   :  { %30176 = vmatpush3.bf16.msra.mxu1 %v30173_v9  ;;  %v15234_v9 = vand.u32 4294901760, %v15233_v60 }
0x279c   :  { %30178 = vmatprep.subr.bf16.mxu1 %v32918_v53 }
0x279d   :  { %30096 = vmatpush3.bf16.msra.mxu0 %v32946_v52  ;;  %v33063_v38 = vpack.c.bf16 %v15234_v9, %v15227_v2  ;;  %v15156_v9 = vsub.f32 %v32934_v45, %v34768_v33 }
0x279e   :  { %30098 = vmatprep.subr.bf16.mxu0 %v32960_v40 }
0x279f   :  { %v15157_v13 = vand.u32 4294901760, %v15156_v9 }
0x27a1   :  { %30100 = vmatpush3.bf16.msra.mxu0 %v32960_v40 }
0x27a2   :  { %30102 = vmatprep.subr.bf16.mxu0 %v32974_v48 }
0x27a5   :  { %30104 = vmatpush3.bf16.msra.mxu0 %v32974_v48 }
0x27a6   :  { %30106 = vmatprep.subr.bf16.mxu0 %v33043_v14 }
0x27a9   :  { %30108 = vmatpush3.bf16.msra.mxu0 %v33043_v14 }
0x27aa   :  { %30110 = vmatprep.subr.bf16.mxu0 %v33049_v43 }
0x27ad   :  { %30112 = vmatpush3.bf16.msra.mxu0 %v33049_v43 }
0x27ae   :  { %30114 = vmatprep.subr.bf16.mxu0 %v33056_v54 }
0x2863   :  { %v28478_v16 = vpop.f32.mrb[32].mxu0 }
0x2864   :  { %v30627_v22 = vadd.f32 %v28478_v16, %v26013_v36  ;;  %v15011_v34 = vpop.f32.mrb[33].mxu0  ;;  %v15163_v16 = vsub.f32 %v32936_v10, %v34770_v28 }
0x2865   :  { %v30628_v12 = vadd.f32 %v26013_v36, %v15011_v34 }
0x2866   :  { %v15022_v44 = vmax.f32 %v30627_v22, 0.0  ;;  %v15169_v22 = vand.u32 4294901760, %v32950_v15  ;;  %v15164_v25 = vand.u32 4294901760, %v15163_v16  ;;  %v15197_v16 = vand.u32 4294901760, %v32978_v31 }
0x2867   :  { %v15021_v1 = vmax.f32 %v30628_v12, 0.0 }
0x2868   :  { %v33074_v46 = vand.u32 4294901760, %v15022_v44  ;;  %v15170_v34 = vsub.f32 %v32950_v15, %v15169_v22 }
0x2869   :  { %v33077_v56 = vand.u32 4294901760, %v15021_v1 }
0x286a   :  { %v33081_v30 = vsub.f32 %v15022_v44, %v33074_v46  ;;  %v15143_v44 = vand.u32 4294901760, %v15142_v47 }
0x286b   :  { %v15105_v60 = vsub.f32 %v15021_v1, %v33077_v56  ;;  %v15150_v1 = vand.u32 4294901760, %v15149_v63  ;;  %v15183_v63 = vand.u32 4294901760, %v32964_v51 }
0x286c   :  { %v34774_v2 = vand.u32 4294901760, %v33081_v30 }
0x286d   :  { %28581 = vmatprep.mubr.f32.mxu1 %v15105_v60  ;;  %v15106_v36 = vand.u32 4294901760, %v15105_v60  ;;  %v30117_v47 = vpack.c.bf16 %v15150_v1, %v15143_v44  ;;  %v34815_v1 = vand.u32 4294901760, %v33081_v30 }
0x286e   :  { %v15117_v12 = vsub.f32 %v33081_v30, %v34774_v2  ;;  %28582 = vmatmul.mubr.f32.vlgmr.msra.gmra.mrb[28].mxu1 %v33081_v30  ;;  %v15177_v2 = vsub.f32 %v32952_v19, %v34812_v7  ;;  %v15184_v7 = vsub.f32 %v32964_v51, %v15183_v63 }
0x286f   :  { %30180 = vmatpush3.bf16.msra.mxu1 %v32918_v53  ;;  %28616 = vmatprep.mubr.f32.mxu1 %v15106_v36  ;;  %v15107_v33 = vsub.f32 %v15105_v60, %v15106_v36  ;;  %v15171_v60 = vand.u32 4294901760, %v15170_v34  ;;  %v15191_v36 = vsub.f32 %v32966_v50, %v15190_v59 }
0x2870   :  { %30182 = vmatprep.subr.bf16.mxu1 %v32926_v18  ;;  %v15118_v8 = vand.u32 4294901760, %v15117_v12  ;;  %v15178_v9 = vand.u32 4294901760, %v15177_v2  ;;  %v15204_v12 = vand.u32 4294901760, %v32980_v23 }
0x2871   :  { %v15108_v28 = vand.u32 4294901760, %v15107_v33  ;;  %v30121_v33 = vpack.c.bf16 %v15164_v25, %v15157_v13  ;;  %v15192_v25 = vand.u32 4294901760, %v15191_v36  ;;  %v15198_v13 = vsub.f32 %v32978_v31, %v15197_v16  ;;  %v26014_v36 = vld [vmem:[%s34757_s3 + $0x28] sm:$0xff] }
0x2872   :  { %v34813_v31 = vand.u32 4294901760, %v32924_v20 }
0x2873   :  { %30184 = vmatpush3.bf16.msra.mxu1 %v32926_v18  ;;  %28511 = vmatprep.mubr.f32.mxu0 %v15108_v28  ;;  %v15205_v28 = vsub.f32 %v32980_v23, %v15204_v12  ;;  %v15199_v50 = vand.u32 4294901760, %v15198_v13  ;;  %v34814_v23 = vand.u32 4294901760, %v32928_v17  ;;  %v34818_v17 = vand.u32 4294901760, %v32952_v19 }
0x2874   :  { %28512 = vmatmul.mubr.f32.vlgmr.msra.gmra.mrb[34].mxu0 %v15118_v8  ;;  %30186 = vmatprep.subr.bf16.mxu1 %v32930_v24  ;;  %v30125_v8 = vpack.c.bf16 %v15178_v9, %v15171_v60 }
0x2875   :  { %30116 = vmatpush3.bf16.msra.mxu0 %v33056_v54  ;;  %28546 = vmatprep.mubr.f32.mxu0 %v33077_v56  ;;  %v15185_v54 = vand.u32 4294901760, %v15184_v7  ;;  %v15206_v2 = vand.u32 4294901760, %v15205_v28  ;;  %v30213_v44 = vpack.c.bf16 %v34814_v23, %v34813_v31 }
0x2876   :  { %30118 = vmatprep.subr.bf16.mxu0 %v30117_v47 }
0x2877   :  { %30188 = vmatpush3.bf16.msra.mxu1 %v32930_v24  ;;  %v30129_v51 = vpack.c.bf16 %v15192_v25, %v15185_v54  ;;  %v30133_v34 = vpack.c.bf16 %v15206_v2, %v15199_v50  ;;  %v26017_v25 = vld [vmem:[%s34757_s3 + $0x40] sm:$0xff] }
0x2878   :  { %30190 = vmatprep.subr.bf16.mxu1 %v32946_v52  ;;  %v15807_v28 = vand.u32 4294901760, %v26017_v25 }
0x2879   :  { %30120 = vmatpush3.bf16.msra.mxu0 %v30117_v47  ;;  %v34816_v47 = vand.u32 4294901760, %v32934_v45  ;;  %v30229_v45 = vpack.c.bf16 %v15204_v12, %v15197_v16  ;;  %v26015_v16 = vld [vmem:[%s34757_s3 + $0x30] sm:$0xff]  ;;  %v26016_v12 = vld [vmem:[%s34757_s3 + $0x38] sm:$0xff] }
0x287a   :  { %30122 = vmatprep.subr.bf16.mxu0 %v30121_v33  ;;  %v15801_v54 = vand.u32 4294901760, %v26015_v16  ;;  %v15804_v13 = vand.u32 4294901760, %v26016_v12 }
0x287b   :  { %30192 = vmatpush3.bf16.msra.mxu1 %v32946_v52 }
0x287c   :  { %30194 = vmatprep.subr.bf16.mxu1 %v32960_v40  ;;  %v33206_v50 = vpack.c.bf16 %v15807_v28, %v15804_v13 }
0x287d   :  { %30124 = vmatpush3.bf16.msra.mxu0 %v30121_v33  ;;  %v34817_v33 = vand.u32 4294901760, %v32936_v10 }
0x287e   :  { %30126 = vmatprep.subr.bf16.mxu0 %v30125_v8 }
0x287f   :  { %30196 = vmatpush3.bf16.msra.mxu1 %v32960_v40  ;;  %v30217_v20 = vpack.c.bf16 %v34817_v33, %v34816_v47  ;;  %v15902_v47 = vsub.f32 %v26016_v12, %v15804_v13  ;;  %v15909_v33 = vsub.f32 %v26017_v25, %v15807_v28 }
0x2880   :  { %30198 = vmatprep.subr.bf16.mxu1 %v32974_v48 }
0x2881   :  { %30128 = vmatpush3.bf16.msra.mxu0 %v30125_v8  ;;  %v15798_v8 = vand.u32 4294901760, %v26014_v36 }
0x2882   :  { %30130 = vmatprep.subr.bf16.mxu0 %v30129_v51 }
0x2883   :  { %30200 = vmatpush3.bf16.msra.mxu1 %v32974_v48  ;;  %v15888_v2 = vsub.f32 %v26014_v36, %v15798_v8 }
0x2884   :  { %30202 = vmatprep.subr.bf16.mxu1 %v33043_v14 }
0x2885   :  { %30132 = vmatpush3.bf16.msra.mxu0 %v30129_v51  ;;  %v33204_v51 = vpack.c.bf16 %v15801_v54, %v15798_v8  ;;  %v15889_v31 = vand.u32 4294901760, %v15888_v2 }
0x2886   :  { %30134 = vmatprep.subr.bf16.mxu0 %v30133_v34 }
0x2887   :  { %30204 = vmatpush3.bf16.msra.mxu1 %v33043_v14 }
0x2888   :  { %30206 = vmatprep.subr.bf16.mxu1 %v33049_v43 }
0x2889   :  { %30136 = vmatpush3.bf16.msra.mxu0 %v30133_v34  ;;  %v15895_v34 = vsub.f32 %v26015_v16, %v15801_v54 }
0x288a   :  { %30138 = vmatprep.subr.bf16.mxu0 %v33059_v41 }
0x288b   :  { %30208 = vmatpush3.bf16.msra.mxu1 %v33049_v43  ;;  %v15896_v23 = vand.u32 4294901760, %v15895_v34 }
0x288c   :  { %30210 = vmatprep.subr.bf16.mxu1 %v33061_v39 }
0x288d   :  { %30140 = vmatpush3.bf16.msra.mxu0 %v33059_v41  ;;  %v30221_v41 = vpack.c.bf16 %v34818_v17, %v15169_v22 }
0x288e   :  { %28617 = vmatmul.mubr.f32.vlgmr.msra.gmra.mrb[28].mxu1 %v34815_v1  ;;  %30142 = vmatprep.subr.bf16.mxu0 %v33063_v38  ;;  %v15897_v1 = vsub.f32 %v15895_v34, %v15896_v23 }
0x288f   :  { %30212 = vmatpush3.bf16.msra.mxu1 %v33061_v39  ;;  %28651 = vmatprep.mubr.f32.mxu1 %v33077_v56  ;;  %v30225_v39 = vpack.c.bf16 %v15190_v59, %v15183_v63  ;;  %v34819_v59 = vmov 0.0  }
0x2890   :  { %30214 = vmatprep.subr.bf16.mxu1 %v30213_v44  ;;  %v15898_v17 = vand.u32 4294901760, %v15897_v1 }
0x2891   :  { %30144 = vmatpush3.bf16.msra.mxu0 %v33063_v38 }
0x2892   :  { %30274 = vmatprep.subr.bf16.mxu0 %v33204_v51 }
0x2893   :  { %30216 = vmatpush3.bf16.msra.mxu1 %v30213_v44  ;;  %v15890_v44 = vsub.f32 %v15888_v2, %v15889_v31 }
0x2894   :  { %28547 = vmatmul.mubr.f32.vlgmr.msra.gmra.mrb[34].mxu0 %v33074_v46  ;;  %30218 = vmatprep.subr.bf16.mxu1 %v30217_v20 }
0x2895   :  { %30276 = vmatpush3.bf16.msra.mxu0 %v33204_v51 }
0x2896   :  { %30278 = vmatprep.subr.bf16.mxu0 %v33206_v50 }
0x2897   :  { %30220 = vmatpush3.bf16.msra.mxu1 %v30217_v20  ;;  %v15891_v20 = vand.u32 4294901760, %v15890_v44 }
0x2898   :  { %30222 = vmatprep.subr.bf16.mxu1 %v30221_v41 }
0x2899   :  { %30280 = vmatpush3.bf16.msra.mxu0 %v33206_v50 }
0x289b   :  { %30224 = vmatpush3.bf16.msra.mxu1 %v30221_v41  ;;  %v15903_v41 = vand.u32 4294901760, %v15902_v47 }
0x289c   :  { %30226 = vmatprep.subr.bf16.mxu1 %v30225_v39 }
0x289f   :  { %30228 = vmatpush3.bf16.msra.mxu1 %v30225_v39  ;;  %v15910_v39 = vand.u32 4294901760, %v15909_v33 }
0x28a0   :  { %30230 = vmatprep.subr.bf16.mxu1 %v30229_v45 }
0x28a3   :  { %30232 = vmatpush3.bf16.msra.mxu1 %v30229_v45  ;;  %v30281_v45 = vpack.c.bf16 %v15898_v17, %v15891_v20 }
0x28a4   :  { %30234 = vmatprep.subr.bf16.mxu1 %v33065_v42 }
0x28a5   :  { %30282 = vmatprep.subr.bf16.mxu0 %v30281_v45 }
0x28a7   :  { %30236 = vmatpush3.bf16.msra.mxu1 %v33065_v42 }
0x28a8   :  { %30238 = vmatprep.subr.bf16.mxu1 %v33067_v26 }
0x28ab   :  { %30240 = vmatpush3.bf16.msra.mxu1 %v33067_v26 }
0x28ac   :  { %30242 = vmatprep.subr.bf16.mxu1 %v32918_v53 }
0x28ae   :  { %28652 = vmatmul.mubr.f32.vlgmr.msra.gmra.mrb[28].mxu1 %v33074_v46 }
0x28af   :  { %30244 = vmatpush3.bf16.msra.mxu1 %v32918_v53  ;;  %28686 = vmatprep.mubr.f32.mxu1 %v33077_v56 }
0x28b0   :  { %30246 = vmatprep.subr.bf16.mxu1 %v32926_v18 }
0x28b3   :  { %30248 = vmatpush3.bf16.msra.mxu1 %v32926_v18  ;;  %v34781_v18 = vsub.s32 3, %v31574_v3 }
0x28b4   :  { %30250 = vmatprep.subr.bf16.mxu1 %v32930_v24 }
0x28b7   :  { %30252 = vmatpush3.bf16.msra.mxu1 %v32930_v24 }
0x28b8   :  { %30254 = vmatprep.subr.bf16.mxu1 %v32946_v52 }
0x28bb   :  { %30256 = vmatpush3.bf16.msra.mxu1 %v32946_v52  ;;  %v15712_v52 = vrot.slane %v32849_v62, %v34781_v18 }
0x28bc   :  { %30258 = vmatprep.subr.bf16.mxu1 %v32960_v40 }
0x28bf   :  { %30260 = vmatpush3.bf16.msra.mxu1 %v32960_v40 }
0x28c0   :  { %30262 = vmatprep.subr.bf16.mxu1 %v32974_v48 }
0x28c3   :  { %30264 = vmatpush3.bf16.msra.mxu1 %v32974_v48 }
0x28c4   :  { %30266 = vmatprep.subr.bf16.mxu1 %v33043_v14 }
0x28c7   :  { %30268 = vmatpush3.bf16.msra.mxu1 %v33043_v14 }
0x28c8   :  { %30270 = vmatprep.subr.bf16.mxu1 %v33049_v43 }
0x28cb   :  { %30272 = vmatpush3.bf16.msra.mxu1 %v33049_v43 }
0x28cc   :  { %28935 = vmatprep.subr.mxu1 %v34819_v59 }
0x28ce   :  { %28687 = vmatmul.mubr.f32.vlgmr.msra.gmra.mrb[28].mxu1 %v33074_v46 }
0x28cf   :  { %28937 = vmatprep.mubr.msk.f32.mxu1 %vm31355_vm1, %v34819_v59 }
0x2967   :  { %v28548_v40 = vpop.f32.mrb[34].mxu0 }
0x2968   :  { %v15271_v53 = vpop.f32.mrb[35].mxu0 }
0x29a1   :  { %v28688_v48 = vpop.f32.mrb[28].mxu1 }
0x29a2   :  { %v30629_v24 = vadd.f32 %v28688_v48, %v28548_v40  ;;  %v15697_v10 = vpop.f32.mrb[29].mxu1  ;;  %v15904_v40 = vsub.f32 %v15902_v47, %v15903_v41 }
0x29a3   :  { %v30630_v15 = vadd.f32 %v15697_v10, %v15271_v53  ;;  %v15911_v53 = vsub.f32 %v15909_v33, %v15910_v39 }
0x29a4   :  { %v15708_v19 = vadd.f32 %v30629_v24, %v32992_v49  ;;  %v15905_v48 = vand.u32 4294901760, %v15904_v40 }
0x29a5   :  { %v15707_v14 = vadd.f32 %v30630_v15, %v32994_v37  ;;  %v15912_v24 = vand.u32 4294901760, %v15911_v53  ;;  %v30293_v15 = vpack.c.bf16 %v15909_v33, %v15902_v47  ;;  %v26045_v33 = vld [vmem:[%s34757_s3 + $0x48] ss:$0 sm:$0xff] }
0x29a6   :  { %v15714_v43 = vadd.f32 %v15712_v52, %v15708_v19  ;;  %v30305_v19 = vpack.c.bf16 %v15896_v23, %v15889_v31 }
0x29a7   :  { %v15713_v38 = vadd.f32 %v15712_v52, %v15707_v14  ;;  %v30285_v10 = vpack.c.bf16 %v15912_v24, %v15905_v48  ;;  %v30289_v52 = vpack.c.bf16 %v15895_v34, %v15888_v2  ;;  %v30309_v14 = vpack.c.bf16 %v15910_v39, %v15903_v41 }
0x29a8   :  { %v15718_v42 = vsel %vm552_vm3, %v15714_v43, 0.0 }
0x29a9   :  { %15719 = vadd.xlane.f32.xlu1 %v15718_v42  ;;  %v15715_v26 = vsel %vm552_vm3, %v15713_v38, 0.0 }
0x29aa   :  { %15716 = vadd.xlane.f32.xlu0 %v15715_v26 }
0x2a36   :  { %v15720_v46 = vpop.xlane.xlu1 %15719 }
0x2a37   :  { %v15722_v56 = vmul.f32 0.03125, %v15720_v46  ;;  %v15717_v30 = vpop.xlane.xlu0 %15716 }
0x2a38   :  { %v15721_v22 = vmul.f32 0.03125, %v15717_v30  ;;  %v34780_v30 = vsub.s32 4, %v31574_v3 }
0x2a39   :  { %v15724_v63 = vsub.f32 %v15714_v43, %v15722_v56 }
0x2a3a   :  { %v15723_v60 = vsub.f32 %v15713_v38, %v15721_v22  ;;  %v34779_v22 = vsub.s32 5, %v31574_v3 }
0x2a3b   :  { %v15726_v9 = vmul.f32 %v15724_v63, %v15724_v63 }
0x2a3c   :  { %v15725_v7 = vmul.f32 %v15723_v60, %v15723_v60  ;;  %v15750_v36 = vrot.slane %v32849_v62, %v34779_v22 }
0x2a3d   :  { %v15730_v49 = vsel %vm552_vm3, %v15726_v9, 0.0  ;;  %v15744_v9 = vrot.slane %v32849_v62, %v34780_v30 }
0x2a3e   :  { %15731 = vadd.xlane.f32.xlu1 %v15730_v49  ;;  %v15727_v37 = vsel %vm552_vm3, %v15725_v7, 0.0 }
0x2a3f   :  { %15728 = vadd.xlane.f32.xlu0 %v15727_v37 }
0x2acb   :  { %v15732_v43 = vpop.xlane.xlu1 %15731 }
0x2acc   :  { %v15734_v38 = vmul.f32 0.03125, %v15732_v43  ;;  %v15729_v42 = vpop.xlane.xlu0 %15728 }
0x2acd   :  { %v15733_v26 = vmul.f32 0.03125, %v15729_v42 }
0x2ace   :  { %v15736_v46 = vadd.f32 1e-05, %v15734_v38 }
0x2acf   :  { %v15735_v56 = vadd.f32 1e-05, %v15733_v26 }
0x2ad0   :  { %31285 = vrsqrt.f32 %v15736_v46 }
0x2ad1   :  { %31287 = vrsqrt.f32 %v15735_v56 }
0x2ada   :  { %v31286_v7 = vpop.eup %31285 }
0x2adb   :  { %v31288_v49 = vpop.eup %31287  ;;  %v15740_v37 = vmul.f32 %v31286_v7, %v15724_v63 }
0x2adc   :  { %v15739_v16 = vmul.f32 %v31288_v49, %v15723_v60 }
0x2add   :  { %v15746_v12 = vmul.f32 %v15744_v9, %v15740_v37 }
0x2ade   :  { %v15745_v8 = vmul.f32 %v15744_v9, %v15739_v16 }
0x2adf   :  { %v33220_v54 = vadd.f32 %v15750_v36, %v15746_v12 }
0x2ae0   :  { %v33222_v25 = vadd.f32 %v15750_v36, %v15745_v8 }
0x2ae1   :  { %v15795_v13 = vsel %vm552_vm3, %v33220_v54, 0 }
0x2ae2   :  { %v15792_v28 = vsel %vm552_vm3, %v33222_v25, 0  ;;  %v15876_v2 = vand.u32 4294901760, %v15795_v13 }
0x2ae3   :  { %v15866_v34 = vand.u32 4294901760, %v15792_v28 }
0x2ae4   :  { %v15877_v63 = vsub.f32 %v15795_v13, %v15876_v2 }
0x2ae5   :  { %v15867_v31 = vsub.f32 %v15792_v28, %v15866_v34 }
0x2ae6   :  { %v15878_v23 = vand.u32 4294901760, %v15877_v63 }
0x2ae7   :  { %v15868_v44 = vand.u32 4294901760, %v15867_v31 }
0x2ae8   :  { %v15879_v62 = vsub.f32 %v15877_v63, %v15878_v23 }
0x2ae9   :  { %v15869_v60 = vsub.f32 %v15867_v31, %v15868_v44 }
0x2aea   :  { %v15880_v47 = vand.u32 4294901760, %v15879_v62 }
0x2aeb   :  { %v15870_v1 = vand.u32 4294901760, %v15869_v60 }
0x2aed   :  { %28697 = vmatprep.mubr.f32.mxu0 %v15870_v1 }
0x2aee   :  { %28698 = vmatmul.mubr.f32.vlgmr.msra.gmra.mrb[36].mxu0 %v15880_v47 }
0x2aef   :  { %30284 = vmatpush3.bf16.msra.mxu0 %v30281_v45  ;;  %28708 = vmatprep.mubr.f32.mxu0 %v15866_v34 }
0x2af0   :  { %30286 = vmatprep.subr.bf16.mxu0 %v30285_v10 }
0x2af3   :  { %30288 = vmatpush3.bf16.msra.mxu0 %v30285_v10 }
0x2af4   :  { %30290 = vmatprep.subr.bf16.mxu0 %v30289_v52 }
0x2af6   :  { %28709 = vmatmul.mubr.f32.vlgmr.msra.gmra.mrb[36].mxu0 %v15876_v2 }
0x2af7   :  { %30292 = vmatpush3.bf16.msra.mxu0 %v30289_v52  ;;  %28719 = vmatprep.mubr.f32.mxu0 %v15867_v31 }
0x2af8   :  { %30294 = vmatprep.subr.bf16.mxu0 %v30293_v15 }
0x2afb   :  { %30296 = vmatpush3.bf16.msra.mxu0 %v30293_v15 }
0x2afc   :  { %30298 = vmatprep.subr.bf16.mxu0 %v33204_v51 }
0x2afe   :  { %28720 = vmatmul.mubr.f32.vlgmr.msra.gmra.mrb[36].mxu0 %v15877_v63 }
0x2aff   :  { %30300 = vmatpush3.bf16.msra.mxu0 %v33204_v51  ;;  %28730 = vmatprep.mubr.f32.mxu0 %v15868_v44 }
0x2b00   :  { %30302 = vmatprep.subr.bf16.mxu0 %v33206_v50 }
0x2b03   :  { %30304 = vmatpush3.bf16.msra.mxu0 %v33206_v50 }
0x2b04   :  { %30306 = vmatprep.subr.bf16.mxu0 %v30305_v19 }
0x2b06   :  { %28731 = vmatmul.mubr.f32.vlgmr.msra.gmra.mrb[36].mxu0 %v15878_v23 }
0x2b07   :  { %30308 = vmatpush3.bf16.msra.mxu0 %v30305_v19  ;;  %28741 = vmatprep.mubr.f32.mxu0 %v15866_v34 }
0x2b08   :  { %30310 = vmatprep.subr.bf16.mxu0 %v30309_v14 }
0x2b0b   :  { %30312 = vmatpush3.bf16.msra.mxu0 %v30309_v14 }
0x2b0c   :  { %30314 = vmatprep.subr.bf16.mxu0 %v33204_v51 }
0x2b0e   :  { %28742 = vmatmul.mubr.f32.vlgmr.msra.gmra.mrb[36].mxu0 %v15876_v2 }
0x2b0f   :  { %30316 = vmatpush3.bf16.msra.mxu0 %v33204_v51  ;;  %28752 = vmatprep.mubr.f32.mxu0 %v15866_v34 }
0x2b10   :  { %30318 = vmatprep.subr.bf16.mxu0 %v33206_v50 }
0x2b13   :  { %30320 = vmatpush3.bf16.msra.mxu0 %v33206_v50 }
0x2b14   :  { %28755 = vmatprep.subr.mxu0 %v34819_v59 }
0x2b16   :  { %28753 = vmatmul.mubr.f32.vlgmr.msra.gmra.mrb[36].mxu0 %v15876_v2 }
0x2b17   :  { %28757 = vmatprep.mubr.msk.f32.mxu0 %vm31355_vm1, %v34819_v59 }
0x2be9   :  { %v28754_v20 = vpop.f32.mrb[36].mxu0 }
0x2bea   :  { %v33242_v17 = vadd.f32 %v28754_v20, %v26045_v33  ;;  %v16315_v41 = vpop.f32.mrb[37].mxu0 }
0x2beb   :  { %v33244_v51 = vadd.f32 %v26045_v33, %v16315_v41 }
0x2bec   :  { %16779 = vrot.lane.b32.xlu1 %v33242_v17, %s31358_s18  ;;  %v16781_v42 = vsel %vm6103_vm11, %v33242_v17, 0 }
0x2bed   :  { %16326 = vrot.lane.b32.xlu0 %v33244_v51, %s31358_s18  ;;  %v16328_v50 = vsel %vm6103_vm11, %v33244_v51, 0  ;;  %v16851_v46 = vand.u32 4294901760, %v16781_v42 }
0x2bee   :  { %v16398_v39 = vand.u32 4294901760, %v16328_v50 }
0x2bef   :  { %v16852_v9 = vsub.f32 %v16781_v42, %v16851_v46 }
0x2bf0   :  { %v16399_v45 = vsub.f32 %v16328_v50, %v16398_v39 }
0x2bf1   :  { %v16853_v49 = vand.u32 4294901760, %v16852_v9 }
0x2bf2   :  { %v16400_v40 = vand.u32 4294901760, %v16399_v45 }
0x2bf3   :  { %v16854_v36 = vsub.f32 %v16852_v9, %v16853_v49 }
0x2bf4   :  { %v16401_v24 = vsub.f32 %v16399_v45, %v16400_v40 }
0x2bf5   :  { %v16855_v12 = vand.u32 4294901760, %v16854_v36 }
0x2bf6   :  { %v16402_v15 = vand.u32 4294901760, %v16401_v24 }
0x2c5e   :  { %v16780_v38 = vpop.permute.xlu1 %16779 }
0x2c5f   :  { %v16327_v53 = vpop.permute.xlu0 %16326  ;;  %v16783_v26 = vsel %vm6103_vm11, %v16780_v38, 0 }
0x2c60   :  { %v16330_v48 = vsel %vm6103_vm11, %v16327_v53, 0  ;;  %v16786_v56 = vand.u32 4294901760, %v16783_v26 }
0x2c61   :  { %v16333_v10 = vand.u32 4294901760, %v16330_v48 }
0x2c62   :  { %v16863_v7 = vsub.f32 %v16783_v26, %v16786_v56 }
0x2c63   :  { %v16410_v52 = vsub.f32 %v16330_v48, %v16333_v10  ;;  %28756 = vmatpush3.xpose.msra.mxu0 %v16333_v10 }
0x2c64   :  { %28760 = vmatprep.subr.mxu0 %v34819_v59  ;;  %v16864_v37 = vand.u32 4294901760, %v16863_v7 }
0x2c65   :  { %v16411_v19 = vand.u32 4294901760, %v16410_v52 }
0x2c66   :  { %28758 = vmatmul.mubr.f32.vlgmr.msra.gmra.mrb[38].mxu0 %v16402_v15  ;;  %v16865_v16 = vsub.f32 %v16863_v7, %v16864_v37 }
0x2c67   :  { %v16412_v14 = vsub.f32 %v16410_v52, %v16411_v19  ;;  %28762 = vmatprep.mubr.msk.f32.mxu0 %vm31355_vm1, %v34819_v59 }
0x2c68   :  { %v16866_v8 = vand.u32 4294901760, %v16865_v16 }
0x2c69   :  { %v16413_v43 = vand.u32 4294901760, %v16412_v14 }
0x2c6b   :  { %28761 = vmatpush3.xpose.msra.mxu0 %v16413_v43 }
0x2c6c   :  { %28765 = vmatprep.subr.mxu0 %v34819_v59 }
0x2c6e   :  { %28763 = vmatmul.mubr.f32.vlgmr.msra.gmra.mrb[38].mxu0 %v16398_v39 }
0x2c6f   :  { %28766 = vmatpush3.xpose.msra.mxu0 %v16410_v52  ;;  %28767 = vmatprep.mubr.msk.f32.mxu0 %vm31355_vm1, %v34819_v59 }
0x2c70   :  { %28770 = vmatprep.subr.mxu0 %v34819_v59 }
0x2c76   :  { %28768 = vmatmul.mubr.f32.vlgmr.msra.gmra.mrb[38].mxu0 %v16399_v45 }
0x2c77   :  { %28771 = vmatpush3.xpose.msra.mxu0 %v16333_v10  ;;  %28772 = vmatprep.mubr.msk.f32.mxu0 %vm31355_vm1, %v34819_v59 }
0x2c78   :  { %28775 = vmatprep.subr.mxu0 %v34819_v59 }
0x2c7e   :  { %28773 = vmatmul.mubr.f32.vlgmr.msra.gmra.mrb[38].mxu0 %v16400_v40 }
0x2c7f   :  { %28776 = vmatpush3.xpose.msra.mxu0 %v16411_v19  ;;  %28777 = vmatprep.mubr.msk.f32.mxu0 %vm31355_vm1, %v34819_v59 }
0x2c80   :  { %28780 = vmatprep.subr.mxu0 %v34819_v59 }
0x2c86   :  { %28778 = vmatmul.mubr.f32.vlgmr.msra.gmra.mrb[38].mxu0 %v16398_v39 }
0x2c87   :  { %28781 = vmatpush3.xpose.msra.mxu0 %v16333_v10  ;;  %28782 = vmatprep.mubr.msk.f32.mxu0 %vm31355_vm1, %v34819_v59 }
0x2c88   :  { %28785 = vmatprep.subr.mxu0 %v34819_v59 }
0x2c8e   :  { %28783 = vmatmul.mubr.f32.vlgmr.msra.gmra.mrb[38].mxu0 %v16398_v39 }
0x2c8f   :  { %28786 = vmatpush3.xpose.msra.mxu0 %v16786_v56  ;;  %28787 = vmatprep.mubr.msk.f32.mxu0 %vm31355_vm1, %v34819_v59 }
0x2c90   :  { %28790 = vmatprep.subr.mxu0 %v34819_v59 }
0x2c92   :  { %28788 = vmatmul.mubr.f32.vlgmr.msra.gmra.mrb[40].mxu0 %v16855_v12 }
0x2c93   :  { %28791 = vmatpush3.xpose.msra.mxu0 %v16866_v8  ;;  %28792 = vmatprep.mubr.msk.f32.mxu0 %vm31355_vm1, %v34819_v59 }
0x2c94   :  { %28795 = vmatprep.subr.mxu0 %v34819_v59 }
0x2c9a   :  { %28793 = vmatmul.mubr.f32.vlgmr.msra.gmra.mrb[40].mxu0 %v16851_v46 }
0x2c9b   :  { %28796 = vmatpush3.xpose.msra.mxu0 %v16863_v7  ;;  %28797 = vmatprep.mubr.msk.f32.mxu0 %vm31355_vm1, %v34819_v59 }
0x2c9c   :  { %28800 = vmatprep.subr.mxu0 %v34819_v59 }
0x2ca2   :  { %28798 = vmatmul.mubr.f32.vlgmr.msra.gmra.mrb[40].mxu0 %v16852_v9 }
0x2ca3   :  { %28801 = vmatpush3.xpose.msra.mxu0 %v16786_v56  ;;  %28802 = vmatprep.mubr.msk.f32.mxu0 %vm31355_vm1, %v34819_v59 }
0x2ca4   :  { %28805 = vmatprep.subr.mxu0 %v34819_v59 }
0x2caa   :  { %28803 = vmatmul.mubr.f32.vlgmr.msra.gmra.mrb[40].mxu0 %v16853_v49 }
0x2cab   :  { %28806 = vmatpush3.xpose.msra.mxu0 %v16864_v37  ;;  %28807 = vmatprep.mubr.msk.f32.mxu0 %vm31355_vm1, %v34819_v59 }
0x2cac   :  { %28810 = vmatprep.subr.mxu0 %v34819_v59 }
0x2cb2   :  { %28808 = vmatmul.mubr.f32.vlgmr.msra.gmra.mrb[40].mxu0 %v16851_v46 }
0x2cb3   :  { %28811 = vmatpush3.xpose.msra.mxu0 %v16786_v56  ;;  %28812 = vmatprep.mubr.msk.f32.mxu0 %vm31355_vm1, %v34819_v59 }
0x2cb4   :  { %28815 = vmatprep.subr.mxu0 %v34819_v59 }
0x2cba   :  { %28813 = vmatmul.mubr.f32.vlgmr.msra.gmra.mrb[40].mxu0 %v16851_v46 }
0x2cbb   :  { %28817 = vmatprep.mubr.msk.f32.mxu0 %vm31355_vm1, %v34819_v59 }
0x2d61   :  { %v16774_v13 = vpop.f32.mrb[38].mxu0 }
0x2d62   :  { %v17231_v28 = vmul.f32 0.35355338, %v16774_v13  ;;  %v28784_v2 = vpop.f32.mrb[39].mxu0 }
0x2d64   :  { %v17233_v34 = vsel %vm6103_vm11, %v17231_v28, -inf }
0x2d65   :  { %17234 = vmax.xlane.f32.xlu1 %v17233_v34 }
0x2d76   :  { %17356 = vrot.lane.b32.xlu1 %v33244_v51, %s31357_s1 }
0x2d7a   :  { %18260 = vrot.lane.b32.xlu1 %v33244_v51, %s31359_s0 }
0x2d7e   :  { %18262 = vrot.lane.b32.xlu1 %v33244_v51, %s31360_s15 }
0x2d82   :  { %18714 = vrot.lane.b32.xlu1 %v33242_v17, %s31359_s0 }
0x2d8d   :  { %v17227_v63 = vpop.f32.mrb[40].mxu0 }
0x2d8e   :  { %v17232_v31 = vmul.f32 0.35355338, %v17227_v63  ;;  %v28814_v23 = vpop.f32.mrb[41].mxu0 }
0x2d90   :  { %v17236_v44 = vsel %vm6103_vm11, %v17232_v31, -inf }
0x2d91   :  { %17237 = vmax.xlane.f32.xlu0 %v17236_v44 }
0x2df2   :  { %v17235_v62 = vpop.xlane.xlu1 %17234 }
0x2df3   :  { %v17239_v60 = vsub.f32 %v17231_v28, %v17235_v62 }
0x2df5   :  { %v17241_v1 = vmul.f32 1.442695, %v17239_v60 }
0x2df6   :  { %v17357_v47 = vpop.permute.xlu1 %17356 }
0x2df7   :  { %31289 = vpow2.f32 %v17241_v1  ;;  %v17363_v33 = vand.u32 4294901760, %v17357_v47 }
0x2df9   :  { %28816 = vmatpush3.msra.mxu0 %v17363_v33  ;;  %v17440_v10 = vsub.f32 %v17357_v47, %v17363_v33 }
0x2dfa   :  { %28820 = vmatprep.subr.mxu0 %v34819_v59 }
0x2dfb   :  { %v17441_v14 = vand.u32 4294901760, %v17440_v10 }
0x2dfd   :  { %v17442_v42 = vsub.f32 %v17440_v10, %v17441_v14 }
0x2dff   :  { %v17443_v56 = vand.u32 4294901760, %v17442_v42 }
0x2e01   :  { %v31290_v20 = vpop.eup %31289 }
0x2e02   :  { %v17245_v41 = vsel %vm6103_vm11, %v31290_v20, 0.0 }
0x2e03   :  { %17246 = vadd.xlane.f32.xlu0 %v17245_v41 }
0x2e1e   :  { %v17238_v50 = vpop.xlane.xlu0 %17237 }
0x2e1f   :  { %v17240_v39 = vsub.f32 %v17232_v31, %v17238_v50 }
0x2e21   :  { %v17243_v45 = vmul.f32 1.442695, %v17240_v39 }
0x2e23   :  { %31291 = vpow2.f32 %v17243_v45  ;;  %v18261_v45 = vpop.permute.xlu1 %18260 }
0x2e2d   :  { %v31292_v40 = vpop.eup %31291 }
0x2e2e   :  { %v17248_v53 = vsel %vm6103_vm11, %v31292_v40, 0.0 }
0x2e2f   :  { %17249 = vadd.xlane.f32.xlu0 %v17248_v53  ;;  %v18264_v53 = vsel %vm6103_vm11, %v18261_v45, 0 }
0x2e45   :  { %17808 = vrot.lane.b32.xlu0 %v33242_v17, %s31357_s1 }
0x2e49   :  { %18716 = vrot.lane.b32.xlu0 %v33242_v17, %s31360_s15 }
0x2e90   :  { %v17247_v48 = vpop.xlane.xlu0 %17246 }
0x2e91   :  { %31293 = vrcp.f32 %v17247_v48 }
0x2e9b   :  { %v31294_v24 = vpop.eup %31293 }
0x2e9c   :  { %v17252_v52 = vmul.f32 %v31294_v24, %v31290_v20  ;;  %v18334_v24 = vand.u32 4294901760, %v18264_v53 }
0x2e9e   :  { %v17360_v15 = vsel %vm6103_vm11, %v17252_v52, 0  ;;  %v17255_v36 = vcombine.high %v17252_v52, %v34819_v59  ;;  %v33327_v13 = vrot.slane %v17252_v52, %v32212_v27  ;;  %v18335_v52 = vsub.f32 %v18264_v53, %v18334_v24 }
0x2e9f   :  { %v17428_v19 = vand.u32 4294901760, %v17360_v15 }
0x2ea0   :  { %v33335_v63 = vrot.slane %v17255_v36, %v32212_v27 }
0x2ea1   :  { %v17429_v43 = vsub.f32 %v17360_v15, %v17428_v19 }
0x2ea2   :  { %34820 = vst [vmem:[#allocation10_spill] sm:$0xff] %v33335_v63 }
0x2ea3   :  { %v17430_v38 = vand.u32 4294901760, %v17429_v43 }
0x2ea5   :  { %v17431_v26 = vsub.f32 %v17429_v43, %v17430_v38 }
0x2ea7   :  { %v17432_v46 = vand.u32 4294901760, %v17431_v26 }
0x2ea9   :  { %28818 = vmatmul.mubr.f32.vlgmr.msra.gmra.mrb[42].mxu0 %v17432_v46 }
0x2eaa   :  { %28821 = vmatpush3.msra.mxu0 %v17443_v56  ;;  %28822 = vmatprep.mubr.msk.f32.mxu0 %vm31355_vm1, %v34819_v59 }
0x2eab   :  { %28825 = vmatprep.subr.mxu0 %v34819_v59 }
0x2eb1   :  { %28823 = vmatmul.mubr.f32.vlgmr.msra.gmra.mrb[42].mxu0 %v17428_v19 }
0x2eb2   :  { %28826 = vmatpush3.msra.mxu0 %v17440_v10  ;;  %28827 = vmatprep.mubr.msk.f32.mxu0 %vm31355_vm1, %v34819_v59 }
0x2eb3   :  { %28830 = vmatprep.subr.mxu0 %v34819_v59 }
0x2eb9   :  { %28828 = vmatmul.mubr.f32.vlgmr.msra.gmra.mrb[42].mxu0 %v17429_v43 }
0x2eba   :  { %28831 = vmatpush3.msra.mxu0 %v17363_v33  ;;  %28832 = vmatprep.mubr.msk.f32.mxu0 %vm31355_vm1, %v34819_v59 }
0x2ebb   :  { %28835 = vmatprep.subr.mxu0 %v34819_v59 }
0x2ebc   :  { %v17250_v9 = vpop.xlane.xlu0 %17249 }
0x2ebd   :  { %31295 = vrcp.f32 %v17250_v9 }
0x2ec0   :  { %v17809_v7 = vpop.permute.xlu0 %17808 }
0x2ec1   :  { %28833 = vmatmul.mubr.f32.vlgmr.msra.gmra.mrb[42].mxu0 %v17430_v38  ;;  %v17815_v49 = vand.u32 4294901760, %v17809_v7 }
0x2ec2   :  { %28836 = vmatpush3.msra.mxu0 %v17441_v14  ;;  %28837 = vmatprep.mubr.msk.f32.mxu0 %vm31355_vm1, %v34819_v59 }
0x2ec3   :  { %28840 = vmatprep.subr.mxu0 %v34819_v59  ;;  %v17892_v12 = vsub.f32 %v17809_v7, %v17815_v49 }
0x2ec4   :  { %v18717_v56 = vpop.permute.xlu0 %18716 }
0x2ec5   :  { %v17893_v31 = vand.u32 4294901760, %v17892_v12  ;;  %v18720_v7 = vsel %vm6103_vm11, %v18717_v56, 0 }
0x2ec7   :  { %v31296_v37 = vpop.eup %31295  ;;  %v17894_v20 = vsub.f32 %v17892_v12, %v17893_v31 }
0x2ec8   :  { %v17254_v16 = vmul.f32 %v31296_v37, %v31292_v40  ;;  %v18263_v40 = vpop.permute.xlu1 %18262  ;;  %v18723_v37 = vand.u32 4294901760, %v18720_v7 }
0x2ec9   :  { %28838 = vmatmul.mubr.f32.vlgmr.msra.gmra.mrb[42].mxu0 %v17428_v19  ;;  %v17895_v39 = vand.u32 4294901760, %v17894_v20  ;;  %v18266_v48 = vsel %vm6103_vm11, %v18263_v40, 0 }
0x2eca   :  { %28841 = vmatpush3.msra.mxu0 %v17363_v33  ;;  %28842 = vmatprep.mubr.msk.f32.mxu0 %vm31355_vm1, %v34819_v59  ;;  %v17812_v8 = vsel %vm6103_vm11, %v17254_v16, 0  ;;  %v33330_v28 = vrot.slane %v17254_v16, %v32212_v27  ;;  %v17270_v2 = vcombine.high %v17254_v16, %v34819_v59  ;;  %v18269_v10 = vand.u32 4294901760, %v18266_v48 }
0x2ecb   :  { %28845 = vmatprep.subr.mxu0 %v34819_v59  ;;  %v17880_v34 = vand.u32 4294901760, %v17812_v8  ;;  %v18800_v16 = vsub.f32 %v18720_v7, %v18723_v37 }
0x2ecc   :  { %v33342_v62 = vrot.slane %v17270_v2, %v32212_v27  ;;  %v18346_v15 = vsub.f32 %v18266_v48, %v18269_v10  ;;  %v18715_v46 = vpop.permute.xlu1 %18714 }
0x2ecd   :  { %v17881_v60 = vsub.f32 %v17812_v8, %v17880_v34  ;;  %v18718_v9 = vsel %vm6103_vm11, %v18715_v46, 0  ;;  %v18801_v8 = vand.u32 4294901760, %v18800_v16 }
0x2ece   :  { %34821 = vst [vmem:[#allocation11_spill] sm:$0xff] %v33342_v62  ;;  %v18347_v14 = vand.u32 4294901760, %v18346_v15 }
0x2ecf   :  { %v17882_v47 = vand.u32 4294901760, %v17881_v60 }
0x2ed0   :  { %v18348_v38 = vsub.f32 %v18346_v15, %v18347_v14 }
0x2ed1   :  { %28843 = vmatmul.mubr.f32.vlgmr.msra.gmra.mrb[42].mxu0 %v17428_v19  ;;  %v17883_v41 = vsub.f32 %v17881_v60, %v17882_v47  ;;  %v18336_v19 = vand.u32 4294901760, %v18335_v52 }
0x2ed2   :  { %28846 = vmatpush3.msra.mxu0 %v17815_v49  ;;  %28847 = vmatprep.mubr.msk.f32.mxu0 %vm31355_vm1, %v34819_v59  ;;  %v18349_v26 = vand.u32 4294901760, %v18348_v38 }
0x2ed3   :  { %28850 = vmatprep.subr.mxu0 %v34819_v59  ;;  %v17884_v50 = vand.u32 4294901760, %v17883_v41  ;;  %v18337_v43 = vsub.f32 %v18335_v52, %v18336_v19 }
0x2ed5   :  { %28848 = vmatmul.mubr.f32.vlgmr.msra.gmra.mrb[44].mxu0 %v17884_v50  ;;  %v18338_v42 = vand.u32 4294901760, %v18337_v43 }
0x2ed6   :  { %28851 = vmatpush3.msra.mxu0 %v17895_v39  ;;  %28852 = vmatprep.mubr.msk.f32.mxu0 %vm31355_vm1, %v34819_v59 }
0x2ed7   :  { %28855 = vmatprep.subr.mxu0 %v34819_v59 }
0x2edd   :  { %28853 = vmatmul.mubr.f32.vlgmr.msra.gmra.mrb[44].mxu0 %v17880_v34 }
0x2ede   :  { %28856 = vmatpush3.msra.mxu0 %v17892_v12  ;;  %28857 = vmatprep.mubr.msk.f32.mxu0 %vm31355_vm1, %v34819_v59 }
0x2edf   :  { %28860 = vmatprep.subr.mxu0 %v34819_v59 }
0x2ee5   :  { %28858 = vmatmul.mubr.f32.vlgmr.msra.gmra.mrb[44].mxu0 %v17881_v60 }
0x2ee6   :  { %28861 = vmatpush3.msra.mxu0 %v17815_v49  ;;  %28862 = vmatprep.mubr.msk.f32.mxu0 %vm31355_vm1, %v34819_v59 }
0x2ee7   :  { %28865 = vmatprep.subr.mxu0 %v34819_v59 }
0x2eed   :  { %28863 = vmatmul.mubr.f32.vlgmr.msra.gmra.mrb[44].mxu0 %v17882_v47 }
0x2eee   :  { %28866 = vmatpush3.msra.mxu0 %v17893_v31  ;;  %28867 = vmatprep.mubr.msk.f32.mxu0 %vm31355_vm1, %v34819_v59 }
0x2eef   :  { %28870 = vmatprep.subr.mxu0 %v34819_v59 }
0x2ef5   :  { %28868 = vmatmul.mubr.f32.vlgmr.msra.gmra.mrb[44].mxu0 %v17880_v34 }
0x2ef6   :  { %28871 = vmatpush3.msra.mxu0 %v17815_v49  ;;  %28872 = vmatprep.mubr.msk.f32.mxu0 %vm31355_vm1, %v34819_v59  ;;  %v18788_v49 = vand.u32 4294901760, %v18718_v9 }
0x2ef7   :  { %28875 = vmatprep.subr.mxu0 %v34819_v59 }
0x2ef8   :  { %v18789_v36 = vsub.f32 %v18718_v9, %v18788_v49 }
0x2efa   :  { %v18790_v12 = vand.u32 4294901760, %v18789_v36 }
0x2efc   :  { %v18791_v2 = vsub.f32 %v18789_v36, %v18790_v12 }
0x2efd   :  { %28873 = vmatmul.mubr.f32.vlgmr.msra.gmra.mrb[44].mxu0 %v17880_v34  ;;  %v18802_v34 = vsub.f32 %v18800_v16, %v18801_v8 }
0x2efe   :  { %28876 = vmatpush3.xpose.msra.mxu0 %v18269_v10  ;;  %28877 = vmatprep.mubr.msk.f32.mxu0 %vm31355_vm1, %v34819_v59  ;;  %v18792_v31 = vand.u32 4294901760, %v18791_v2 }
0x2eff   :  { %28880 = vmatprep.subr.mxu0 %v34819_v59  ;;  %v18803_v60 = vand.u32 4294901760, %v18802_v34 }
0x2f01   :  { %28878 = vmatmul.mubr.f32.vlgmr.msra.gmra.mrb[46].mxu0 %v18338_v42 }
0x2f02   :  { %28881 = vmatpush3.xpose.msra.mxu0 %v18349_v26  ;;  %28882 = vmatprep.mubr.msk.f32.mxu0 %vm31355_vm1, %v34819_v59 }
0x2f03   :  { %28885 = vmatprep.subr.mxu0 %v34819_v59 }
0x2f09   :  { %28883 = vmatmul.mubr.f32.vlgmr.msra.gmra.mrb[46].mxu0 %v18334_v24 }
0x2f0a   :  { %28886 = vmatpush3.xpose.msra.mxu0 %v18346_v15  ;;  %28887 = vmatprep.mubr.msk.f32.mxu0 %vm31355_vm1, %v34819_v59 }
0x2f0b   :  { %28890 = vmatprep.subr.mxu0 %v34819_v59 }
0x2f11   :  { %28888 = vmatmul.mubr.f32.vlgmr.msra.gmra.mrb[46].mxu0 %v18335_v52 }
0x2f12   :  { %28891 = vmatpush3.xpose.msra.mxu0 %v18269_v10  ;;  %28892 = vmatprep.mubr.msk.f32.mxu0 %vm31355_vm1, %v34819_v59 }
0x2f13   :  { %28895 = vmatprep.subr.mxu0 %v34819_v59 }
0x2f19   :  { %28893 = vmatmul.mubr.f32.vlgmr.msra.gmra.mrb[46].mxu0 %v18336_v19 }
0x2f1a   :  { %28896 = vmatpush3.xpose.msra.mxu0 %v18347_v14  ;;  %28897 = vmatprep.mubr.msk.f32.mxu0 %vm31355_vm1, %v34819_v59 }
0x2f1b   :  { %28900 = vmatprep.subr.mxu0 %v34819_v59 }
0x2f21   :  { %28898 = vmatmul.mubr.f32.vlgmr.msra.gmra.mrb[46].mxu0 %v18334_v24 }
0x2f22   :  { %28901 = vmatpush3.xpose.msra.mxu0 %v18269_v10  ;;  %28902 = vmatprep.mubr.msk.f32.mxu0 %vm31355_vm1, %v34819_v59 }
0x2f23   :  { %28905 = vmatprep.subr.mxu0 %v34819_v59 }
0x2f29   :  { %28903 = vmatmul.mubr.f32.vlgmr.msra.gmra.mrb[46].mxu0 %v18334_v24 }
0x2f2a   :  { %28906 = vmatpush3.xpose.msra.mxu0 %v18723_v37  ;;  %28907 = vmatprep.mubr.msk.f32.mxu0 %vm31355_vm1, %v34819_v59 }
0x2f2b   :  { %28910 = vmatprep.subr.mxu0 %v34819_v59 }
0x2f2d   :  { %28908 = vmatmul.mubr.f32.vlgmr.msra.gmra.mrb[48].mxu0 %v18792_v31 }
0x2f2e   :  { %28911 = vmatpush3.xpose.msra.mxu0 %v18803_v60  ;;  %28912 = vmatprep.mubr.msk.f32.mxu0 %vm31355_vm1, %v34819_v59 }
0x2f2f   :  { %28915 = vmatprep.subr.mxu0 %v34819_v59 }
0x2f35   :  { %28913 = vmatmul.mubr.f32.vlgmr.msra.gmra.mrb[48].mxu0 %v18788_v49 }
0x2f36   :  { %28916 = vmatpush3.xpose.msra.mxu0 %v18800_v16  ;;  %28917 = vmatprep.mubr.msk.f32.mxu0 %vm31355_vm1, %v34819_v59 }
0x2f37   :  { %28920 = vmatprep.subr.mxu0 %v34819_v59 }
0x2f3d   :  { %28918 = vmatmul.mubr.f32.vlgmr.msra.gmra.mrb[48].mxu0 %v18789_v36 }
0x2f3e   :  { %28921 = vmatpush3.xpose.msra.mxu0 %v18723_v37  ;;  %28922 = vmatprep.mubr.msk.f32.mxu0 %vm31355_vm1, %v34819_v59 }
0x2f3f   :  { %28925 = vmatprep.subr.mxu0 %v34819_v59 }
0x2f45   :  { %28923 = vmatmul.mubr.f32.vlgmr.msra.gmra.mrb[48].mxu0 %v18790_v12 }
0x2f46   :  { %28926 = vmatpush3.xpose.msra.mxu0 %v18801_v8  ;;  %28927 = vmatprep.mubr.msk.f32.mxu0 %vm31355_vm1, %v34819_v59 }
0x2f47   :  { %28930 = vmatprep.subr.mxu0 %v34819_v59 }
0x2f4d   :  { %28928 = vmatmul.mubr.f32.vlgmr.msra.gmra.mrb[48].mxu0 %v18788_v49 }
0x2f4e   :  { %28931 = vmatpush3.xpose.msra.mxu0 %v18723_v37  ;;  %28932 = vmatprep.mubr.msk.f32.mxu0 %vm31355_vm1, %v34819_v59 }
0x2f4f   :  { %28965 = vmatprep.subr.mxu0 %v34819_v59 }
0x2f55   :  { %28933 = vmatmul.mubr.f32.vlgmr.msra.gmra.mrb[48].mxu0 %v18788_v49 }
0x2f56   :  { %28967 = vmatprep.mubr.msk.f32.mxu0 %vm31355_vm1, %v34819_v59 }
0x2fa4   :  { %v33408_v47 = vpop.f32.mrb[42].mxu0 }
0x2fa5   :  { %v28844_v20 = vpop.f32.mrb[43].mxu0 }
0x2fd0   :  { %v33410_v41 = vpop.f32.mrb[44].mxu0 }
0x2fd1   :  { %v28874_v50 = vpop.f32.mrb[45].mxu0 }
0x2ffc   :  { %v18710_v39 = vpop.f32.mrb[46].mxu0 }
0x2ffd   :  { %v19168_v45 = vmul.f32 0.35355338, %v18710_v39  ;;  %v28904_v40 = vpop.f32.mrb[47].mxu0 }
0x2fff   :  { %v19170_v53 = vsel %vm6103_vm11, %v19168_v45, -inf }
0x3000   :  { %19171 = vmax.xlane.f32.xlu1 %v19170_v53 }
0x3028   :  { %v19164_v48 = vpop.f32.mrb[48].mxu0 }
0x3029   :  { %v19169_v24 = vmul.f32 0.35355338, %v19164_v48  ;;  %v28934_v10 = vpop.f32.mrb[49].mxu0 }
0x302b   :  { %v19173_v52 = vsel %vm6103_vm11, %v19169_v24, -inf }
0x302c   :  { %19174 = vmax.xlane.f32.xlu0 %v19173_v52 }
0x308d   :  { %v19172_v15 = vpop.xlane.xlu1 %19171 }
0x308e   :  { %v19176_v19 = vsub.f32 %v19168_v45, %v19172_v15 }
0x3090   :  { %v19178_v14 = vmul.f32 1.442695, %v19176_v19 }
0x3092   :  { %31297 = vpow2.f32 %v19178_v14 }
0x309c   :  { %v31298_v43 = vpop.eup %31297 }
0x309d   :  { %v19182_v38 = vsel %vm6103_vm11, %v31298_v43, 0.0 }
0x309e   :  { %19183 = vadd.xlane.f32.xlu0 %v19182_v38 }
0x30b4   :  { %19293 = vrot.lane.b32.xlu0 %v33244_v51, %s31362_s16 }
0x30b8   :  { %20651 = vrot.lane.b32.xlu0 %v33242_v17, %s31363_s17 }
0x30b9   :  { %v19175_v42 = vpop.xlane.xlu0 %19174 }
0x30ba   :  { %v19177_v26 = vsub.f32 %v19169_v24, %v19175_v42 }
0x30bc   :  { %v19180_v46 = vmul.f32 1.442695, %v19177_v26  ;;  %20653 = vrot.lane.b32.xlu0 %v33242_v17, %s31364_s19 }
0x30be   :  { %31299 = vpow2.f32 %v19180_v46 }
0x30c8   :  { %v31300_v56 = vpop.eup %31299 }
0x30c9   :  { %v19185_v9 = vsel %vm6103_vm11, %v31300_v56, 0.0 }
0x30ca   :  { %19186 = vadd.xlane.f32.xlu1 %v19185_v9 }
0x30db   :  { %19745 = vrot.lane.b32.xlu1 %v33242_v17, %s31362_s16 }
0x30df   :  { %20197 = vrot.lane.b32.xlu1 %v33244_v51, %s31363_s17 }
0x30e3   :  { %20199 = vrot.lane.b32.xlu1 %v33244_v51, %s31364_s19 }
0x312b   :  { %v19184_v7 = vpop.xlane.xlu0 %19183 }
0x312c   :  { %31301 = vrcp.f32 %v19184_v7 }
0x312f   :  { %v19294_v49 = vpop.permute.xlu0 %19293 }
0x3130   :  { %v19300_v37 = vand.u32 4294901760, %v19294_v49 }
0x3132   :  { %28936 = vmatpush3.msra.mxu1 %v19300_v37  ;;  %v19377_v12 = vsub.f32 %v19294_v49, %v19300_v37 }
0x3133   :  { %28940 = vmatprep.subr.mxu1 %v34819_v59 }
0x3134   :  { %v19378_v34 = vand.u32 4294901760, %v19377_v12 }
0x3136   :  { %v31302_v36 = vpop.eup %31301  ;;  %v19379_v20 = vsub.f32 %v19377_v12, %v19378_v34 }
0x3137   :  { %v19189_v16 = vmul.f32 %v31302_v36, %v31298_v43 }
0x3138   :  { %v19380_v45 = vand.u32 4294901760, %v19379_v20 }
0x3139   :  { %v19297_v8 = vsel %vm6103_vm11, %v19189_v16, 0  ;;  %v19192_v26 = vcombine.high %v19189_v16, %v34819_v59  ;;  %v33468_v9 = vrot.slane %v19189_v16, %v32212_v27 }
0x313a   :  { %v33430_v2 = vand.u32 4294901760, %v19297_v8 }
0x313c   :  { %v19366_v31 = vsub.f32 %v19297_v8, %v33430_v2 }
0x313e   :  { %v19367_v60 = vand.u32 4294901760, %v19366_v31 }
0x3140   :  { %v19368_v50 = vsub.f32 %v19366_v31, %v19367_v60 }
0x3142   :  { %v19369_v39 = vand.u32 4294901760, %v19368_v50 }
0x3144   :  { %28938 = vmatmul.mubr.f32.vlgmr.msra.gmra.mrb[30].mxu1 %v19369_v39 }
0x3145   :  { %28941 = vmatpush3.msra.mxu1 %v19380_v45  ;;  %28942 = vmatprep.mubr.msk.f32.mxu1 %vm31355_vm1, %v34819_v59 }
0x3146   :  { %28945 = vmatprep.subr.mxu1 %v34819_v59 }
0x314c   :  { %28943 = vmatmul.mubr.f32.vlgmr.msra.gmra.mrb[30].mxu1 %v33430_v2 }
0x314d   :  { %28946 = vmatpush3.msra.mxu1 %v19377_v12  ;;  %28947 = vmatprep.mubr.msk.f32.mxu1 %vm31355_vm1, %v34819_v59 }
0x314e   :  { %28950 = vmatprep.subr.mxu1 %v34819_v59 }
0x3154   :  { %28948 = vmatmul.mubr.f32.vlgmr.msra.gmra.mrb[30].mxu1 %v19366_v31 }
0x3155   :  { %28951 = vmatpush3.msra.mxu1 %v19300_v37  ;;  %28952 = vmatprep.mubr.msk.f32.mxu1 %vm31355_vm1, %v34819_v59 }
0x3156   :  { %28955 = vmatprep.subr.mxu1 %v34819_v59 }
0x3157   :  { %v19187_v40 = vpop.xlane.xlu1 %19186 }
0x3158   :  { %31303 = vrcp.f32 %v19187_v40 }
0x315b   :  { %v19746_v53 = vpop.permute.xlu1 %19745 }
0x315c   :  { %v33443_v48 = vand.u32 4294901760, %v19746_v53  ;;  %28953 = vmatmul.mubr.f32.vlgmr.msra.gmra.mrb[30].mxu1 %v19367_v60  ;;  %v33486_v60 = vrot.slane %v19192_v26, %v32212_v27 }
0x315d   :  { %28956 = vmatpush3.msra.mxu1 %v19378_v34  ;;  %28957 = vmatprep.mubr.msk.f32.mxu1 %vm31355_vm1, %v34819_v59 }
0x315e   :  { %28966 = vmatpush3.msra.mxu0 %v33443_v48  ;;  %28960 = vmatprep.subr.mxu1 %v34819_v59  ;;  %v33454_v14 = vsub.f32 %v19746_v53, %v33443_v48 }
0x315f   :  { %v20198_v24 = vpop.permute.xlu1 %20197  ;;  %28970 = vmatprep.subr.mxu0 %v34819_v59 }
0x3160   :  { %v20201_v10 = vsel %vm6103_vm11, %v20198_v24, 0 }
0x3161   :  { %v33451_v52 = vand.u32 4294901760, %v20201_v10 }
0x3162   :  { %v31304_v15 = vpop.eup %31303 }
0x3163   :  { %v19191_v19 = vmul.f32 %v31304_v15, %v31300_v56  ;;  %v33457_v43 = vsub.f32 %v20201_v10, %v33451_v52  ;;  %v20200_v38 = vpop.permute.xlu1 %20199 }
0x3164   :  { %v20203_v42 = vsel %vm6103_vm11, %v20200_v38, 0  ;;  %28958 = vmatmul.mubr.f32.vlgmr.msra.gmra.mrb[30].mxu1 %v33430_v2 }
0x3165   :  { %v33462_v46 = vand.u32 4294901760, %v20203_v42  ;;  %28961 = vmatpush3.msra.mxu1 %v19300_v37  ;;  %28962 = vmatprep.mubr.msk.f32.mxu1 %vm31355_vm1, %v34819_v59  ;;  %v19749_v56 = vsel %vm6103_vm11, %v19191_v19, 0  ;;  %v33471_v7 = vrot.slane %v19191_v19, %v32212_v27  ;;  %v20273_v49 = vand.u32 4294901760, %v33457_v43 }
0x3166   :  { %28995 = vmatprep.subr.mxu1 %v34819_v59  ;;  %v33475_v36 = vand.u32 4294901760, %v19749_v56  ;;  %v19207_v12 = vcombine.high %v19191_v19, %v34819_v59  ;;  %v19830_v37 = vand.u32 4294901760, %v33454_v14 }
0x3167   :  { %v20283_v8 = vsub.f32 %v20203_v42, %v33462_v46  ;;  %v19222_v34 = vcombine.low %v33468_v9, %v33471_v7  ;;  %v20274_v39 = vsub.f32 %v33457_v43, %v20273_v49 }
0x3168   :  { %v19818_v31 = vsub.f32 %v19749_v56, %v33475_v36  ;;  %v33489_v20 = vrot.slane %v19207_v12, %v32212_v27  ;;  %v19831_v24 = vsub.f32 %v33454_v14, %v19830_v37 }
0x3169   :  { %v20284_v50 = vand.u32 4294901760, %v20283_v8  ;;  %v20275_v38 = vand.u32 4294901760, %v20274_v39 }
0x316a   :  { %v19819_v45 = vand.u32 4294901760, %v19818_v31  ;;  %v19832_v26 = vand.u32 4294901760, %v19831_v24 }
0x316b   :  { %v20285_v10 = vsub.f32 %v20283_v8, %v20284_v50 }
0x316c   :  { %28963 = vmatmul.mubr.f32.vlgmr.msra.gmra.mrb[30].mxu1 %v33430_v2  ;;  %v19820_v15 = vsub.f32 %v19818_v31, %v19819_v45  ;;  %v20652_v2 = vpop.permute.xlu0 %20651 }
0x316d   :  { %v20286_v19 = vand.u32 4294901760, %v20285_v10  ;;  %28996 = vmatpush3.xpose.msra.mxu1 %v33462_v46  ;;  %28997 = vmatprep.mubr.msk.f32.mxu1 %vm31355_vm1, %v34819_v59  ;;  %v20655_v56 = vsel %vm6103_vm11, %v20652_v2, 0 }
0x316e   :  { %29000 = vmatprep.subr.mxu1 %v34819_v59  ;;  %v19821_v42 = vand.u32 4294901760, %v19820_v15 }
0x3170   :  { %28968 = vmatmul.mubr.f32.vlgmr.msra.gmra.mrb[50].mxu0 %v19821_v42  ;;  %28998 = vmatmul.mubr.f32.vlgmr.msra.gmra.mrb[32].mxu1 %v20275_v38 }
0x3171   :  { %28971 = vmatpush3.msra.mxu0 %v19832_v26  ;;  %29001 = vmatpush3.xpose.msra.mxu1 %v20286_v19 }
0x3172   :  { %28972 = vmatprep.mubr.msk.f32.mxu0 %vm31355_vm1, %v34819_v59  ;;  %28975 = vmatprep.subr.mxu0 %v34819_v59 }
0x3173   :  { %29002 = vmatprep.mubr.msk.f32.mxu1 %vm31355_vm1, %v34819_v59  ;;  %29005 = vmatprep.subr.mxu1 %v34819_v59 }
0x3178   :  { %28973 = vmatmul.mubr.f32.vlgmr.msra.gmra.mrb[50].mxu0 %v33475_v36  ;;  %29003 = vmatmul.mubr.f32.vlgmr.msra.gmra.mrb[32].mxu1 %v33451_v52 }
0x3179   :  { %28976 = vmatpush3.msra.mxu0 %v33454_v14  ;;  %29006 = vmatpush3.xpose.msra.mxu1 %v20283_v8  ;;  %v20654_v14 = vpop.permute.xlu0 %20653 }
0x317a   :  { %28977 = vmatprep.mubr.msk.f32.mxu0 %vm31355_vm1, %v34819_v59  ;;  %28980 = vmatprep.subr.mxu0 %v34819_v59  ;;  %v20657_v12 = vsel %vm6103_vm11, %v20654_v14, 0 }
0x317b   :  { %29007 = vmatprep.mubr.msk.f32.mxu1 %vm31355_vm1, %v34819_v59  ;;  %29010 = vmatprep.subr.mxu1 %v34819_v59  ;;  %v20660_v8 = vand.u32 4294901760, %v20657_v12 }
0x317d   :  { %v20737_v39 = vsub.f32 %v20657_v12, %v20660_v8 }
0x3180   :  { %28978 = vmatmul.mubr.f32.vlgmr.msra.gmra.mrb[50].mxu0 %v19818_v31  ;;  %29008 = vmatmul.mubr.f32.vlgmr.msra.gmra.mrb[32].mxu1 %v33457_v43  ;;  %v20725_v43 = vand.u32 4294901760, %v20655_v56 }
0x3181   :  { %28981 = vmatpush3.msra.mxu0 %v33443_v48  ;;  %29011 = vmatpush3.xpose.msra.mxu1 %v33462_v46 }
0x3182   :  { %28982 = vmatprep.mubr.msk.f32.mxu0 %vm31355_vm1, %v34819_v59  ;;  %28985 = vmatprep.subr.mxu0 %v34819_v59  ;;  %v20726_v31 = vsub.f32 %v20655_v56, %v20725_v43 }
0x3183   :  { %29012 = vmatprep.mubr.msk.f32.mxu1 %vm31355_vm1, %v34819_v59  ;;  %29015 = vmatprep.subr.mxu1 %v34819_v59 }
0x3188   :  { %28983 = vmatmul.mubr.f32.vlgmr.msra.gmra.mrb[50].mxu0 %v19819_v45  ;;  %29013 = vmatmul.mubr.f32.vlgmr.msra.gmra.mrb[32].mxu1 %v20273_v49  ;;  %v20727_v49 = vand.u32 4294901760, %v20726_v31 }
0x3189   :  { %28986 = vmatpush3.msra.mxu0 %v19830_v37  ;;  %29016 = vmatpush3.xpose.msra.mxu1 %v20284_v50  ;;  %v20738_v37 = vand.u32 4294901760, %v20737_v39 }
0x318a   :  { %28987 = vmatprep.mubr.msk.f32.mxu0 %vm31355_vm1, %v34819_v59  ;;  %28990 = vmatprep.subr.mxu0 %v34819_v59  ;;  %v20728_v50 = vsub.f32 %v20726_v31, %v20727_v49 }
0x318b   :  { %29017 = vmatprep.mubr.msk.f32.mxu1 %vm31355_vm1, %v34819_v59  ;;  %29020 = vmatprep.subr.mxu1 %v34819_v59  ;;  %v20739_v45 = vsub.f32 %v20737_v39, %v20738_v37 }
0x3190   :  { %28988 = vmatmul.mubr.f32.vlgmr.msra.gmra.mrb[50].mxu0 %v33475_v36  ;;  %29018 = vmatmul.mubr.f32.vlgmr.msra.gmra.mrb[32].mxu1 %v33451_v52 }
0x3191   :  { %28991 = vmatpush3.msra.mxu0 %v33443_v48  ;;  %29021 = vmatpush3.xpose.msra.mxu1 %v33462_v46  ;;  %v20729_v48 = vand.u32 4294901760, %v20728_v50  ;;  %v20740_v46 = vand.u32 4294901760, %v20739_v45 }
0x3192   :  { %28992 = vmatprep.mubr.msk.f32.mxu0 %vm31355_vm1, %v34819_v59  ;;  %29022 = vmatprep.mubr.msk.f32.mxu1 %vm31355_vm1, %v34819_v59 }
0x3193   :  { %29025 = vmatprep.subr.mxu0 %v34819_v59  ;;  %29055 = vmatprep.subr.mxu1 %v34819_v59 }
0x3198   :  { %28993 = vmatmul.mubr.f32.vlgmr.msra.gmra.mrb[50].mxu0 %v33475_v36  ;;  %29023 = vmatmul.mubr.f32.vlgmr.msra.gmra.mrb[32].mxu1 %v33451_v52 }
0x3199   :  { %29026 = vmatpush3.xpose.msra.mxu0 %v20660_v8  ;;  %29027 = vmatprep.mubr.msk.f32.mxu0 %vm31355_vm1, %v34819_v59 }
0x319a   :  { %29030 = vmatprep.subr.mxu0 %v34819_v59  ;;  %29057 = vmatprep.mubr.msk.f32.mxu1 %vm31355_vm1, %v34819_v59 }
0x319c   :  { %29028 = vmatmul.mubr.f32.vlgmr.msra.gmra.mrb[52].mxu0 %v20729_v48 }
0x319d   :  { %29031 = vmatpush3.xpose.msra.mxu0 %v20740_v46  ;;  %29032 = vmatprep.mubr.msk.f32.mxu0 %vm31355_vm1, %v34819_v59 }
0x319e   :  { %29035 = vmatprep.subr.mxu0 %v34819_v59 }
0x31a4   :  { %29033 = vmatmul.mubr.f32.vlgmr.msra.gmra.mrb[52].mxu0 %v20725_v43 }
0x31a5   :  { %29036 = vmatpush3.xpose.msra.mxu0 %v20737_v39  ;;  %29037 = vmatprep.mubr.msk.f32.mxu0 %vm31355_vm1, %v34819_v59 }
0x31a6   :  { %29040 = vmatprep.subr.mxu0 %v34819_v59 }
0x31ac   :  { %29038 = vmatmul.mubr.f32.vlgmr.msra.gmra.mrb[52].mxu0 %v20726_v31 }
0x31ad   :  { %29041 = vmatpush3.xpose.msra.mxu0 %v20660_v8  ;;  %29042 = vmatprep.mubr.msk.f32.mxu0 %vm31355_vm1, %v34819_v59 }
0x31ae   :  { %29045 = vmatprep.subr.mxu0 %v34819_v59 }
0x31b4   :  { %29043 = vmatmul.mubr.f32.vlgmr.msra.gmra.mrb[52].mxu0 %v20727_v49 }
0x31b5   :  { %29046 = vmatpush3.xpose.msra.mxu0 %v20738_v37  ;;  %29047 = vmatprep.mubr.msk.f32.mxu0 %vm31355_vm1, %v34819_v59 }
0x31b6   :  { %29050 = vmatprep.subr.mxu0 %v34819_v59 }
0x31bc   :  { %29048 = vmatmul.mubr.f32.vlgmr.msra.gmra.mrb[52].mxu0 %v20725_v43 }
0x31bd   :  { %29051 = vmatpush3.xpose.msra.mxu0 %v20660_v8  ;;  %29052 = vmatprep.mubr.msk.f32.mxu0 %vm31355_vm1, %v34819_v59 }
0x31be   :  { %29085 = vmatprep.subr.mxu0 %v34819_v59 }
0x31c4   :  { %29053 = vmatmul.mubr.f32.vlgmr.msra.gmra.mrb[52].mxu0 %v20725_v43 }
0x31c5   :  { %29087 = vmatprep.mubr.msk.f32.mxu0 %vm31355_vm1, %v34819_v59 }
0x323f   :  { %v33568_v52 = vpop.f32.mrb[30].mxu1 }
0x3240   :  { %v28964_v36 = vpop.f32.mrb[31].mxu1 }
0x326b   :  { %v33570_v24 = vpop.f32.mrb[50].mxu0  ;;  %v20647_v10 = vpop.f32.mrb[32].mxu1 }
0x326c   :  { %v21105_v15 = vmul.f32 0.35355338, %v20647_v10  ;;  %v28994_v19 = vpop.f32.mrb[51].mxu0  ;;  %v29024_v38 = vpop.f32.mrb[33].mxu1 }
0x326e   :  { %v21107_v42 = vsel %vm6103_vm11, %v21105_v15, -inf }
0x326f   :  { %21108 = vmax.xlane.f32.xlu1 %v21107_v42 }
0x3297   :  { %v21101_v26 = vpop.f32.mrb[52].mxu0 }
0x3298   :  { %v21106_v2 = vmul.f32 0.35355338, %v21101_v26  ;;  %v29054_v14 = vpop.f32.mrb[53].mxu0 }
0x329a   :  { %v21110_v56 = vsel %vm6103_vm11, %v21106_v2, -inf }
0x329b   :  { %21111 = vmax.xlane.f32.xlu0 %v21110_v56 }
0x32fc   :  { %v21109_v12 = vpop.xlane.xlu1 %21108 }
0x32fd   :  { %v21113_v43 = vsub.f32 %v21105_v15, %v21109_v12 }
0x32ff   :  { %v21115_v8 = vmul.f32 1.442695, %v21113_v43 }
0x3301   :  { %31305 = vpow2.f32 %v21115_v8 }
0x330b   :  { %v31306_v31 = vpop.eup %31305 }
0x330c   :  { %v21119_v39 = vsel %vm6103_vm11, %v31306_v31, 0.0 }
0x330d   :  { %21120 = vadd.xlane.f32.xlu0 %v21119_v39 }
0x3323   :  { %21230 = vrot.lane.b32.xlu0 %v33244_v51, %s31365_s20 }
0x3327   :  { %22588 = vrot.lane.b32.xlu0 %v33242_v17, %s31366_s21 }
0x3328   :  { %v21112_v49 = vpop.xlane.xlu0 %21111 }
0x3329   :  { %v21114_v37 = vsub.f32 %v21106_v2, %v21112_v49 }
0x332b   :  { %v21117_v50 = vmul.f32 1.442695, %v21114_v37  ;;  %22590 = vrot.lane.b32.xlu0 %v33242_v17, %s31367_s22 }
0x332d   :  { %31307 = vpow2.f32 %v21117_v50 }
0x3337   :  { %v31308_v45 = vpop.eup %31307 }
0x3338   :  { %v21122_v48 = vsel %vm6103_vm11, %v31308_v45, 0.0 }
0x3339   :  { %21123 = vadd.xlane.f32.xlu1 %v21122_v48 }
0x334a   :  { %21682 = vrot.lane.b32.xlu1 %v33242_v17, %s31365_s20 }
0x334e   :  { %22134 = vrot.lane.b32.xlu1 %v33244_v51, %s31366_s21 }
0x3352   :  { %22136 = vrot.lane.b32.xlu1 %v33244_v51, %s31367_s22 }
0x339a   :  { %v21121_v46 = vpop.xlane.xlu0 %21120 }
0x339b   :  { %31309 = vrcp.f32 %v21121_v46 }
0x339e   :  { %v21231_v36 = vpop.permute.xlu0 %21230 }
0x339f   :  { %v21237_v10 = vand.u32 4294901760, %v21231_v36 }
0x33a1   :  { %29056 = vmatpush3.msra.mxu1 %v21237_v10  ;;  %v21314_v38 = vsub.f32 %v21231_v36, %v21237_v10 }
0x33a2   :  { %29060 = vmatprep.subr.mxu1 %v34819_v59 }
0x33a3   :  { %v21315_v2 = vand.u32 4294901760, %v21314_v38 }
0x33a5   :  { %v31310_v15 = vpop.eup %31309  ;;  %v21316_v12 = vsub.f32 %v21314_v38, %v21315_v2 }
0x33a6   :  { %v21126_v19 = vmul.f32 %v31310_v15, %v31306_v31 }
0x33a7   :  { %v21317_v39 = vand.u32 4294901760, %v21316_v12 }
0x33a8   :  { %v21234_v42 = vsel %vm6103_vm11, %v21126_v19, 0 }
0x33a9   :  { %v33590_v26 = vand.u32 4294901760, %v21234_v42 }
0x33ab   :  { %v21303_v14 = vsub.f32 %v21234_v42, %v33590_v26 }
0x33ad   :  { %v21304_v56 = vand.u32 4294901760, %v21303_v14 }
0x33af   :  { %v21305_v43 = vsub.f32 %v21303_v14, %v21304_v56 }
0x33b1   :  { %v21306_v8 = vand.u32 4294901760, %v21305_v43  ;;  %v33628_v43 = vrot.slane %v21126_v19, %v32212_v27 }
0x33b3   :  { %29058 = vmatmul.mubr.f32.vlgmr.msra.gmra.mrb[34].mxu1 %v21306_v8 }
0x33b4   :  { %29061 = vmatpush3.msra.mxu1 %v21317_v39  ;;  %29062 = vmatprep.mubr.msk.f32.mxu1 %vm31355_vm1, %v34819_v59 }
0x33b5   :  { %29065 = vmatprep.subr.mxu1 %v34819_v59 }
0x33bb   :  { %29063 = vmatmul.mubr.f32.vlgmr.msra.gmra.mrb[34].mxu1 %v33590_v26 }
0x33bc   :  { %29066 = vmatpush3.msra.mxu1 %v21314_v38  ;;  %29067 = vmatprep.mubr.msk.f32.mxu1 %vm31355_vm1, %v34819_v59 }
0x33bd   :  { %29070 = vmatprep.subr.mxu1 %v34819_v59 }
0x33c3   :  { %29068 = vmatmul.mubr.f32.vlgmr.msra.gmra.mrb[34].mxu1 %v21303_v14 }
0x33c4   :  { %29071 = vmatpush3.msra.mxu1 %v21237_v10  ;;  %29072 = vmatprep.mubr.msk.f32.mxu1 %vm31355_vm1, %v34819_v59 }
0x33c5   :  { %29075 = vmatprep.subr.mxu1 %v34819_v59 }
0x33c6   :  { %v21124_v31 = vpop.xlane.xlu1 %21123 }
0x33c7   :  { %31311 = vrcp.f32 %v21124_v31 }
0x33ca   :  { %v21683_v49 = vpop.permute.xlu1 %21682 }
0x33cb   :  { %v33603_v37 = vand.u32 4294901760, %v21683_v49  ;;  %29073 = vmatmul.mubr.f32.vlgmr.msra.gmra.mrb[34].mxu1 %v21304_v56  ;;  %v21129_v56 = vcombine.high %v21126_v19, %v34819_v59 }
0x33cc   :  { %29076 = vmatpush3.msra.mxu1 %v21315_v2  ;;  %29077 = vmatprep.mubr.msk.f32.mxu1 %vm31355_vm1, %v34819_v59 }
0x33cd   :  { %29086 = vmatpush3.msra.mxu0 %v33603_v37  ;;  %29080 = vmatprep.subr.mxu1 %v34819_v59  ;;  %v33614_v38 = vsub.f32 %v21683_v49, %v33603_v37 }
0x33ce   :  { %v22135_v50 = vpop.permute.xlu1 %22134  ;;  %29090 = vmatprep.subr.mxu0 %v34819_v59 }
0x33cf   :  { %v22138_v48 = vsel %vm6103_vm11, %v22135_v50, 0 }
0x33d0   :  { %v33611_v46 = vand.u32 4294901760, %v22138_v48 }
0x33d1   :  { %v31312_v36 = vpop.eup %31311 }
0x33d2   :  { %v21128_v15 = vmul.f32 %v31312_v36, %v31308_v45  ;;  %v33617_v42 = vsub.f32 %v22138_v48, %v33611_v46  ;;  %v22137_v2 = vpop.permute.xlu1 %22136 }
0x33d3   :  { %v22140_v14 = vsel %vm6103_vm11, %v22137_v2, 0  ;;  %29078 = vmatmul.mubr.f32.vlgmr.msra.gmra.mrb[34].mxu1 %v33590_v26  ;;  %v33646_v2 = vrot.slane %v21129_v56, %v32212_v27 }
0x33d4   :  { %v33622_v12 = vand.u32 4294901760, %v22140_v14  ;;  %29081 = vmatpush3.msra.mxu1 %v21237_v10  ;;  %29082 = vmatprep.mubr.msk.f32.mxu1 %vm31355_vm1, %v34819_v59  ;;  %v21686_v45 = vsel %vm6103_vm11, %v21128_v15, 0  ;;  %v33631_v8 = vrot.slane %v21128_v15, %v32212_v27  ;;  %v22210_v39 = vand.u32 4294901760, %v33617_v42 }
0x33d5   :  { %29115 = vmatprep.subr.mxu1 %v34819_v59  ;;  %v33635_v31 = vand.u32 4294901760, %v21686_v45  ;;  %v21144_v49 = vcombine.high %v21128_v15, %v34819_v59  ;;  %v21767_v10 = vand.u32 4294901760, %v33614_v38 }
0x33d6   :  { %v22220_v50 = vsub.f32 %v22140_v14, %v33622_v12  ;;  %v22211_v15 = vsub.f32 %v33617_v42, %v22210_v39 }
0x33d7   :  { %v21755_v36 = vsub.f32 %v21686_v45, %v33635_v31  ;;  %v33649_v22 = vrot.slane %v21144_v49, %v32212_v27  ;;  %v21768_v1 = vsub.f32 %v33614_v38, %v21767_v10 }
0x33d8   :  { %v22221_v30 = vand.u32 4294901760, %v22220_v50  ;;  %v22212_v49 = vand.u32 4294901760, %v22211_v15 }
0x33d9   :  { %v21756_v33 = vand.u32 4294901760, %v21755_v36  ;;  %v21769_v14 = vand.u32 4294901760, %v21768_v1 }
0x33da   :  { %v22222_v19 = vsub.f32 %v22220_v50, %v22221_v30 }
0x33db   :  { %29083 = vmatmul.mubr.f32.vlgmr.msra.gmra.mrb[34].mxu1 %v33590_v26  ;;  %v21757_v56 = vsub.f32 %v21755_v36, %v21756_v33 }
0x33dc   :  { %v22223_v45 = vand.u32 4294901760, %v22222_v19  ;;  %29116 = vmatpush3.xpose.msra.mxu1 %v33622_v12  ;;  %29117 = vmatprep.mubr.msk.f32.mxu1 %vm31355_vm1, %v34819_v59 }
0x33dd   :  { %29120 = vmatprep.subr.mxu1 %v34819_v59  ;;  %v21758_v44 = vand.u32 4294901760, %v21757_v56 }
0x33df   :  { %29088 = vmatmul.mubr.f32.vlgmr.msra.gmra.mrb[54].mxu0 %v21758_v44  ;;  %29118 = vmatmul.mubr.f32.vlgmr.msra.gmra.mrb[36].mxu1 %v22212_v49  ;;  %v22589_v44 = vpop.permute.xlu0 %22588 }
0x33e0   :  { %29091 = vmatpush3.msra.mxu0 %v21769_v14  ;;  %29121 = vmatpush3.xpose.msra.mxu1 %v22223_v45  ;;  %v22592_v26 = vsel %vm6103_vm11, %v22589_v44, 0 }
0x33e1   :  { %29092 = vmatprep.mubr.msk.f32.mxu0 %vm31355_vm1, %v34819_v59  ;;  %29095 = vmatprep.subr.mxu0 %v34819_v59 }
0x33e2   :  { %29122 = vmatprep.mubr.msk.f32.mxu1 %vm31355_vm1, %v34819_v59  ;;  %29125 = vmatprep.subr.mxu1 %v34819_v59 }
0x33e3   :  { %v22591_v1 = vpop.permute.xlu0 %22590 }
0x33e7   :  { %29093 = vmatmul.mubr.f32.vlgmr.msra.gmra.mrb[54].mxu0 %v33635_v31  ;;  %29123 = vmatmul.mubr.f32.vlgmr.msra.gmra.mrb[36].mxu1 %v33611_v46 }
0x33e8   :  { %29096 = vmatpush3.msra.mxu0 %v33614_v38  ;;  %29126 = vmatpush3.xpose.msra.mxu1 %v22220_v50  ;;  %v22594_v38 = vsel %vm6103_vm11, %v22591_v1, 0 }
0x33e9   :  { %29097 = vmatprep.mubr.msk.f32.mxu0 %vm31355_vm1, %v34819_v59  ;;  %29100 = vmatprep.subr.mxu0 %v34819_v59  ;;  %v22597_v50 = vand.u32 4294901760, %v22594_v38 }
0x33ea   :  { %29127 = vmatprep.mubr.msk.f32.mxu1 %vm31355_vm1, %v34819_v59  ;;  %29130 = vmatprep.subr.mxu1 %v34819_v59 }
0x33ef   :  { %29098 = vmatmul.mubr.f32.vlgmr.msra.gmra.mrb[54].mxu0 %v21755_v36  ;;  %29128 = vmatmul.mubr.f32.vlgmr.msra.gmra.mrb[36].mxu1 %v33617_v42  ;;  %v22662_v42 = vand.u32 4294901760, %v22592_v26  ;;  %v22674_v36 = vsub.f32 %v22594_v38, %v22597_v50 }
0x33f0   :  { %29101 = vmatpush3.msra.mxu0 %v33603_v37  ;;  %29131 = vmatpush3.xpose.msra.mxu1 %v33622_v12 }
0x33f1   :  { %29102 = vmatprep.mubr.msk.f32.mxu0 %vm31355_vm1, %v34819_v59  ;;  %29105 = vmatprep.subr.mxu0 %v34819_v59  ;;  %v22663_v19 = vsub.f32 %v22592_v26, %v22662_v42 }
0x33f2   :  { %29132 = vmatprep.mubr.msk.f32.mxu1 %vm31355_vm1, %v34819_v59  ;;  %29135 = vmatprep.subr.mxu1 %v34819_v59 }
0x33f7   :  { %29103 = vmatmul.mubr.f32.vlgmr.msra.gmra.mrb[54].mxu0 %v21756_v33  ;;  %29133 = vmatmul.mubr.f32.vlgmr.msra.gmra.mrb[36].mxu1 %v22210_v39  ;;  %v22675_v33 = vand.u32 4294901760, %v22674_v36 }
0x33f8   :  { %29106 = vmatpush3.msra.mxu0 %v21767_v10  ;;  %29136 = vmatpush3.xpose.msra.mxu1 %v22221_v30  ;;  %v22664_v30 = vand.u32 4294901760, %v22663_v19 }
0x33f9   :  { %29107 = vmatprep.mubr.msk.f32.mxu0 %vm31355_vm1, %v34819_v59  ;;  %29110 = vmatprep.subr.mxu0 %v34819_v59  ;;  %v22676_v10 = vsub.f32 %v22674_v36, %v22675_v33 }
0x33fa   :  { %29137 = vmatprep.mubr.msk.f32.mxu1 %vm31355_vm1, %v34819_v59  ;;  %29140 = vmatprep.subr.mxu1 %v34819_v59  ;;  %v22665_v39 = vsub.f32 %v22663_v19, %v22664_v30 }
0x33ff   :  { %29108 = vmatmul.mubr.f32.vlgmr.msra.gmra.mrb[54].mxu0 %v33635_v31  ;;  %29138 = vmatmul.mubr.f32.vlgmr.msra.gmra.mrb[36].mxu1 %v33611_v46 }
0x3400   :  { %29111 = vmatpush3.msra.mxu0 %v33603_v37  ;;  %29141 = vmatpush3.xpose.msra.mxu1 %v33622_v12  ;;  %v22666_v37 = vand.u32 4294901760, %v22665_v39  ;;  %v22677_v12 = vand.u32 4294901760, %v22676_v10 }
0x3401   :  { %29112 = vmatprep.mubr.msk.f32.mxu0 %vm31355_vm1, %v34819_v59  ;;  %29142 = vmatprep.mubr.msk.f32.mxu1 %vm31355_vm1, %v34819_v59 }
0x3402   :  { %29145 = vmatprep.subr.mxu0 %v34819_v59  ;;  %29175 = vmatprep.subr.mxu1 %v34819_v59 }
0x3407   :  { %29113 = vmatmul.mubr.f32.vlgmr.msra.gmra.mrb[54].mxu0 %v33635_v31  ;;  %29143 = vmatmul.mubr.f32.vlgmr.msra.gmra.mrb[36].mxu1 %v33611_v46 }
0x3408   :  { %29146 = vmatpush3.xpose.msra.mxu0 %v22597_v50  ;;  %29147 = vmatprep.mubr.msk.f32.mxu0 %vm31355_vm1, %v34819_v59 }
0x3409   :  { %29150 = vmatprep.subr.mxu0 %v34819_v59  ;;  %29177 = vmatprep.mubr.msk.f32.mxu1 %vm31355_vm1, %v34819_v59 }
0x340b   :  { %29148 = vmatmul.mubr.f32.vlgmr.msra.gmra.mrb[56].mxu0 %v22666_v37 }
0x340c   :  { %29151 = vmatpush3.xpose.msra.mxu0 %v22677_v12  ;;  %29152 = vmatprep.mubr.msk.f32.mxu0 %vm31355_vm1, %v34819_v59 }
0x340d   :  { %29155 = vmatprep.subr.mxu0 %v34819_v59 }
0x3413   :  { %29153 = vmatmul.mubr.f32.vlgmr.msra.gmra.mrb[56].mxu0 %v22662_v42 }
0x3414   :  { %29156 = vmatpush3.xpose.msra.mxu0 %v22674_v36  ;;  %29157 = vmatprep.mubr.msk.f32.mxu0 %vm31355_vm1, %v34819_v59 }
0x3415   :  { %29160 = vmatprep.subr.mxu0 %v34819_v59 }
0x341b   :  { %29158 = vmatmul.mubr.f32.vlgmr.msra.gmra.mrb[56].mxu0 %v22663_v19 }
0x341c   :  { %29161 = vmatpush3.xpose.msra.mxu0 %v22597_v50  ;;  %29162 = vmatprep.mubr.msk.f32.mxu0 %vm31355_vm1, %v34819_v59 }
0x341d   :  { %29165 = vmatprep.subr.mxu0 %v34819_v59 }
0x3423   :  { %29163 = vmatmul.mubr.f32.vlgmr.msra.gmra.mrb[56].mxu0 %v22664_v30 }
0x3424   :  { %29166 = vmatpush3.xpose.msra.mxu0 %v22675_v33  ;;  %29167 = vmatprep.mubr.msk.f32.mxu0 %vm31355_vm1, %v34819_v59 }
0x3425   :  { %29170 = vmatprep.subr.mxu0 %v34819_v59 }
0x342b   :  { %29168 = vmatmul.mubr.f32.vlgmr.msra.gmra.mrb[56].mxu0 %v22662_v42 }
0x342c   :  { %29171 = vmatpush3.xpose.msra.mxu0 %v22597_v50  ;;  %29172 = vmatprep.mubr.msk.f32.mxu0 %vm31355_vm1, %v34819_v59 }
0x342d   :  { %29205 = vmatprep.subr.mxu0 %v34819_v59 }
0x3433   :  { %29173 = vmatmul.mubr.f32.vlgmr.msra.gmra.mrb[56].mxu0 %v22662_v42 }
0x3434   :  { %29207 = vmatprep.mubr.msk.f32.mxu0 %vm31355_vm1, %v34819_v59 }
0x34ae   :  { %v21678_v46 = vpop.f32.mrb[34].mxu1 }
0x34af   :  { %v29084_v31 = vpop.f32.mrb[35].mxu1 }
0x34da   :  { %v22130_v15 = vpop.f32.mrb[54].mxu0  ;;  %v22584_v14 = vpop.f32.mrb[36].mxu1 }
0x34db   :  { %v23042_v56 = vmul.f32 0.35355338, %v22584_v14  ;;  %v29114_v45 = vpop.f32.mrb[55].mxu0  ;;  %v29144_v49 = vpop.f32.mrb[37].mxu1 }
0x34dd   :  { %v23044_v44 = vsel %vm6103_vm11, %v23042_v56, -inf }
0x34de   :  { %23045 = vmax.xlane.f32.xlu1 %v23044_v44 }
0x3506   :  { %v23038_v1 = vpop.f32.mrb[56].mxu0 }
0x3507   :  { %v23043_v26 = vmul.f32 0.35355338, %v23038_v1  ;;  %v29174_v38 = vpop.f32.mrb[57].mxu0 }
0x3509   :  { %v23047_v50 = vsel %vm6103_vm11, %v23043_v26, -inf }
0x350a   :  { %23048 = vmax.xlane.f32.xlu0 %v23047_v50 }
0x356b   :  { %v23046_v42 = vpop.xlane.xlu1 %23045 }
0x356c   :  { %v23050_v19 = vsub.f32 %v23042_v56, %v23046_v42 }
0x356e   :  { %v23052_v36 = vmul.f32 1.442695, %v23050_v19 }
0x3570   :  { %31313 = vpow2.f32 %v23052_v36 }
0x357a   :  { %v31314_v30 = vpop.eup %31313 }
0x357b   :  { %v23056_v33 = vsel %vm6103_vm11, %v31314_v30, 0.0 }
0x357c   :  { %23057 = vadd.xlane.f32.xlu0 %v23056_v33 }
0x3592   :  { %23167 = vrot.lane.b32.xlu0 %v33244_v51, %s31368_s23 }
0x3596   :  { %24098 = vrot.lane.b32.xlu0 %v33570_v24, %s31369_s24 }
0x3597   :  { %v23049_v39 = vpop.xlane.xlu0 %23048 }
0x3598   :  { %v23051_v10 = vsub.f32 %v23043_v26, %v23049_v39 }
0x359a   :  { %v23054_v37 = vmul.f32 1.442695, %v23051_v10  ;;  %24106 = vrot.lane.b32.xlu0 %v22130_v15, %s31370_s25 }
0x359c   :  { %31315 = vpow2.f32 %v23054_v37 }
0x35a6   :  { %v31316_v12 = vpop.eup %31315 }
0x35a7   :  { %v23059_v31 = vsel %vm6103_vm11, %v31316_v12, 0.0 }
0x35a8   :  { %23060 = vadd.xlane.f32.xlu1 %v23059_v31 }
0x35b9   :  { %23619 = vrot.lane.b32.xlu1 %v33242_v17, %s31368_s23 }
0x35bd   :  { %24096 = vrot.lane.b32.xlu1 %v33568_v52, %s31369_s24 }
0x35c1   :  { %24104 = vrot.lane.b32.xlu1 %v21678_v46, %s31370_s25 }
0x3609   :  { %v23058_v51 = vpop.xlane.xlu0 %23057 }
0x360a   :  { %31317 = vrcp.f32 %v23058_v51 }
0x360d   :  { %v23168_v24 = vpop.permute.xlu0 %23167 }
0x360e   :  { %v23174_v14 = vand.u32 4294901760, %v23168_v24 }
0x3610   :  { %29176 = vmatpush3.msra.mxu1 %v23174_v14  ;;  %v23251_v45 = vsub.f32 %v23168_v24, %v23174_v14 }
0x3611   :  { %29180 = vmatprep.subr.mxu1 %v34819_v59 }
0x3612   :  { %v23252_v1 = vand.u32 4294901760, %v23251_v45 }
0x3614   :  { %v31318_v15 = vpop.eup %31317  ;;  %v23253_v38 = vsub.f32 %v23251_v45, %v23252_v1 }
0x3615   :  { %v23063_v56 = vmul.f32 %v31318_v15, %v31314_v30 }
0x3616   :  { %v23254_v46 = vand.u32 4294901760, %v23253_v38 }
0x3617   :  { %v23171_v49 = vsel %vm6103_vm11, %v23063_v56, 0  ;;  %v23066_v33 = vcombine.high %v23063_v56, %v34819_v59  ;;  %v33762_v31 = vrot.slane %v23063_v56, %v32212_v27 }
0x3618   :  { %v23239_v44 = vand.u32 4294901760, %v23171_v49 }
0x361a   :  { %v23240_v17 = vsub.f32 %v23171_v49, %v23239_v44 }
0x361c   :  { %v23241_v26 = vand.u32 4294901760, %v23240_v17 }
0x361e   :  { %v23242_v52 = vsub.f32 %v23240_v17, %v23241_v26 }
0x3620   :  { %v23243_v50 = vand.u32 4294901760, %v23242_v52 }
0x3622   :  { %29178 = vmatmul.mubr.f32.vlgmr.msra.gmra.mrb[38].mxu1 %v23243_v50 }
0x3623   :  { %29181 = vmatpush3.msra.mxu1 %v23254_v46  ;;  %29182 = vmatprep.mubr.msk.f32.mxu1 %vm31355_vm1, %v34819_v59 }
0x3624   :  { %29185 = vmatprep.subr.mxu1 %v34819_v59 }
0x362a   :  { %29183 = vmatmul.mubr.f32.vlgmr.msra.gmra.mrb[38].mxu1 %v23239_v44 }
0x362b   :  { %29186 = vmatpush3.msra.mxu1 %v23251_v45  ;;  %29187 = vmatprep.mubr.msk.f32.mxu1 %vm31355_vm1, %v34819_v59  ;;  %v33769_v45 = vrot.slane %v23066_v33, %v32212_v27 }
0x362c   :  { %29190 = vmatprep.subr.mxu1 %v34819_v59 }
0x3632   :  { %29188 = vmatmul.mubr.f32.vlgmr.msra.gmra.mrb[38].mxu1 %v23240_v17 }
0x3633   :  { %29191 = vmatpush3.msra.mxu1 %v23174_v14  ;;  %29192 = vmatprep.mubr.msk.f32.mxu1 %vm31355_vm1, %v34819_v59 }
0x3634   :  { %29195 = vmatprep.subr.mxu1 %v34819_v59 }
0x3635   :  { %v23061_v42 = vpop.xlane.xlu1 %23060 }
0x3636   :  { %31319 = vrcp.f32 %v23061_v42 }
0x3639   :  { %v23620_v19 = vpop.permute.xlu1 %23619 }
0x363a   :  { %v23626_v36 = vand.u32 4294901760, %v23620_v19  ;;  %29193 = vmatmul.mubr.f32.vlgmr.msra.gmra.mrb[38].mxu1 %v23241_v26 }
0x363b   :  { %29196 = vmatpush3.msra.mxu1 %v23252_v1  ;;  %29197 = vmatprep.mubr.msk.f32.mxu1 %vm31355_vm1, %v34819_v59 }
0x363c   :  { %29206 = vmatpush3.msra.mxu0 %v23626_v36  ;;  %29200 = vmatprep.subr.mxu1 %v34819_v59  ;;  %v23703_v10 = vsub.f32 %v23620_v19, %v23626_v36  ;;  %v26024_v19 = vld [vmem:[%s34759_s5 + $0xa8] sm:$0xff] }
0x363d   :  { %29210 = vmatprep.subr.mxu0 %v34819_v59  ;;  %v24135_v33 = vand.u32 4294901760, %v26024_v19 }
0x3640   :  { %v31320_v30 = vpop.eup %31319 }
0x3641   :  { %v23065_v39 = vmul.f32 %v31320_v30, %v31316_v12  ;;  %v23704_v12 = vand.u32 4294901760, %v23703_v10  ;;  %v26025_v30 = vld [vmem:[%s34759_s5 + $0xb0] sm:$0xff] }
0x3642   :  { %29198 = vmatmul.mubr.f32.vlgmr.msra.gmra.mrb[38].mxu1 %v23239_v44 }
0x3643   :  { %29201 = vmatpush3.msra.mxu1 %v23174_v14  ;;  %29202 = vmatprep.mubr.msk.f32.mxu1 %vm31355_vm1, %v34819_v59  ;;  %v23623_v37 = vsel %vm6103_vm11, %v23065_v39, 0  ;;  %v33765_v51 = vrot.slane %v23065_v39, %v32212_v27  ;;  %v23081_v24 = vcombine.high %v23065_v39, %v34819_v59  ;;  %v23705_v52 = vsub.f32 %v23703_v10, %v23704_v12 }
0x3644   :  { %v23691_v15 = vand.u32 4294901760, %v23623_v37  ;;  %v24138_v39 = vand.u32 4294901760, %v26025_v30 }
0x3645   :  { %v33776_v1 = vrot.slane %v23081_v24, %v32212_v27  ;;  %v23706_v42 = vand.u32 4294901760, %v23705_v52  ;;  %v26026_v24 = vld [vmem:[%s34759_s5 + $0xb8] sm:$0xff] }
0x3646   :  { %v23692_v56 = vsub.f32 %v23623_v37, %v23691_v15  ;;  %v24232_v37 = vsub.f32 %v26025_v30, %v24138_v39 }
0x3648   :  { %v23693_v38 = vand.u32 4294901760, %v23692_v56  ;;  %v24233_v52 = vand.u32 4294901760, %v24232_v37 }
0x364a   :  { %29203 = vmatmul.mubr.f32.vlgmr.msra.gmra.mrb[38].mxu1 %v23239_v44  ;;  %v23694_v50 = vsub.f32 %v23692_v56, %v23693_v38 }
0x364c   :  { %v23695_v46 = vand.u32 4294901760, %v23694_v50 }
0x364e   :  { %29208 = vmatmul.mubr.f32.vlgmr.msra.gmra.mrb[58].mxu0 %v23695_v46 }
0x364f   :  { %29211 = vmatpush3.msra.mxu0 %v23706_v42  ;;  %29212 = vmatprep.mubr.msk.f32.mxu0 %vm31355_vm1, %v34819_v59  ;;  %v24234_v42 = vsub.f32 %v24232_v37, %v24233_v52 }
0x3650   :  { %29215 = vmatprep.subr.mxu0 %v34819_v59 }
0x3651   :  { %v24235_v30 = vand.u32 4294901760, %v24234_v42  ;;  %v24097_v42 = vpop.permute.xlu1 %24096 }
0x3652   :  { %v24118_v16 = vsel %vm6103_vm11, %v33408_v47, %v24097_v42 }
0x3655   :  { %v24105_v49 = vpop.permute.xlu1 %24104 }
0x3656   :  { %29213 = vmatmul.mubr.f32.vlgmr.msra.gmra.mrb[58].mxu0 %v23691_v15 }
0x3657   :  { %29216 = vmatpush3.msra.mxu0 %v23703_v10  ;;  %29217 = vmatprep.mubr.msk.f32.mxu0 %vm31355_vm1, %v34819_v59  ;;  %v33803_v10 = vpack.c.bf16 %v24138_v39, %v24135_v33 }
0x3658   :  { %29220 = vmatprep.subr.mxu0 %v34819_v59 }
0x3659   :  { %30322 = vmatprep.subr.bf16.mxu1 %v33803_v10 }
0x365a   :  { %30324 = vmatpush3.bf16.msra.mxu1 %v33803_v10 }
0x365e   :  { %29218 = vmatmul.mubr.f32.vlgmr.msra.gmra.mrb[58].mxu0 %v23692_v56 }
0x365f   :  { %29221 = vmatpush3.msra.mxu0 %v23626_v36  ;;  %29222 = vmatprep.mubr.msk.f32.mxu0 %vm31355_vm1, %v34819_v59 }
0x3660   :  { %29225 = vmatprep.subr.mxu0 %v34819_v59 }
0x3666   :  { %29223 = vmatmul.mubr.f32.vlgmr.msra.gmra.mrb[58].mxu0 %v23693_v38 }
0x3667   :  { %29226 = vmatpush3.msra.mxu0 %v23704_v12  ;;  %29227 = vmatprep.mubr.msk.f32.mxu0 %vm31355_vm1, %v34819_v59  ;;  %v24141_v12 = vand.u32 4294901760, %v26026_v24 }
0x3668   :  { %29230 = vmatprep.subr.mxu0 %v34819_v59 }
0x366e   :  { %29228 = vmatmul.mubr.f32.vlgmr.msra.gmra.mrb[58].mxu0 %v23691_v15 }
0x366f   :  { %29231 = vmatpush3.msra.mxu0 %v23626_v36  ;;  %29232 = vmatprep.mubr.msk.f32.mxu0 %vm31355_vm1, %v34819_v59  ;;  %v24225_v36 = vsub.f32 %v26024_v19, %v24135_v33 }
0x3671   :  { %v24226_v38 = vand.u32 4294901760, %v24225_v36 }
0x3673   :  { %v24227_v46 = vsub.f32 %v24225_v36, %v24226_v38 }
0x3675   :  { %v24228_v19 = vand.u32 4294901760, %v24227_v46 }
0x3676   :  { %29233 = vmatmul.mubr.f32.vlgmr.msra.gmra.mrb[58].mxu0 %v23691_v15  ;;  %v26027_v15 = vld [vmem:[%s34759_s5 + $0xc0] sm:$0xff] }
0x3677   :  { %v24144_v56 = vand.u32 4294901760, %v26027_v15  ;;  %v30329_v18 = vpack.c.bf16 %v24235_v30, %v24228_v19  ;;  %v24120_v19 = vsel %vm39_vm0, %v24118_v16, %v24105_v49 }
0x3679   :  { %v33813_v50 = vpack.c.bf16 %v24144_v56, %v24141_v12 }
0x367b   :  { %30326 = vmatprep.subr.bf16.mxu1 %v33813_v50 }
0x367c   :  { %30328 = vmatpush3.bf16.msra.mxu1 %v33813_v50 }
0x367d   :  { %30330 = vmatprep.subr.bf16.mxu1 %v30329_v18 }
0x371d   :  { %v23615_v27 = vpop.f32.mrb[38].mxu1 }
0x371e   :  { %24112 = vrot.lane.b32.xlu1 %v23615_v27, %s31371_s11  ;;  %v29204_v44 = vpop.f32.mrb[39].mxu1  ;;  %v24239_v27 = vsub.f32 %v26026_v24, %v24141_v12 }
0x371f   :  { %v24246_v44 = vsub.f32 %v26027_v15, %v24144_v56  ;;  %v30337_v15 = vpack.c.bf16 %v24232_v37, %v24225_v36  ;;  %v30353_v56 = vpack.c.bf16 %v24233_v52, %v24226_v38  ;;  %v24099_v36 = vpop.permute.xlu0 %24098 }
0x3720   :  { %v24240_v33 = vand.u32 4294901760, %v24239_v27  ;;  %v24119_v38 = vsel %vm6103_vm11, %v33410_v41, %v24099_v36 }
0x3721   :  { %v24247_v39 = vand.u32 4294901760, %v24246_v44  ;;  %v30341_v12 = vpack.c.bf16 %v24246_v44, %v24239_v27 }
0x3722   :  { %v24241_v48 = vsub.f32 %v24239_v27, %v24240_v33 }
0x3723   :  { %v24248_v26 = vsub.f32 %v24246_v44, %v24247_v39  ;;  %v30357_v46 = vpack.c.bf16 %v24247_v39, %v24240_v33  ;;  %v24107_v37 = vpop.permute.xlu0 %24106 }
0x3724   :  { %v24242_v17 = vand.u32 4294901760, %v24241_v48  ;;  %v24121_v47 = vsel %vm39_vm0, %v24119_v38, %v24107_v37 }
0x3725   :  { %v24249_v40 = vand.u32 4294901760, %v24248_v26 }
0x3727   :  { %v30333_v24 = vpack.c.bf16 %v24249_v40, %v24242_v17 }
0x3749   :  { %v24067_v23 = vpop.f32.mrb[58].mxu0 }
0x374a   :  { %24114 = vrot.lane.b32.xlu0 %v24067_v23, %s31371_s11  ;;  %v29234_v53 = vpop.f32.mrb[59].mxu0 }
0x3790   :  { %v24113_v30 = vpop.permute.xlu1 %24112 }
0x3791   :  { %v24122_v14 = vsel %vm7127_vm12, %v24120_v19, %v24113_v30 }
0x3792   :  { %v24129_v23 = vsel %vm552_vm3, %v24122_v14, 0 }
0x3793   :  { %v24203_v53 = vand.u32 4294901760, %v24129_v23 }
0x3795   :  { %v24204_v48 = vsub.f32 %v24129_v23, %v24203_v53 }
0x3797   :  { %v24205_v26 = vand.u32 4294901760, %v24204_v48 }
0x3799   :  { %v24206_v40 = vsub.f32 %v24204_v48, %v24205_v26 }
0x379b   :  { %v24207_v17 = vand.u32 4294901760, %v24206_v40 }
0x379d   :  { %29243 = vmatprep.mubr.f32.mxu1 %v24207_v17  ;;  %v31372_v17 = vmov 1934713408  }
0x379e   :  { %v7064_v36 = vunpack.c.l.s4 %v31372_v17 }
0x37a0   :  { %v7065_v37 = vunpack.c.0.s8 %v7064_v36 }
0x37a2   :  { %v33858_v38 = vsub.s32 %v7065_v37, %v31574_v3 }
0x37bc   :  { %v24115_v52 = vpop.permute.xlu0 %24114 }
0x37bd   :  { %v24123_v16 = vsel %vm7127_vm12, %v24121_v47, %v24115_v52  ;;  %v34822_v47 = vcombine.low %v32746_v32, %v32752_v57 }
0x37be   :  { %v24132_v49 = vsel %vm552_vm3, %v24123_v16, 0 }
0x37bf   :  { %v24213_v27 = vand.u32 4294901760, %v24132_v49  ;;  %v33864_v52 = vrot.slane %v34822_v47, %v33858_v38  ;;  %v34832_v47 = vcombine.low %v32762_v6, %v32765_v55 }
0x37c1   :  { %v24214_v14 = vsub.f32 %v24132_v49, %v24213_v27  ;;  %v12908_v16 = vcombine.high %v33864_v52, %v34819_v59  ;;  %v33872_v49 = vrot.slane %v19222_v34, %v33858_v38  ;;  %v34825_v34 = vcombine.low %v33762_v31, %v33765_v51 }
0x37c3   :  { %v24215_v44 = vand.u32 4294901760, %v24214_v14 }
0x37c5   :  { %v24216_v33 = vsub.f32 %v24214_v14, %v24215_v44 }
0x37c7   :  { %v24217_v39 = vand.u32 4294901760, %v24216_v33 }
0x37c9   :  { %29244 = vmatmul.mubr.f32.vlgmr.msra.gmra.mrb[40].mxu1 %v24217_v39  ;;  %v33890_v39 = vrot.slane %v34825_v34, %v33858_v38 }
0x37ca   :  { %30332 = vmatpush3.bf16.msra.mxu1 %v30329_v18  ;;  %29254 = vmatprep.mubr.f32.mxu1 %v24203_v53  ;;  %v33839_v18 = vld [vmem:[%s34759_s5 + $0x148] sm:$0x3f] }
0x37cb   :  { %30334 = vmatprep.subr.bf16.mxu1 %v30333_v24  ;;  %v24127_v41 = vrot.slane %v33839_v18, %v31577_v4 }
0x37ce   :  { %30336 = vmatpush3.bf16.msra.mxu1 %v30333_v24 }
0x37cf   :  { %30338 = vmatprep.subr.bf16.mxu1 %v30337_v15 }
0x37d1   :  { %29255 = vmatmul.mubr.f32.vlgmr.msra.gmra.mrb[40].mxu1 %v24213_v27 }
0x37d2   :  { %30340 = vmatpush3.bf16.msra.mxu1 %v30337_v15  ;;  %29265 = vmatprep.mubr.f32.mxu1 %v24204_v48 }
0x37d3   :  { %30342 = vmatprep.subr.bf16.mxu1 %v30341_v12 }
0x37d6   :  { %30344 = vmatpush3.bf16.msra.mxu1 %v30341_v12 }
0x37d7   :  { %30346 = vmatprep.subr.bf16.mxu1 %v33803_v10 }
0x37d9   :  { %29266 = vmatmul.mubr.f32.vlgmr.msra.gmra.mrb[40].mxu1 %v24214_v14 }
0x37da   :  { %30348 = vmatpush3.bf16.msra.mxu1 %v33803_v10  ;;  %29276 = vmatprep.mubr.f32.mxu1 %v24205_v26 }
0x37db   :  { %30350 = vmatprep.subr.bf16.mxu1 %v33813_v50 }
0x37de   :  { %30352 = vmatpush3.bf16.msra.mxu1 %v33813_v50 }
0x37df   :  { %30354 = vmatprep.subr.bf16.mxu1 %v30353_v56 }
0x37e1   :  { %29277 = vmatmul.mubr.f32.vlgmr.msra.gmra.mrb[40].mxu1 %v24215_v44  ;;  %v19254_v44 = vcombine.high %v33872_v49, %v34819_v59 }
0x37e2   :  { %30356 = vmatpush3.bf16.msra.mxu1 %v30353_v56  ;;  %29287 = vmatprep.mubr.f32.mxu1 %v24203_v53 }
0x37e3   :  { %30358 = vmatprep.subr.bf16.mxu1 %v30357_v46 }
0x37e6   :  { %30360 = vmatpush3.bf16.msra.mxu1 %v30357_v46 }
0x37e7   :  { %30362 = vmatprep.subr.bf16.mxu1 %v33803_v10 }
0x37e9   :  { %29288 = vmatmul.mubr.f32.vlgmr.msra.gmra.mrb[40].mxu1 %v24213_v27 }
0x37ea   :  { %30364 = vmatpush3.bf16.msra.mxu1 %v33803_v10  ;;  %29298 = vmatprep.mubr.f32.mxu1 %v24203_v53 }
0x37eb   :  { %30366 = vmatprep.subr.bf16.mxu1 %v33813_v50 }
0x37ee   :  { %30368 = vmatpush3.bf16.msra.mxu1 %v33813_v50 }
0x37f1   :  { %29299 = vmatmul.mubr.f32.vlgmr.msra.gmra.mrb[40].mxu1 %v24213_v27  ;;  %v34823_v27 = vcombine.low %v32409_v29, %v32412_v21 }
0x37f3   :  { %v33879_v14 = vrot.slane %v34823_v27, %v33858_v38 }
0x37f5   :  { %34824 = vst [vmem:[#allocation12_spill] sm:$0xff] %v33879_v14  ;;  %v9034_v33 = vcombine.high %v33879_v14, %v34819_v59 }
0x38c4   :  { %v29300_v24 = vpop.f32.mrb[40].mxu1 }
0x38c5   :  { %v30633_v15 = vadd.f32 %v29300_v24, %v24127_v41  ;;  %v24652_v12 = vpop.f32.mrb[41].mxu1 }
0x38c6   :  { %v30634_v56 = vadd.f32 %v24652_v12, %v24127_v41  ;;  %v34826_v41 = vcombine.high %v32409_v29, %v32412_v21  ;;  %v34827_v12 = vcombine.high %v33468_v9, %v33471_v7 }
0x38c7   :  { %v24663_v10 = vadd.f32 %v30633_v15, %v33220_v54  ;;  %v23128_v15 = vcombine.high %v33890_v39, %v34819_v59 }
0x38c8   :  { %v24662_v46 = vadd.f32 %v30634_v56, %v33222_v25  ;;  %v9017_v24 = vrot.slane %v34826_v41, %v33858_v38  ;;  %v19237_v56 = vrot.slane %v34827_v12, %v33858_v38 }
0x38c9   :  { %v24667_v42 = vsel %vm552_vm3, %v24663_v10, 0.0 }
0x38ca   :  { %24668 = vadd.xlane.f32.xlu0 %v24667_v42  ;;  %v24664_v50 = vsel %vm552_vm3, %v24662_v46, 0.0  ;;  %v9035_v21 = vcombine.high %v9017_v24, %v34819_v59  ;;  %v19255_v9 = vcombine.high %v19237_v56, %v34819_v59 }
0x38cb   :  { %24665 = vadd.xlane.f32.xlu1 %v24664_v50 }
0x3957   :  { %v24669_v19 = vpop.xlane.xlu0 %24668 }
0x3958   :  { %v24671_v30 = vmul.f32 0.03125, %v24669_v19  ;;  %v24666_v23 = vpop.xlane.xlu1 %24665 }
0x3959   :  { %v24670_v53 = vmul.f32 0.03125, %v24666_v23 }
0x395a   :  { %v33847_v48 = vsub.f32 %v24663_v10, %v24671_v30  ;;  %v34828_v10 = vcombine.high %v32746_v32, %v32752_v57  ;;  %v34830_v57 = vcombine.low %v32423_v58, %v32426_v61 }
0x395b   :  { %v33849_v4 = vsub.f32 %v24662_v46, %v24670_v53  ;;  %v34829_v46 = vcombine.high %v33762_v31, %v33765_v51  ;;  %v26019_v31 = vld [vmem:[%s34758_s4 + $0x28] sm:$0xff]  ;;  %v26020_v51 = vld [vmem:[%s34758_s4 + $0x30] sm:$0xff]  ;;  %v34831_v53 = vcombine.low %v33486_v60, %v33489_v20 }
0x395c   :  { %v24675_v26 = vmul.f32 %v33847_v48, %v33847_v48  ;;  %v12891_v29 = vrot.slane %v34828_v10, %v33858_v38  ;;  %v9026_v7 = vrot.slane %v34830_v57, %v33858_v38  ;;  %v24713_v50 = vand.u32 4294901760, %v26019_v31 }
0x395d   :  { %v24674_v54 = vmul.f32 %v33849_v4, %v33849_v4  ;;  %v23111_v42 = vrot.slane %v34829_v46, %v33858_v38  ;;  %v24716_v19 = vand.u32 4294901760, %v26020_v51 }
0x395e   :  { %v24679_v25 = vsel %vm552_vm3, %v24675_v26, 0.0  ;;  %v12909_v32 = vcombine.high %v12891_v29, %v34819_v59  ;;  %v19246_v26 = vrot.slane %v34831_v53, %v33858_v38 }
0x395f   :  { %24680 = vadd.xlane.f32.xlu1 %v24679_v25  ;;  %v24676_v40 = vsel %vm552_vm3, %v24674_v54, 0.0  ;;  %v23129_v30 = vcombine.high %v23111_v42, %v34819_v59  ;;  %v33934_v23 = vpack.c.bf16 %v24716_v19, %v24713_v50  ;;  %v26021_v54 = vld [vmem:[%s34758_s4 + $0x38] sm:$0xff]  ;;  %v26022_v25 = vld [vmem:[%s34758_s4 + $0x40] sm:$0xff]  ;;  %v24810_v17 = vsub.f32 %v26020_v51, %v24716_v19 }
0x3960   :  { %24677 = vadd.xlane.f32.xlu0 %v24676_v40  ;;  %v24803_v40 = vsub.f32 %v26019_v31, %v24713_v50  ;;  %v24719_v36 = vand.u32 4294901760, %v26021_v54  ;;  %v24722_v37 = vand.u32 4294901760, %v26022_v25  ;;  %v34834_v19 = vcombine.high %v32423_v58, %v32426_v61 }
0x3961   :  { %30370 = vmatprep.subr.bf16.mxu0 %v33934_v23  ;;  %v34836_v58 = vcombine.high %v32762_v6, %v32765_v55  ;;  %v34838_v6 = vcombine.low %v32587_v0, %v32590_v5 }
0x3962   :  { %30372 = vmatpush3.bf16.msra.mxu0 %v33934_v23  ;;  %v24804_v27 = vand.u32 4294901760, %v24803_v40  ;;  %v33955_v34 = vpack.c.bf16 %v24722_v37, %v24719_v36  ;;  %v24824_v12 = vsub.f32 %v26022_v25, %v24722_v37  ;;  %v34835_v25 = vcombine.high %v33486_v60, %v33489_v20 }
0x3963   :  { %v12907_v61 = vrot.slane %v34836_v58, %v33858_v38  ;;  %v34837_v60 = vcombine.high %v33769_v45, %v33776_v1  ;;  %v34008_v55 = vrot.slane %v34838_v6, %v33858_v38  ;;  %v34102_v58 = vld [vmem:[%s34759_s5 + $0xc8] sm:$0xff] }
0x3964   :  { %v24805_v41 = vsub.f32 %v24803_v40, %v24804_v27  ;;  %30374 = vmatprep.subr.bf16.mxu0 %v33955_v34 }
0x3965   :  { %v23127_v20 = vrot.slane %v34837_v60, %v33858_v38  ;;  %v34789_v60 = vand.u32 4294901760, %v34102_v58 }
0x3966   :  { %30376 = vmatpush3.bf16.msra.mxu0 %v33955_v34 }
0x3970   :  { %12913 = vrot.lane.b32.xlu1 %v12908_v16, %s31369_s24  ;;  %v12900_v16 = vrot.slane %v34832_v47, %v33858_v38  ;;  %v12911_v47 = vcombine.high %v12907_v61, %v34819_v59 }
0x3972   :  { %v12910_v31 = vcombine.high %v12900_v16, %v34819_v59 }
0x3974   :  { %19259 = vrot.lane.b32.xlu1 %v19254_v44, %s31369_s24  ;;  %v24811_v44 = vand.u32 4294901760, %v24810_v17 }
0x3976   :  { %9039 = vrot.lane.b32.xlu0 %v9034_v33, %s31369_s24  ;;  %v9036_v33 = vcombine.high %v9026_v7, %v34819_v59 }
0x3978   :  { %9043 = vrot.lane.b32.xlu1 %v9017_v24, %s31370_s25  ;;  %v24812_v24 = vsub.f32 %v24810_v17, %v24811_v44 }
0x397a   :  { %23133 = vrot.lane.b32.xlu0 %v23128_v15, %s31369_s24  ;;  %v24817_v15 = vsub.f32 %v26021_v54, %v24719_v36  ;;  %v19253_v36 = vrot.slane %v34835_v25, %v33858_v38 }
0x397c   :  { %19263 = vrot.lane.b32.xlu1 %v19237_v56, %s31370_s25  ;;  %v34833_v56 = vcombine.low %v33769_v45, %v33776_v1  ;;  %v24818_v46 = vand.u32 4294901760, %v24817_v15  ;;  %v33988_v37 = vpack.c.bf16 %v24824_v12, %v24817_v15  ;;  %v10971_v45 = vcombine.high %v34008_v55, %v34819_v59 }
0x397d   :  { %v34839_v1 = vcombine.low %v33327_v13, %v33330_v28 }
0x397e   :  { %12917 = vrot.lane.b32.xlu0 %v12891_v29, %s31370_s25  ;;  %v23120_v10 = vrot.slane %v34833_v56, %v33858_v38  ;;  %v24806_v29 = vand.u32 4294901760, %v24805_v41  ;;  %v24819_v57 = vsub.f32 %v24817_v15, %v24818_v46  ;;  %v23131_v41 = vcombine.high %v23127_v20, %v34819_v59 }
0x3980   :  { %9047 = vrot.lane.b32.xlu1 %v9035_v21, %s31371_s11  ;;  %v24813_v21 = vand.u32 4294901760, %v24812_v24  ;;  %v24820_v51 = vand.u32 4294901760, %v24819_v57  ;;  %v23130_v54 = vcombine.high %v23120_v10, %v34819_v59  ;;  %v34840_v24 = vcombine.low %v32225_v35, %v32228_v11 }
0x3981   :  { %v34844_v57 = vcombine.high %v32587_v0, %v32590_v5  ;;  %v34846_v5 = vld [vmem:[#allocation6_spill] sm:$0xff] }
0x3982   :  { %23137 = vrot.lane.b32.xlu0 %v23111_v42, %s31370_s25  ;;  %v24825_v42 = vand.u32 4294901760, %v24824_v12  ;;  %v34029_v15 = vrot.slane %v34840_v24, %v33858_v38 }
0x3984   :  { %19267 = vrot.lane.b32.xlu1 %v19255_v9, %s31371_s11  ;;  %v19256_v9 = vcombine.high %v19246_v26, %v34819_v59  ;;  %v34034_v56 = vpack.c.bf16 %v24825_v42, %v24818_v46 }
0x3986   :  { %12921 = vrot.lane.b32.xlu0 %v12909_v32, %s31371_s11  ;;  %v33967_v32 = vpack.c.bf16 %v24813_v21, %v24806_v29  ;;  %v34842_v29 = vcombine.high %v32225_v35, %v32228_v11  ;;  %v10954_v35 = vrot.slane %v34844_v57, %v33858_v38 }
0x3988   :  { %9051 = vrot.lane.b32.xlu1 %v9026_v7, %s31373_s12  ;;  %v24826_v7 = vsub.f32 %v24824_v12, %v24825_v42  ;;  %30378 = vmatprep.subr.bf16.mxu0 %v33967_v32  ;;  %v7076_v21 = vrot.slane %v34842_v29, %v33858_v38  ;;  %v34843_v42 = vcombine.high %v33327_v13, %v33330_v28  ;;  %v34847_v28 = vld [vmem:[#allocation7_spill] sm:$0xff] }
0x3989   :  { %v10972_v0 = vcombine.high %v10954_v35, %v34819_v59  ;;  %v34157_v29 = vld [vmem:[%s34759_s5 + $0x100] sm:$0xff] }
0x398a   :  { %23141 = vrot.lane.b32.xlu0 %v23129_v30, %s31371_s11  ;;  %v24827_v50 = vand.u32 4294901760, %v24826_v7  ;;  %v9033_v30 = vrot.slane %v34834_v19, %v33858_v38  ;;  %v7094_v11 = vcombine.high %v7076_v21, %v34819_v59  ;;  %v34845_v7 = vcombine.high %v33628_v43, %v33631_v8 }
0x398c   :  { %19271 = vrot.lane.b32.xlu1 %v19246_v26, %s31373_s12  ;;  %v33977_v53 = vpack.c.bf16 %v24827_v50, %v24820_v51  ;;  %v33979_v26 = vpack.c.bf16 %v24810_v17, %v24803_v40  ;;  %v9037_v40 = vcombine.high %v9033_v30, %v34819_v59  ;;  %v19257_v17 = vcombine.high %v19253_v36, %v34819_v59 }
0x398d   :  { %v34848_v51 = vcombine.low %v34846_v5, %v34847_v28 }
0x398e   :  { %12925 = vrot.lane.b32.xlu0 %v12900_v16, %s31373_s12  ;;  %v34019_v16 = vrot.slane %v34839_v1, %v33858_v38 }
0x398f   :  { %v34079_v50 = vrot.slane %v34848_v51, %v33858_v38 }
0x3990   :  { %9055 = vrot.lane.b32.xlu1 %v9036_v33, %s31368_s23  ;;  %v34021_v33 = vpack.c.bf16 %v24811_v44, %v24804_v27  ;;  %v17317_v12 = vcombine.high %v34019_v16, %v34819_v59  ;;  %v7093_v27 = vcombine.high %v34029_v15, %v34819_v59  ;;  %v34841_v44 = vcombine.low %v33628_v43, %v33631_v8 }
0x3991   :  { %v34849_v8 = vcombine.low %v33335_v63, %v33342_v62 }
0x3992   :  { %23145 = vrot.lane.b32.xlu0 %v23120_v10, %s31373_s12  ;;  %v34043_v10 = vrot.slane %v34841_v44, %v33858_v38  ;;  %v34152_v44 = vld [vmem:[%s34759_s5 + $0xf8] sm:$0xff] }
0x3993   :  { %v34089_v19 = vrot.slane %v34849_v8, %v33858_v38 }
0x3994   :  { %19275 = vrot.lane.b32.xlu1 %v19256_v9, %s31368_s23  ;;  %v21191_v46 = vcombine.high %v34043_v10, %v34819_v59  ;;  %v17300_v9 = vrot.slane %v34843_v42, %v33858_v38  ;;  %v34782_v42 = vand.u32 4294901760, %v34157_v29 }
0x3996   :  { %12929 = vrot.lane.b32.xlu0 %v12910_v31, %s31368_s23  ;;  %v21174_v31 = vrot.slane %v34845_v7, %v33858_v38  ;;  %v17318_v13 = vcombine.high %v17300_v9, %v34819_v59 }
0x3998   :  { %9059 = vrot.lane.b32.xlu1 %v9033_v30, %s31365_s20  ;;  %v21192_v43 = vcombine.high %v21174_v31, %v34819_v59  ;;  %v34850_v30 = vld [vmem:[#allocation8_spill] sm:$0xff] }
0x399a   :  { %23149 = vrot.lane.b32.xlu0 %v23130_v54, %s31368_s23  ;;  %v34851_v54 = vld [vmem:[#allocation9_spill] sm:$0xff] }
0x399b   :  { %v34852_v25 = vcombine.low %v34850_v30, %v34851_v54 }
0x399c   :  { %19279 = vrot.lane.b32.xlu1 %v19253_v36, %s31365_s20 }
0x399d   :  { %v34097_v36 = vrot.slane %v34852_v25, %v33858_v38 }
0x399e   :  { %12933 = vrot.lane.b32.xlu0 %v12907_v61, %s31365_s20  ;;  %v34107_v61 = vld [vmem:[%s34759_s5 + $0xd0] sm:$0xff] }
0x399f   :  { %34853 = vst [vmem:[#allocation13_spill] sm:$0xff] %v34097_v36 }
0x39a0   :  { %9063 = vrot.lane.b32.xlu1 %v9037_v40, %s31362_s16  ;;  %v34112_v40 = vld [vmem:[%s34759_s5 + $0xd8] sm:$0xff] }
0x39a1   :  { %v34787_v6 = vand.u32 4294901760, %v34112_v40 }
0x39a2   :  { %23153 = vrot.lane.b32.xlu0 %v23127_v20, %s31365_s20  ;;  %v34788_v20 = vand.u32 4294901760, %v34107_v61 }
0x39a4   :  { %19283 = vrot.lane.b32.xlu1 %v19257_v17, %s31362_s16  ;;  %v34121_v17 = vld [vmem:[%s34759_s5 + $0xe0] sm:$0xff] }
0x39a5   :  { %v34786_v1 = vand.u32 4294901760, %v34121_v17 }
0x39a6   :  { %12937 = vrot.lane.b32.xlu0 %v12911_v47, %s31362_s16  ;;  %v34127_v47 = vld [vmem:[%s34759_s5 + $0xe8] sm:$0xff] }
0x39a7   :  { %v34785_v24 = vand.u32 4294901760, %v34127_v47 }
0x39a8   :  { %10976 = vrot.lane.b32.xlu1 %v10971_v45, %s31369_s24  ;;  %v34132_v45 = vld [vmem:[%s34759_s5 + $0xf0] sm:$0xff] }
0x39aa   :  { %23157 = vrot.lane.b32.xlu0 %v23131_v41, %s31362_s16  ;;  %v34139_v41 = vpack.c.bf16 %v34788_v20, %v34789_v60 }
0x39ac   :  { %17322 = vrot.lane.b32.xlu1 %v17317_v12, %s31369_s24  ;;  %v34784_v12 = vand.u32 4294901760, %v34132_v45  ;;  %30418 = vmatprep.subr.bf16.mxu1 %v34139_v41 }
0x39ad   :  { %30420 = vmatpush3.bf16.msra.mxu1 %v34139_v41 }
0x39ae   :  { %7098 = vrot.lane.b32.xlu0 %v7093_v27, %s31369_s24  ;;  %v34147_v27 = vpack.c.bf16 %v34786_v1, %v34787_v6  ;;  %v34857_v1 = vsub.s32 2, %v31574_v3 }
0x39b0   :  { %7102 = vrot.lane.b32.xlu1 %v7076_v21, %s31370_s25  ;;  %30422 = vmatprep.subr.bf16.mxu1 %v34147_v27  ;;  %v34166_v21 = vpack.c.bf16 %v34784_v12, %v34785_v24  ;;  %v24699_v6 = vrot.slane %v33839_v18, %v34857_v1 }
0x39b1   :  { %30424 = vmatpush3.bf16.msra.mxu1 %v34147_v27 }
0x39b2   :  { %21196 = vrot.lane.b32.xlu0 %v21191_v46, %s31369_s24  ;;  %v34783_v46 = vand.u32 4294901760, %v34152_v44  ;;  %30426 = vmatprep.subr.bf16.mxu1 %v34166_v21 }
0x39b4   :  { %17326 = vrot.lane.b32.xlu1 %v17300_v9, %s31370_s25  ;;  %v34176_v9 = vpack.c.bf16 %v34782_v42, %v34783_v46 }
0x39b5   :  { %30428 = vmatpush3.bf16.msra.mxu1 %v34166_v21 }
0x39b6   :  { %10980 = vrot.lane.b32.xlu0 %v10954_v35, %s31370_s25  ;;  %30430 = vmatprep.subr.bf16.mxu1 %v34176_v9 }
0x39b8   :  { %7106 = vrot.lane.b32.xlu1 %v7094_v11, %s31371_s11 }
0x39b9   :  { %30432 = vmatpush3.bf16.msra.mxu1 %v34176_v9 }
0x39ba   :  { %21200 = vrot.lane.b32.xlu0 %v21174_v31, %s31370_s25 }
0x39bc   :  { %17330 = vrot.lane.b32.xlu1 %v17318_v13, %s31371_s11 }
0x39be   :  { %10984 = vrot.lane.b32.xlu0 %v10972_v0, %s31371_s11 }
0x39c0   :  { %7110 = vrot.lane.b32.xlu1 %v34079_v50, %s31373_s12 }
0x39c2   :  { %21204 = vrot.lane.b32.xlu0 %v21192_v43, %s31371_s11 }
0x39c4   :  { %17334 = vrot.lane.b32.xlu1 %v34089_v19, %s31373_s12 }
0x39c6   :  { %10988 = vrot.lane.b32.xlu0 %v34097_v36, %s31373_s12 }
0x39ec   :  { %v24681_v57 = vpop.xlane.xlu1 %24680 }
0x39ed   :  { %v24683_v35 = vmul.f32 0.03125, %v24681_v57  ;;  %v24678_v11 = vpop.xlane.xlu0 %24677  ;;  %v34856_v57 = vld [vmem:[#allocation5_spill] sm:$0xff] }
0x39ee   :  { %v24682_v7 = vmul.f32 0.03125, %v24678_v11  ;;  %v24693_v11 = vrot.slane %v33839_v18, %v34856_v57 }
0x39ef   :  { %v24685_v31 = vadd.f32 1e-05, %v24683_v35 }
0x39f0   :  { %v24684_v13 = vadd.f32 1e-05, %v24682_v7  ;;  %v12914_v0 = vpop.permute.xlu1 %12913 }
0x39f1   :  { %31321 = vrsqrt.f32 %v24685_v31  ;;  %v34181_v51 = vpop.permute.xlu0 %9039  ;;  %v12940_v42 = vsel %vm6103_vm11, %v33864_v52, %v12914_v0 }
0x39f2   :  { %34854 = vst [vmem:[#allocation14_spill] sm:$0xff] %v34181_v51  ;;  %31323 = vrsqrt.f32 %v24684_v13 }
0x39f4   :  { %v19260_v43 = vpop.permute.xlu1 %19259 }
0x39f5   :  { %v23134_v8 = vpop.permute.xlu0 %23133  ;;  %v19286_v13 = vsel %vm6103_vm11, %v33872_v49, %v19260_v43 }
0x39f8   :  { %v34183_v25 = vpop.permute.xlu1 %9043 }
0x39f9   :  { %34855 = vst [vmem:[#allocation15_spill] sm:$0xff] %v34183_v25  ;;  %v12918_v46 = vpop.permute.xlu0 %12917 }
0x39fa   :  { %v12941_v12 = vsel %vm39_vm0, %v12940_v42, %v12918_v46  ;;  %v23160_v46 = vsel %vm6103_vm11, %v33890_v39, %v23134_v8 }
0x39fb   :  { %v31322_v35 = vpop.eup %31321 }
0x39fc   :  { %v31324_v7 = vpop.eup %31323  ;;  %v24689_v31 = vmul.f32 %v31322_v35, %v33847_v48  ;;  %v19264_v24 = vpop.permute.xlu1 %19263 }
0x39fd   :  { %v24688_v52 = vmul.f32 %v31324_v7, %v33849_v4  ;;  %v19287_v42 = vsel %vm39_vm0, %v19286_v13, %v19264_v24  ;;  %v23138_v0 = vpop.permute.xlu0 %23137 }
0x39fe   :  { %v23161_v57 = vsel %vm39_vm0, %v23160_v46, %v23138_v0  ;;  %v24695_v20 = vmul.f32 %v24693_v11, %v24689_v31 }
0x39ff   :  { %v24694_v48 = vmul.f32 %v24693_v11, %v24688_v52 }
0x3a00   :  { %v34201_v35 = vpop.permute.xlu1 %9047  ;;  %v34203_v49 = vadd.f32 %v24699_v6, %v24695_v20 }
0x3a01   :  { %34858 = vst [vmem:[#allocation5_spill] sm:$0xff] %v34201_v35  ;;  %v12922_v43 = vpop.permute.xlu0 %12921  ;;  %v34205_v60 = vadd.f32 %v24699_v6, %v24694_v48 }
0x3a02   :  { %v12942_v18 = vsel %vm7127_vm12, %v12941_v12, %v12922_v43  ;;  %v24710_v4 = vsel %vm552_vm3, %v34203_v49, 0 }
0x3a03   :  { %v24707_v39 = vsel %vm552_vm3, %v34205_v60, 0  ;;  %v34212_v1 = vand.u32 4294901760, %v24710_v4 }
0x3a04   :  { %v19268_v24 = vpop.permute.xlu1 %19267  ;;  %v34214_v8 = vand.u32 4294901760, %v24707_v39 }
0x3a05   :  { %v19288_v11 = vsel %vm7127_vm12, %v19287_v42, %v19268_v24  ;;  %v23142_v20 = vpop.permute.xlu0 %23141  ;;  %v24792_v7 = vsub.f32 %v24710_v4, %v34212_v1 }
0x3a06   :  { %v23162_v6 = vsel %vm7127_vm12, %v23161_v57, %v23142_v20  ;;  %v24782_v12 = vsub.f32 %v24707_v39, %v34214_v8 }
0x3a07   :  { %v24793_v31 = vand.u32 4294901760, %v24792_v7 }
0x3a08   :  { %v34220_v13 = vpop.permute.xlu1 %9051  ;;  %v24783_v52 = vand.u32 4294901760, %v24782_v12 }
0x3a09   :  { %34859 = vst [vmem:[#allocation16_spill] sm:$0xff] %v34220_v13  ;;  %v12926_v46 = vpop.permute.xlu0 %12925  ;;  %v24794_v0 = vsub.f32 %v24792_v7, %v24793_v31 }
0x3a0a   :  { %v12943_v48 = vsel %vm552_vm3, %v12942_v18, %v12926_v46  ;;  %v24784_v43 = vsub.f32 %v24782_v12, %v24783_v52 }
0x3a0b   :  { %v24795_v14 = vand.u32 4294901760, %v24794_v0 }
0x3a0c   :  { %v19272_v35 = vpop.permute.xlu1 %19271  ;;  %v24785_v25 = vand.u32 4294901760, %v24784_v43 }
0x3a0d   :  { %v19289_v42 = vsel %vm552_vm3, %v19288_v11, %v19272_v35  ;;  %v23146_v24 = vpop.permute.xlu0 %23145 }
0x3a0e   :  { %v23163_v4 = vsel %vm552_vm3, %v23162_v6, %v23146_v24  ;;  %29309 = vmatprep.mubr.f32.mxu0 %v24785_v25 }
0x3a0f   :  { %29310 = vmatmul.mubr.f32.vlgmr.msra.gmra.mrb[60].mxu0 %v24795_v14 }
0x3a10   :  { %30380 = vmatpush3.bf16.msra.mxu0 %v33967_v32  ;;  %29320 = vmatprep.mubr.f32.mxu0 %v34214_v8  ;;  %v34227_v57 = vpop.permute.xlu1 %9055 }
0x3a11   :  { %34860 = vst [vmem:[#allocation17_spill] sm:$0xff] %v34227_v57  ;;  %v12930_v39 = vpop.permute.xlu0 %12929  ;;  %30382 = vmatprep.subr.bf16.mxu0 %v33977_v53  ;;  %v34877_v57 = vand.u32 4294901760, %v34127_v47 }
0x3a12   :  { %v12944_v18 = vsel %vm7130_vm13, %v12943_v48, %v12930_v39 }
0x3a13   :  { %v34454_v13 = vsub.f32 %v34127_v47, %v34877_v57 }
0x3a14   :  { %30384 = vmatpush3.bf16.msra.mxu0 %v33977_v53  ;;  %v19276_v35 = vpop.permute.xlu1 %19275 }
0x3a15   :  { %v19290_v11 = vsel %vm7130_vm13, %v19289_v42, %v19276_v35  ;;  %v23150_v20 = vpop.permute.xlu0 %23149  ;;  %30386 = vmatprep.subr.bf16.mxu0 %v33979_v26 }
0x3a16   :  { %v23164_v14 = vsel %vm7130_vm13, %v23163_v4, %v23150_v20 }
0x3a17   :  { %29321 = vmatmul.mubr.f32.vlgmr.msra.gmra.mrb[60].mxu0 %v34212_v1 }
0x3a18   :  { %30388 = vmatpush3.bf16.msra.mxu0 %v33979_v26  ;;  %29331 = vmatprep.mubr.f32.mxu0 %v24782_v12  ;;  %v34237_v32 = vpop.permute.xlu1 %9059 }
0x3a19   :  { %34861 = vst [vmem:[#allocation18_spill] sm:$0xff] %v34237_v32  ;;  %v12934_v25 = vpop.permute.xlu0 %12933  ;;  %30390 = vmatprep.subr.bf16.mxu0 %v33988_v37 }
0x3a1a   :  { %v34241_v53 = vsel %vm7132_vm14, %v12944_v18, %v12934_v25 }
0x3a1b   :  { %34862 = vst [vmem:[#allocation19_spill] sm:$0xff] %v34241_v53 }
0x3a1c   :  { %30392 = vmatpush3.bf16.msra.mxu0 %v33988_v37  ;;  %v19280_v6 = vpop.permute.xlu1 %19279 }
0x3a1d   :  { %v34245_v46 = vsel %vm7132_vm14, %v19290_v11, %v19280_v6  ;;  %v23154_v0 = vpop.permute.xlu0 %23153  ;;  %30394 = vmatprep.subr.bf16.mxu0 %v33934_v23 }
0x3a1e   :  { %34863 = vst [vmem:[#allocation20_spill] sm:$0xff] %v34245_v46  ;;  %v34249_v26 = vsel %vm7132_vm14, %v23164_v14, %v23154_v0 }
0x3a1f   :  { %34864 = vst [vmem:[#allocation21_spill] sm:$0xff] %v34249_v26  ;;  %29332 = vmatmul.mubr.f32.vlgmr.msra.gmra.mrb[60].mxu0 %v24792_v7 }
0x3a20   :  { %30396 = vmatpush3.bf16.msra.mxu0 %v33934_v23  ;;  %29342 = vmatprep.mubr.f32.mxu0 %v24783_v52  ;;  %v34252_v12 = vpop.permute.xlu1 %9063 }
0x3a21   :  { %34865 = vst [vmem:[#allocation22_spill] sm:$0xff] %v34252_v12  ;;  %v34254_v48 = vpop.permute.xlu0 %12937  ;;  %30398 = vmatprep.subr.bf16.mxu0 %v33955_v34 }
0x3a22   :  { %34866 = vst [vmem:[#allocation23_spill] sm:$0xff] %v34254_v48 }
0x3a24   :  { %30400 = vmatpush3.bf16.msra.mxu0 %v33955_v34  ;;  %v34258_v37 = vpop.permute.xlu1 %19283 }
0x3a25   :  { %34867 = vst [vmem:[#allocation24_spill] sm:$0xff] %v34258_v37  ;;  %v34260_v43 = vpop.permute.xlu0 %23157  ;;  %30402 = vmatprep.subr.bf16.mxu0 %v34021_v33 }
0x3a26   :  { %34868 = vst [vmem:[#allocation25_spill] sm:$0xff] %v34260_v43 }
0x3a27   :  { %29343 = vmatmul.mubr.f32.vlgmr.msra.gmra.mrb[60].mxu0 %v24793_v31 }
0x3a28   :  { %30404 = vmatpush3.bf16.msra.mxu0 %v34021_v33  ;;  %29353 = vmatprep.mubr.f32.mxu0 %v34214_v8  ;;  %v10977_v7 = vpop.permute.xlu1 %10976 }
0x3a29   :  { %v7099_v52 = vpop.permute.xlu0 %7098  ;;  %30406 = vmatprep.subr.bf16.mxu0 %v34034_v56  ;;  %v11003_v31 = vsel %vm6103_vm11, %v34008_v55, %v10977_v7 }
0x3a2a   :  { %v7125_v4 = vsel %vm6103_vm11, %v34029_v15, %v7099_v52 }
0x3a2c   :  { %30408 = vmatpush3.bf16.msra.mxu0 %v34034_v56  ;;  %v17323_v42 = vpop.permute.xlu1 %17322 }
0x3a2d   :  { %v21197_v24 = vpop.permute.xlu0 %21196  ;;  %30410 = vmatprep.subr.bf16.mxu0 %v33934_v23  ;;  %v17349_v35 = vsel %vm6103_vm11, %v34019_v16, %v17323_v42  ;;  %v26037_v42 = vld [vmem:[%s34759_s5 + $0x110] sm:$0xff] }
0x3a2f   :  { %29354 = vmatmul.mubr.f32.vlgmr.msra.gmra.mrb[60].mxu0 %v34212_v1 }
0x3a30   :  { %30412 = vmatpush3.bf16.msra.mxu0 %v33934_v23  ;;  %29364 = vmatprep.mubr.f32.mxu0 %v34214_v8  ;;  %v7103_v33 = vpop.permute.xlu1 %7102  ;;  %v21223_v23 = vsel %vm6103_vm11, %v34043_v10, %v21197_v24 }
0x3a31   :  { %v7126_v39 = vsel %vm39_vm0, %v7125_v4, %v7103_v33  ;;  %v10981_v56 = vpop.permute.xlu0 %10980  ;;  %30414 = vmatprep.subr.bf16.mxu0 %v33955_v34  ;;  %v25270_v4 = vand.u32 4294901760, %v26037_v42 }
0x3a32   :  { %v11004_v18 = vsel %vm39_vm0, %v11003_v31, %v10981_v56  ;;  %v26038_v31 = vld [vmem:[%s34759_s5 + $0x118] sm:$0xff] }
0x3a33   :  { %v25273_v56 = vand.u32 4294901760, %v26038_v31  ;;  %v34362_v48 = vsub.f32 %v26037_v42, %v25270_v4 }
0x3a34   :  { %30416 = vmatpush3.bf16.msra.mxu0 %v33955_v34  ;;  %v17327_v15 = vpop.permute.xlu1 %17326 }
0x3a35   :  { %v17350_v8 = vsel %vm39_vm0, %v17349_v35, %v17327_v15  ;;  %v21201_v11 = vpop.permute.xlu0 %21200  ;;  %v26040_v15 = vld [vmem:[%s34759_s5 + $0x128] sm:$0xff]  ;;  %v34800_v46 = vand.u32 4294901760, %v34362_v48 }
0x3a36   :  { %v21224_v55 = vsel %vm39_vm0, %v21223_v23, %v21201_v11  ;;  %v26041_v23 = vld [vmem:[%s34759_s5 + $0x130] sm:$0xff] }
0x3a37   :  { %29365 = vmatmul.mubr.f32.vlgmr.msra.gmra.mrb[60].mxu0 %v34212_v1  ;;  %v26036_v1 = vld [vmem:[%s34759_s5 + $0x108] sm:$0xff]  ;;  %v25282_v11 = vand.u32 4294901760, %v26041_v23 }
0x3a38   :  { %v7107_v20 = vpop.permute.xlu1 %7106  ;;  %v25267_v24 = vand.u32 4294901760, %v26036_v1 }
0x3a39   :  { %v7128_v14 = vsel %vm7127_vm12, %v7126_v39, %v7107_v20  ;;  %v10985_v25 = vpop.permute.xlu0 %10984  ;;  %v26039_v39 = vld [vmem:[%s34759_s5 + $0x120] sm:$0xff]  ;;  %v26042_v20 = vld [vmem:[%s34759_s5 + $0x138] sm:$0xff]  ;;  %v34385_v12 = vsub.f32 %v26041_v23, %v25282_v11 }
0x3a3a   :  { %v34288_v6 = vsel %vm7127_vm12, %v11004_v18, %v10985_v25  ;;  %v34305_v33 = vpack.c.bf16 %v25270_v4, %v25267_v24  ;;  %v25276_v18 = vand.u32 4294901760, %v26039_v39  ;;  %v34873_v25 = vand.u32 4294901760, %v34102_v58 }
0x3a3b   :  { %34869 = vst [vmem:[#allocation26_spill] sm:$0xff] %v34288_v6  ;;  %v34360_v53 = vsub.f32 %v26036_v1, %v25267_v24 }
0x3a3c   :  { %v17331_v16 = vpop.permute.xlu1 %17330  ;;  %30434 = vmatprep.subr.bf16.mxu1 %v34305_v33  ;;  %v34315_v35 = vpack.c.bf16 %v25276_v18, %v25273_v56 }
0x3a3d   :  { %v34291_v34 = vsel %vm7127_vm12, %v17350_v8, %v17331_v16  ;;  %v21205_v0 = vpop.permute.xlu0 %21204  ;;  %30436 = vmatpush3.bf16.msra.mxu1 %v34305_v33  ;;  %v25279_v8 = vand.u32 4294901760, %v26040_v15  ;;  %v34336_v16 = vsub.f32 %v34102_v58, %v34873_v25 }
0x3a3e   :  { %34870 = vst [vmem:[#allocation27_spill] sm:$0xff] %v34291_v34  ;;  %v34294_v10 = vsel %vm7127_vm12, %v21224_v55, %v21205_v0  ;;  %30438 = vmatprep.subr.bf16.mxu1 %v34315_v35  ;;  %v34874_v0 = vand.u32 4294901760, %v34107_v61 }
0x3a3f   :  { %34871 = vst [vmem:[#allocation28_spill] sm:$0xff] %v34294_v10  ;;  %v34325_v55 = vpack.c.bf16 %v25282_v11, %v25279_v8  ;;  %v25285_v10 = vand.u32 4294901760, %v26042_v20  ;;  %v34383_v37 = vsub.f32 %v26040_v15, %v25279_v8 }
0x3a40   :  { %v7111_v7 = vpop.permute.xlu1 %7110 }
0x3a41   :  { %v34297_v52 = vsel %vm552_vm3, %v7128_v14, %v7111_v7  ;;  %30440 = vmatpush3.bf16.msra.mxu1 %v34315_v35  ;;  %v26043_v14 = vld [vmem:[%s34759_s5 + $0x140] sm:$0xff]  ;;  %v34341_v7 = vsub.f32 %v34107_v61, %v34874_v0  ;;  %v34398_v23 = vsub.f32 %v26042_v20, %v25285_v10 }
0x3a42   :  { %34872 = vst [vmem:[#allocation29_spill] sm:$0xff] %v34297_v52  ;;  %v25288_v34 = vand.u32 4294901760, %v26043_v14  ;;  %30442 = vmatprep.subr.bf16.mxu1 %v34325_v55  ;;  %v34791_v52 = vand.u32 4294901760, %v34336_v16 }
0x3a43   :  { %v34792_v6 = vand.u32 4294901760, %v34341_v7 }
0x3a44   :  { %v34347_v26 = vpack.c.bf16 %v25288_v34, %v25285_v10  ;;  %v25347_v58 = vsub.f32 %v34336_v16, %v34791_v52  ;;  %v34793_v52 = vand.u32 4294901760, %v34360_v53  ;;  %v34400_v8 = vsub.f32 %v26043_v14, %v25288_v34 }
0x3a45   :  { %30444 = vmatpush3.bf16.msra.mxu1 %v34325_v55  ;;  %v25354_v61 = vsub.f32 %v34341_v7, %v34792_v6 }
0x3a46   :  { %30446 = vmatprep.subr.bf16.mxu1 %v34347_v26  ;;  %v25348_v25 = vand.u32 4294901760, %v25347_v58  ;;  %v25403_v6 = vsub.f32 %v34360_v53, %v34793_v52  ;;  %v25410_v58 = vsub.f32 %v34362_v48, %v34800_v46 }
0x3a47   :  { %v25355_v0 = vand.u32 4294901760, %v25354_v61  ;;  %v34372_v61 = vsub.f32 %v26038_v31, %v25273_v56  ;;  %v34798_v56 = vand.u32 4294901760, %v34385_v12 }
0x3a48   :  { %v25404_v1 = vand.u32 4294901760, %v25403_v6  ;;  %v25411_v24 = vand.u32 4294901760, %v25410_v58 }
0x3a49   :  { %30448 = vmatpush3.bf16.msra.mxu1 %v34347_v26  ;;  %v34357_v43 = vpack.c.bf16 %v25355_v0, %v25348_v25  ;;  %v34374_v25 = vsub.f32 %v26039_v39, %v25276_v18  ;;  %v34799_v42 = vand.u32 4294901760, %v34372_v61  ;;  %v34795_v39 = vand.u32 4294901760, %v34383_v37 }
0x3a4a   :  { %v34378_v0 = vpack.c.bf16 %v25411_v24, %v25404_v1  ;;  %v25438_v15 = vsub.f32 %v34385_v12, %v34798_v56  ;;  %v34797_v24 = vand.u32 4294901760, %v34398_v23 }
0x3a4b   :  { %30450 = vmatprep.subr.bf16.mxu1 %v34357_v43  ;;  %v34794_v4 = vand.u32 4294901760, %v34374_v25  ;;  %v25417_v52 = vsub.f32 %v34372_v61, %v34799_v42  ;;  %v25431_v58 = vsub.f32 %v34383_v37, %v34795_v39 }
0x3a4c   :  { %v25439_v1 = vand.u32 4294901760, %v25438_v15  ;;  %v25445_v39 = vsub.f32 %v34398_v23, %v34797_v24  ;;  %v34430_v15 = vpack.c.bf16 %v34385_v12, %v34383_v37 }
0x3a4d   :  { %v25424_v31 = vsub.f32 %v34374_v25, %v34794_v4  ;;  %v25418_v6 = vand.u32 4294901760, %v25417_v52  ;;  %v25432_v52 = vand.u32 4294901760, %v25431_v58  ;;  %v34426_v58 = vpack.c.bf16 %v34374_v25, %v34372_v61 }
0x3a4e   :  { %v25446_v34 = vand.u32 4294901760, %v25445_v39  ;;  %v34434_v39 = vpack.c.bf16 %v34400_v8, %v34398_v23 }
0x3a4f   :  { %v25425_v18 = vand.u32 4294901760, %v25424_v31  ;;  %v34796_v31 = vand.u32 4294901760, %v34400_v8  ;;  %v34406_v4 = vpack.c.bf16 %v25439_v1, %v25432_v52  ;;  %v26047_v52 = vld [vmem:[%s34758_s4 + $0x48] ss:$0 sm:$0xff]  ;;  %v34875_v1 = vand.u32 4294901760, %v34112_v40 }
0x3a51   :  { %v34402_v11 = vpack.c.bf16 %v25425_v18, %v25418_v6  ;;  %v25452_v10 = vsub.f32 %v34400_v8, %v34796_v31  ;;  %v34418_v6 = vpack.c.bf16 %v34341_v7, %v34336_v16  ;;  %v34422_v18 = vpack.c.bf16 %v34362_v48, %v34360_v53 }
0x3a53   :  { %v25453_v20 = vand.u32 4294901760, %v25452_v10  ;;  %v34442_v10 = vsub.f32 %v34112_v40, %v34875_v1  ;;  %v34878_v1 = vand.u32 4294901760, %v34132_v45 }
0x3a55   :  { %v34414_v14 = vpack.c.bf16 %v25453_v20, %v25446_v34  ;;  %v34876_v34 = vand.u32 4294901760, %v34121_v17  ;;  %v34801_v46 = vand.u32 4294901760, %v34442_v10  ;;  %v34459_v51 = vsub.f32 %v34132_v45, %v34878_v1 }
0x3a56   :  { %v34880_v1 = vand.u32 4294901760, %v34157_v29  ;;  %v34881_v45 = vand.u32 4294901760, %v34454_v13 }
0x3a57   :  { %v34447_v20 = vsub.f32 %v34121_v17, %v34876_v34 }
0x3a58   :  { %v25375_v62 = vsub.f32 %v34454_v13, %v34881_v45 }
0x3a59   :  { %v34802_v32 = vand.u32 4294901760, %v34447_v20 }
0x3a5a   :  { %v25376_v36 = vand.u32 4294901760, %v25375_v62 }
0x3a5b   :  { %v25368_v47 = vsub.f32 %v34447_v20, %v34802_v32 }
0x3a5d   :  { %v25369_v30 = vand.u32 4294901760, %v25368_v47 }
0x3b0a   :  { %v29366_v31 = vpop.f32.mrb[60].mxu0 }
0x3b0b   :  { %v30635_v24 = vadd.f32 %v29366_v31, %v26047_v52  ;;  %v25230_v56 = vpop.f32.mrb[61].mxu0 }
0x3b0c   :  { %v30636_v42 = vadd.f32 %v26047_v52, %v25230_v56  ;;  %v25361_v56 = vsub.f32 %v34442_v10, %v34801_v46  ;;  %v34484_v46 = vsub.f32 %v34157_v29, %v34880_v1  ;;  %v34882_v29 = vand.u32 4294901760, %v34459_v51 }
0x3b0d   :  { %v25241_v40 = vmax.f32 %v30635_v24, 0.0 }
0x3b0e   :  { %v25240_v17 = vmax.f32 %v30636_v42, 0.0  ;;  %v34879_v42 = vand.u32 4294901760, %v34152_v44  ;;  %v25362_v57 = vand.u32 4294901760, %v25361_v56  ;;  %v25395_v1 = vand.u32 4294901760, %v34484_v46 }
0x3b0f   :  { %v34461_v34 = vand.u32 4294901760, %v25241_v40 }
0x3b10   :  { %v34463_v31 = vand.u32 4294901760, %v25240_v17  ;;  %v34479_v52 = vsub.f32 %v34152_v44, %v34879_v42  ;;  %v25382_v42 = vsub.f32 %v34459_v51, %v34882_v29  ;;  %v30453_v47 = vpack.c.bf16 %v25369_v30, %v25362_v57 }
0x3b11   :  { %v34473_v24 = vsub.f32 %v25241_v40, %v34461_v34 }
0x3b12   :  { %v34487_v54 = vsub.f32 %v25240_v17, %v34463_v31  ;;  %v25388_v17 = vand.u32 4294901760, %v34479_v52  ;;  %v25383_v5 = vand.u32 4294901760, %v25382_v42 }
0x3b13   :  { %v34806_v32 = vand.u32 4294901760, %v34473_v24 }
0x3b14   :  { %v25325_v40 = vand.u32 4294901760, %v34487_v54  ;;  %v25389_v45 = vsub.f32 %v34479_v52, %v25388_v17 }
0x3b15   :  { %v25336_v44 = vsub.f32 %v34473_v24, %v34806_v32  ;;  %v25396_v32 = vsub.f32 %v34484_v46, %v25395_v1 }
0x3b16   :  { %v25326_v63 = vsub.f32 %v34487_v54, %v25325_v40  ;;  %v25390_v30 = vand.u32 4294901760, %v25389_v45  ;;  %v34908_v45 = vld [vmem:[#allocation9_spill] sm:$0xff] }
0x3b17   :  { %v25337_v28 = vand.u32 4294901760, %v25336_v44  ;;  %v25397_v62 = vand.u32 4294901760, %v25396_v32  ;;  %v34884_v32 = vand.u32 4294901760, %v34341_v7  ;;  %v34889_v7 = vmov %v34882_v29  ;;  %v34905_v29 = vld [vmem:[#allocation11_spill] sm:$0xff] }
0x3b18   :  { %v25327_v56 = vand.u32 4294901760, %v25326_v63  ;;  %v30457_v63 = vpack.c.bf16 %v25383_v5, %v25376_v36  ;;  %v30485_v5 = vpack.c.bf16 %v34447_v20, %v34442_v10  ;;  %v30493_v36 = vpack.c.bf16 %v34484_v46, %v34479_v52 }
0x3b19   :  { %v30461_v57 = vpack.c.bf16 %v25397_v62, %v25390_v30  ;;  %v34895_v46 = vand.u32 4294901760, %v34385_v12  ;;  %v34910_v62 = vld [vmem:[#allocation14_spill] sm:$0xff] }
0x3b1a   :  { %29399 = vmatprep.mubr.f32.mxu1 %v25327_v56 }
0x3b1b   :  { %29400 = vmatmul.mubr.f32.vlgmr.msra.gmra.mrb[42].mxu1 %v25337_v28  ;;  %v30489_v28 = vpack.c.bf16 %v34459_v51, %v34454_v13  ;;  %v34893_v51 = vand.u32 4294901760, %v34374_v25  ;;  %v7095_v25 = vcombine.high %v34079_v50, %v34819_v59  ;;  %v34903_v50 = vld [vmem:[#allocation13_spill] sm:$0xff] }
0x3b1c   :  { %30452 = vmatpush3.bf16.msra.mxu1 %v34357_v43  ;;  %29434 = vmatprep.mubr.f32.mxu1 %v34463_v31  ;;  %v10973_v44 = vcombine.high %v34903_v50, %v34819_v59 }
0x3b1d   :  { %30454 = vmatprep.subr.bf16.mxu1 %v30453_v47 }
0x3b20   :  { %30456 = vmatpush3.bf16.msra.mxu1 %v30453_v47  ;;  %v34907_v47 = vld [vmem:[#allocation8_spill] sm:$0xff] }
0x3b21   :  { %30458 = vmatprep.subr.bf16.mxu1 %v30457_v63 }
0x3b24   :  { %30460 = vmatpush3.bf16.msra.mxu1 %v30457_v63  ;;  %v34909_v63 = vcombine.high %v34907_v47, %v34908_v45 }
0x3b25   :  { %30462 = vmatprep.subr.bf16.mxu1 %v30461_v57 }
0x3b26   :  { %v10970_v30 = vrot.slane %v34909_v63, %v33858_v38  ;;  %v34926_v63 = vld [vmem:[#allocation29_spill] sm:$0xff] }
0x3b28   :  { %30464 = vmatpush3.bf16.msra.mxu1 %v30461_v57  ;;  %v34911_v57 = vld [vmem:[#allocation12_spill] sm:$0xff] }
0x3b29   :  { %30466 = vmatprep.subr.bf16.mxu1 %v34378_v0 }
0x3b2c   :  { %30468 = vmatpush3.bf16.msra.mxu1 %v34378_v0  ;;  %v34886_v0 = vand.u32 4294901760, %v34447_v20  ;;  %v34894_v20 = vand.u32 4294901760, %v34383_v37 }
0x3b2d   :  { %30470 = vmatprep.subr.bf16.mxu1 %v34402_v11 }
0x3b30   :  { %30472 = vmatpush3.bf16.msra.mxu1 %v34402_v11 }
0x3b31   :  { %30474 = vmatprep.subr.bf16.mxu1 %v34406_v4 }
0x3b34   :  { %30476 = vmatpush3.bf16.msra.mxu1 %v34406_v4  ;;  %v34885_v4 = vand.u32 4294901760, %v34442_v10 }
0x3b35   :  { %30478 = vmatprep.subr.bf16.mxu1 %v34414_v14 }
0x3b36   :  { %v30549_v11 = vpack.c.bf16 %v34886_v0, %v34885_v4  ;;  %v34914_v4 = vld [vmem:[#allocation16_spill] sm:$0xff] }
0x3b38   :  { %30480 = vmatpush3.bf16.msra.mxu1 %v34414_v14  ;;  %v34887_v14 = vand.u32 4294901760, %v34473_v24 }
0x3b39   :  { %30482 = vmatprep.subr.bf16.mxu1 %v34418_v6 }
0x3b3b   :  { %29435 = vmatmul.mubr.f32.vlgmr.msra.gmra.mrb[42].mxu1 %v34461_v34 }
0x3b3c   :  { %30484 = vmatpush3.bf16.msra.mxu1 %v34418_v6  ;;  %29469 = vmatprep.mubr.f32.mxu1 %v34487_v54  ;;  %v34883_v54 = vand.u32 4294901760, %v34336_v16  ;;  %v34888_v16 = vand.u32 4294901760, %v34454_v13  ;;  %v34892_v13 = vand.u32 4294901760, %v34372_v61 }
0x3b3d   :  { %30486 = vmatprep.subr.bf16.mxu1 %v30485_v5 }
0x3b3e   :  { %v30545_v43 = vpack.c.bf16 %v34884_v32, %v34883_v54  ;;  %v30553_v6 = vpack.c.bf16 %v34889_v7, %v34888_v16  ;;  %v30565_v10 = vpack.c.bf16 %v34893_v51, %v34892_v13  ;;  %v34913_v32 = vld [vmem:[#allocation5_spill] sm:$0xff] }
0x3b3f   :  { %v34916_v16 = vld [vmem:[#allocation17_spill] sm:$0xff] }
0x3b40   :  { %30488 = vmatpush3.bf16.msra.mxu1 %v30485_v5  ;;  %v9066_v5 = vsel %vm6103_vm11, %v34911_v57, %v34910_v62 }
0x3b41   :  { %30490 = vmatprep.subr.bf16.mxu1 %v30489_v28 }
0x3b44   :  { %30492 = vmatpush3.bf16.msra.mxu1 %v30489_v28  ;;  %v34912_v28 = vld [vmem:[#allocation15_spill] sm:$0xff] }
0x3b45   :  { %30494 = vmatprep.subr.bf16.mxu1 %v30493_v36 }
0x3b48   :  { %30496 = vmatpush3.bf16.msra.mxu1 %v30493_v36  ;;  %v9067_v36 = vsel %vm39_vm0, %v9066_v5, %v34912_v28  ;;  %vm13859_vm0 = vcmask 523264  }
0x3b49   :  { %30498 = vmatprep.subr.bf16.mxu1 %v34422_v18 }
0x3b4c   :  { %30500 = vmatpush3.bf16.msra.mxu1 %v34422_v18  ;;  %v30557_v18 = vpack.c.bf16 %v25395_v1, %v25388_v17 }
0x3b4d   :  { %30502 = vmatprep.subr.bf16.mxu1 %v34426_v58 }
0x3b50   :  { %30504 = vmatpush3.bf16.msra.mxu1 %v34426_v58  ;;  %v34890_v58 = vand.u32 4294901760, %v34360_v53  ;;  %v34896_v53 = vand.u32 4294901760, %v34398_v23  ;;  %v17319_v23 = vcombine.high %v34089_v19, %v34819_v59  ;;  %v34904_v19 = vld [vmem:[#allocation10_spill] sm:$0xff] }
0x3b51   :  { %30506 = vmatprep.subr.bf16.mxu1 %v34430_v15  ;;  %v34906_v42 = vcombine.high %v34904_v19, %v34905_v29 }
0x3b53   :  { %v17316_v17 = vrot.slane %v34906_v42, %v33858_v38 }
0x3b54   :  { %30508 = vmatpush3.bf16.msra.mxu1 %v34430_v15  ;;  %v34891_v15 = vand.u32 4294901760, %v34362_v48  ;;  %v34897_v48 = vand.u32 4294901760, %v34400_v8  ;;  %v34900_v8 = vld [vmem:[#allocation6_spill] sm:$0xff] }
0x3b55   :  { %30510 = vmatprep.subr.bf16.mxu1 %v34434_v39  ;;  %v17320_v54 = vcombine.high %v17316_v17, %v34819_v59 }
0x3b56   :  { %v30573_v52 = vpack.c.bf16 %v34897_v48, %v34896_v53 }
0x3b58   :  { %30512 = vmatpush3.bf16.msra.mxu1 %v34434_v39  ;;  %v30561_v39 = vpack.c.bf16 %v34891_v15, %v34890_v58  ;;  %v34918_v58 = vld [vmem:[#allocation22_spill] sm:$0xff] }
0x3b59   :  { %30514 = vmatprep.subr.bf16.mxu1 %v34139_v41 }
0x3b5b   :  { %29470 = vmatmul.mubr.f32.vlgmr.msra.gmra.mrb[42].mxu1 %v34473_v24  ;;  %v30569_v24 = vpack.c.bf16 %v34895_v46, %v34894_v20 }
0x3b5c   :  { %30516 = vmatpush3.bf16.msra.mxu1 %v34139_v41  ;;  %29504 = vmatprep.mubr.f32.mxu1 %v25325_v40 }
0x3b5d   :  { %30518 = vmatprep.subr.bf16.mxu1 %v34147_v27 }
0x3b60   :  { %30520 = vmatpush3.bf16.msra.mxu1 %v34147_v27 }
0x3b61   :  { %30522 = vmatprep.subr.bf16.mxu1 %v34166_v21 }
0x3b64   :  { %30524 = vmatpush3.bf16.msra.mxu1 %v34166_v21 }
0x3b65   :  { %30526 = vmatprep.subr.bf16.mxu1 %v34176_v9 }
0x3b68   :  { %30528 = vmatpush3.bf16.msra.mxu1 %v34176_v9 }
0x3b69   :  { %30530 = vmatprep.subr.bf16.mxu1 %v34305_v33 }
0x3b6c   :  { %30532 = vmatpush3.bf16.msra.mxu1 %v34305_v33 }
0x3b6d   :  { %30534 = vmatprep.subr.bf16.mxu1 %v34315_v35 }
0x3b70   :  { %30536 = vmatpush3.bf16.msra.mxu1 %v34315_v35 }
0x3b71   :  { %30538 = vmatprep.subr.bf16.mxu1 %v34325_v55 }
0x3b74   :  { %30540 = vmatpush3.bf16.msra.mxu1 %v34325_v55 }
0x3b75   :  { %30542 = vmatprep.subr.bf16.mxu1 %v34347_v26 }
0x3b78   :  { %30544 = vmatpush3.bf16.msra.mxu1 %v34347_v26 }
0x3b79   :  { %30546 = vmatprep.subr.bf16.mxu1 %v30545_v43 }
0x3b7b   :  { %29505 = vmatmul.mubr.f32.vlgmr.msra.gmra.mrb[42].mxu1 %v34887_v14 }
0x3b7c   :  { %30548 = vmatpush3.bf16.msra.mxu1 %v30545_v43  ;;  %29539 = vmatprep.mubr.f32.mxu1 %v34463_v31  ;;  %v9068_v43 = vsel %vm7127_vm12, %v9067_v36, %v34913_v32 }
0x3b7d   :  { %30550 = vmatprep.subr.bf16.mxu1 %v30549_v11  ;;  %v9069_v0 = vsel %vm552_vm3, %v9068_v43, %v34914_v4 }
0x3b7e   :  { %v9070_v7 = vsel %vm7130_vm13, %v9069_v0, %v34916_v16 }
0x3b80   :  { %30552 = vmatpush3.bf16.msra.mxu1 %v30549_v11  ;;  %v34915_v11 = vcombine.high %v33646_v2, %v33649_v22 }
0x3b81   :  { %30554 = vmatprep.subr.bf16.mxu1 %v30553_v6 }
0x3b82   :  { %v21190_v14 = vrot.slane %v34915_v11, %v33858_v38 }
0x3b84   :  { %30556 = vmatpush3.bf16.msra.mxu1 %v30553_v6  ;;  %v34917_v6 = vld [vmem:[#allocation18_spill] sm:$0xff] }
0x3b85   :  { %30558 = vmatprep.subr.bf16.mxu1 %v30557_v18 }
0x3b88   :  { %30560 = vmatpush3.bf16.msra.mxu1 %v30557_v18  ;;  %v9071_v18 = vsel %vm7132_vm14, %v9070_v7, %v34917_v6 }
0x3b89   :  { %30562 = vmatprep.subr.bf16.mxu1 %v30561_v39  ;;  %v9072_v15 = vsel %vm7134_vm15, %v9071_v18, %v34918_v58 }
0x3b8c   :  { %30564 = vmatpush3.bf16.msra.mxu1 %v30561_v39  ;;  %v10974_v39 = vcombine.high %v10970_v30, %v34819_v59 }
0x3b8d   :  { %30566 = vmatprep.subr.bf16.mxu1 %v30565_v10 }
0x3b90   :  { %30568 = vmatpush3.bf16.msra.mxu1 %v30565_v10 }
0x3b91   :  { %30570 = vmatprep.subr.bf16.mxu1 %v30569_v24 }
0x3b94   :  { %30572 = vmatpush3.bf16.msra.mxu1 %v30569_v24 }
0x3b95   :  { %30574 = vmatprep.subr.bf16.mxu1 %v30573_v52 }
0x3b98   :  { %30576 = vmatpush3.bf16.msra.mxu1 %v30573_v52 }
0x3b99   :  { %30578 = vmatprep.subr.bf16.mxu1 %v34139_v41 }
0x3b9b   :  { %29540 = vmatmul.mubr.f32.vlgmr.msra.gmra.mrb[42].mxu1 %v34461_v34 }
0x3b9c   :  { %30580 = vmatpush3.bf16.msra.mxu1 %v34139_v41  ;;  %29574 = vmatprep.mubr.f32.mxu1 %v34463_v31  ;;  %v34611_v41 = vld [vmem:[%s34759_s5 + $0x148] sm:$0x3f] }
0x3b9d   :  { %30582 = vmatprep.subr.bf16.mxu1 %v34147_v27 }
0x3ba0   :  { %30584 = vmatpush3.bf16.msra.mxu1 %v34147_v27  ;;  %v34898_v27 = vsub.s32 3, %v31574_v3 }
0x3ba1   :  { %30586 = vmatprep.subr.bf16.mxu1 %v34166_v21 }
0x3ba4   :  { %30588 = vmatpush3.bf16.msra.mxu1 %v34166_v21  ;;  %v25931_v21 = vrot.slane %v34611_v41, %v34898_v27  ;;  %v34919_v27 = vld [vmem:[#allocation24_spill] sm:$0xff] }
0x3ba5   :  { %30590 = vmatprep.subr.bf16.mxu1 %v34176_v9 }
0x3ba8   :  { %30592 = vmatpush3.bf16.msra.mxu1 %v34176_v9 }
0x3ba9   :  { %30594 = vmatprep.subr.bf16.mxu1 %v34305_v33 }
0x3bac   :  { %30596 = vmatpush3.bf16.msra.mxu1 %v34305_v33 }
0x3bad   :  { %30598 = vmatprep.subr.bf16.mxu1 %v34315_v35 }
0x3bb0   :  { %30600 = vmatpush3.bf16.msra.mxu1 %v34315_v35 }
0x3bb1   :  { %30602 = vmatprep.subr.bf16.mxu1 %v34325_v55 }
0x3bb4   :  { %30604 = vmatpush3.bf16.msra.mxu1 %v34325_v55 }
0x3bb5   :  { %30606 = vmatprep.subr.bf16.mxu1 %v34347_v26 }
0x3bb8   :  { %30608 = vmatpush3.bf16.msra.mxu1 %v34347_v26 }
0x3bbb   :  { %29575 = vmatmul.mubr.f32.vlgmr.msra.gmra.mrb[42].mxu1 %v34461_v34  ;;  %v34901_v34 = vld [vmem:[#allocation7_spill] sm:$0xff] }
0x3bbc   :  { %v34902_v31 = vcombine.high %v34900_v8, %v34901_v34 }
0x3bbe   :  { %v7092_v40 = vrot.slane %v34902_v31, %v33858_v38 }
0x3bc0   :  { %v7096_v56 = vcombine.high %v7092_v40, %v34819_v59 }
0x3c8e   :  { %v29576_v9 = vpop.f32.mrb[42].mxu1 }
0x3c8f   :  { %v25927_v12 = vadd.f32 %v29576_v9, %v34203_v49  ;;  %v25916_v37 = vpop.f32.mrb[43].mxu1 }
0x3c90   :  { %v25926_v33 = vadd.f32 %v25916_v37, %v34205_v60  ;;  %v34899_v60 = vcombine.low %v33646_v2, %v33649_v22  ;;  %v21194_v22 = vcombine.high %v21190_v14, %v34819_v59  ;;  %v17335_v2 = vpop.permute.xlu1 %17334  ;;  %v34922_v37 = vld [vmem:[#allocation19_spill] sm:$0xff] }
0x3c91   :  { %v25933_v35 = vadd.f32 %v25931_v21, %v25927_v12  ;;  %v34921_v12 = vld [vmem:[#allocation23_spill] sm:$0xff] }
0x3c92   :  { %v25932_v55 = vadd.f32 %v25931_v21, %v25926_v33  ;;  %v21183_v49 = vrot.slane %v34899_v60, %v33858_v38  ;;  %v10989_v38 = vpop.permute.xlu0 %10988  ;;  %v34920_v21 = vld [vmem:[#allocation20_spill] sm:$0xff]  ;;  %v12946_v33 = vsel %vm7134_vm15, %v34922_v37, %v34921_v12 }
0x3c93   :  { %v25937_v26 = vsel %vm552_vm3, %v25933_v35, 0.0  ;;  %v19292_v9 = vsel %vm7134_vm15, %v34920_v21, %v34919_v27 }
0x3c94   :  { %25938 = vadd.xlane.f32.xlu1 %v25937_v26  ;;  %v25934_v61 = vsel %vm552_vm3, %v25932_v55, 0.0  ;;  %v21193_v1 = vcombine.high %v21183_v49, %v34819_v59 }
0x3c95   :  { %25935 = vadd.xlane.f32.xlu0 %v25934_v61 }
0x3ca5   :  { %7114 = vrot.lane.b32.xlu1 %v7095_v25, %s31368_s23 }
0x3ca9   :  { %17338 = vrot.lane.b32.xlu1 %v17319_v23, %s31368_s23 }
0x3cab   :  { %21208 = vrot.lane.b32.xlu0 %v21183_v49, %s31373_s12 }
0x3cad   :  { %7118 = vrot.lane.b32.xlu1 %v7092_v40, %s31365_s20 }
0x3caf   :  { %10992 = vrot.lane.b32.xlu0 %v10973_v44, %s31368_s23 }
0x3cb1   :  { %17342 = vrot.lane.b32.xlu1 %v17316_v17, %s31365_s20 }
0x3cb3   :  { %21212 = vrot.lane.b32.xlu0 %v21193_v1, %s31368_s23  ;;  %v34925_v1 = vld [vmem:[#allocation26_spill] sm:$0xff]  ;;  %s31374_s23 = smov [#allocation2]  }
0x3cb4   :  { %s25979_s12 = sshll.u32 %s31374_s23, 4  ;;  %s25980_s12 = int_to_ptr.vmem [resolvable:$true] %s25979_s12 }
0x3cb5   :  { %7122 = vrot.lane.b32.xlu1 %v7096_v56, %s31362_s16  ;;  %v11006_v56 = vsel %vm552_vm3, %v34925_v1, %v10989_v38  ;;  %p31335_p1 = scmp.lt.s32.totalorder %s25980_s12, %s25980_s12 }
0x3cb7   :  { %10996 = vrot.lane.b32.xlu0 %v10970_v30, %s31365_s20 }
0x3cb9   :  { %17346 = vrot.lane.b32.xlu1 %v17320_v54, %s31362_s16  ;;  %v34927_v54 = vld [vmem:[#allocation27_spill] sm:$0xff] }
0x3cba   :  { %v17352_v32 = vsel %vm552_vm3, %v34927_v54, %v17335_v2 }
0x3cbb   :  { %21216 = vrot.lane.b32.xlu0 %v21190_v14, %s31365_s20  ;;  %v34928_v14 = vld [vmem:[#allocation28_spill] sm:$0xff] }
0x3cbd   :  { %13852 = vrot.lane.b32.xlu1 %v9072_v15, %s31357_s1 }
0x3cbf   :  { %11000 = vrot.lane.b32.xlu0 %v10974_v39, %s31362_s16 }
0x3cc3   :  { %21220 = vrot.lane.b32.xlu0 %v21194_v22, %s31362_s16 }
0x3d21   :  { %v25939_v13 = vpop.xlane.xlu1 %25938 }
0x3d22   :  { %v25941_v51 = vmul.f32 0.03125, %v25939_v13  ;;  %v25936_v10 = vpop.xlane.xlu0 %25935 }
0x3d23   :  { %v25940_v20 = vmul.f32 0.03125, %v25936_v10 }
0x3d24   :  { %v34680_v46 = vsub.f32 %v25933_v35, %v25941_v51  ;;  %v34923_v35 = vld [vmem:[#allocation25_spill] sm:$0xff] }
0x3d25   :  { %v34682_v24 = vsub.f32 %v25932_v55, %v25940_v20  ;;  %v34924_v55 = vld [vmem:[#allocation21_spill] sm:$0xff]  ;;  %v7115_v25 = vpop.permute.xlu1 %7114 }
0x3d26   :  { %v25945_v53 = vmul.f32 %v34680_v46, %v34680_v46  ;;  %v23166_v26 = vsel %vm7134_vm15, %v34924_v55, %v34923_v35  ;;  %v21209_v61 = vpop.permute.xlu0 %21208  ;;  %v7131_v30 = vsel %vm7130_vm13, %v34926_v63, %v7115_v25 }
0x3d27   :  { %v25944_v48 = vmul.f32 %v34682_v24, %v34682_v24  ;;  %v21226_v16 = vsel %vm552_vm3, %v34928_v14, %v21209_v61 }
0x3d28   :  { %v25949_v59 = vsel %vm552_vm3, %v25945_v53, 0.0 }
0x3d29   :  { %25950 = vadd.xlane.f32.xlu0 %v25949_v59  ;;  %v25946_v52 = vsel %vm552_vm3, %v25944_v48, 0.0  ;;  %v17339_v60 = vpop.permute.xlu1 %17338  ;;  %v34929_v48 = vsub.s32 4, %v31574_v3 }
0x3d2a   :  { %25947 = vadd.xlane.f32.xlu1 %v25946_v52  ;;  %v10993_v23 = vpop.permute.xlu0 %10992  ;;  %v17353_v18 = vsel %vm7130_vm13, %v17352_v32, %v17339_v60 }
0x3d2b   :  { %v11007_v62 = vsel %vm7130_vm13, %v11006_v56, %v10993_v23  ;;  %v25963_v59 = vrot.slane %v34611_v41, %v34929_v48 }
0x3d2d   :  { %v7119_v8 = vpop.permute.xlu1 %7118 }
0x3d2e   :  { %v21213_v49 = vpop.permute.xlu0 %21212  ;;  %v7133_v5 = vsel %vm7132_vm14, %v7131_v30, %v7119_v8 }
0x3d2f   :  { %v21227_v58 = vsel %vm7130_vm13, %v21226_v16, %v21213_v49 }
0x3d31   :  { %v17343_v31 = vpop.permute.xlu1 %17342 }
0x3d32   :  { %v10997_v34 = vpop.permute.xlu0 %10996  ;;  %v17354_v22 = vsel %vm7132_vm14, %v17353_v18, %v17343_v31 }
0x3d33   :  { %v11008_v28 = vsel %vm7132_vm14, %v11007_v62, %v10997_v34 }
0x3d35   :  { %v7123_v50 = vpop.permute.xlu1 %7122 }
0x3d36   :  { %v21217_v40 = vpop.permute.xlu0 %21216  ;;  %v7135_v43 = vsel %vm7134_vm15, %v7133_v5, %v7123_v50 }
0x3d37   :  { %v21228_v2 = vsel %vm7132_vm14, %v21227_v58, %v21217_v40 }
0x3d39   :  { %v17347_v19 = vpop.permute.xlu1 %17346 }
0x3d3a   :  { %v11001_v44 = vpop.permute.xlu0 %11000  ;;  %v17355_v38 = vsel %vm7134_vm15, %v17354_v22, %v17347_v19 }
0x3d3b   :  { %24072 = vrot.lane.b32.xlu1 %v19292_v9, %s31357_s1  ;;  %v11009_v4 = vsel %vm7134_vm15, %v11008_v28, %v11001_v44  ;;  %v34930_v9 = vsub.s32 5, %v31574_v3 }
0x3d3d   :  { %v13853_v42 = vpop.permute.xlu1 %13852  ;;  %v25969_v12 = vrot.slane %v34611_v41, %v34930_v9 }
0x3d3e   :  { %v21221_v29 = vpop.permute.xlu0 %21220  ;;  %v13860_v7 = vsel %vm13859_vm0, %v7135_v43, %v13853_v42 }
0x3d3f   :  { %13856 = vrot.lane.b32.xlu0 %v12946_v33, %s31357_s1  ;;  %v21229_v13 = vsel %vm7134_vm15, %v21228_v2, %v21221_v29 }
0x3d43   :  { %24076 = vrot.lane.b32.xlu0 %v23166_v26, %s31357_s1 }
0x3db6   :  { %v25951_v17 = vpop.xlane.xlu0 %25950 }
0x3db7   :  { %v25953_v47 = vmul.f32 0.03125, %v25951_v17  ;;  %v25948_v45 = vpop.xlane.xlu1 %25947 }
0x3db8   :  { %v25952_v57 = vmul.f32 0.03125, %v25948_v45 }
0x3db9   :  { %v25955_v36 = vadd.f32 1e-05, %v25953_v47 }
0x3dba   :  { %v25954_v0 = vadd.f32 1e-05, %v25952_v57  ;;  %v13857_v11 = vpop.permute.xlu0 %13856 }
0x3dbb   :  { %31325 = vrsqrt.f32 %v25955_v36  ;;  %v13861_v6 = vsel %vm13859_vm0, %v11009_v4, %v13857_v11  ;;  %v24073_v39 = vpop.permute.xlu1 %24072 }
0x3dbc   :  { %31327 = vrsqrt.f32 %v25954_v0  ;;  %v13864_v15 = vcombine.low %v13860_v7, %v13861_v6  ;;  %v24079_v10 = vsel %vm13859_vm0, %v17355_v38, %v24073_v39 }
0x3dbe   :  { %26012 = vst.sshfl [vmem:[%s34761_s7] sm:$0x33 pattern:$0x76325410] %v13864_v15  ;;  %v24077_v51 = vpop.permute.xlu0 %24076 }
0x3dbf   :  { %v24080_v20 = vsel %vm13859_vm0, %v21229_v13, %v24077_v51 }
0x3dc0   :  { %v24083_v53 = vcombine.low %v24079_v10, %v24080_v20 }
0x3dc2   :  { %26048 = vst.sshfl [vmem:[%s34761_s7 + $0x4] sm:$0x33 pattern:$0x76325410] %v24083_v53  ;;  %s31330_s7 = scalar_lea.vmem %s25980_s12, 256 }
0x3dc3   :  { %p31331_p0 = scmp.ne.s32.totalorder %s25980_s12, %s31330_s7  ;;  %p31336_p2 = scmp.lt.s32.totalorder %s31330_s7, %s31330_s7 }
0x3dc5   :  { %v31326_v52 = vpop.eup %31325  ;;  %p31337_p3 = por %p31336_p2, %p31335_p1 }
0x3dc6   :  { %v31328_v27 = vpop.eup %31327  ;;  %v25959_v21 = vmul.f32 %v31326_v52, %v34680_v46 }
0x3dc7   :  { %v25958_v37 = vmul.f32 %v31328_v27, %v34682_v24  ;;  %p31338_p4 = pnand %p31337_p3, %p31331_p0 }
0x3dc8   :  { %v25965_v33 = vmul.f32 %v25963_v59, %v25959_v21 }
0x3dc9   :  { %v25964_v35 = vmul.f32 %v25963_v59, %v25958_v37 }
0x3dca   :  { %v25971_v55 = vadd.f32 %v25969_v12, %v25965_v33 }
0x3dcb   :  { %v25970_v26 = vadd.f32 %v25969_v12, %v25964_v35 }
0x3dcc   :  { %25973 = vst.msk [vmem:[#allocation2 + $0x8] sm:$0xff] %vm552_vm3, %v25971_v55 }
0x3dcd   :  { %25972 = vst.msk [vmem:[#allocation2] sm:$0xff] %vm552_vm3, %v25970_v26 }
0x3dce   :  { %31341 = shalt.err (!%p31338_p4)
}
0x3dcf   :  { %s31342_s10 = scalar_lea.hbm %s34760_s6, 256 }
0x3dd0   :  { %p31343_p5 = scmp.ne.s32.totalorder %s34760_s6, %s31342_s10  ;;  %p31346_p6 = scmp.lt.u32.totalorder %s31342_s10, %s34760_s6 }
0x3dd2   :  { %p31348_p7 = pnand %p31346_p6, %p31343_p5 }
0x3dd4   :  { %31351 = shalt.err (!%p31348_p7)
}
0x3dd5   :  { %s31375_s25 = smov 128  }
0x3dd6   :  { %25985 = dma.vmem_to_hbm [thread:$0]  %s25980_s12, 256, %s34760_s6, [#allocation3], %s31375_s25, %s31375_s25, %s31369_s24  }
0x3dd7   :  { %31352 = dma.done.wait [#allocation3], 256  }
0x3dd8   :  { %31353 = vsyncadd [#allocation3], 4294967040 }
0x3dd9   :  { %25993 = vsyncpa [#allocation3], 1 }

</bundles_post_ra>
